<compile_context>
chip_gen: v6e
topology: v6e:2x2x1
jax: 0.10.0
libtpu: 0.0.40
codegen_flags: <defaults>
</compile_context>

<pallas_src>
import functools

import jax
import jax.numpy as jnp
from jax.experimental import pallas as pl
from jax.experimental.pallas import tpu as pltpu


SUBLANE = 8      # sublane granule (rows)
LANE = 128       # lane granule (cols)


# ----------------------------------------------------------------------------
# Fused Pallas kernel
# ----------------------------------------------------------------------------
def _bigru_fused_kernel(*refs, num_layers, seq_len, batch, hidden, out_len):
    """Fused bidirectional multi-layer GRU + Linear head.

    Ref layout (inputs, then output, then scratch):
      refs[0] : x      (T*B, F)   bf16, time-major, batch-inner
      refs[1] : x_rev  (T*B, F)   bf16, time-reversed
      per layer l (5 refs):
        wih_nat (D_in, 6H) bf16  natural-time input -> fwd columns (bwd cols 0)
        wih_rev (D_in, 6H) bf16  reversed-time input -> bwd columns (fwd cols 0)
        bi      (1, 6H)    f32   (bir+bhr, biz+bhz, bin) interleaved fwd/bwd
        whh     (2H, 6H)   bf16  block recurrent weights (fwd rows / bwd rows)
        bhn     (1, 2H)    f32   n-gate hidden biases [fwd|bwd]
      refs[2+5L] : fc_w (2H, O_pad) bf16
      refs[3+5L] : fc_b (1, O_pad)  f32
      refs[4+5L] : out  (out_len*B, O_pad) f32
      scratch    : acts (T*B, 2H) f32, acts_rev (T*B, 2H) f32, iall (T*B, 6H) f32

    Column order of the 6H gate axis: [r_f r_b | z_f z_b | n_f n_b].
    Row block t of iall holds: fwd projection of time t in the fwd columns and
    bwd projection of time T-1-t in the bwd columns, so the recurrence reads a
    single contiguous (B, 6H) slice per step.
    """
    T, B, H = seq_len, batch, hidden
    x_ref, xrev_ref = refs[0], refs[1]
    fc_w_ref = refs[2 + 5 * num_layers]
    fc_b_ref = refs[3 + 5 * num_layers]
    out_ref = refs[4 + 5 * num_layers]
    acts, acts_rev, iall = refs[5 + 5 * num_layers:]

    for layer in range(num_layers):
        wnat_ref, wrev_ref, bi_ref, whh_ref, bhn_ref = (
            refs[2 + 5 * layer: 7 + 5 * layer])
        last = layer == num_layers - 1

        # ---- Hoisted, lane-dense input projection: two matmuls covering all T
        #      steps, both directions and all three gates; r/z biases folded. --
        if layer == 0:
            prev = x_ref[...]                                  # already bf16
            prev_rev = xrev_ref[...]
        else:
            prev = acts[...].astype(jnp.bfloat16)              # [fwd|bwd] @ t
            prev_rev = acts_rev[...].astype(jnp.bfloat16)      # [fwd|bwd] @ T-1-t
        iall[...] = (
            jnp.dot(prev, wnat_ref[...], preferred_element_type=jnp.float32)
            + jnp.dot(prev_rev, wrev_ref[...], preferred_element_type=jnp.float32)
            + bi_ref[...]
        )

        # ---- Serial recurrence: fwd and bwd carried jointly as an SSA value
        #      (B, 2H); one packed (B,2H)@(2H,6H) bf16 MXU push per step.  The
        #      loop is fully unrolled (T static, small), all indices static. --
        whh = whh_ref[...]                                     # (2H, 6H) bf16
        bhn = jnp.broadcast_to(bhn_ref[...], (B, 2 * H))       # hoisted bcast
        h = jnp.zeros((B, 2 * H), jnp.float32)                 # h0 = 0, [fwd|bwd]

        for t in range(T):
            tr = T - 1 - t
            hp = jnp.dot(h.astype(jnp.bfloat16), whh,
                         preferred_element_type=jnp.float32)   # (B, 6H) f32
            i_t = iall[t * B:(t + 1) * B, :]                   # one aligned load

            # one 128-lane sigmoid covers r_f, r_b, z_f, z_b
            rz = jax.nn.sigmoid(i_t[:, :4 * H] + hp[:, :4 * H])
            r = rz[:, :2 * H]
            z = rz[:, 2 * H:]
            # one 64-lane tanh covers n_f, n_b (bhn only inside r * (.))
            n = jnp.tanh(i_t[:, 4 * H:] + r * (hp[:, 4 * H:] + bhn))
            h = n + z * (h - n)                                # (1-z)*n + z*h

            # layer output: fwd state belongs to time t, bwd state to T-1-t
            acts[t * B:(t + 1) * B, :H] = h[:, :H]
            acts[tr * B:(tr + 1) * B, H:] = h[:, H:]
            if not last:                                       # feed next hoist
                acts_rev[tr * B:(tr + 1) * B, :H] = h[:, :H]
                acts_rev[t * B:(t + 1) * B, H:] = h[:, H:]

    # ---- FC head on the last out_len steps: one lane-dense matmul epilogue. --
    base = (T - out_len) * B
    out_ref[...] = (
        jnp.dot(acts[base:, :].astype(jnp.bfloat16), fc_w_ref[...],
                preferred_element_type=jnp.float32)
        + fc_b_ref[...]
    )


# ----------------------------------------------------------------------------
# Wrapper
# ----------------------------------------------------------------------------
def _bigru_fused_pallas(x_flat, xrev_flat, layer_params, fc_w, fc_b, *,
                        seq_len, batch, hidden, out_len):
    T, B, H = seq_len, batch, hidden
    o_pad = fc_w.shape[-1]
    num_layers = len(layer_params)

    inputs = [x_flat, xrev_flat]
    for lp in layer_params:
        inputs += [lp["wih_nat"], lp["wih_rev"], lp["bi"], lp["whh"], lp["bhn"]]
    inputs += [fc_w, fc_b]

    vmem = pl.BlockSpec(memory_space=pltpu.MemorySpace.VMEM)
    kernel = functools.partial(
        _bigru_fused_kernel,
        num_layers=num_layers, seq_len=T, batch=B, hidden=H, out_len=out_len)

    # Whole-array VMEM residency, single launch.  For large T/B/H this would
    # switch to a time-chunked grid ("arbitrary") with the carry in scratch.
    return pl.pallas_call(
        kernel,
        out_shape=jax.ShapeDtypeStruct((out_len * B, o_pad), jnp.float32),
        in_specs=[vmem] * len(inputs),
        out_specs=vmem,
        scratch_shapes=[
            pltpu.VMEM((T * B, 2 * H), jnp.float32),   # layer output, time t
            pltpu.VMEM((T * B, 2 * H), jnp.float32),   # layer output, reversed
            pltpu.VMEM((T * B, 6 * H), jnp.float32),   # hoisted input projection
        ],
        compiler_params=pltpu.CompilerParams(
            vmem_limit_bytes=32 * 1024 * 1024),
    )(*inputs)


@functools.partial(jax.jit, static_argnames=("output_seq_len", "output_size"))
def bigru_forward(x, packed, *, output_seq_len, output_size):
    """x: (B, T, F) float32 -> (B, output_seq_len, output_size)."""
    B, T, F = x.shape
    H = packed["layers"][0]["whh"].shape[0] // 2
    B_pad = -(-B // SUBLANE) * SUBLANE                 # pad batch to sublane granule

    xp = jnp.zeros((B_pad, T, F), x.dtype).at[:B].set(x)
    xt = jnp.transpose(xp, (1, 0, 2))                  # (T, B_pad, F) time-major
    x_flat = xt.reshape(T * B_pad, F).astype(jnp.bfloat16)
    xrev_flat = xt[::-1].reshape(T * B_pad, F).astype(jnp.bfloat16)

    y = _bigru_fused_pallas(
        x_flat, xrev_flat, packed["layers"], packed["fc_w"], packed["fc_b"],
        seq_len=T, batch=B_pad, hidden=H, out_len=output_seq_len)

    y = y.reshape(output_seq_len, B_pad, -1)[:, :B, :output_size]
    return jnp.transpose(y, (1, 0, 2))


# ----------------------------------------------------------------------------
# Parameter packing: PyTorch-style params -> fused kernel slabs (done once,
# outside the forward pass).  Gate/direction column order: [r_f r_b|z_f z_b|n_f n_b].
# ----------------------------------------------------------------------------
def pack_params(params):
    layers = []
    for layer in params["gru"]:
        wih_f, whh_f, bih_f, bhh_f = layer["fwd"]      # (3,D,H)/(3,H,H)/(3,1,H)
        wih_b, whh_b, bih_b, bhh_b = layer["bwd"]
        H = whh_f.shape[-1]
        D = wih_f.shape[1]
        zD = jnp.zeros((D, H), jnp.float32)
        zH = jnp.zeros((H, H), jnp.float32)

        # natural-time input -> fwd columns; reversed-time input -> bwd columns
        wih_nat = jnp.concatenate(
            [wih_f[0], zD, wih_f[1], zD, wih_f[2], zD], axis=1)        # (D, 6H)
        wih_rev = jnp.concatenate(
            [zD, wih_b[0], zD, wih_b[1], zD, wih_b[2]], axis=1)        # (D, 6H)
        whh = jnp.concatenate([
            jnp.concatenate([whh_f[0], zH, whh_f[1], zH, whh_f[2], zH], axis=1),
            jnp.concatenate([zH, whh_b[0], zH, whh_b[1], zH, whh_b[2]], axis=1),
        ], axis=0)                                                      # (2H, 6H)
        # fold hidden-side r/z biases into the input-side bias; bhn must stay
        # inside r * (.) so it is kept separate.
        bi = jnp.concatenate(
            [bih_f[0] + bhh_f[0], bih_b[0] + bhh_b[0],
             bih_f[1] + bhh_f[1], bih_b[1] + bhh_b[1],
             bih_f[2], bih_b[2]], axis=1)                               # (1, 6H)
        bhn = jnp.concatenate([bhh_f[2], bhh_b[2]], axis=1)             # (1, 2H)

        layers.append({
            "wih_nat": wih_nat.astype(jnp.bfloat16),
            "wih_rev": wih_rev.astype(jnp.bfloat16),
            "whh": whh.astype(jnp.bfloat16),
            "bi": bi,
            "bhn": bhn,
        })

    # FC head: pad output columns to a lane-dense width (multiple of 128).
    h2, o = params["fc_w"].shape
    o_pad = -(-o // LANE) * LANE
    fc_w = jnp.zeros((h2, o_pad), jnp.float32).at[:, :o].set(params["fc_w"])
    fc_b = jnp.zeros((1, o_pad), jnp.float32).at[:, :o].set(params["fc_b"])
    return {"layers": layers, "fc_w": fc_w.astype(jnp.bfloat16), "fc_b": fc_b}


# ----------------------------------------------------------------------------
# Pure-JAX reference (for correctness check of the Pallas kernel).  mm_dtype
# controls the matmul operand dtype (f32 for the exact reference, bf16 to match
# the kernel's MXU operand precision); accumulation and gate math are f32.
# ----------------------------------------------------------------------------
def _mm(a, b, mm_dtype):
    return jnp.dot(a.astype(mm_dtype), b.astype(mm_dtype),
                   preferred_element_type=jnp.float32)


def gru_layer_ref(x_tbd, wih, whh, bih, bhh, mm_dtype):
    B = x_tbd.shape[1]
    H = whh.shape[-1]

    def step(h, x_t):
        i_r = _mm(x_t, wih[0], mm_dtype) + bih[0]
        i_z = _mm(x_t, wih[1], mm_dtype) + bih[1]
        i_n = _mm(x_t, wih[2], mm_dtype) + bih[2]
        h_r = _mm(h, whh[0], mm_dtype) + bhh[0]
        h_z = _mm(h, whh[1], mm_dtype) + bhh[1]
        h_n = _mm(h, whh[2], mm_dtype) + bhh[2]
        r = jax.nn.sigmoid(i_r + h_r)
        z = jax.nn.sigmoid(i_z + h_z)
        n = jnp.tanh(i_n + r * h_n)
        h_new = (1.0 - z) * n + z * h
        return h_new, h_new

    _, ys = jax.lax.scan(step, jnp.zeros((B, H), jnp.float32), x_tbd)
    return ys


def bigru_forward_ref(x, params, *, output_seq_len, mm_dtype=jnp.float32):
    h = jnp.transpose(x, (1, 0, 2))
    for layer in params["gru"]:
        fwd = gru_layer_ref(h, *layer["fwd"], mm_dtype)
        bwd = gru_layer_ref(h[::-1], *layer["bwd"], mm_dtype)[::-1]
        h = jnp.concatenate([fwd, bwd], axis=-1)
    out = jnp.transpose(h, (1, 0, 2))[:, -output_seq_len:, :]
    return _mm(out, params["fc_w"], mm_dtype) + params["fc_b"]


# ----------------------------------------------------------------------------
# Deterministic parameter init (mirrors nn.GRU / nn.Linear shapes)
# ----------------------------------------------------------------------------
def init_params(key, n_features, hidden_size, num_layers, output_size):
    H = hidden_size
    k_gru = 1.0 / jnp.sqrt(H)
    layers = []
    for layer_idx in range(num_layers):
        d_in = n_features if layer_idx == 0 else 2 * H
        dirs = {}
        for dname in ("fwd", "bwd"):
            key, k1, k2, k3, k4 = jax.random.split(key, 5)
            wih = jax.random.uniform(k1, (3, d_in, H), jnp.float32, -k_gru, k_gru)
            whh = jax.random.uniform(k2, (3, H, H), jnp.float32, -k_gru, k_gru)
            bih = jax.random.uniform(k3, (3, 1, H), jnp.float32, -k_gru, k_gru)
            bhh = jax.random.uniform(k4, (3, 1, H), jnp.float32, -k_gru, k_gru)
            dirs[dname] = (wih, whh, bih, bhh)
        layers.append(dirs)
    k_fc = 1.0 / jnp.sqrt(2 * H)
    key, k1, k2 = jax.random.split(key, 3)
    fc_w = jax.random.uniform(k1, (2 * H, output_size), jnp.float32, -k_fc, k_fc)
    fc_b = jax.random.uniform(k2, (1, output_size), jnp.float32, -k_fc, k_fc)
    return {"gru": layers, "fc_w": fc_w, "fc_b": fc_b}


if __name__ == "__main__":
    # Small, module-consistent shapes.
    n_features = 8
    hidden_size = 32
    num_layers = 2
    output_seq_len = 20
    output_size = 2
    batch, seq_len = 2, 24

    key = jax.random.PRNGKey(0)
    key, kx, kp = jax.random.split(key, 3)
    x = jax.random.normal(kx, (batch, seq_len, n_features), jnp.float32)
    params = init_params(kp, n_features, hidden_size, num_layers, output_size)
    packed = pack_params(params)

    y = bigru_forward(x, packed, output_seq_len=output_seq_len,
                      output_size=output_size)
    y = jax.block_until_ready(y)
    assert y.shape == (batch, output_seq_len, output_size), y.shape

    # 1) Matched reference: identical bf16 matmul operands, f32 accumulation
    #    and f32 gate math -> only packing/bias-folding reassociation remains.
    y_ref_bf16 = bigru_forward_ref(x, params, output_seq_len=output_seq_len,
                                   mm_dtype=jnp.bfloat16)
    assert jnp.allclose(y, y_ref_bf16, atol=2e-3, rtol=2e-3), (
        float(jnp.max(jnp.abs(y - y_ref_bf16))))

    # 2) Pure-f32 reference: loose bound covering bf16 MXU-operand rounding
    #    accumulated over the 2-layer, 24-step recurrence.
    y_ref_f32 = bigru_forward_ref(x, params, output_seq_len=output_seq_len)
    assert jnp.allclose(y, y_ref_f32, atol=1.5e-1, rtol=5e-2), (
        float(jnp.max(jnp.abs(y - y_ref_f32))))

    print("KERNEL_OK")
</pallas_src>

<mosaic_0001>
module attributes {stable_mosaic.version = 11 : i64} {
  func.func @_bigru_fused_kernel(%arg0: memref<192x8xbf16, #tpu.memory_space<vmem>>, %arg1: memref<192x8xbf16, #tpu.memory_space<vmem>>, %arg2: memref<8x192xbf16, #tpu.memory_space<vmem>>, %arg3: memref<8x192xbf16, #tpu.memory_space<vmem>>, %arg4: memref<1x192xf32, #tpu.memory_space<vmem>>, %arg5: memref<64x192xbf16, #tpu.memory_space<vmem>>, %arg6: memref<1x64xf32, #tpu.memory_space<vmem>>, %arg7: memref<64x192xbf16, #tpu.memory_space<vmem>>, %arg8: memref<64x192xbf16, #tpu.memory_space<vmem>>, %arg9: memref<1x192xf32, #tpu.memory_space<vmem>>, %arg10: memref<64x192xbf16, #tpu.memory_space<vmem>>, %arg11: memref<1x64xf32, #tpu.memory_space<vmem>>, %arg12: memref<64x128xbf16, #tpu.memory_space<vmem>>, %arg13: memref<1x128xf32, #tpu.memory_space<vmem>>, %arg14: memref<160x128xf32, #tpu.memory_space<vmem>>, %arg15: memref<192x64xf32, #tpu.memory_space<vmem>>, %arg16: memref<192x64xf32, #tpu.memory_space<vmem>>, %arg17: memref<192x192xf32, #tpu.memory_space<vmem>>) attributes {dimension_semantics = [], scalar_prefetch = 0 : i64, scratch_operands = 3 : i64, tpu.core_type = #tpu.core_type<tc>} {
    %c0 = arith.constant 0 : index
    %c0_0 = arith.constant 0 : index
    %0 = vector.load %arg0[%c0, %c0_0] : memref<192x8xbf16, #tpu.memory_space<vmem>>, vector<192x8xbf16>
    %c0_1 = arith.constant 0 : index
    %c0_2 = arith.constant 0 : index
    %1 = vector.load %arg1[%c0_1, %c0_2] : memref<192x8xbf16, #tpu.memory_space<vmem>>, vector<192x8xbf16>
    %c0_3 = arith.constant 0 : index
    %c0_4 = arith.constant 0 : index
    %2 = vector.load %arg2[%c0_3, %c0_4] : memref<8x192xbf16, #tpu.memory_space<vmem>>, vector<8x192xbf16>
    %cst = arith.constant dense<0.000000e+00> : vector<192x192xf32>
    %3 = tpu.matmul %0, %2, %cst {dimension_numbers = #tpu.dot_dimension_numbers<[1], [0], [0], [1], [0, 0, 1, 1], [], []>} : vector<192x8xbf16>, vector<8x192xbf16>, vector<192x192xf32> -> vector<192x192xf32>
    %c0_5 = arith.constant 0 : index
    %c0_6 = arith.constant 0 : index
    %4 = vector.load %arg3[%c0_5, %c0_6] : memref<8x192xbf16, #tpu.memory_space<vmem>>, vector<8x192xbf16>
    %cst_7 = arith.constant dense<0.000000e+00> : vector<192x192xf32>
    %5 = tpu.matmul %1, %4, %cst_7 {dimension_numbers = #tpu.dot_dimension_numbers<[1], [0], [0], [1], [0, 0, 1, 1], [], []>} : vector<192x8xbf16>, vector<8x192xbf16>, vector<192x192xf32> -> vector<192x192xf32>
    %6 = arith.addf %3, %5 : vector<192x192xf32>
    %c0_8 = arith.constant 0 : index
    %c0_9 = arith.constant 0 : index
    %7 = vector.load %arg4[%c0_8, %c0_9] : memref<1x192xf32, #tpu.memory_space<vmem>>, vector<1x192xf32>
    %8 = vector.broadcast %7 : vector<1x192xf32> to vector<192x192xf32>
    %9 = arith.addf %6, %8 : vector<192x192xf32>
    %c0_10 = arith.constant 0 : index
    %c0_11 = arith.constant 0 : index
    %10 = vector.load %arg17[%c0_10, %c0_11] : memref<192x192xf32, #tpu.memory_space<vmem>>, vector<192x192xf32>
    tpu.vector_store %arg17[%c0_10, %c0_11], %9 {strides = array<i32>} : memref<192x192xf32, #tpu.memory_space<vmem>>, vector<192x192xf32>,
    %c0_12 = arith.constant 0 : index
    %c0_13 = arith.constant 0 : index
    %11 = vector.load %arg5[%c0_12, %c0_13] : memref<64x192xbf16, #tpu.memory_space<vmem>>, vector<64x192xbf16>
    %c0_14 = arith.constant 0 : index
    %c0_15 = arith.constant 0 : index
    %12 = vector.load %arg6[%c0_14, %c0_15] : memref<1x64xf32, #tpu.memory_space<vmem>>, vector<1x64xf32>
    %13 = vector.shape_cast %12 : vector<1x64xf32> to vector<1x64xf32>
    %14 = vector.broadcast %13 : vector<1x64xf32> to vector<8x64xf32>
    %cst_16 = arith.constant 0.000000e+00 : f32
    %15 = vector.broadcast %cst_16 : f32 to vector<8x64xf32>
    %16 = arith.truncf %15 : vector<8x64xf32> to vector<8x64xbf16>
    %cst_17 = arith.constant dense<0.000000e+00> : vector<8x192xf32>
    %17 = tpu.matmul %16, %11, %cst_17 {dimension_numbers = #tpu.dot_dimension_numbers<[1], [0], [0], [1], [0, 0, 1, 1], [], []>} : vector<8x64xbf16>, vector<64x192xbf16>, vector<8x192xf32> -> vector<8x192xf32>
    %c0_18 = arith.constant 0 : index
    %c0_19 = arith.constant 0 : index
    %18 = vector.load %arg17[%c0_18, %c0_19] : memref<192x192xf32, #tpu.memory_space<vmem>>, vector<8x192xf32>
    %19 = vector.extract_strided_slice %18 {offsets = [0, 0], sizes = [8, 128], strides = [1, 1]} : vector<8x192xf32> to vector<8x128xf32>
    %20 = vector.extract_strided_slice %17 {offsets = [0, 0], sizes = [8, 128], strides = [1, 1]} : vector<8x192xf32> to vector<8x128xf32>
    %21 = arith.addf %19, %20 : vector<8x128xf32>
    %22 = arith.negf %21 : vector<8x128xf32>
    %23 = math.exp %22 : vector<8x128xf32>
    %cst_20 = arith.constant 1.000000e+00 : f32
    %24 = vector.broadcast %cst_20 : f32 to vector<8x128xf32>
    %25 = arith.addf %24, %23 : vector<8x128xf32>
    %26 = arith.divf %24, %25 : vector<8x128xf32>
    %27 = vector.extract_strided_slice %26 {offsets = [0, 0], sizes = [8, 64], strides = [1, 1]} : vector<8x128xf32> to vector<8x64xf32>
    %28 = vector.extract_strided_slice %26 {offsets = [0, 64], sizes = [8, 64], strides = [1, 1]} : vector<8x128xf32> to vector<8x64xf32>
    %29 = vector.extract_strided_slice %18 {offsets = [0, 128], sizes = [8, 64], strides = [1, 1]} : vector<8x192xf32> to vector<8x64xf32>
    %30 = vector.extract_strided_slice %17 {offsets = [0, 128], sizes = [8, 64], strides = [1, 1]} : vector<8x192xf32> to vector<8x64xf32>
    %31 = arith.addf %30, %14 : vector<8x64xf32>
    %32 = arith.mulf %27, %31 : vector<8x64xf32>
    %33 = arith.addf %29, %32 : vector<8x64xf32>
    %34 = math.tanh %33 : vector<8x64xf32>
    %35 = arith.subf %15, %34 : vector<8x64xf32>
    %36 = arith.mulf %28, %35 : vector<8x64xf32>
    %37 = arith.addf %34, %36 : vector<8x64xf32>
    %38 = vector.extract_strided_slice %37 {offsets = [0, 0], sizes = [8, 32], strides = [1, 1]} : vector<8x64xf32> to vector<8x32xf32>
    %c0_21 = arith.constant 0 : index
    %c0_22 = arith.constant 0 : index
    %39 = vector.load %arg15[%c0_21, %c0_22] : memref<192x64xf32, #tpu.memory_space<vmem>>, vector<8x32xf32>
    tpu.vector_store %arg15[%c0_21, %c0_22], %38 {strides = array<i32>} : memref<192x64xf32, #tpu.memory_space<vmem>>, vector<8x32xf32>,
    %40 = vector.extract_strided_slice %37 {offsets = [0, 32], sizes = [8, 32], strides = [1, 1]} : vector<8x64xf32> to vector<8x32xf32>
    %c184 = arith.constant 184 : index
    %c32 = arith.constant 32 : index
    %41 = vector.load %arg15[%c184, %c32] : memref<192x64xf32, #tpu.memory_space<vmem>>, vector<8x32xf32>
    tpu.vector_store %arg15[%c184, %c32], %40 {strides = array<i32>} : memref<192x64xf32, #tpu.memory_space<vmem>>, vector<8x32xf32>,
    %42 = vector.extract_strided_slice %37 {offsets = [0, 0], sizes = [8, 32], strides = [1, 1]} : vector<8x64xf32> to vector<8x32xf32>
    %c184_23 = arith.constant 184 : index
    %c0_24 = arith.constant 0 : index
    %43 = vector.load %arg16[%c184_23, %c0_24] : memref<192x64xf32, #tpu.memory_space<vmem>>, vector<8x32xf32>
    tpu.vector_store %arg16[%c184_23, %c0_24], %42 {strides = array<i32>} : memref<192x64xf32, #tpu.memory_space<vmem>>, vector<8x32xf32>,
    %44 = vector.extract_strided_slice %37 {offsets = [0, 32], sizes = [8, 32], strides = [1, 1]} : vector<8x64xf32> to vector<8x32xf32>
    %c0_25 = arith.constant 0 : index
    %c32_26 = arith.constant 32 : index
    %45 = vector.load %arg16[%c0_25, %c32_26] : memref<192x64xf32, #tpu.memory_space<vmem>>, vector<8x32xf32>
    tpu.vector_store %arg16[%c0_25, %c32_26], %44 {strides = array<i32>} : memref<192x64xf32, #tpu.memory_space<vmem>>, vector<8x32xf32>,
    %46 = arith.truncf %37 : vector<8x64xf32> to vector<8x64xbf16>
    %cst_27 = arith.constant dense<0.000000e+00> : vector<8x192xf32>
    %47 = tpu.matmul %46, %11, %cst_27 {dimension_numbers = #tpu.dot_dimension_numbers<[1], [0], [0], [1], [0, 0, 1, 1], [], []>} : vector<8x64xbf16>, vector<64x192xbf16>, vector<8x192xf32> -> vector<8x192xf32>
    %c8 = arith.constant 8 : index
    %c0_28 = arith.constant 0 : index
    %48 = vector.load %arg17[%c8, %c0_28] : memref<192x192xf32, #tpu.memory_space<vmem>>, vector<8x192xf32>
    %49 = vector.extract_strided_slice %48 {offsets = [0, 0], sizes = [8, 128], strides = [1, 1]} : vector<8x192xf32> to vector<8x128xf32>
    %50 = vector.extract_strided_slice %47 {offsets = [0, 0], sizes = [8, 128], strides = [1, 1]} : vector<8x192xf32> to vector<8x128xf32>
    %51 = arith.addf %49, %50 : vector<8x128xf32>
    %52 = arith.negf %51 : vector<8x128xf32>
    %53 = math.exp %52 : vector<8x128xf32>
    %cst_29 = arith.constant 1.000000e+00 : f32
    %54 = vector.broadcast %cst_29 : f32 to vector<8x128xf32>
    %55 = arith.addf %54, %53 : vector<8x128xf32>
    %56 = arith.divf %54, %55 : vector<8x128xf32>
    %57 = vector.extract_strided_slice %56 {offsets = [0, 0], sizes = [8, 64], strides = [1, 1]} : vector<8x128xf32> to vector<8x64xf32>
    %58 = vector.extract_strided_slice %56 {offsets = [0, 64], sizes = [8, 64], strides = [1, 1]} : vector<8x128xf32> to vector<8x64xf32>
    %59 = vector.extract_strided_slice %48 {offsets = [0, 128], sizes = [8, 64], strides = [1, 1]} : vector<8x192xf32> to vector<8x64xf32>
    %60 = vector.extract_strided_slice %47 {offsets = [0, 128], sizes = [8, 64], strides = [1, 1]} : vector<8x192xf32> to vector<8x64xf32>
    %61 = arith.addf %60, %14 : vector<8x64xf32>
    %62 = arith.mulf %57, %61 : vector<8x64xf32>
    %63 = arith.addf %59, %62 : vector<8x64xf32>
    %64 = math.tanh %63 : vector<8x64xf32>
    %65 = arith.subf %37, %64 : vector<8x64xf32>
    %66 = arith.mulf %58, %65 : vector<8x64xf32>
    %67 = arith.addf %64, %66 : vector<8x64xf32>
    %68 = vector.extract_strided_slice %67 {offsets = [0, 0], sizes = [8, 32], strides = [1, 1]} : vector<8x64xf32> to vector<8x32xf32>
    %c8_30 = arith.constant 8 : index
    %c0_31 = arith.constant 0 : index
    %69 = vector.load %arg15[%c8_30, %c0_31] : memref<192x64xf32, #tpu.memory_space<vmem>>, vector<8x32xf32>
    tpu.vector_store %arg15[%c8_30, %c0_31], %68 {strides = array<i32>} : memref<192x64xf32, #tpu.memory_space<vmem>>, vector<8x32xf32>,
    %70 = vector.extract_strided_slice %67 {offsets = [0, 32], sizes = [8, 32], strides = [1, 1]} : vector<8x64xf32> to vector<8x32xf32>
    %c176 = arith.constant 176 : index
    %c32_32 = arith.constant 32 : index
    %71 = vector.load %arg15[%c176, %c32_32] : memref<192x64xf32, #tpu.memory_space<vmem>>, vector<8x32xf32>
    tpu.vector_store %arg15[%c176, %c32_32], %70 {strides = array<i32>} : memref<192x64xf32, #tpu.memory_space<vmem>>, vector<8x32xf32>,
    %72 = vector.extract_strided_slice %67 {offsets = [0, 0], sizes = [8, 32], strides = [1, 1]} : vector<8x64xf32> to vector<8x32xf32>
    %c176_33 = arith.constant 176 : index
    %c0_34 = arith.constant 0 : index
    %73 = vector.load %arg16[%c176_33, %c0_34] : memref<192x64xf32, #tpu.memory_space<vmem>>, vector<8x32xf32>
    tpu.vector_store %arg16[%c176_33, %c0_34], %72 {strides = array<i32>} : memref<192x64xf32, #tpu.memory_space<vmem>>, vector<8x32xf32>,
    %74 = vector.extract_strided_slice %67 {offsets = [0, 32], sizes = [8, 32], strides = [1, 1]} : vector<8x64xf32> to vector<8x32xf32>
    %c8_35 = arith.constant 8 : index
    %c32_36 = arith.constant 32 : index
    %75 = vector.load %arg16[%c8_35, %c32_36] : memref<192x64xf32, #tpu.memory_space<vmem>>, vector<8x32xf32>
    tpu.vector_store %arg16[%c8_35, %c32_36], %74 {strides = array<i32>} : memref<192x64xf32, #tpu.memory_space<vmem>>, vector<8x32xf32>,
    %76 = arith.truncf %67 : vector<8x64xf32> to vector<8x64xbf16>
    %cst_37 = arith.constant dense<0.000000e+00> : vector<8x192xf32>
    %77 = tpu.matmul %76, %11, %cst_37 {dimension_numbers = #tpu.dot_dimension_numbers<[1], [0], [0], [1], [0, 0, 1, 1], [], []>} : vector<8x64xbf16>, vector<64x192xbf16>, vector<8x192xf32> -> vector<8x192xf32>
    %c16 = arith.constant 16 : index
    %c0_38 = arith.constant 0 : index
    %78 = vector.load %arg17[%c16, %c0_38] : memref<192x192xf32, #tpu.memory_space<vmem>>, vector<8x192xf32>
    %79 = vector.extract_strided_slice %78 {offsets = [0, 0], sizes = [8, 128], strides = [1, 1]} : vector<8x192xf32> to vector<8x128xf32>
    %80 = vector.extract_strided_slice %77 {offsets = [0, 0], sizes = [8, 128], strides = [1, 1]} : vector<8x192xf32> to vector<8x128xf32>
    %81 = arith.addf %79, %80 : vector<8x128xf32>
    %82 = arith.negf %81 : vector<8x128xf32>
    %83 = math.exp %82 : vector<8x128xf32>
    %cst_39 = arith.constant 1.000000e+00 : f32
    %84 = vector.broadcast %cst_39 : f32 to vector<8x128xf32>
    %85 = arith.addf %84, %83 : vector<8x128xf32>
    %86 = arith.divf %84, %85 : vector<8x128xf32>
    %87 = vector.extract_strided_slice %86 {offsets = [0, 0], sizes = [8, 64], strides = [1, 1]} : vector<8x128xf32> to vector<8x64xf32>
    %88 = vector.extract_strided_slice %86 {offsets = [0, 64], sizes = [8, 64], strides = [1, 1]} : vector<8x128xf32> to vector<8x64xf32>
    %89 = vector.extract_strided_slice %78 {offsets = [0, 128], sizes = [8, 64], strides = [1, 1]} : vector<8x192xf32> to vector<8x64xf32>
    %90 = vector.extract_strided_slice %77 {offsets = [0, 128], sizes = [8, 64], strides = [1, 1]} : vector<8x192xf32> to vector<8x64xf32>
    %91 = arith.addf %90, %14 : vector<8x64xf32>
    %92 = arith.mulf %87, %91 : vector<8x64xf32>
    %93 = arith.addf %89, %92 : vector<8x64xf32>
    %94 = math.tanh %93 : vector<8x64xf32>
    %95 = arith.subf %67, %94 : vector<8x64xf32>
    %96 = arith.mulf %88, %95 : vector<8x64xf32>
    %97 = arith.addf %94, %96 : vector<8x64xf32>
    %98 = vector.extract_strided_slice %97 {offsets = [0, 0], sizes = [8, 32], strides = [1, 1]} : vector<8x64xf32> to vector<8x32xf32>
    %c16_40 = arith.constant 16 : index
    %c0_41 = arith.constant 0 : index
    %99 = vector.load %arg15[%c16_40, %c0_41] : memref<192x64xf32, #tpu.memory_space<vmem>>, vector<8x32xf32>
    tpu.vector_store %arg15[%c16_40, %c0_41], %98 {strides = array<i32>} : memref<192x64xf32, #tpu.memory_space<vmem>>, vector<8x32xf32>,
    %100 = vector.extract_strided_slice %97 {offsets = [0, 32], sizes = [8, 32], strides = [1, 1]} : vector<8x64xf32> to vector<8x32xf32>
    %c168 = arith.constant 168 : index
    %c32_42 = arith.constant 32 : index
    %101 = vector.load %arg15[%c168, %c32_42] : memref<192x64xf32, #tpu.memory_space<vmem>>, vector<8x32xf32>
    tpu.vector_store %arg15[%c168, %c32_42], %100 {strides = array<i32>} : memref<192x64xf32, #tpu.memory_space<vmem>>, vector<8x32xf32>,
    %102 = vector.extract_strided_slice %97 {offsets = [0, 0], sizes = [8, 32], strides = [1, 1]} : vector<8x64xf32> to vector<8x32xf32>
    %c168_43 = arith.constant 168 : index
    %c0_44 = arith.constant 0 : index
    %103 = vector.load %arg16[%c168_43, %c0_44] : memref<192x64xf32, #tpu.memory_space<vmem>>, vector<8x32xf32>
    tpu.vector_store %arg16[%c168_43, %c0_44], %102 {strides = array<i32>} : memref<192x64xf32, #tpu.memory_space<vmem>>, vector<8x32xf32>,
    %104 = vector.extract_strided_slice %97 {offsets = [0, 32], sizes = [8, 32], strides = [1, 1]} : vector<8x64xf32> to vector<8x32xf32>
    %c16_45 = arith.constant 16 : index
    %c32_46 = arith.constant 32 : index
    %105 = vector.load %arg16[%c16_45, %c32_46] : memref<192x64xf32, #tpu.memory_space<vmem>>, vector<8x32xf32>
    tpu.vector_store %arg16[%c16_45, %c32_46], %104 {strides = array<i32>} : memref<192x64xf32, #tpu.memory_space<vmem>>, vector<8x32xf32>,
    %106 = arith.truncf %97 : vector<8x64xf32> to vector<8x64xbf16>
    %cst_47 = arith.constant dense<0.000000e+00> : vector<8x192xf32>
    %107 = tpu.matmul %106, %11, %cst_47 {dimension_numbers = #tpu.dot_dimension_numbers<[1], [0], [0], [1], [0, 0, 1, 1], [], []>} : vector<8x64xbf16>, vector<64x192xbf16>, vector<8x192xf32> -> vector<8x192xf32>
    %c24 = arith.constant 24 : index
    %c0_48 = arith.constant 0 : index
    %108 = vector.load %arg17[%c24, %c0_48] : memref<192x192xf32, #tpu.memory_space<vmem>>, vector<8x192xf32>
    %109 = vector.extract_strided_slice %108 {offsets = [0, 0], sizes = [8, 128], strides = [1, 1]} : vector<8x192xf32> to vector<8x128xf32>
    %110 = vector.extract_strided_slice %107 {offsets = [0, 0], sizes = [8, 128], strides = [1, 1]} : vector<8x192xf32> to vector<8x128xf32>
    %111 = arith.addf %109, %110 : vector<8x128xf32>
    %112 = arith.negf %111 : vector<8x128xf32>
    %113 = math.exp %112 : vector<8x128xf32>
    %cst_49 = arith.constant 1.000000e+00 : f32
    %114 = vector.broadcast %cst_49 : f32 to vector<8x128xf32>
    %115 = arith.addf %114, %113 : vector<8x128xf32>
    %116 = arith.divf %114, %115 : vector<8x128xf32>
    %117 = vector.extract_strided_slice %116 {offsets = [0, 0], sizes = [8, 64], strides = [1, 1]} : vector<8x128xf32> to vector<8x64xf32>
    %118 = vector.extract_strided_slice %116 {offsets = [0, 64], sizes = [8, 64], strides = [1, 1]} : vector<8x128xf32> to vector<8x64xf32>
    %119 = vector.extract_strided_slice %108 {offsets = [0, 128], sizes = [8, 64], strides = [1, 1]} : vector<8x192xf32> to vector<8x64xf32>
    %120 = vector.extract_strided_slice %107 {offsets = [0, 128], sizes = [8, 64], strides = [1, 1]} : vector<8x192xf32> to vector<8x64xf32>
    %121 = arith.addf %120, %14 : vector<8x64xf32>
    %122 = arith.mulf %117, %121 : vector<8x64xf32>
    %123 = arith.addf %119, %122 : vector<8x64xf32>
    %124 = math.tanh %123 : vector<8x64xf32>
    %125 = arith.subf %97, %124 : vector<8x64xf32>
    %126 = arith.mulf %118, %125 : vector<8x64xf32>
    %127 = arith.addf %124, %126 : vector<8x64xf32>
    %128 = vector.extract_strided_slice %127 {offsets = [0, 0], sizes = [8, 32], strides = [1, 1]} : vector<8x64xf32> to vector<8x32xf32>
    %c24_50 = arith.constant 24 : index
    %c0_51 = arith.constant 0 : index
    %129 = vector.load %arg15[%c24_50, %c0_51] : memref<192x64xf32, #tpu.memory_space<vmem>>, vector<8x32xf32>
    tpu.vector_store %arg15[%c24_50, %c0_51], %128 {strides = array<i32>} : memref<192x64xf32, #tpu.memory_space<vmem>>, vector<8x32xf32>,
    %130 = vector.extract_strided_slice %127 {offsets = [0, 32], sizes = [8, 32], strides = [1, 1]} : vector<8x64xf32> to vector<8x32xf32>
    %c160 = arith.constant 160 : index
    %c32_52 = arith.constant 32 : index
    %131 = vector.load %arg15[%c160, %c32_52] : memref<192x64xf32, #tpu.memory_space<vmem>>, vector<8x32xf32>
    tpu.vector_store %arg15[%c160, %c32_52], %130 {strides = array<i32>} : memref<192x64xf32, #tpu.memory_space<vmem>>, vector<8x32xf32>,
    %132 = vector.extract_strided_slice %127 {offsets = [0, 0], sizes = [8, 32], strides = [1, 1]} : vector<8x64xf32> to vector<8x32xf32>
    %c160_53 = arith.constant 160 : index
    %c0_54 = arith.constant 0 : index
    %133 = vector.load %arg16[%c160_53, %c0_54] : memref<192x64xf32, #tpu.memory_space<vmem>>, vector<8x32xf32>
    tpu.vector_store %arg16[%c160_53, %c0_54], %132 {strides = array<i32>} : memref<192x64xf32, #tpu.memory_space<vmem>>, vector<8x32xf32>,
    %134 = vector.extract_strided_slice %127 {offsets = [0, 32], sizes = [8, 32], strides = [1, 1]} : vector<8x64xf32> to vector<8x32xf32>
    %c24_55 = arith.constant 24 : index
    %c32_56 = arith.constant 32 : index
    %135 = vector.load %arg16[%c24_55, %c32_56] : memref<192x64xf32, #tpu.memory_space<vmem>>, vector<8x32xf32>
    tpu.vector_store %arg16[%c24_55, %c32_56], %134 {strides = array<i32>} : memref<192x64xf32, #tpu.memory_space<vmem>>, vector<8x32xf32>,
    %136 = arith.truncf %127 : vector<8x64xf32> to vector<8x64xbf16>
    %cst_57 = arith.constant dense<0.000000e+00> : vector<8x192xf32>
    %137 = tpu.matmul %136, %11, %cst_57 {dimension_numbers = #tpu.dot_dimension_numbers<[1], [0], [0], [1], [0, 0, 1, 1], [], []>} : vector<8x64xbf16>, vector<64x192xbf16>, vector<8x192xf32> -> vector<8x192xf32>
    %c32_58 = arith.constant 32 : index
    %c0_59 = arith.constant 0 : index
    %138 = vector.load %arg17[%c32_58, %c0_59] : memref<192x192xf32, #tpu.memory_space<vmem>>, vector<8x192xf32>
    %139 = vector.extract_strided_slice %138 {offsets = [0, 0], sizes = [8, 128], strides = [1, 1]} : vector<8x192xf32> to vector<8x128xf32>
    %140 = vector.extract_strided_slice %137 {offsets = [0, 0], sizes = [8, 128], strides = [1, 1]} : vector<8x192xf32> to vector<8x128xf32>
    %141 = arith.addf %139, %140 : vector<8x128xf32>
    %142 = arith.negf %141 : vector<8x128xf32>
    %143 = math.exp %142 : vector<8x128xf32>
    %cst_60 = arith.constant 1.000000e+00 : f32
    %144 = vector.broadcast %cst_60 : f32 to vector<8x128xf32>
    %145 = arith.addf %144, %143 : vector<8x128xf32>
    %146 = arith.divf %144, %145 : vector<8x128xf32>
    %147 = vector.extract_strided_slice %146 {offsets = [0, 0], sizes = [8, 64], strides = [1, 1]} : vector<8x128xf32> to vector<8x64xf32>
    %148 = vector.extract_strided_slice %146 {offsets = [0, 64], sizes = [8, 64], strides = [1, 1]} : vector<8x128xf32> to vector<8x64xf32>
    %149 = vector.extract_strided_slice %138 {offsets = [0, 128], sizes = [8, 64], strides = [1, 1]} : vector<8x192xf32> to vector<8x64xf32>
    %150 = vector.extract_strided_slice %137 {offsets = [0, 128], sizes = [8, 64], strides = [1, 1]} : vector<8x192xf32> to vector<8x64xf32>
    %151 = arith.addf %150, %14 : vector<8x64xf32>
    %152 = arith.mulf %147, %151 : vector<8x64xf32>
    %153 = arith.addf %149, %152 : vector<8x64xf32>
    %154 = math.tanh %153 : vector<8x64xf32>
    %155 = arith.subf %127, %154 : vector<8x64xf32>
    %156 = arith.mulf %148, %155 : vector<8x64xf32>
    %157 = arith.addf %154, %156 : vector<8x64xf32>
    %158 = vector.extract_strided_slice %157 {offsets = [0, 0], sizes = [8, 32], strides = [1, 1]} : vector<8x64xf32> to vector<8x32xf32>
    %c32_61 = arith.constant 32 : index
    %c0_62 = arith.constant 0 : index
    %159 = vector.load %arg15[%c32_61, %c0_62] : memref<192x64xf32, #tpu.memory_space<vmem>>, vector<8x32xf32>
    tpu.vector_store %arg15[%c32_61, %c0_62], %158 {strides = array<i32>} : memref<192x64xf32, #tpu.memory_space<vmem>>, vector<8x32xf32>,
    %160 = vector.extract_strided_slice %157 {offsets = [0, 32], sizes = [8, 32], strides = [1, 1]} : vector<8x64xf32> to vector<8x32xf32>
    %c152 = arith.constant 152 : index
    %c32_63 = arith.constant 32 : index
    %161 = vector.load %arg15[%c152, %c32_63] : memref<192x64xf32, #tpu.memory_space<vmem>>, vector<8x32xf32>
    tpu.vector_store %arg15[%c152, %c32_63], %160 {strides = array<i32>} : memref<192x64xf32, #tpu.memory_space<vmem>>, vector<8x32xf32>,
    %162 = vector.extract_strided_slice %157 {offsets = [0, 0], sizes = [8, 32], strides = [1, 1]} : vector<8x64xf32> to vector<8x32xf32>
    %c152_64 = arith.constant 152 : index
    %c0_65 = arith.constant 0 : index
    %163 = vector.load %arg16[%c152_64, %c0_65] : memref<192x64xf32, #tpu.memory_space<vmem>>, vector<8x32xf32>
    tpu.vector_store %arg16[%c152_64, %c0_65], %162 {strides = array<i32>} : memref<192x64xf32, #tpu.memory_space<vmem>>, vector<8x32xf32>,
    %164 = vector.extract_strided_slice %157 {offsets = [0, 32], sizes = [8, 32], strides = [1, 1]} : vector<8x64xf32> to vector<8x32xf32>
    %c32_66 = arith.constant 32 : index
    %c32_67 = arith.constant 32 : index
    %165 = vector.load %arg16[%c32_66, %c32_67] : memref<192x64xf32, #tpu.memory_space<vmem>>, vector<8x32xf32>
    tpu.vector_store %arg16[%c32_66, %c32_67], %164 {strides = array<i32>} : memref<192x64xf32, #tpu.memory_space<vmem>>, vector<8x32xf32>,
    %166 = arith.truncf %157 : vector<8x64xf32> to vector<8x64xbf16>
    %cst_68 = arith.constant dense<0.000000e+00> : vector<8x192xf32>
    %167 = tpu.matmul %166, %11, %cst_68 {dimension_numbers = #tpu.dot_dimension_numbers<[1], [0], [0], [1], [0, 0, 1, 1], [], []>} : vector<8x64xbf16>, vector<64x192xbf16>, vector<8x192xf32> -> vector<8x192xf32>
    %c40 = arith.constant 40 : index
    %c0_69 = arith.constant 0 : index
    %168 = vector.load %arg17[%c40, %c0_69] : memref<192x192xf32, #tpu.memory_space<vmem>>, vector<8x192xf32>
    %169 = vector.extract_strided_slice %168 {offsets = [0, 0], sizes = [8, 128], strides = [1, 1]} : vector<8x192xf32> to vector<8x128xf32>
    %170 = vector.extract_strided_slice %167 {offsets = [0, 0], sizes = [8, 128], strides = [1, 1]} : vector<8x192xf32> to vector<8x128xf32>
    %171 = arith.addf %169, %170 : vector<8x128xf32>
    %172 = arith.negf %171 : vector<8x128xf32>
    %173 = math.exp %172 : vector<8x128xf32>
    %cst_70 = arith.constant 1.000000e+00 : f32
    %174 = vector.broadcast %cst_70 : f32 to vector<8x128xf32>
    %175 = arith.addf %174, %173 : vector<8x128xf32>
    %176 = arith.divf %174, %175 : vector<8x128xf32>
    %177 = vector.extract_strided_slice %176 {offsets = [0, 0], sizes = [8, 64], strides = [1, 1]} : vector<8x128xf32> to vector<8x64xf32>
    %178 = vector.extract_strided_slice %176 {offsets = [0, 64], sizes = [8, 64], strides = [1, 1]} : vector<8x128xf32> to vector<8x64xf32>
    %179 = vector.extract_strided_slice %168 {offsets = [0, 128], sizes = [8, 64], strides = [1, 1]} : vector<8x192xf32> to vector<8x64xf32>
    %180 = vector.extract_strided_slice %167 {offsets = [0, 128], sizes = [8, 64], strides = [1, 1]} : vector<8x192xf32> to vector<8x64xf32>
    %181 = arith.addf %180, %14 : vector<8x64xf32>
    %182 = arith.mulf %177, %181 : vector<8x64xf32>
    %183 = arith.addf %179, %182 : vector<8x64xf32>
    %184 = math.tanh %183 : vector<8x64xf32>
    %185 = arith.subf %157, %184 : vector<8x64xf32>
    %186 = arith.mulf %178, %185 : vector<8x64xf32>
    %187 = arith.addf %184, %186 : vector<8x64xf32>
    %188 = vector.extract_strided_slice %187 {offsets = [0, 0], sizes = [8, 32], strides = [1, 1]} : vector<8x64xf32> to vector<8x32xf32>
    %c40_71 = arith.constant 40 : index
    %c0_72 = arith.constant 0 : index
    %189 = vector.load %arg15[%c40_71, %c0_72] : memref<192x64xf32, #tpu.memory_space<vmem>>, vector<8x32xf32>
    tpu.vector_store %arg15[%c40_71, %c0_72], %188 {strides = array<i32>} : memref<192x64xf32, #tpu.memory_space<vmem>>, vector<8x32xf32>,
    %190 = vector.extract_strided_slice %187 {offsets = [0, 32], sizes = [8, 32], strides = [1, 1]} : vector<8x64xf32> to vector<8x32xf32>
    %c144 = arith.constant 144 : index
    %c32_73 = arith.constant 32 : index
    %191 = vector.load %arg15[%c144, %c32_73] : memref<192x64xf32, #tpu.memory_space<vmem>>, vector<8x32xf32>
    tpu.vector_store %arg15[%c144, %c32_73], %190 {strides = array<i32>} : memref<192x64xf32, #tpu.memory_space<vmem>>, vector<8x32xf32>,
    %192 = vector.extract_strided_slice %187 {offsets = [0, 0], sizes = [8, 32], strides = [1, 1]} : vector<8x64xf32> to vector<8x32xf32>
    %c144_74 = arith.constant 144 : index
    %c0_75 = arith.constant 0 : index
    %193 = vector.load %arg16[%c144_74, %c0_75] : memref<192x64xf32, #tpu.memory_space<vmem>>, vector<8x32xf32>
    tpu.vector_store %arg16[%c144_74, %c0_75], %192 {strides = array<i32>} : memref<192x64xf32, #tpu.memory_space<vmem>>, vector<8x32xf32>,
    %194 = vector.extract_strided_slice %187 {offsets = [0, 32], sizes = [8, 32], strides = [1, 1]} : vector<8x64xf32> to vector<8x32xf32>
    %c40_76 = arith.constant 40 : index
    %c32_77 = arith.constant 32 : index
    %195 = vector.load %arg16[%c40_76, %c32_77] : memref<192x64xf32, #tpu.memory_space<vmem>>, vector<8x32xf32>
    tpu.vector_store %arg16[%c40_76, %c32_77], %194 {strides = array<i32>} : memref<192x64xf32, #tpu.memory_space<vmem>>, vector<8x32xf32>,
    %196 = arith.truncf %187 : vector<8x64xf32> to vector<8x64xbf16>
    %cst_78 = arith.constant dense<0.000000e+00> : vector<8x192xf32>
    %197 = tpu.matmul %196, %11, %cst_78 {dimension_numbers = #tpu.dot_dimension_numbers<[1], [0], [0], [1], [0, 0, 1, 1], [], []>} : vector<8x64xbf16>, vector<64x192xbf16>, vector<8x192xf32> -> vector<8x192xf32>
    %c48 = arith.constant 48 : index
    %c0_79 = arith.constant 0 : index
    %198 = vector.load %arg17[%c48, %c0_79] : memref<192x192xf32, #tpu.memory_space<vmem>>, vector<8x192xf32>
    %199 = vector.extract_strided_slice %198 {offsets = [0, 0], sizes = [8, 128], strides = [1, 1]} : vector<8x192xf32> to vector<8x128xf32>
    %200 = vector.extract_strided_slice %197 {offsets = [0, 0], sizes = [8, 128], strides = [1, 1]} : vector<8x192xf32> to vector<8x128xf32>
    %201 = arith.addf %199, %200 : vector<8x128xf32>
    %202 = arith.negf %201 : vector<8x128xf32>
    %203 = math.exp %202 : vector<8x128xf32>
    %cst_80 = arith.constant 1.000000e+00 : f32
    %204 = vector.broadcast %cst_80 : f32 to vector<8x128xf32>
    %205 = arith.addf %204, %203 : vector<8x128xf32>
    %206 = arith.divf %204, %205 : vector<8x128xf32>
    %207 = vector.extract_strided_slice %206 {offsets = [0, 0], sizes = [8, 64], strides = [1, 1]} : vector<8x128xf32> to vector<8x64xf32>
    %208 = vector.extract_strided_slice %206 {offsets = [0, 64], sizes = [8, 64], strides = [1, 1]} : vector<8x128xf32> to vector<8x64xf32>
    %209 = vector.extract_strided_slice %198 {offsets = [0, 128], sizes = [8, 64], strides = [1, 1]} : vector<8x192xf32> to vector<8x64xf32>
    %210 = vector.extract_strided_slice %197 {offsets = [0, 128], sizes = [8, 64], strides = [1, 1]} : vector<8x192xf32> to vector<8x64xf32>
    %211 = arith.addf %210, %14 : vector<8x64xf32>
    %212 = arith.mulf %207, %211 : vector<8x64xf32>
    %213 = arith.addf %209, %212 : vector<8x64xf32>
    %214 = math.tanh %213 : vector<8x64xf32>
    %215 = arith.subf %187, %214 : vector<8x64xf32>
    %216 = arith.mulf %208, %215 : vector<8x64xf32>
    %217 = arith.addf %214, %216 : vector<8x64xf32>
    %218 = vector.extract_strided_slice %217 {offsets = [0, 0], sizes = [8, 32], strides = [1, 1]} : vector<8x64xf32> to vector<8x32xf32>
    %c48_81 = arith.constant 48 : index
    %c0_82 = arith.constant 0 : index
    %219 = vector.load %arg15[%c48_81, %c0_82] : memref<192x64xf32, #tpu.memory_space<vmem>>, vector<8x32xf32>
    tpu.vector_store %arg15[%c48_81, %c0_82], %218 {strides = array<i32>} : memref<192x64xf32, #tpu.memory_space<vmem>>, vector<8x32xf32>,
    %220 = vector.extract_strided_slice %217 {offsets = [0, 32], sizes = [8, 32], strides = [1, 1]} : vector<8x64xf32> to vector<8x32xf32>
    %c136 = arith.constant 136 : index
    %c32_83 = arith.constant 32 : index
    %221 = vector.load %arg15[%c136, %c32_83] : memref<192x64xf32, #tpu.memory_space<vmem>>, vector<8x32xf32>
    tpu.vector_store %arg15[%c136, %c32_83], %220 {strides = array<i32>} : memref<192x64xf32, #tpu.memory_space<vmem>>, vector<8x32xf32>,
    %222 = vector.extract_strided_slice %217 {offsets = [0, 0], sizes = [8, 32], strides = [1, 1]} : vector<8x64xf32> to vector<8x32xf32>
    %c136_84 = arith.constant 136 : index
    %c0_85 = arith.constant 0 : index
    %223 = vector.load %arg16[%c136_84, %c0_85] : memref<192x64xf32, #tpu.memory_space<vmem>>, vector<8x32xf32>
    tpu.vector_store %arg16[%c136_84, %c0_85], %222 {strides = array<i32>} : memref<192x64xf32, #tpu.memory_space<vmem>>, vector<8x32xf32>,
    %224 = vector.extract_strided_slice %217 {offsets = [0, 32], sizes = [8, 32], strides = [1, 1]} : vector<8x64xf32> to vector<8x32xf32>
    %c48_86 = arith.constant 48 : index
    %c32_87 = arith.constant 32 : index
    %225 = vector.load %arg16[%c48_86, %c32_87] : memref<192x64xf32, #tpu.memory_space<vmem>>, vector<8x32xf32>
    tpu.vector_store %arg16[%c48_86, %c32_87], %224 {strides = array<i32>} : memref<192x64xf32, #tpu.memory_space<vmem>>, vector<8x32xf32>,
    %226 = arith.truncf %217 : vector<8x64xf32> to vector<8x64xbf16>
    %cst_88 = arith.constant dense<0.000000e+00> : vector<8x192xf32>
    %227 = tpu.matmul %226, %11, %cst_88 {dimension_numbers = #tpu.dot_dimension_numbers<[1], [0], [0], [1], [0, 0, 1, 1], [], []>} : vector<8x64xbf16>, vector<64x192xbf16>, vector<8x192xf32> -> vector<8x192xf32>
    %c56 = arith.constant 56 : index
    %c0_89 = arith.constant 0 : index
    %228 = vector.load %arg17[%c56, %c0_89] : memref<192x192xf32, #tpu.memory_space<vmem>>, vector<8x192xf32>
    %229 = vector.extract_strided_slice %228 {offsets = [0, 0], sizes = [8, 128], strides = [1, 1]} : vector<8x192xf32> to vector<8x128xf32>
    %230 = vector.extract_strided_slice %227 {offsets = [0, 0], sizes = [8, 128], strides = [1, 1]} : vector<8x192xf32> to vector<8x128xf32>
    %231 = arith.addf %229, %230 : vector<8x128xf32>
    %232 = arith.negf %231 : vector<8x128xf32>
    %233 = math.exp %232 : vector<8x128xf32>
    %cst_90 = arith.constant 1.000000e+00 : f32
    %234 = vector.broadcast %cst_90 : f32 to vector<8x128xf32>
    %235 = arith.addf %234, %233 : vector<8x128xf32>
    %236 = arith.divf %234, %235 : vector<8x128xf32>
    %237 = vector.extract_strided_slice %236 {offsets = [0, 0], sizes = [8, 64], strides = [1, 1]} : vector<8x128xf32> to vector<8x64xf32>
    %238 = vector.extract_strided_slice %236 {offsets = [0, 64], sizes = [8, 64], strides = [1, 1]} : vector<8x128xf32> to vector<8x64xf32>
    %239 = vector.extract_strided_slice %228 {offsets = [0, 128], sizes = [8, 64], strides = [1, 1]} : vector<8x192xf32> to vector<8x64xf32>
    %240 = vector.extract_strided_slice %227 {offsets = [0, 128], sizes = [8, 64], strides = [1, 1]} : vector<8x192xf32> to vector<8x64xf32>
    %241 = arith.addf %240, %14 : vector<8x64xf32>
    %242 = arith.mulf %237, %241 : vector<8x64xf32>
    %243 = arith.addf %239, %242 : vector<8x64xf32>
    %244 = math.tanh %243 : vector<8x64xf32>
    %245 = arith.subf %217, %244 : vector<8x64xf32>
    %246 = arith.mulf %238, %245 : vector<8x64xf32>
    %247 = arith.addf %244, %246 : vector<8x64xf32>
    %248 = vector.extract_strided_slice %247 {offsets = [0, 0], sizes = [8, 32], strides = [1, 1]} : vector<8x64xf32> to vector<8x32xf32>
    %c56_91 = arith.constant 56 : index
    %c0_92 = arith.constant 0 : index
    %249 = vector.load %arg15[%c56_91, %c0_92] : memref<192x64xf32, #tpu.memory_space<vmem>>, vector<8x32xf32>
    tpu.vector_store %arg15[%c56_91, %c0_92], %248 {strides = array<i32>} : memref<192x64xf32, #tpu.memory_space<vmem>>, vector<8x32xf32>,
    %250 = vector.extract_strided_slice %247 {offsets = [0, 32], sizes = [8, 32], strides = [1, 1]} : vector<8x64xf32> to vector<8x32xf32>
    %c128 = arith.constant 128 : index
    %c32_93 = arith.constant 32 : index
    %251 = vector.load %arg15[%c128, %c32_93] : memref<192x64xf32, #tpu.memory_space<vmem>>, vector<8x32xf32>
    tpu.vector_store %arg15[%c128, %c32_93], %250 {strides = array<i32>} : memref<192x64xf32, #tpu.memory_space<vmem>>, vector<8x32xf32>,
    %252 = vector.extract_strided_slice %247 {offsets = [0, 0], sizes = [8, 32], strides = [1, 1]} : vector<8x64xf32> to vector<8x32xf32>
    %c128_94 = arith.constant 128 : index
    %c0_95 = arith.constant 0 : index
    %253 = vector.load %arg16[%c128_94, %c0_95] : memref<192x64xf32, #tpu.memory_space<vmem>>, vector<8x32xf32>
    tpu.vector_store %arg16[%c128_94, %c0_95], %252 {strides = array<i32>} : memref<192x64xf32, #tpu.memory_space<vmem>>, vector<8x32xf32>,
    %254 = vector.extract_strided_slice %247 {offsets = [0, 32], sizes = [8, 32], strides = [1, 1]} : vector<8x64xf32> to vector<8x32xf32>
    %c56_96 = arith.constant 56 : index
    %c32_97 = arith.constant 32 : index
    %255 = vector.load %arg16[%c56_96, %c32_97] : memref<192x64xf32, #tpu.memory_space<vmem>>, vector<8x32xf32>
    tpu.vector_store %arg16[%c56_96, %c32_97], %254 {strides = array<i32>} : memref<192x64xf32, #tpu.memory_space<vmem>>, vector<8x32xf32>,
    %256 = arith.truncf %247 : vector<8x64xf32> to vector<8x64xbf16>
    %cst_98 = arith.constant dense<0.000000e+00> : vector<8x192xf32>
    %257 = tpu.matmul %256, %11, %cst_98 {dimension_numbers = #tpu.dot_dimension_numbers<[1], [0], [0], [1], [0, 0, 1, 1], [], []>} : vector<8x64xbf16>, vector<64x192xbf16>, vector<8x192xf32> -> vector<8x192xf32>
    %c64 = arith.constant 64 : index
    %c0_99 = arith.constant 0 : index
    %258 = vector.load %arg17[%c64, %c0_99] : memref<192x192xf32, #tpu.memory_space<vmem>>, vector<8x192xf32>
    %259 = vector.extract_strided_slice %258 {offsets = [0, 0], sizes = [8, 128], strides = [1, 1]} : vector<8x192xf32> to vector<8x128xf32>
    %260 = vector.extract_strided_slice %257 {offsets = [0, 0], sizes = [8, 128], strides = [1, 1]} : vector<8x192xf32> to vector<8x128xf32>
    %261 = arith.addf %259, %260 : vector<8x128xf32>
    %262 = arith.negf %261 : vector<8x128xf32>
    %263 = math.exp %262 : vector<8x128xf32>
    %cst_100 = arith.constant 1.000000e+00 : f32
    %264 = vector.broadcast %cst_100 : f32 to vector<8x128xf32>
    %265 = arith.addf %264, %263 : vector<8x128xf32>
    %266 = arith.divf %264, %265 : vector<8x128xf32>
    %267 = vector.extract_strided_slice %266 {offsets = [0, 0], sizes = [8, 64], strides = [1, 1]} : vector<8x128xf32> to vector<8x64xf32>
    %268 = vector.extract_strided_slice %266 {offsets = [0, 64], sizes = [8, 64], strides = [1, 1]} : vector<8x128xf32> to vector<8x64xf32>
    %269 = vector.extract_strided_slice %258 {offsets = [0, 128], sizes = [8, 64], strides = [1, 1]} : vector<8x192xf32> to vector<8x64xf32>
    %270 = vector.extract_strided_slice %257 {offsets = [0, 128], sizes = [8, 64], strides = [1, 1]} : vector<8x192xf32> to vector<8x64xf32>
    %271 = arith.addf %270, %14 : vector<8x64xf32>
    %272 = arith.mulf %267, %271 : vector<8x64xf32>
    %273 = arith.addf %269, %272 : vector<8x64xf32>
    %274 = math.tanh %273 : vector<8x64xf32>
    %275 = arith.subf %247, %274 : vector<8x64xf32>
    %276 = arith.mulf %268, %275 : vector<8x64xf32>
    %277 = arith.addf %274, %276 : vector<8x64xf32>
    %278 = vector.extract_strided_slice %277 {offsets = [0, 0], sizes = [8, 32], strides = [1, 1]} : vector<8x64xf32> to vector<8x32xf32>
    %c64_101 = arith.constant 64 : index
    %c0_102 = arith.constant 0 : index
    %279 = vector.load %arg15[%c64_101, %c0_102] : memref<192x64xf32, #tpu.memory_space<vmem>>, vector<8x32xf32>
    tpu.vector_store %arg15[%c64_101, %c0_102], %278 {strides = array<i32>} : memref<192x64xf32, #tpu.memory_space<vmem>>, vector<8x32xf32>,
    %280 = vector.extract_strided_slice %277 {offsets = [0, 32], sizes = [8, 32], strides = [1, 1]} : vector<8x64xf32> to vector<8x32xf32>
    %c120 = arith.constant 120 : index
    %c32_103 = arith.constant 32 : index
    %281 = vector.load %arg15[%c120, %c32_103] : memref<192x64xf32, #tpu.memory_space<vmem>>, vector<8x32xf32>
    tpu.vector_store %arg15[%c120, %c32_103], %280 {strides = array<i32>} : memref<192x64xf32, #tpu.memory_space<vmem>>, vector<8x32xf32>,
    %282 = vector.extract_strided_slice %277 {offsets = [0, 0], sizes = [8, 32], strides = [1, 1]} : vector<8x64xf32> to vector<8x32xf32>
    %c120_104 = arith.constant 120 : index
    %c0_105 = arith.constant 0 : index
    %283 = vector.load %arg16[%c120_104, %c0_105] : memref<192x64xf32, #tpu.memory_space<vmem>>, vector<8x32xf32>
    tpu.vector_store %arg16[%c120_104, %c0_105], %282 {strides = array<i32>} : memref<192x64xf32, #tpu.memory_space<vmem>>, vector<8x32xf32>,
    %284 = vector.extract_strided_slice %277 {offsets = [0, 32], sizes = [8, 32], strides = [1, 1]} : vector<8x64xf32> to vector<8x32xf32>
    %c64_106 = arith.constant 64 : index
    %c32_107 = arith.constant 32 : index
    %285 = vector.load %arg16[%c64_106, %c32_107] : memref<192x64xf32, #tpu.memory_space<vmem>>, vector<8x32xf32>
    tpu.vector_store %arg16[%c64_106, %c32_107], %284 {strides = array<i32>} : memref<192x64xf32, #tpu.memory_space<vmem>>, vector<8x32xf32>,
    %286 = arith.truncf %277 : vector<8x64xf32> to vector<8x64xbf16>
    %cst_108 = arith.constant dense<0.000000e+00> : vector<8x192xf32>
    %287 = tpu.matmul %286, %11, %cst_108 {dimension_numbers = #tpu.dot_dimension_numbers<[1], [0], [0], [1], [0, 0, 1, 1], [], []>} : vector<8x64xbf16>, vector<64x192xbf16>, vector<8x192xf32> -> vector<8x192xf32>
    %c72 = arith.constant 72 : index
    %c0_109 = arith.constant 0 : index
    %288 = vector.load %arg17[%c72, %c0_109] : memref<192x192xf32, #tpu.memory_space<vmem>>, vector<8x192xf32>
    %289 = vector.extract_strided_slice %288 {offsets = [0, 0], sizes = [8, 128], strides = [1, 1]} : vector<8x192xf32> to vector<8x128xf32>
    %290 = vector.extract_strided_slice %287 {offsets = [0, 0], sizes = [8, 128], strides = [1, 1]} : vector<8x192xf32> to vector<8x128xf32>
    %291 = arith.addf %289, %290 : vector<8x128xf32>
    %292 = arith.negf %291 : vector<8x128xf32>
    %293 = math.exp %292 : vector<8x128xf32>
    %cst_110 = arith.constant 1.000000e+00 : f32
    %294 = vector.broadcast %cst_110 : f32 to vector<8x128xf32>
    %295 = arith.addf %294, %293 : vector<8x128xf32>
    %296 = arith.divf %294, %295 : vector<8x128xf32>
    %297 = vector.extract_strided_slice %296 {offsets = [0, 0], sizes = [8, 64], strides = [1, 1]} : vector<8x128xf32> to vector<8x64xf32>
    %298 = vector.extract_strided_slice %296 {offsets = [0, 64], sizes = [8, 64], strides = [1, 1]} : vector<8x128xf32> to vector<8x64xf32>
    %299 = vector.extract_strided_slice %288 {offsets = [0, 128], sizes = [8, 64], strides = [1, 1]} : vector<8x192xf32> to vector<8x64xf32>
    %300 = vector.extract_strided_slice %287 {offsets = [0, 128], sizes = [8, 64], strides = [1, 1]} : vector<8x192xf32> to vector<8x64xf32>
    %301 = arith.addf %300, %14 : vector<8x64xf32>
    %302 = arith.mulf %297, %301 : vector<8x64xf32>
    %303 = arith.addf %299, %302 : vector<8x64xf32>
    %304 = math.tanh %303 : vector<8x64xf32>
    %305 = arith.subf %277, %304 : vector<8x64xf32>
    %306 = arith.mulf %298, %305 : vector<8x64xf32>
    %307 = arith.addf %304, %306 : vector<8x64xf32>
    %308 = vector.extract_strided_slice %307 {offsets = [0, 0], sizes = [8, 32], strides = [1, 1]} : vector<8x64xf32> to vector<8x32xf32>
    %c72_111 = arith.constant 72 : index
    %c0_112 = arith.constant 0 : index
    %309 = vector.load %arg15[%c72_111, %c0_112] : memref<192x64xf32, #tpu.memory_space<vmem>>, vector<8x32xf32>
    tpu.vector_store %arg15[%c72_111, %c0_112], %308 {strides = array<i32>} : memref<192x64xf32, #tpu.memory_space<vmem>>, vector<8x32xf32>,
    %310 = vector.extract_strided_slice %307 {offsets = [0, 32], sizes = [8, 32], strides = [1, 1]} : vector<8x64xf32> to vector<8x32xf32>
    %c112 = arith.constant 112 : index
    %c32_113 = arith.constant 32 : index
    %311 = vector.load %arg15[%c112, %c32_113] : memref<192x64xf32, #tpu.memory_space<vmem>>, vector<8x32xf32>
    tpu.vector_store %arg15[%c112, %c32_113], %310 {strides = array<i32>} : memref<192x64xf32, #tpu.memory_space<vmem>>, vector<8x32xf32>,
    %312 = vector.extract_strided_slice %307 {offsets = [0, 0], sizes = [8, 32], strides = [1, 1]} : vector<8x64xf32> to vector<8x32xf32>
    %c112_114 = arith.constant 112 : index
    %c0_115 = arith.constant 0 : index
    %313 = vector.load %arg16[%c112_114, %c0_115] : memref<192x64xf32, #tpu.memory_space<vmem>>, vector<8x32xf32>
    tpu.vector_store %arg16[%c112_114, %c0_115], %312 {strides = array<i32>} : memref<192x64xf32, #tpu.memory_space<vmem>>, vector<8x32xf32>,
    %314 = vector.extract_strided_slice %307 {offsets = [0, 32], sizes = [8, 32], strides = [1, 1]} : vector<8x64xf32> to vector<8x32xf32>
    %c72_116 = arith.constant 72 : index
    %c32_117 = arith.constant 32 : index
    %315 = vector.load %arg16[%c72_116, %c32_117] : memref<192x64xf32, #tpu.memory_space<vmem>>, vector<8x32xf32>
    tpu.vector_store %arg16[%c72_116, %c32_117], %314 {strides = array<i32>} : memref<192x64xf32, #tpu.memory_space<vmem>>, vector<8x32xf32>,
    %316 = arith.truncf %307 : vector<8x64xf32> to vector<8x64xbf16>
    %cst_118 = arith.constant dense<0.000000e+00> : vector<8x192xf32>
    %317 = tpu.matmul %316, %11, %cst_118 {dimension_numbers = #tpu.dot_dimension_numbers<[1], [0], [0], [1], [0, 0, 1, 1], [], []>} : vector<8x64xbf16>, vector<64x192xbf16>, vector<8x192xf32> -> vector<8x192xf32>
    %c80 = arith.constant 80 : index
    %c0_119 = arith.constant 0 : index
    %318 = vector.load %arg17[%c80, %c0_119] : memref<192x192xf32, #tpu.memory_space<vmem>>, vector<8x192xf32>
    %319 = vector.extract_strided_slice %318 {offsets = [0, 0], sizes = [8, 128], strides = [1, 1]} : vector<8x192xf32> to vector<8x128xf32>
    %320 = vector.extract_strided_slice %317 {offsets = [0, 0], sizes = [8, 128], strides = [1, 1]} : vector<8x192xf32> to vector<8x128xf32>
    %321 = arith.addf %319, %320 : vector<8x128xf32>
    %322 = arith.negf %321 : vector<8x128xf32>
    %323 = math.exp %322 : vector<8x128xf32>
    %cst_120 = arith.constant 1.000000e+00 : f32
    %324 = vector.broadcast %cst_120 : f32 to vector<8x128xf32>
    %325 = arith.addf %324, %323 : vector<8x128xf32>
    %326 = arith.divf %324, %325 : vector<8x128xf32>
    %327 = vector.extract_strided_slice %326 {offsets = [0, 0], sizes = [8, 64], strides = [1, 1]} : vector<8x128xf32> to vector<8x64xf32>
    %328 = vector.extract_strided_slice %326 {offsets = [0, 64], sizes = [8, 64], strides = [1, 1]} : vector<8x128xf32> to vector<8x64xf32>
    %329 = vector.extract_strided_slice %318 {offsets = [0, 128], sizes = [8, 64], strides = [1, 1]} : vector<8x192xf32> to vector<8x64xf32>
    %330 = vector.extract_strided_slice %317 {offsets = [0, 128], sizes = [8, 64], strides = [1, 1]} : vector<8x192xf32> to vector<8x64xf32>
    %331 = arith.addf %330, %14 : vector<8x64xf32>
    %332 = arith.mulf %327, %331 : vector<8x64xf32>
    %333 = arith.addf %329, %332 : vector<8x64xf32>
    %334 = math.tanh %333 : vector<8x64xf32>
    %335 = arith.subf %307, %334 : vector<8x64xf32>
    %336 = arith.mulf %328, %335 : vector<8x64xf32>
    %337 = arith.addf %334, %336 : vector<8x64xf32>
    %338 = vector.extract_strided_slice %337 {offsets = [0, 0], sizes = [8, 32], strides = [1, 1]} : vector<8x64xf32> to vector<8x32xf32>
    %c80_121 = arith.constant 80 : index
    %c0_122 = arith.constant 0 : index
    %339 = vector.load %arg15[%c80_121, %c0_122] : memref<192x64xf32, #tpu.memory_space<vmem>>, vector<8x32xf32>
    tpu.vector_store %arg15[%c80_121, %c0_122], %338 {strides = array<i32>} : memref<192x64xf32, #tpu.memory_space<vmem>>, vector<8x32xf32>,
    %340 = vector.extract_strided_slice %337 {offsets = [0, 32], sizes = [8, 32], strides = [1, 1]} : vector<8x64xf32> to vector<8x32xf32>
    %c104 = arith.constant 104 : index
    %c32_123 = arith.constant 32 : index
    %341 = vector.load %arg15[%c104, %c32_123] : memref<192x64xf32, #tpu.memory_space<vmem>>, vector<8x32xf32>
    tpu.vector_store %arg15[%c104, %c32_123], %340 {strides = array<i32>} : memref<192x64xf32, #tpu.memory_space<vmem>>, vector<8x32xf32>,
    %342 = vector.extract_strided_slice %337 {offsets = [0, 0], sizes = [8, 32], strides = [1, 1]} : vector<8x64xf32> to vector<8x32xf32>
    %c104_124 = arith.constant 104 : index
    %c0_125 = arith.constant 0 : index
    %343 = vector.load %arg16[%c104_124, %c0_125] : memref<192x64xf32, #tpu.memory_space<vmem>>, vector<8x32xf32>
    tpu.vector_store %arg16[%c104_124, %c0_125], %342 {strides = array<i32>} : memref<192x64xf32, #tpu.memory_space<vmem>>, vector<8x32xf32>,
    %344 = vector.extract_strided_slice %337 {offsets = [0, 32], sizes = [8, 32], strides = [1, 1]} : vector<8x64xf32> to vector<8x32xf32>
    %c80_126 = arith.constant 80 : index
    %c32_127 = arith.constant 32 : index
    %345 = vector.load %arg16[%c80_126, %c32_127] : memref<192x64xf32, #tpu.memory_space<vmem>>, vector<8x32xf32>
    tpu.vector_store %arg16[%c80_126, %c32_127], %344 {strides = array<i32>} : memref<192x64xf32, #tpu.memory_space<vmem>>, vector<8x32xf32>,
    %346 = arith.truncf %337 : vector<8x64xf32> to vector<8x64xbf16>
    %cst_128 = arith.constant dense<0.000000e+00> : vector<8x192xf32>
    %347 = tpu.matmul %346, %11, %cst_128 {dimension_numbers = #tpu.dot_dimension_numbers<[1], [0], [0], [1], [0, 0, 1, 1], [], []>} : vector<8x64xbf16>, vector<64x192xbf16>, vector<8x192xf32> -> vector<8x192xf32>
    %c88 = arith.constant 88 : index
    %c0_129 = arith.constant 0 : index
    %348 = vector.load %arg17[%c88, %c0_129] : memref<192x192xf32, #tpu.memory_space<vmem>>, vector<8x192xf32>
    %349 = vector.extract_strided_slice %348 {offsets = [0, 0], sizes = [8, 128], strides = [1, 1]} : vector<8x192xf32> to vector<8x128xf32>
    %350 = vector.extract_strided_slice %347 {offsets = [0, 0], sizes = [8, 128], strides = [1, 1]} : vector<8x192xf32> to vector<8x128xf32>
    %351 = arith.addf %349, %350 : vector<8x128xf32>
    %352 = arith.negf %351 : vector<8x128xf32>
    %353 = math.exp %352 : vector<8x128xf32>
    %cst_130 = arith.constant 1.000000e+00 : f32
    %354 = vector.broadcast %cst_130 : f32 to vector<8x128xf32>
    %355 = arith.addf %354, %353 : vector<8x128xf32>
    %356 = arith.divf %354, %355 : vector<8x128xf32>
    %357 = vector.extract_strided_slice %356 {offsets = [0, 0], sizes = [8, 64], strides = [1, 1]} : vector<8x128xf32> to vector<8x64xf32>
    %358 = vector.extract_strided_slice %356 {offsets = [0, 64], sizes = [8, 64], strides = [1, 1]} : vector<8x128xf32> to vector<8x64xf32>
    %359 = vector.extract_strided_slice %348 {offsets = [0, 128], sizes = [8, 64], strides = [1, 1]} : vector<8x192xf32> to vector<8x64xf32>
    %360 = vector.extract_strided_slice %347 {offsets = [0, 128], sizes = [8, 64], strides = [1, 1]} : vector<8x192xf32> to vector<8x64xf32>
    %361 = arith.addf %360, %14 : vector<8x64xf32>
    %362 = arith.mulf %357, %361 : vector<8x64xf32>
    %363 = arith.addf %359, %362 : vector<8x64xf32>
    %364 = math.tanh %363 : vector<8x64xf32>
    %365 = arith.subf %337, %364 : vector<8x64xf32>
    %366 = arith.mulf %358, %365 : vector<8x64xf32>
    %367 = arith.addf %364, %366 : vector<8x64xf32>
    %368 = vector.extract_strided_slice %367 {offsets = [0, 0], sizes = [8, 32], strides = [1, 1]} : vector<8x64xf32> to vector<8x32xf32>
    %c88_131 = arith.constant 88 : index
    %c0_132 = arith.constant 0 : index
    %369 = vector.load %arg15[%c88_131, %c0_132] : memref<192x64xf32, #tpu.memory_space<vmem>>, vector<8x32xf32>
    tpu.vector_store %arg15[%c88_131, %c0_132], %368 {strides = array<i32>} : memref<192x64xf32, #tpu.memory_space<vmem>>, vector<8x32xf32>,
    %370 = vector.extract_strided_slice %367 {offsets = [0, 32], sizes = [8, 32], strides = [1, 1]} : vector<8x64xf32> to vector<8x32xf32>
    %c96 = arith.constant 96 : index
    %c32_133 = arith.constant 32 : index
    %371 = vector.load %arg15[%c96, %c32_133] : memref<192x64xf32, #tpu.memory_space<vmem>>, vector<8x32xf32>
    tpu.vector_store %arg15[%c96, %c32_133], %370 {strides = array<i32>} : memref<192x64xf32, #tpu.memory_space<vmem>>, vector<8x32xf32>,
    %372 = vector.extract_strided_slice %367 {offsets = [0, 0], sizes = [8, 32], strides = [1, 1]} : vector<8x64xf32> to vector<8x32xf32>
    %c96_134 = arith.constant 96 : index
    %c0_135 = arith.constant 0 : index
    %373 = vector.load %arg16[%c96_134, %c0_135] : memref<192x64xf32, #tpu.memory_space<vmem>>, vector<8x32xf32>
    tpu.vector_store %arg16[%c96_134, %c0_135], %372 {strides = array<i32>} : memref<192x64xf32, #tpu.memory_space<vmem>>, vector<8x32xf32>,
    %374 = vector.extract_strided_slice %367 {offsets = [0, 32], sizes = [8, 32], strides = [1, 1]} : vector<8x64xf32> to vector<8x32xf32>
    %c88_136 = arith.constant 88 : index
    %c32_137 = arith.constant 32 : index
    %375 = vector.load %arg16[%c88_136, %c32_137] : memref<192x64xf32, #tpu.memory_space<vmem>>, vector<8x32xf32>
    tpu.vector_store %arg16[%c88_136, %c32_137], %374 {strides = array<i32>} : memref<192x64xf32, #tpu.memory_space<vmem>>, vector<8x32xf32>,
    %376 = arith.truncf %367 : vector<8x64xf32> to vector<8x64xbf16>
    %cst_138 = arith.constant dense<0.000000e+00> : vector<8x192xf32>
    %377 = tpu.matmul %376, %11, %cst_138 {dimension_numbers = #tpu.dot_dimension_numbers<[1], [0], [0], [1], [0, 0, 1, 1], [], []>} : vector<8x64xbf16>, vector<64x192xbf16>, vector<8x192xf32> -> vector<8x192xf32>
    %c96_139 = arith.constant 96 : index
    %c0_140 = arith.constant 0 : index
    %378 = vector.load %arg17[%c96_139, %c0_140] : memref<192x192xf32, #tpu.memory_space<vmem>>, vector<8x192xf32>
    %379 = vector.extract_strided_slice %378 {offsets = [0, 0], sizes = [8, 128], strides = [1, 1]} : vector<8x192xf32> to vector<8x128xf32>
    %380 = vector.extract_strided_slice %377 {offsets = [0, 0], sizes = [8, 128], strides = [1, 1]} : vector<8x192xf32> to vector<8x128xf32>
    %381 = arith.addf %379, %380 : vector<8x128xf32>
    %382 = arith.negf %381 : vector<8x128xf32>
    %383 = math.exp %382 : vector<8x128xf32>
    %cst_141 = arith.constant 1.000000e+00 : f32
    %384 = vector.broadcast %cst_141 : f32 to vector<8x128xf32>
    %385 = arith.addf %384, %383 : vector<8x128xf32>
    %386 = arith.divf %384, %385 : vector<8x128xf32>
    %387 = vector.extract_strided_slice %386 {offsets = [0, 0], sizes = [8, 64], strides = [1, 1]} : vector<8x128xf32> to vector<8x64xf32>
    %388 = vector.extract_strided_slice %386 {offsets = [0, 64], sizes = [8, 64], strides = [1, 1]} : vector<8x128xf32> to vector<8x64xf32>
    %389 = vector.extract_strided_slice %378 {offsets = [0, 128], sizes = [8, 64], strides = [1, 1]} : vector<8x192xf32> to vector<8x64xf32>
    %390 = vector.extract_strided_slice %377 {offsets = [0, 128], sizes = [8, 64], strides = [1, 1]} : vector<8x192xf32> to vector<8x64xf32>
    %391 = arith.addf %390, %14 : vector<8x64xf32>
    %392 = arith.mulf %387, %391 : vector<8x64xf32>
    %393 = arith.addf %389, %392 : vector<8x64xf32>
    %394 = math.tanh %393 : vector<8x64xf32>
    %395 = arith.subf %367, %394 : vector<8x64xf32>
    %396 = arith.mulf %388, %395 : vector<8x64xf32>
    %397 = arith.addf %394, %396 : vector<8x64xf32>
    %398 = vector.extract_strided_slice %397 {offsets = [0, 0], sizes = [8, 32], strides = [1, 1]} : vector<8x64xf32> to vector<8x32xf32>
    %c96_142 = arith.constant 96 : index
    %c0_143 = arith.constant 0 : index
    %399 = vector.load %arg15[%c96_142, %c0_143] : memref<192x64xf32, #tpu.memory_space<vmem>>, vector<8x32xf32>
    tpu.vector_store %arg15[%c96_142, %c0_143], %398 {strides = array<i32>} : memref<192x64xf32, #tpu.memory_space<vmem>>, vector<8x32xf32>,
    %400 = vector.extract_strided_slice %397 {offsets = [0, 32], sizes = [8, 32], strides = [1, 1]} : vector<8x64xf32> to vector<8x32xf32>
    %c88_144 = arith.constant 88 : index
    %c32_145 = arith.constant 32 : index
    %401 = vector.load %arg15[%c88_144, %c32_145] : memref<192x64xf32, #tpu.memory_space<vmem>>, vector<8x32xf32>
    tpu.vector_store %arg15[%c88_144, %c32_145], %400 {strides = array<i32>} : memref<192x64xf32, #tpu.memory_space<vmem>>, vector<8x32xf32>,
    %402 = vector.extract_strided_slice %397 {offsets = [0, 0], sizes = [8, 32], strides = [1, 1]} : vector<8x64xf32> to vector<8x32xf32>
    %c88_146 = arith.constant 88 : index
    %c0_147 = arith.constant 0 : index
    %403 = vector.load %arg16[%c88_146, %c0_147] : memref<192x64xf32, #tpu.memory_space<vmem>>, vector<8x32xf32>
    tpu.vector_store %arg16[%c88_146, %c0_147], %402 {strides = array<i32>} : memref<192x64xf32, #tpu.memory_space<vmem>>, vector<8x32xf32>,
    %404 = vector.extract_strided_slice %397 {offsets = [0, 32], sizes = [8, 32], strides = [1, 1]} : vector<8x64xf32> to vector<8x32xf32>
    %c96_148 = arith.constant 96 : index
    %c32_149 = arith.constant 32 : index
    %405 = vector.load %arg16[%c96_148, %c32_149] : memref<192x64xf32, #tpu.memory_space<vmem>>, vector<8x32xf32>
    tpu.vector_store %arg16[%c96_148, %c32_149], %404 {strides = array<i32>} : memref<192x64xf32, #tpu.memory_space<vmem>>, vector<8x32xf32>,
    %406 = arith.truncf %397 : vector<8x64xf32> to vector<8x64xbf16>
    %cst_150 = arith.constant dense<0.000000e+00> : vector<8x192xf32>
    %407 = tpu.matmul %406, %11, %cst_150 {dimension_numbers = #tpu.dot_dimension_numbers<[1], [0], [0], [1], [0, 0, 1, 1], [], []>} : vector<8x64xbf16>, vector<64x192xbf16>, vector<8x192xf32> -> vector<8x192xf32>
    %c104_151 = arith.constant 104 : index
    %c0_152 = arith.constant 0 : index
    %408 = vector.load %arg17[%c104_151, %c0_152] : memref<192x192xf32, #tpu.memory_space<vmem>>, vector<8x192xf32>
    %409 = vector.extract_strided_slice %408 {offsets = [0, 0], sizes = [8, 128], strides = [1, 1]} : vector<8x192xf32> to vector<8x128xf32>
    %410 = vector.extract_strided_slice %407 {offsets = [0, 0], sizes = [8, 128], strides = [1, 1]} : vector<8x192xf32> to vector<8x128xf32>
    %411 = arith.addf %409, %410 : vector<8x128xf32>
    %412 = arith.negf %411 : vector<8x128xf32>
    %413 = math.exp %412 : vector<8x128xf32>
    %cst_153 = arith.constant 1.000000e+00 : f32
    %414 = vector.broadcast %cst_153 : f32 to vector<8x128xf32>
    %415 = arith.addf %414, %413 : vector<8x128xf32>
    %416 = arith.divf %414, %415 : vector<8x128xf32>
    %417 = vector.extract_strided_slice %416 {offsets = [0, 0], sizes = [8, 64], strides = [1, 1]} : vector<8x128xf32> to vector<8x64xf32>
    %418 = vector.extract_strided_slice %416 {offsets = [0, 64], sizes = [8, 64], strides = [1, 1]} : vector<8x128xf32> to vector<8x64xf32>
    %419 = vector.extract_strided_slice %408 {offsets = [0, 128], sizes = [8, 64], strides = [1, 1]} : vector<8x192xf32> to vector<8x64xf32>
    %420 = vector.extract_strided_slice %407 {offsets = [0, 128], sizes = [8, 64], strides = [1, 1]} : vector<8x192xf32> to vector<8x64xf32>
    %421 = arith.addf %420, %14 : vector<8x64xf32>
    %422 = arith.mulf %417, %421 : vector<8x64xf32>
    %423 = arith.addf %419, %422 : vector<8x64xf32>
    %424 = math.tanh %423 : vector<8x64xf32>
    %425 = arith.subf %397, %424 : vector<8x64xf32>
    %426 = arith.mulf %418, %425 : vector<8x64xf32>
    %427 = arith.addf %424, %426 : vector<8x64xf32>
    %428 = vector.extract_strided_slice %427 {offsets = [0, 0], sizes = [8, 32], strides = [1, 1]} : vector<8x64xf32> to vector<8x32xf32>
    %c104_154 = arith.constant 104 : index
    %c0_155 = arith.constant 0 : index
    %429 = vector.load %arg15[%c104_154, %c0_155] : memref<192x64xf32, #tpu.memory_space<vmem>>, vector<8x32xf32>
    tpu.vector_store %arg15[%c104_154, %c0_155], %428 {strides = array<i32>} : memref<192x64xf32, #tpu.memory_space<vmem>>, vector<8x32xf32>,
    %430 = vector.extract_strided_slice %427 {offsets = [0, 32], sizes = [8, 32], strides = [1, 1]} : vector<8x64xf32> to vector<8x32xf32>
    %c80_156 = arith.constant 80 : index
    %c32_157 = arith.constant 32 : index
    %431 = vector.load %arg15[%c80_156, %c32_157] : memref<192x64xf32, #tpu.memory_space<vmem>>, vector<8x32xf32>
    tpu.vector_store %arg15[%c80_156, %c32_157], %430 {strides = array<i32>} : memref<192x64xf32, #tpu.memory_space<vmem>>, vector<8x32xf32>,
    %432 = vector.extract_strided_slice %427 {offsets = [0, 0], sizes = [8, 32], strides = [1, 1]} : vector<8x64xf32> to vector<8x32xf32>
    %c80_158 = arith.constant 80 : index
    %c0_159 = arith.constant 0 : index
    %433 = vector.load %arg16[%c80_158, %c0_159] : memref<192x64xf32, #tpu.memory_space<vmem>>, vector<8x32xf32>
    tpu.vector_store %arg16[%c80_158, %c0_159], %432 {strides = array<i32>} : memref<192x64xf32, #tpu.memory_space<vmem>>, vector<8x32xf32>,
    %434 = vector.extract_strided_slice %427 {offsets = [0, 32], sizes = [8, 32], strides = [1, 1]} : vector<8x64xf32> to vector<8x32xf32>
    %c104_160 = arith.constant 104 : index
    %c32_161 = arith.constant 32 : index
    %435 = vector.load %arg16[%c104_160, %c32_161] : memref<192x64xf32, #tpu.memory_space<vmem>>, vector<8x32xf32>
    tpu.vector_store %arg16[%c104_160, %c32_161], %434 {strides = array<i32>} : memref<192x64xf32, #tpu.memory_space<vmem>>, vector<8x32xf32>,
    %436 = arith.truncf %427 : vector<8x64xf32> to vector<8x64xbf16>
    %cst_162 = arith.constant dense<0.000000e+00> : vector<8x192xf32>
    %437 = tpu.matmul %436, %11, %cst_162 {dimension_numbers = #tpu.dot_dimension_numbers<[1], [0], [0], [1], [0, 0, 1, 1], [], []>} : vector<8x64xbf16>, vector<64x192xbf16>, vector<8x192xf32> -> vector<8x192xf32>
    %c112_163 = arith.constant 112 : index
    %c0_164 = arith.constant 0 : index
    %438 = vector.load %arg17[%c112_163, %c0_164] : memref<192x192xf32, #tpu.memory_space<vmem>>, vector<8x192xf32>
    %439 = vector.extract_strided_slice %438 {offsets = [0, 0], sizes = [8, 128], strides = [1, 1]} : vector<8x192xf32> to vector<8x128xf32>
    %440 = vector.extract_strided_slice %437 {offsets = [0, 0], sizes = [8, 128], strides = [1, 1]} : vector<8x192xf32> to vector<8x128xf32>
    %441 = arith.addf %439, %440 : vector<8x128xf32>
    %442 = arith.negf %441 : vector<8x128xf32>
    %443 = math.exp %442 : vector<8x128xf32>
    %cst_165 = arith.constant 1.000000e+00 : f32
    %444 = vector.broadcast %cst_165 : f32 to vector<8x128xf32>
    %445 = arith.addf %444, %443 : vector<8x128xf32>
    %446 = arith.divf %444, %445 : vector<8x128xf32>
    %447 = vector.extract_strided_slice %446 {offsets = [0, 0], sizes = [8, 64], strides = [1, 1]} : vector<8x128xf32> to vector<8x64xf32>
    %448 = vector.extract_strided_slice %446 {offsets = [0, 64], sizes = [8, 64], strides = [1, 1]} : vector<8x128xf32> to vector<8x64xf32>
    %449 = vector.extract_strided_slice %438 {offsets = [0, 128], sizes = [8, 64], strides = [1, 1]} : vector<8x192xf32> to vector<8x64xf32>
    %450 = vector.extract_strided_slice %437 {offsets = [0, 128], sizes = [8, 64], strides = [1, 1]} : vector<8x192xf32> to vector<8x64xf32>
    %451 = arith.addf %450, %14 : vector<8x64xf32>
    %452 = arith.mulf %447, %451 : vector<8x64xf32>
    %453 = arith.addf %449, %452 : vector<8x64xf32>
    %454 = math.tanh %453 : vector<8x64xf32>
    %455 = arith.subf %427, %454 : vector<8x64xf32>
    %456 = arith.mulf %448, %455 : vector<8x64xf32>
    %457 = arith.addf %454, %456 : vector<8x64xf32>
    %458 = vector.extract_strided_slice %457 {offsets = [0, 0], sizes = [8, 32], strides = [1, 1]} : vector<8x64xf32> to vector<8x32xf32>
    %c112_166 = arith.constant 112 : index
    %c0_167 = arith.constant 0 : index
    %459 = vector.load %arg15[%c112_166, %c0_167] : memref<192x64xf32, #tpu.memory_space<vmem>>, vector<8x32xf32>
    tpu.vector_store %arg15[%c112_166, %c0_167], %458 {strides = array<i32>} : memref<192x64xf32, #tpu.memory_space<vmem>>, vector<8x32xf32>,
    %460 = vector.extract_strided_slice %457 {offsets = [0, 32], sizes = [8, 32], strides = [1, 1]} : vector<8x64xf32> to vector<8x32xf32>
    %c72_168 = arith.constant 72 : index
    %c32_169 = arith.constant 32 : index
    %461 = vector.load %arg15[%c72_168, %c32_169] : memref<192x64xf32, #tpu.memory_space<vmem>>, vector<8x32xf32>
    tpu.vector_store %arg15[%c72_168, %c32_169], %460 {strides = array<i32>} : memref<192x64xf32, #tpu.memory_space<vmem>>, vector<8x32xf32>,
    %462 = vector.extract_strided_slice %457 {offsets = [0, 0], sizes = [8, 32], strides = [1, 1]} : vector<8x64xf32> to vector<8x32xf32>
    %c72_170 = arith.constant 72 : index
    %c0_171 = arith.constant 0 : index
    %463 = vector.load %arg16[%c72_170, %c0_171] : memref<192x64xf32, #tpu.memory_space<vmem>>, vector<8x32xf32>
    tpu.vector_store %arg16[%c72_170, %c0_171], %462 {strides = array<i32>} : memref<192x64xf32, #tpu.memory_space<vmem>>, vector<8x32xf32>,
    %464 = vector.extract_strided_slice %457 {offsets = [0, 32], sizes = [8, 32], strides = [1, 1]} : vector<8x64xf32> to vector<8x32xf32>
    %c112_172 = arith.constant 112 : index
    %c32_173 = arith.constant 32 : index
    %465 = vector.load %arg16[%c112_172, %c32_173] : memref<192x64xf32, #tpu.memory_space<vmem>>, vector<8x32xf32>
    tpu.vector_store %arg16[%c112_172, %c32_173], %464 {strides = array<i32>} : memref<192x64xf32, #tpu.memory_space<vmem>>, vector<8x32xf32>,
    %466 = arith.truncf %457 : vector<8x64xf32> to vector<8x64xbf16>
    %cst_174 = arith.constant dense<0.000000e+00> : vector<8x192xf32>
    %467 = tpu.matmul %466, %11, %cst_174 {dimension_numbers = #tpu.dot_dimension_numbers<[1], [0], [0], [1], [0, 0, 1, 1], [], []>} : vector<8x64xbf16>, vector<64x192xbf16>, vector<8x192xf32> -> vector<8x192xf32>
    %c120_175 = arith.constant 120 : index
    %c0_176 = arith.constant 0 : index
    %468 = vector.load %arg17[%c120_175, %c0_176] : memref<192x192xf32, #tpu.memory_space<vmem>>, vector<8x192xf32>
    %469 = vector.extract_strided_slice %468 {offsets = [0, 0], sizes = [8, 128], strides = [1, 1]} : vector<8x192xf32> to vector<8x128xf32>
    %470 = vector.extract_strided_slice %467 {offsets = [0, 0], sizes = [8, 128], strides = [1, 1]} : vector<8x192xf32> to vector<8x128xf32>
    %471 = arith.addf %469, %470 : vector<8x128xf32>
    %472 = arith.negf %471 : vector<8x128xf32>
    %473 = math.exp %472 : vector<8x128xf32>
    %cst_177 = arith.constant 1.000000e+00 : f32
    %474 = vector.broadcast %cst_177 : f32 to vector<8x128xf32>
    %475 = arith.addf %474, %473 : vector<8x128xf32>
    %476 = arith.divf %474, %475 : vector<8x128xf32>
    %477 = vector.extract_strided_slice %476 {offsets = [0, 0], sizes = [8, 64], strides = [1, 1]} : vector<8x128xf32> to vector<8x64xf32>
    %478 = vector.extract_strided_slice %476 {offsets = [0, 64], sizes = [8, 64], strides = [1, 1]} : vector<8x128xf32> to vector<8x64xf32>
    %479 = vector.extract_strided_slice %468 {offsets = [0, 128], sizes = [8, 64], strides = [1, 1]} : vector<8x192xf32> to vector<8x64xf32>
    %480 = vector.extract_strided_slice %467 {offsets = [0, 128], sizes = [8, 64], strides = [1, 1]} : vector<8x192xf32> to vector<8x64xf32>
    %481 = arith.addf %480, %14 : vector<8x64xf32>
    %482 = arith.mulf %477, %481 : vector<8x64xf32>
    %483 = arith.addf %479, %482 : vector<8x64xf32>
    %484 = math.tanh %483 : vector<8x64xf32>
    %485 = arith.subf %457, %484 : vector<8x64xf32>
    %486 = arith.mulf %478, %485 : vector<8x64xf32>
    %487 = arith.addf %484, %486 : vector<8x64xf32>
    %488 = vector.extract_strided_slice %487 {offsets = [0, 0], sizes = [8, 32], strides = [1, 1]} : vector<8x64xf32> to vector<8x32xf32>
    %c120_178 = arith.constant 120 : index
    %c0_179 = arith.constant 0 : index
    %489 = vector.load %arg15[%c120_178, %c0_179] : memref<192x64xf32, #tpu.memory_space<vmem>>, vector<8x32xf32>
    tpu.vector_store %arg15[%c120_178, %c0_179], %488 {strides = array<i32>} : memref<192x64xf32, #tpu.memory_space<vmem>>, vector<8x32xf32>,
    %490 = vector.extract_strided_slice %487 {offsets = [0, 32], sizes = [8, 32], strides = [1, 1]} : vector<8x64xf32> to vector<8x32xf32>
    %c64_180 = arith.constant 64 : index
    %c32_181 = arith.constant 32 : index
    %491 = vector.load %arg15[%c64_180, %c32_181] : memref<192x64xf32, #tpu.memory_space<vmem>>, vector<8x32xf32>
    tpu.vector_store %arg15[%c64_180, %c32_181], %490 {strides = array<i32>} : memref<192x64xf32, #tpu.memory_space<vmem>>, vector<8x32xf32>,
    %492 = vector.extract_strided_slice %487 {offsets = [0, 0], sizes = [8, 32], strides = [1, 1]} : vector<8x64xf32> to vector<8x32xf32>
    %c64_182 = arith.constant 64 : index
    %c0_183 = arith.constant 0 : index
    %493 = vector.load %arg16[%c64_182, %c0_183] : memref<192x64xf32, #tpu.memory_space<vmem>>, vector<8x32xf32>
    tpu.vector_store %arg16[%c64_182, %c0_183], %492 {strides = array<i32>} : memref<192x64xf32, #tpu.memory_space<vmem>>, vector<8x32xf32>,
    %494 = vector.extract_strided_slice %487 {offsets = [0, 32], sizes = [8, 32], strides = [1, 1]} : vector<8x64xf32> to vector<8x32xf32>
    %c120_184 = arith.constant 120 : index
    %c32_185 = arith.constant 32 : index
    %495 = vector.load %arg16[%c120_184, %c32_185] : memref<192x64xf32, #tpu.memory_space<vmem>>, vector<8x32xf32>
    tpu.vector_store %arg16[%c120_184, %c32_185], %494 {strides = array<i32>} : memref<192x64xf32, #tpu.memory_space<vmem>>, vector<8x32xf32>,
    %496 = arith.truncf %487 : vector<8x64xf32> to vector<8x64xbf16>
    %cst_186 = arith.constant dense<0.000000e+00> : vector<8x192xf32>
    %497 = tpu.matmul %496, %11, %cst_186 {dimension_numbers = #tpu.dot_dimension_numbers<[1], [0], [0], [1], [0, 0, 1, 1], [], []>} : vector<8x64xbf16>, vector<64x192xbf16>, vector<8x192xf32> -> vector<8x192xf32>
    %c128_187 = arith.constant 128 : index
    %c0_188 = arith.constant 0 : index
    %498 = vector.load %arg17[%c128_187, %c0_188] : memref<192x192xf32, #tpu.memory_space<vmem>>, vector<8x192xf32>
    %499 = vector.extract_strided_slice %498 {offsets = [0, 0], sizes = [8, 128], strides = [1, 1]} : vector<8x192xf32> to vector<8x128xf32>
    %500 = vector.extract_strided_slice %497 {offsets = [0, 0], sizes = [8, 128], strides = [1, 1]} : vector<8x192xf32> to vector<8x128xf32>
    %501 = arith.addf %499, %500 : vector<8x128xf32>
    %502 = arith.negf %501 : vector<8x128xf32>
    %503 = math.exp %502 : vector<8x128xf32>
    %cst_189 = arith.constant 1.000000e+00 : f32
    %504 = vector.broadcast %cst_189 : f32 to vector<8x128xf32>
    %505 = arith.addf %504, %503 : vector<8x128xf32>
    %506 = arith.divf %504, %505 : vector<8x128xf32>
    %507 = vector.extract_strided_slice %506 {offsets = [0, 0], sizes = [8, 64], strides = [1, 1]} : vector<8x128xf32> to vector<8x64xf32>
    %508 = vector.extract_strided_slice %506 {offsets = [0, 64], sizes = [8, 64], strides = [1, 1]} : vector<8x128xf32> to vector<8x64xf32>
    %509 = vector.extract_strided_slice %498 {offsets = [0, 128], sizes = [8, 64], strides = [1, 1]} : vector<8x192xf32> to vector<8x64xf32>
    %510 = vector.extract_strided_slice %497 {offsets = [0, 128], sizes = [8, 64], strides = [1, 1]} : vector<8x192xf32> to vector<8x64xf32>
    %511 = arith.addf %510, %14 : vector<8x64xf32>
    %512 = arith.mulf %507, %511 : vector<8x64xf32>
    %513 = arith.addf %509, %512 : vector<8x64xf32>
    %514 = math.tanh %513 : vector<8x64xf32>
    %515 = arith.subf %487, %514 : vector<8x64xf32>
    %516 = arith.mulf %508, %515 : vector<8x64xf32>
    %517 = arith.addf %514, %516 : vector<8x64xf32>
    %518 = vector.extract_strided_slice %517 {offsets = [0, 0], sizes = [8, 32], strides = [1, 1]} : vector<8x64xf32> to vector<8x32xf32>
    %c128_190 = arith.constant 128 : index
    %c0_191 = arith.constant 0 : index
    %519 = vector.load %arg15[%c128_190, %c0_191] : memref<192x64xf32, #tpu.memory_space<vmem>>, vector<8x32xf32>
    tpu.vector_store %arg15[%c128_190, %c0_191], %518 {strides = array<i32>} : memref<192x64xf32, #tpu.memory_space<vmem>>, vector<8x32xf32>,
    %520 = vector.extract_strided_slice %517 {offsets = [0, 32], sizes = [8, 32], strides = [1, 1]} : vector<8x64xf32> to vector<8x32xf32>
    %c56_192 = arith.constant 56 : index
    %c32_193 = arith.constant 32 : index
    %521 = vector.load %arg15[%c56_192, %c32_193] : memref<192x64xf32, #tpu.memory_space<vmem>>, vector<8x32xf32>
    tpu.vector_store %arg15[%c56_192, %c32_193], %520 {strides = array<i32>} : memref<192x64xf32, #tpu.memory_space<vmem>>, vector<8x32xf32>,
    %522 = vector.extract_strided_slice %517 {offsets = [0, 0], sizes = [8, 32], strides = [1, 1]} : vector<8x64xf32> to vector<8x32xf32>
    %c56_194 = arith.constant 56 : index
    %c0_195 = arith.constant 0 : index
    %523 = vector.load %arg16[%c56_194, %c0_195] : memref<192x64xf32, #tpu.memory_space<vmem>>, vector<8x32xf32>
    tpu.vector_store %arg16[%c56_194, %c0_195], %522 {strides = array<i32>} : memref<192x64xf32, #tpu.memory_space<vmem>>, vector<8x32xf32>,
    %524 = vector.extract_strided_slice %517 {offsets = [0, 32], sizes = [8, 32], strides = [1, 1]} : vector<8x64xf32> to vector<8x32xf32>
    %c128_196 = arith.constant 128 : index
    %c32_197 = arith.constant 32 : index
    %525 = vector.load %arg16[%c128_196, %c32_197] : memref<192x64xf32, #tpu.memory_space<vmem>>, vector<8x32xf32>
    tpu.vector_store %arg16[%c128_196, %c32_197], %524 {strides = array<i32>} : memref<192x64xf32, #tpu.memory_space<vmem>>, vector<8x32xf32>,
    %526 = arith.truncf %517 : vector<8x64xf32> to vector<8x64xbf16>
    %cst_198 = arith.constant dense<0.000000e+00> : vector<8x192xf32>
    %527 = tpu.matmul %526, %11, %cst_198 {dimension_numbers = #tpu.dot_dimension_numbers<[1], [0], [0], [1], [0, 0, 1, 1], [], []>} : vector<8x64xbf16>, vector<64x192xbf16>, vector<8x192xf32> -> vector<8x192xf32>
    %c136_199 = arith.constant 136 : index
    %c0_200 = arith.constant 0 : index
    %528 = vector.load %arg17[%c136_199, %c0_200] : memref<192x192xf32, #tpu.memory_space<vmem>>, vector<8x192xf32>
    %529 = vector.extract_strided_slice %528 {offsets = [0, 0], sizes = [8, 128], strides = [1, 1]} : vector<8x192xf32> to vector<8x128xf32>
    %530 = vector.extract_strided_slice %527 {offsets = [0, 0], sizes = [8, 128], strides = [1, 1]} : vector<8x192xf32> to vector<8x128xf32>
    %531 = arith.addf %529, %530 : vector<8x128xf32>
    %532 = arith.negf %531 : vector<8x128xf32>
    %533 = math.exp %532 : vector<8x128xf32>
    %cst_201 = arith.constant 1.000000e+00 : f32
    %534 = vector.broadcast %cst_201 : f32 to vector<8x128xf32>
    %535 = arith.addf %534, %533 : vector<8x128xf32>
    %536 = arith.divf %534, %535 : vector<8x128xf32>
    %537 = vector.extract_strided_slice %536 {offsets = [0, 0], sizes = [8, 64], strides = [1, 1]} : vector<8x128xf32> to vector<8x64xf32>
    %538 = vector.extract_strided_slice %536 {offsets = [0, 64], sizes = [8, 64], strides = [1, 1]} : vector<8x128xf32> to vector<8x64xf32>
    %539 = vector.extract_strided_slice %528 {offsets = [0, 128], sizes = [8, 64], strides = [1, 1]} : vector<8x192xf32> to vector<8x64xf32>
    %540 = vector.extract_strided_slice %527 {offsets = [0, 128], sizes = [8, 64], strides = [1, 1]} : vector<8x192xf32> to vector<8x64xf32>
    %541 = arith.addf %540, %14 : vector<8x64xf32>
    %542 = arith.mulf %537, %541 : vector<8x64xf32>
    %543 = arith.addf %539, %542 : vector<8x64xf32>
    %544 = math.tanh %543 : vector<8x64xf32>
    %545 = arith.subf %517, %544 : vector<8x64xf32>
    %546 = arith.mulf %538, %545 : vector<8x64xf32>
    %547 = arith.addf %544, %546 : vector<8x64xf32>
    %548 = vector.extract_strided_slice %547 {offsets = [0, 0], sizes = [8, 32], strides = [1, 1]} : vector<8x64xf32> to vector<8x32xf32>
    %c136_202 = arith.constant 136 : index
    %c0_203 = arith.constant 0 : index
    %549 = vector.load %arg15[%c136_202, %c0_203] : memref<192x64xf32, #tpu.memory_space<vmem>>, vector<8x32xf32>
    tpu.vector_store %arg15[%c136_202, %c0_203], %548 {strides = array<i32>} : memref<192x64xf32, #tpu.memory_space<vmem>>, vector<8x32xf32>,
    %550 = vector.extract_strided_slice %547 {offsets = [0, 32], sizes = [8, 32], strides = [1, 1]} : vector<8x64xf32> to vector<8x32xf32>
    %c48_204 = arith.constant 48 : index
    %c32_205 = arith.constant 32 : index
    %551 = vector.load %arg15[%c48_204, %c32_205] : memref<192x64xf32, #tpu.memory_space<vmem>>, vector<8x32xf32>
    tpu.vector_store %arg15[%c48_204, %c32_205], %550 {strides = array<i32>} : memref<192x64xf32, #tpu.memory_space<vmem>>, vector<8x32xf32>,
    %552 = vector.extract_strided_slice %547 {offsets = [0, 0], sizes = [8, 32], strides = [1, 1]} : vector<8x64xf32> to vector<8x32xf32>
    %c48_206 = arith.constant 48 : index
    %c0_207 = arith.constant 0 : index
    %553 = vector.load %arg16[%c48_206, %c0_207] : memref<192x64xf32, #tpu.memory_space<vmem>>, vector<8x32xf32>
    tpu.vector_store %arg16[%c48_206, %c0_207], %552 {strides = array<i32>} : memref<192x64xf32, #tpu.memory_space<vmem>>, vector<8x32xf32>,
    %554 = vector.extract_strided_slice %547 {offsets = [0, 32], sizes = [8, 32], strides = [1, 1]} : vector<8x64xf32> to vector<8x32xf32>
    %c136_208 = arith.constant 136 : index
    %c32_209 = arith.constant 32 : index
    %555 = vector.load %arg16[%c136_208, %c32_209] : memref<192x64xf32, #tpu.memory_space<vmem>>, vector<8x32xf32>
    tpu.vector_store %arg16[%c136_208, %c32_209], %554 {strides = array<i32>} : memref<192x64xf32, #tpu.memory_space<vmem>>, vector<8x32xf32>,
    %556 = arith.truncf %547 : vector<8x64xf32> to vector<8x64xbf16>
    %cst_210 = arith.constant dense<0.000000e+00> : vector<8x192xf32>
    %557 = tpu.matmul %556, %11, %cst_210 {dimension_numbers = #tpu.dot_dimension_numbers<[1], [0], [0], [1], [0, 0, 1, 1], [], []>} : vector<8x64xbf16>, vector<64x192xbf16>, vector<8x192xf32> -> vector<8x192xf32>
    %c144_211 = arith.constant 144 : index
    %c0_212 = arith.constant 0 : index
    %558 = vector.load %arg17[%c144_211, %c0_212] : memref<192x192xf32, #tpu.memory_space<vmem>>, vector<8x192xf32>
    %559 = vector.extract_strided_slice %558 {offsets = [0, 0], sizes = [8, 128], strides = [1, 1]} : vector<8x192xf32> to vector<8x128xf32>
    %560 = vector.extract_strided_slice %557 {offsets = [0, 0], sizes = [8, 128], strides = [1, 1]} : vector<8x192xf32> to vector<8x128xf32>
    %561 = arith.addf %559, %560 : vector<8x128xf32>
    %562 = arith.negf %561 : vector<8x128xf32>
    %563 = math.exp %562 : vector<8x128xf32>
    %cst_213 = arith.constant 1.000000e+00 : f32
    %564 = vector.broadcast %cst_213 : f32 to vector<8x128xf32>
    %565 = arith.addf %564, %563 : vector<8x128xf32>
    %566 = arith.divf %564, %565 : vector<8x128xf32>
    %567 = vector.extract_strided_slice %566 {offsets = [0, 0], sizes = [8, 64], strides = [1, 1]} : vector<8x128xf32> to vector<8x64xf32>
    %568 = vector.extract_strided_slice %566 {offsets = [0, 64], sizes = [8, 64], strides = [1, 1]} : vector<8x128xf32> to vector<8x64xf32>
    %569 = vector.extract_strided_slice %558 {offsets = [0, 128], sizes = [8, 64], strides = [1, 1]} : vector<8x192xf32> to vector<8x64xf32>
    %570 = vector.extract_strided_slice %557 {offsets = [0, 128], sizes = [8, 64], strides = [1, 1]} : vector<8x192xf32> to vector<8x64xf32>
    %571 = arith.addf %570, %14 : vector<8x64xf32>
    %572 = arith.mulf %567, %571 : vector<8x64xf32>
    %573 = arith.addf %569, %572 : vector<8x64xf32>
    %574 = math.tanh %573 : vector<8x64xf32>
    %575 = arith.subf %547, %574 : vector<8x64xf32>
    %576 = arith.mulf %568, %575 : vector<8x64xf32>
    %577 = arith.addf %574, %576 : vector<8x64xf32>
    %578 = vector.extract_strided_slice %577 {offsets = [0, 0], sizes = [8, 32], strides = [1, 1]} : vector<8x64xf32> to vector<8x32xf32>
    %c144_214 = arith.constant 144 : index
    %c0_215 = arith.constant 0 : index
    %579 = vector.load %arg15[%c144_214, %c0_215] : memref<192x64xf32, #tpu.memory_space<vmem>>, vector<8x32xf32>
    tpu.vector_store %arg15[%c144_214, %c0_215], %578 {strides = array<i32>} : memref<192x64xf32, #tpu.memory_space<vmem>>, vector<8x32xf32>,
    %580 = vector.extract_strided_slice %577 {offsets = [0, 32], sizes = [8, 32], strides = [1, 1]} : vector<8x64xf32> to vector<8x32xf32>
    %c40_216 = arith.constant 40 : index
    %c32_217 = arith.constant 32 : index
    %581 = vector.load %arg15[%c40_216, %c32_217] : memref<192x64xf32, #tpu.memory_space<vmem>>, vector<8x32xf32>
    tpu.vector_store %arg15[%c40_216, %c32_217], %580 {strides = array<i32>} : memref<192x64xf32, #tpu.memory_space<vmem>>, vector<8x32xf32>,
    %582 = vector.extract_strided_slice %577 {offsets = [0, 0], sizes = [8, 32], strides = [1, 1]} : vector<8x64xf32> to vector<8x32xf32>
    %c40_218 = arith.constant 40 : index
    %c0_219 = arith.constant 0 : index
    %583 = vector.load %arg16[%c40_218, %c0_219] : memref<192x64xf32, #tpu.memory_space<vmem>>, vector<8x32xf32>
    tpu.vector_store %arg16[%c40_218, %c0_219], %582 {strides = array<i32>} : memref<192x64xf32, #tpu.memory_space<vmem>>, vector<8x32xf32>,
    %584 = vector.extract_strided_slice %577 {offsets = [0, 32], sizes = [8, 32], strides = [1, 1]} : vector<8x64xf32> to vector<8x32xf32>
    %c144_220 = arith.constant 144 : index
    %c32_221 = arith.constant 32 : index
    %585 = vector.load %arg16[%c144_220, %c32_221] : memref<192x64xf32, #tpu.memory_space<vmem>>, vector<8x32xf32>
    tpu.vector_store %arg16[%c144_220, %c32_221], %584 {strides = array<i32>} : memref<192x64xf32, #tpu.memory_space<vmem>>, vector<8x32xf32>,
    %586 = arith.truncf %577 : vector<8x64xf32> to vector<8x64xbf16>
    %cst_222 = arith.constant dense<0.000000e+00> : vector<8x192xf32>
    %587 = tpu.matmul %586, %11, %cst_222 {dimension_numbers = #tpu.dot_dimension_numbers<[1], [0], [0], [1], [0, 0, 1, 1], [], []>} : vector<8x64xbf16>, vector<64x192xbf16>, vector<8x192xf32> -> vector<8x192xf32>
    %c152_223 = arith.constant 152 : index
    %c0_224 = arith.constant 0 : index
    %588 = vector.load %arg17[%c152_223, %c0_224] : memref<192x192xf32, #tpu.memory_space<vmem>>, vector<8x192xf32>
    %589 = vector.extract_strided_slice %588 {offsets = [0, 0], sizes = [8, 128], strides = [1, 1]} : vector<8x192xf32> to vector<8x128xf32>
    %590 = vector.extract_strided_slice %587 {offsets = [0, 0], sizes = [8, 128], strides = [1, 1]} : vector<8x192xf32> to vector<8x128xf32>
    %591 = arith.addf %589, %590 : vector<8x128xf32>
    %592 = arith.negf %591 : vector<8x128xf32>
    %593 = math.exp %592 : vector<8x128xf32>
    %cst_225 = arith.constant 1.000000e+00 : f32
    %594 = vector.broadcast %cst_225 : f32 to vector<8x128xf32>
    %595 = arith.addf %594, %593 : vector<8x128xf32>
    %596 = arith.divf %594, %595 : vector<8x128xf32>
    %597 = vector.extract_strided_slice %596 {offsets = [0, 0], sizes = [8, 64], strides = [1, 1]} : vector<8x128xf32> to vector<8x64xf32>
    %598 = vector.extract_strided_slice %596 {offsets = [0, 64], sizes = [8, 64], strides = [1, 1]} : vector<8x128xf32> to vector<8x64xf32>
    %599 = vector.extract_strided_slice %588 {offsets = [0, 128], sizes = [8, 64], strides = [1, 1]} : vector<8x192xf32> to vector<8x64xf32>
    %600 = vector.extract_strided_slice %587 {offsets = [0, 128], sizes = [8, 64], strides = [1, 1]} : vector<8x192xf32> to vector<8x64xf32>
    %601 = arith.addf %600, %14 : vector<8x64xf32>
    %602 = arith.mulf %597, %601 : vector<8x64xf32>
    %603 = arith.addf %599, %602 : vector<8x64xf32>
    %604 = math.tanh %603 : vector<8x64xf32>
    %605 = arith.subf %577, %604 : vector<8x64xf32>
    %606 = arith.mulf %598, %605 : vector<8x64xf32>
    %607 = arith.addf %604, %606 : vector<8x64xf32>
    %608 = vector.extract_strided_slice %607 {offsets = [0, 0], sizes = [8, 32], strides = [1, 1]} : vector<8x64xf32> to vector<8x32xf32>
    %c152_226 = arith.constant 152 : index
    %c0_227 = arith.constant 0 : index
    %609 = vector.load %arg15[%c152_226, %c0_227] : memref<192x64xf32, #tpu.memory_space<vmem>>, vector<8x32xf32>
    tpu.vector_store %arg15[%c152_226, %c0_227], %608 {strides = array<i32>} : memref<192x64xf32, #tpu.memory_space<vmem>>, vector<8x32xf32>,
    %610 = vector.extract_strided_slice %607 {offsets = [0, 32], sizes = [8, 32], strides = [1, 1]} : vector<8x64xf32> to vector<8x32xf32>
    %c32_228 = arith.constant 32 : index
    %c32_229 = arith.constant 32 : index
    %611 = vector.load %arg15[%c32_228, %c32_229] : memref<192x64xf32, #tpu.memory_space<vmem>>, vector<8x32xf32>
    tpu.vector_store %arg15[%c32_228, %c32_229], %610 {strides = array<i32>} : memref<192x64xf32, #tpu.memory_space<vmem>>, vector<8x32xf32>,
    %612 = vector.extract_strided_slice %607 {offsets = [0, 0], sizes = [8, 32], strides = [1, 1]} : vector<8x64xf32> to vector<8x32xf32>
    %c32_230 = arith.constant 32 : index
    %c0_231 = arith.constant 0 : index
    %613 = vector.load %arg16[%c32_230, %c0_231] : memref<192x64xf32, #tpu.memory_space<vmem>>, vector<8x32xf32>
    tpu.vector_store %arg16[%c32_230, %c0_231], %612 {strides = array<i32>} : memref<192x64xf32, #tpu.memory_space<vmem>>, vector<8x32xf32>,
    %614 = vector.extract_strided_slice %607 {offsets = [0, 32], sizes = [8, 32], strides = [1, 1]} : vector<8x64xf32> to vector<8x32xf32>
    %c152_232 = arith.constant 152 : index
    %c32_233 = arith.constant 32 : index
    %615 = vector.load %arg16[%c152_232, %c32_233] : memref<192x64xf32, #tpu.memory_space<vmem>>, vector<8x32xf32>
    tpu.vector_store %arg16[%c152_232, %c32_233], %614 {strides = array<i32>} : memref<192x64xf32, #tpu.memory_space<vmem>>, vector<8x32xf32>,
    %616 = arith.truncf %607 : vector<8x64xf32> to vector<8x64xbf16>
    %cst_234 = arith.constant dense<0.000000e+00> : vector<8x192xf32>
    %617 = tpu.matmul %616, %11, %cst_234 {dimension_numbers = #tpu.dot_dimension_numbers<[1], [0], [0], [1], [0, 0, 1, 1], [], []>} : vector<8x64xbf16>, vector<64x192xbf16>, vector<8x192xf32> -> vector<8x192xf32>
    %c160_235 = arith.constant 160 : index
    %c0_236 = arith.constant 0 : index
    %618 = vector.load %arg17[%c160_235, %c0_236] : memref<192x192xf32, #tpu.memory_space<vmem>>, vector<8x192xf32>
    %619 = vector.extract_strided_slice %618 {offsets = [0, 0], sizes = [8, 128], strides = [1, 1]} : vector<8x192xf32> to vector<8x128xf32>
    %620 = vector.extract_strided_slice %617 {offsets = [0, 0], sizes = [8, 128], strides = [1, 1]} : vector<8x192xf32> to vector<8x128xf32>
    %621 = arith.addf %619, %620 : vector<8x128xf32>
    %622 = arith.negf %621 : vector<8x128xf32>
    %623 = math.exp %622 : vector<8x128xf32>
    %cst_237 = arith.constant 1.000000e+00 : f32
    %624 = vector.broadcast %cst_237 : f32 to vector<8x128xf32>
    %625 = arith.addf %624, %623 : vector<8x128xf32>
    %626 = arith.divf %624, %625 : vector<8x128xf32>
    %627 = vector.extract_strided_slice %626 {offsets = [0, 0], sizes = [8, 64], strides = [1, 1]} : vector<8x128xf32> to vector<8x64xf32>
    %628 = vector.extract_strided_slice %626 {offsets = [0, 64], sizes = [8, 64], strides = [1, 1]} : vector<8x128xf32> to vector<8x64xf32>
    %629 = vector.extract_strided_slice %618 {offsets = [0, 128], sizes = [8, 64], strides = [1, 1]} : vector<8x192xf32> to vector<8x64xf32>
    %630 = vector.extract_strided_slice %617 {offsets = [0, 128], sizes = [8, 64], strides = [1, 1]} : vector<8x192xf32> to vector<8x64xf32>
    %631 = arith.addf %630, %14 : vector<8x64xf32>
    %632 = arith.mulf %627, %631 : vector<8x64xf32>
    %633 = arith.addf %629, %632 : vector<8x64xf32>
    %634 = math.tanh %633 : vector<8x64xf32>
    %635 = arith.subf %607, %634 : vector<8x64xf32>
    %636 = arith.mulf %628, %635 : vector<8x64xf32>
    %637 = arith.addf %634, %636 : vector<8x64xf32>
    %638 = vector.extract_strided_slice %637 {offsets = [0, 0], sizes = [8, 32], strides = [1, 1]} : vector<8x64xf32> to vector<8x32xf32>
    %c160_238 = arith.constant 160 : index
    %c0_239 = arith.constant 0 : index
    %639 = vector.load %arg15[%c160_238, %c0_239] : memref<192x64xf32, #tpu.memory_space<vmem>>, vector<8x32xf32>
    tpu.vector_store %arg15[%c160_238, %c0_239], %638 {strides = array<i32>} : memref<192x64xf32, #tpu.memory_space<vmem>>, vector<8x32xf32>,
    %640 = vector.extract_strided_slice %637 {offsets = [0, 32], sizes = [8, 32], strides = [1, 1]} : vector<8x64xf32> to vector<8x32xf32>
    %c24_240 = arith.constant 24 : index
    %c32_241 = arith.constant 32 : index
    %641 = vector.load %arg15[%c24_240, %c32_241] : memref<192x64xf32, #tpu.memory_space<vmem>>, vector<8x32xf32>
    tpu.vector_store %arg15[%c24_240, %c32_241], %640 {strides = array<i32>} : memref<192x64xf32, #tpu.memory_space<vmem>>, vector<8x32xf32>,
    %642 = vector.extract_strided_slice %637 {offsets = [0, 0], sizes = [8, 32], strides = [1, 1]} : vector<8x64xf32> to vector<8x32xf32>
    %c24_242 = arith.constant 24 : index
    %c0_243 = arith.constant 0 : index
    %643 = vector.load %arg16[%c24_242, %c0_243] : memref<192x64xf32, #tpu.memory_space<vmem>>, vector<8x32xf32>
    tpu.vector_store %arg16[%c24_242, %c0_243], %642 {strides = array<i32>} : memref<192x64xf32, #tpu.memory_space<vmem>>, vector<8x32xf32>,
    %644 = vector.extract_strided_slice %637 {offsets = [0, 32], sizes = [8, 32], strides = [1, 1]} : vector<8x64xf32> to vector<8x32xf32>
    %c160_244 = arith.constant 160 : index
    %c32_245 = arith.constant 32 : index
    %645 = vector.load %arg16[%c160_244, %c32_245] : memref<192x64xf32, #tpu.memory_space<vmem>>, vector<8x32xf32>
    tpu.vector_store %arg16[%c160_244, %c32_245], %644 {strides = array<i32>} : memref<192x64xf32, #tpu.memory_space<vmem>>, vector<8x32xf32>,
    %646 = arith.truncf %637 : vector<8x64xf32> to vector<8x64xbf16>
    %cst_246 = arith.constant dense<0.000000e+00> : vector<8x192xf32>
    %647 = tpu.matmul %646, %11, %cst_246 {dimension_numbers = #tpu.dot_dimension_numbers<[1], [0], [0], [1], [0, 0, 1, 1], [], []>} : vector<8x64xbf16>, vector<64x192xbf16>, vector<8x192xf32> -> vector<8x192xf32>
    %c168_247 = arith.constant 168 : index
    %c0_248 = arith.constant 0 : index
    %648 = vector.load %arg17[%c168_247, %c0_248] : memref<192x192xf32, #tpu.memory_space<vmem>>, vector<8x192xf32>
    %649 = vector.extract_strided_slice %648 {offsets = [0, 0], sizes = [8, 128], strides = [1, 1]} : vector<8x192xf32> to vector<8x128xf32>
    %650 = vector.extract_strided_slice %647 {offsets = [0, 0], sizes = [8, 128], strides = [1, 1]} : vector<8x192xf32> to vector<8x128xf32>
    %651 = arith.addf %649, %650 : vector<8x128xf32>
    %652 = arith.negf %651 : vector<8x128xf32>
    %653 = math.exp %652 : vector<8x128xf32>
    %cst_249 = arith.constant 1.000000e+00 : f32
    %654 = vector.broadcast %cst_249 : f32 to vector<8x128xf32>
    %655 = arith.addf %654, %653 : vector<8x128xf32>
    %656 = arith.divf %654, %655 : vector<8x128xf32>
    %657 = vector.extract_strided_slice %656 {offsets = [0, 0], sizes = [8, 64], strides = [1, 1]} : vector<8x128xf32> to vector<8x64xf32>
    %658 = vector.extract_strided_slice %656 {offsets = [0, 64], sizes = [8, 64], strides = [1, 1]} : vector<8x128xf32> to vector<8x64xf32>
    %659 = vector.extract_strided_slice %648 {offsets = [0, 128], sizes = [8, 64], strides = [1, 1]} : vector<8x192xf32> to vector<8x64xf32>
    %660 = vector.extract_strided_slice %647 {offsets = [0, 128], sizes = [8, 64], strides = [1, 1]} : vector<8x192xf32> to vector<8x64xf32>
    %661 = arith.addf %660, %14 : vector<8x64xf32>
    %662 = arith.mulf %657, %661 : vector<8x64xf32>
    %663 = arith.addf %659, %662 : vector<8x64xf32>
    %664 = math.tanh %663 : vector<8x64xf32>
    %665 = arith.subf %637, %664 : vector<8x64xf32>
    %666 = arith.mulf %658, %665 : vector<8x64xf32>
    %667 = arith.addf %664, %666 : vector<8x64xf32>
    %668 = vector.extract_strided_slice %667 {offsets = [0, 0], sizes = [8, 32], strides = [1, 1]} : vector<8x64xf32> to vector<8x32xf32>
    %c168_250 = arith.constant 168 : index
    %c0_251 = arith.constant 0 : index
    %669 = vector.load %arg15[%c168_250, %c0_251] : memref<192x64xf32, #tpu.memory_space<vmem>>, vector<8x32xf32>
    tpu.vector_store %arg15[%c168_250, %c0_251], %668 {strides = array<i32>} : memref<192x64xf32, #tpu.memory_space<vmem>>, vector<8x32xf32>,
    %670 = vector.extract_strided_slice %667 {offsets = [0, 32], sizes = [8, 32], strides = [1, 1]} : vector<8x64xf32> to vector<8x32xf32>
    %c16_252 = arith.constant 16 : index
    %c32_253 = arith.constant 32 : index
    %671 = vector.load %arg15[%c16_252, %c32_253] : memref<192x64xf32, #tpu.memory_space<vmem>>, vector<8x32xf32>
    tpu.vector_store %arg15[%c16_252, %c32_253], %670 {strides = array<i32>} : memref<192x64xf32, #tpu.memory_space<vmem>>, vector<8x32xf32>,
    %672 = vector.extract_strided_slice %667 {offsets = [0, 0], sizes = [8, 32], strides = [1, 1]} : vector<8x64xf32> to vector<8x32xf32>
    %c16_254 = arith.constant 16 : index
    %c0_255 = arith.constant 0 : index
    %673 = vector.load %arg16[%c16_254, %c0_255] : memref<192x64xf32, #tpu.memory_space<vmem>>, vector<8x32xf32>
    tpu.vector_store %arg16[%c16_254, %c0_255], %672 {strides = array<i32>} : memref<192x64xf32, #tpu.memory_space<vmem>>, vector<8x32xf32>,
    %674 = vector.extract_strided_slice %667 {offsets = [0, 32], sizes = [8, 32], strides = [1, 1]} : vector<8x64xf32> to vector<8x32xf32>
    %c168_256 = arith.constant 168 : index
    %c32_257 = arith.constant 32 : index
    %675 = vector.load %arg16[%c168_256, %c32_257] : memref<192x64xf32, #tpu.memory_space<vmem>>, vector<8x32xf32>
    tpu.vector_store %arg16[%c168_256, %c32_257], %674 {strides = array<i32>} : memref<192x64xf32, #tpu.memory_space<vmem>>, vector<8x32xf32>,
    %676 = arith.truncf %667 : vector<8x64xf32> to vector<8x64xbf16>
    %cst_258 = arith.constant dense<0.000000e+00> : vector<8x192xf32>
    %677 = tpu.matmul %676, %11, %cst_258 {dimension_numbers = #tpu.dot_dimension_numbers<[1], [0], [0], [1], [0, 0, 1, 1], [], []>} : vector<8x64xbf16>, vector<64x192xbf16>, vector<8x192xf32> -> vector<8x192xf32>
    %c176_259 = arith.constant 176 : index
    %c0_260 = arith.constant 0 : index
    %678 = vector.load %arg17[%c176_259, %c0_260] : memref<192x192xf32, #tpu.memory_space<vmem>>, vector<8x192xf32>
    %679 = vector.extract_strided_slice %678 {offsets = [0, 0], sizes = [8, 128], strides = [1, 1]} : vector<8x192xf32> to vector<8x128xf32>
    %680 = vector.extract_strided_slice %677 {offsets = [0, 0], sizes = [8, 128], strides = [1, 1]} : vector<8x192xf32> to vector<8x128xf32>
    %681 = arith.addf %679, %680 : vector<8x128xf32>
    %682 = arith.negf %681 : vector<8x128xf32>
    %683 = math.exp %682 : vector<8x128xf32>
    %cst_261 = arith.constant 1.000000e+00 : f32
    %684 = vector.broadcast %cst_261 : f32 to vector<8x128xf32>
    %685 = arith.addf %684, %683 : vector<8x128xf32>
    %686 = arith.divf %684, %685 : vector<8x128xf32>
    %687 = vector.extract_strided_slice %686 {offsets = [0, 0], sizes = [8, 64], strides = [1, 1]} : vector<8x128xf32> to vector<8x64xf32>
    %688 = vector.extract_strided_slice %686 {offsets = [0, 64], sizes = [8, 64], strides = [1, 1]} : vector<8x128xf32> to vector<8x64xf32>
    %689 = vector.extract_strided_slice %678 {offsets = [0, 128], sizes = [8, 64], strides = [1, 1]} : vector<8x192xf32> to vector<8x64xf32>
    %690 = vector.extract_strided_slice %677 {offsets = [0, 128], sizes = [8, 64], strides = [1, 1]} : vector<8x192xf32> to vector<8x64xf32>
    %691 = arith.addf %690, %14 : vector<8x64xf32>
    %692 = arith.mulf %687, %691 : vector<8x64xf32>
    %693 = arith.addf %689, %692 : vector<8x64xf32>
    %694 = math.tanh %693 : vector<8x64xf32>
    %695 = arith.subf %667, %694 : vector<8x64xf32>
    %696 = arith.mulf %688, %695 : vector<8x64xf32>
    %697 = arith.addf %694, %696 : vector<8x64xf32>
    %698 = vector.extract_strided_slice %697 {offsets = [0, 0], sizes = [8, 32], strides = [1, 1]} : vector<8x64xf32> to vector<8x32xf32>
    %c176_262 = arith.constant 176 : index
    %c0_263 = arith.constant 0 : index
    %699 = vector.load %arg15[%c176_262, %c0_263] : memref<192x64xf32, #tpu.memory_space<vmem>>, vector<8x32xf32>
    tpu.vector_store %arg15[%c176_262, %c0_263], %698 {strides = array<i32>} : memref<192x64xf32, #tpu.memory_space<vmem>>, vector<8x32xf32>,
    %700 = vector.extract_strided_slice %697 {offsets = [0, 32], sizes = [8, 32], strides = [1, 1]} : vector<8x64xf32> to vector<8x32xf32>
    %c8_264 = arith.constant 8 : index
    %c32_265 = arith.constant 32 : index
    %701 = vector.load %arg15[%c8_264, %c32_265] : memref<192x64xf32, #tpu.memory_space<vmem>>, vector<8x32xf32>
    tpu.vector_store %arg15[%c8_264, %c32_265], %700 {strides = array<i32>} : memref<192x64xf32, #tpu.memory_space<vmem>>, vector<8x32xf32>,
    %702 = vector.extract_strided_slice %697 {offsets = [0, 0], sizes = [8, 32], strides = [1, 1]} : vector<8x64xf32> to vector<8x32xf32>
    %c8_266 = arith.constant 8 : index
    %c0_267 = arith.constant 0 : index
    %703 = vector.load %arg16[%c8_266, %c0_267] : memref<192x64xf32, #tpu.memory_space<vmem>>, vector<8x32xf32>
    tpu.vector_store %arg16[%c8_266, %c0_267], %702 {strides = array<i32>} : memref<192x64xf32, #tpu.memory_space<vmem>>, vector<8x32xf32>,
    %704 = vector.extract_strided_slice %697 {offsets = [0, 32], sizes = [8, 32], strides = [1, 1]} : vector<8x64xf32> to vector<8x32xf32>
    %c176_268 = arith.constant 176 : index
    %c32_269 = arith.constant 32 : index
    %705 = vector.load %arg16[%c176_268, %c32_269] : memref<192x64xf32, #tpu.memory_space<vmem>>, vector<8x32xf32>
    tpu.vector_store %arg16[%c176_268, %c32_269], %704 {strides = array<i32>} : memref<192x64xf32, #tpu.memory_space<vmem>>, vector<8x32xf32>,
    %706 = arith.truncf %697 : vector<8x64xf32> to vector<8x64xbf16>
    %cst_270 = arith.constant dense<0.000000e+00> : vector<8x192xf32>
    %707 = tpu.matmul %706, %11, %cst_270 {dimension_numbers = #tpu.dot_dimension_numbers<[1], [0], [0], [1], [0, 0, 1, 1], [], []>} : vector<8x64xbf16>, vector<64x192xbf16>, vector<8x192xf32> -> vector<8x192xf32>
    %c184_271 = arith.constant 184 : index
    %c0_272 = arith.constant 0 : index
    %708 = vector.load %arg17[%c184_271, %c0_272] : memref<192x192xf32, #tpu.memory_space<vmem>>, vector<8x192xf32>
    %709 = vector.extract_strided_slice %708 {offsets = [0, 0], sizes = [8, 128], strides = [1, 1]} : vector<8x192xf32> to vector<8x128xf32>
    %710 = vector.extract_strided_slice %707 {offsets = [0, 0], sizes = [8, 128], strides = [1, 1]} : vector<8x192xf32> to vector<8x128xf32>
    %711 = arith.addf %709, %710 : vector<8x128xf32>
    %712 = arith.negf %711 : vector<8x128xf32>
    %713 = math.exp %712 : vector<8x128xf32>
    %cst_273 = arith.constant 1.000000e+00 : f32
    %714 = vector.broadcast %cst_273 : f32 to vector<8x128xf32>
    %715 = arith.addf %714, %713 : vector<8x128xf32>
    %716 = arith.divf %714, %715 : vector<8x128xf32>
    %717 = vector.extract_strided_slice %716 {offsets = [0, 0], sizes = [8, 64], strides = [1, 1]} : vector<8x128xf32> to vector<8x64xf32>
    %718 = vector.extract_strided_slice %716 {offsets = [0, 64], sizes = [8, 64], strides = [1, 1]} : vector<8x128xf32> to vector<8x64xf32>
    %719 = vector.extract_strided_slice %708 {offsets = [0, 128], sizes = [8, 64], strides = [1, 1]} : vector<8x192xf32> to vector<8x64xf32>
    %720 = vector.extract_strided_slice %707 {offsets = [0, 128], sizes = [8, 64], strides = [1, 1]} : vector<8x192xf32> to vector<8x64xf32>
    %721 = arith.addf %720, %14 : vector<8x64xf32>
    %722 = arith.mulf %717, %721 : vector<8x64xf32>
    %723 = arith.addf %719, %722 : vector<8x64xf32>
    %724 = math.tanh %723 : vector<8x64xf32>
    %725 = arith.subf %697, %724 : vector<8x64xf32>
    %726 = arith.mulf %718, %725 : vector<8x64xf32>
    %727 = arith.addf %724, %726 : vector<8x64xf32>
    %728 = vector.extract_strided_slice %727 {offsets = [0, 0], sizes = [8, 32], strides = [1, 1]} : vector<8x64xf32> to vector<8x32xf32>
    %c184_274 = arith.constant 184 : index
    %c0_275 = arith.constant 0 : index
    %729 = vector.load %arg15[%c184_274, %c0_275] : memref<192x64xf32, #tpu.memory_space<vmem>>, vector<8x32xf32>
    tpu.vector_store %arg15[%c184_274, %c0_275], %728 {strides = array<i32>} : memref<192x64xf32, #tpu.memory_space<vmem>>, vector<8x32xf32>,
    %730 = vector.extract_strided_slice %727 {offsets = [0, 32], sizes = [8, 32], strides = [1, 1]} : vector<8x64xf32> to vector<8x32xf32>
    %c0_276 = arith.constant 0 : index
    %c32_277 = arith.constant 32 : index
    %731 = vector.load %arg15[%c0_276, %c32_277] : memref<192x64xf32, #tpu.memory_space<vmem>>, vector<8x32xf32>
    tpu.vector_store %arg15[%c0_276, %c32_277], %730 {strides = array<i32>} : memref<192x64xf32, #tpu.memory_space<vmem>>, vector<8x32xf32>,
    %732 = vector.extract_strided_slice %727 {offsets = [0, 0], sizes = [8, 32], strides = [1, 1]} : vector<8x64xf32> to vector<8x32xf32>
    %c0_278 = arith.constant 0 : index
    %c0_279 = arith.constant 0 : index
    %733 = vector.load %arg16[%c0_278, %c0_279] : memref<192x64xf32, #tpu.memory_space<vmem>>, vector<8x32xf32>
    tpu.vector_store %arg16[%c0_278, %c0_279], %732 {strides = array<i32>} : memref<192x64xf32, #tpu.memory_space<vmem>>, vector<8x32xf32>,
    %734 = vector.extract_strided_slice %727 {offsets = [0, 32], sizes = [8, 32], strides = [1, 1]} : vector<8x64xf32> to vector<8x32xf32>
    %c184_280 = arith.constant 184 : index
    %c32_281 = arith.constant 32 : index
    %735 = vector.load %arg16[%c184_280, %c32_281] : memref<192x64xf32, #tpu.memory_space<vmem>>, vector<8x32xf32>
    tpu.vector_store %arg16[%c184_280, %c32_281], %734 {strides = array<i32>} : memref<192x64xf32, #tpu.memory_space<vmem>>, vector<8x32xf32>,
    %c0_282 = arith.constant 0 : index
    %c0_283 = arith.constant 0 : index
    %736 = vector.load %arg15[%c0_282, %c0_283] : memref<192x64xf32, #tpu.memory_space<vmem>>, vector<192x64xf32>
    %737 = arith.truncf %736 : vector<192x64xf32> to vector<192x64xbf16>
    %c0_284 = arith.constant 0 : index
    %c0_285 = arith.constant 0 : index
    %738 = vector.load %arg16[%c0_284, %c0_285] : memref<192x64xf32, #tpu.memory_space<vmem>>, vector<192x64xf32>
    %739 = arith.truncf %738 : vector<192x64xf32> to vector<192x64xbf16>
    %c0_286 = arith.constant 0 : index
    %c0_287 = arith.constant 0 : index
    %740 = vector.load %arg7[%c0_286, %c0_287] : memref<64x192xbf16, #tpu.memory_space<vmem>>, vector<64x192xbf16>
    %cst_288 = arith.constant dense<0.000000e+00> : vector<192x192xf32>
    %741 = tpu.matmul %737, %740, %cst_288 {dimension_numbers = #tpu.dot_dimension_numbers<[1], [0], [0], [1], [0, 0, 1, 1], [], []>} : vector<192x64xbf16>, vector<64x192xbf16>, vector<192x192xf32> -> vector<192x192xf32>
    %c0_289 = arith.constant 0 : index
    %c0_290 = arith.constant 0 : index
    %742 = vector.load %arg8[%c0_289, %c0_290] : memref<64x192xbf16, #tpu.memory_space<vmem>>, vector<64x192xbf16>
    %cst_291 = arith.constant dense<0.000000e+00> : vector<192x192xf32>
    %743 = tpu.matmul %739, %742, %cst_291 {dimension_numbers = #tpu.dot_dimension_numbers<[1], [0], [0], [1], [0, 0, 1, 1], [], []>} : vector<192x64xbf16>, vector<64x192xbf16>, vector<192x192xf32> -> vector<192x192xf32>
    %744 = arith.addf %741, %743 : vector<192x192xf32>
    %c0_292 = arith.constant 0 : index
    %c0_293 = arith.constant 0 : index
    %745 = vector.load %arg9[%c0_292, %c0_293] : memref<1x192xf32, #tpu.memory_space<vmem>>, vector<1x192xf32>
    %746 = vector.broadcast %745 : vector<1x192xf32> to vector<192x192xf32>
    %747 = arith.addf %744, %746 : vector<192x192xf32>
    %c0_294 = arith.constant 0 : index
    %c0_295 = arith.constant 0 : index
    %748 = vector.load %arg17[%c0_294, %c0_295] : memref<192x192xf32, #tpu.memory_space<vmem>>, vector<192x192xf32>
    tpu.vector_store %arg17[%c0_294, %c0_295], %747 {strides = array<i32>} : memref<192x192xf32, #tpu.memory_space<vmem>>, vector<192x192xf32>,
    %c0_296 = arith.constant 0 : index
    %c0_297 = arith.constant 0 : index
    %749 = vector.load %arg10[%c0_296, %c0_297] : memref<64x192xbf16, #tpu.memory_space<vmem>>, vector<64x192xbf16>
    %c0_298 = arith.constant 0 : index
    %c0_299 = arith.constant 0 : index
    %750 = vector.load %arg11[%c0_298, %c0_299] : memref<1x64xf32, #tpu.memory_space<vmem>>, vector<1x64xf32>
    %751 = vector.shape_cast %750 : vector<1x64xf32> to vector<1x64xf32>
    %752 = vector.broadcast %751 : vector<1x64xf32> to vector<8x64xf32>
    %cst_300 = arith.constant 0.000000e+00 : f32
    %753 = vector.broadcast %cst_300 : f32 to vector<8x64xf32>
    %754 = arith.truncf %753 : vector<8x64xf32> to vector<8x64xbf16>
    %cst_301 = arith.constant dense<0.000000e+00> : vector<8x192xf32>
    %755 = tpu.matmul %754, %749, %cst_301 {dimension_numbers = #tpu.dot_dimension_numbers<[1], [0], [0], [1], [0, 0, 1, 1], [], []>} : vector<8x64xbf16>, vector<64x192xbf16>, vector<8x192xf32> -> vector<8x192xf32>
    %c0_302 = arith.constant 0 : index
    %c0_303 = arith.constant 0 : index
    %756 = vector.load %arg17[%c0_302, %c0_303] : memref<192x192xf32, #tpu.memory_space<vmem>>, vector<8x192xf32>
    %757 = vector.extract_strided_slice %756 {offsets = [0, 0], sizes = [8, 128], strides = [1, 1]} : vector<8x192xf32> to vector<8x128xf32>
    %758 = vector.extract_strided_slice %755 {offsets = [0, 0], sizes = [8, 128], strides = [1, 1]} : vector<8x192xf32> to vector<8x128xf32>
    %759 = arith.addf %757, %758 : vector<8x128xf32>
    %760 = arith.negf %759 : vector<8x128xf32>
    %761 = math.exp %760 : vector<8x128xf32>
    %cst_304 = arith.constant 1.000000e+00 : f32
    %762 = vector.broadcast %cst_304 : f32 to vector<8x128xf32>
    %763 = arith.addf %762, %761 : vector<8x128xf32>
    %764 = arith.divf %762, %763 : vector<8x128xf32>
    %765 = vector.extract_strided_slice %764 {offsets = [0, 0], sizes = [8, 64], strides = [1, 1]} : vector<8x128xf32> to vector<8x64xf32>
    %766 = vector.extract_strided_slice %764 {offsets = [0, 64], sizes = [8, 64], strides = [1, 1]} : vector<8x128xf32> to vector<8x64xf32>
    %767 = vector.extract_strided_slice %756 {offsets = [0, 128], sizes = [8, 64], strides = [1, 1]} : vector<8x192xf32> to vector<8x64xf32>
    %768 = vector.extract_strided_slice %755 {offsets = [0, 128], sizes = [8, 64], strides = [1, 1]} : vector<8x192xf32> to vector<8x64xf32>
    %769 = arith.addf %768, %752 : vector<8x64xf32>
    %770 = arith.mulf %765, %769 : vector<8x64xf32>
    %771 = arith.addf %767, %770 : vector<8x64xf32>
    %772 = math.tanh %771 : vector<8x64xf32>
    %773 = arith.subf %753, %772 : vector<8x64xf32>
    %774 = arith.mulf %766, %773 : vector<8x64xf32>
    %775 = arith.addf %772, %774 : vector<8x64xf32>
    %776 = vector.extract_strided_slice %775 {offsets = [0, 0], sizes = [8, 32], strides = [1, 1]} : vector<8x64xf32> to vector<8x32xf32>
    %c0_305 = arith.constant 0 : index
    %c0_306 = arith.constant 0 : index
    %777 = vector.load %arg15[%c0_305, %c0_306] : memref<192x64xf32, #tpu.memory_space<vmem>>, vector<8x32xf32>
    tpu.vector_store %arg15[%c0_305, %c0_306], %776 {strides = array<i32>} : memref<192x64xf32, #tpu.memory_space<vmem>>, vector<8x32xf32>,
    %778 = vector.extract_strided_slice %775 {offsets = [0, 32], sizes = [8, 32], strides = [1, 1]} : vector<8x64xf32> to vector<8x32xf32>
    %c184_307 = arith.constant 184 : index
    %c32_308 = arith.constant 32 : index
    %779 = vector.load %arg15[%c184_307, %c32_308] : memref<192x64xf32, #tpu.memory_space<vmem>>, vector<8x32xf32>
    tpu.vector_store %arg15[%c184_307, %c32_308], %778 {strides = array<i32>} : memref<192x64xf32, #tpu.memory_space<vmem>>, vector<8x32xf32>,
    %780 = arith.truncf %775 : vector<8x64xf32> to vector<8x64xbf16>
    %cst_309 = arith.constant dense<0.000000e+00> : vector<8x192xf32>
    %781 = tpu.matmul %780, %749, %cst_309 {dimension_numbers = #tpu.dot_dimension_numbers<[1], [0], [0], [1], [0, 0, 1, 1], [], []>} : vector<8x64xbf16>, vector<64x192xbf16>, vector<8x192xf32> -> vector<8x192xf32>
    %c8_310 = arith.constant 8 : index
    %c0_311 = arith.constant 0 : index
    %782 = vector.load %arg17[%c8_310, %c0_311] : memref<192x192xf32, #tpu.memory_space<vmem>>, vector<8x192xf32>
    %783 = vector.extract_strided_slice %782 {offsets = [0, 0], sizes = [8, 128], strides = [1, 1]} : vector<8x192xf32> to vector<8x128xf32>
    %784 = vector.extract_strided_slice %781 {offsets = [0, 0], sizes = [8, 128], strides = [1, 1]} : vector<8x192xf32> to vector<8x128xf32>
    %785 = arith.addf %783, %784 : vector<8x128xf32>
    %786 = arith.negf %785 : vector<8x128xf32>
    %787 = math.exp %786 : vector<8x128xf32>
    %cst_312 = arith.constant 1.000000e+00 : f32
    %788 = vector.broadcast %cst_312 : f32 to vector<8x128xf32>
    %789 = arith.addf %788, %787 : vector<8x128xf32>
    %790 = arith.divf %788, %789 : vector<8x128xf32>
    %791 = vector.extract_strided_slice %790 {offsets = [0, 0], sizes = [8, 64], strides = [1, 1]} : vector<8x128xf32> to vector<8x64xf32>
    %792 = vector.extract_strided_slice %790 {offsets = [0, 64], sizes = [8, 64], strides = [1, 1]} : vector<8x128xf32> to vector<8x64xf32>
    %793 = vector.extract_strided_slice %782 {offsets = [0, 128], sizes = [8, 64], strides = [1, 1]} : vector<8x192xf32> to vector<8x64xf32>
    %794 = vector.extract_strided_slice %781 {offsets = [0, 128], sizes = [8, 64], strides = [1, 1]} : vector<8x192xf32> to vector<8x64xf32>
    %795 = arith.addf %794, %752 : vector<8x64xf32>
    %796 = arith.mulf %791, %795 : vector<8x64xf32>
    %797 = arith.addf %793, %796 : vector<8x64xf32>
    %798 = math.tanh %797 : vector<8x64xf32>
    %799 = arith.subf %775, %798 : vector<8x64xf32>
    %800 = arith.mulf %792, %799 : vector<8x64xf32>
    %801 = arith.addf %798, %800 : vector<8x64xf32>
    %802 = vector.extract_strided_slice %801 {offsets = [0, 0], sizes = [8, 32], strides = [1, 1]} : vector<8x64xf32> to vector<8x32xf32>
    %c8_313 = arith.constant 8 : index
    %c0_314 = arith.constant 0 : index
    %803 = vector.load %arg15[%c8_313, %c0_314] : memref<192x64xf32, #tpu.memory_space<vmem>>, vector<8x32xf32>
    tpu.vector_store %arg15[%c8_313, %c0_314], %802 {strides = array<i32>} : memref<192x64xf32, #tpu.memory_space<vmem>>, vector<8x32xf32>,
    %804 = vector.extract_strided_slice %801 {offsets = [0, 32], sizes = [8, 32], strides = [1, 1]} : vector<8x64xf32> to vector<8x32xf32>
    %c176_315 = arith.constant 176 : index
    %c32_316 = arith.constant 32 : index
    %805 = vector.load %arg15[%c176_315, %c32_316] : memref<192x64xf32, #tpu.memory_space<vmem>>, vector<8x32xf32>
    tpu.vector_store %arg15[%c176_315, %c32_316], %804 {strides = array<i32>} : memref<192x64xf32, #tpu.memory_space<vmem>>, vector<8x32xf32>,
    %806 = arith.truncf %801 : vector<8x64xf32> to vector<8x64xbf16>
    %cst_317 = arith.constant dense<0.000000e+00> : vector<8x192xf32>
    %807 = tpu.matmul %806, %749, %cst_317 {dimension_numbers = #tpu.dot_dimension_numbers<[1], [0], [0], [1], [0, 0, 1, 1], [], []>} : vector<8x64xbf16>, vector<64x192xbf16>, vector<8x192xf32> -> vector<8x192xf32>
    %c16_318 = arith.constant 16 : index
    %c0_319 = arith.constant 0 : index
    %808 = vector.load %arg17[%c16_318, %c0_319] : memref<192x192xf32, #tpu.memory_space<vmem>>, vector<8x192xf32>
    %809 = vector.extract_strided_slice %808 {offsets = [0, 0], sizes = [8, 128], strides = [1, 1]} : vector<8x192xf32> to vector<8x128xf32>
    %810 = vector.extract_strided_slice %807 {offsets = [0, 0], sizes = [8, 128], strides = [1, 1]} : vector<8x192xf32> to vector<8x128xf32>
    %811 = arith.addf %809, %810 : vector<8x128xf32>
    %812 = arith.negf %811 : vector<8x128xf32>
    %813 = math.exp %812 : vector<8x128xf32>
    %cst_320 = arith.constant 1.000000e+00 : f32
    %814 = vector.broadcast %cst_320 : f32 to vector<8x128xf32>
    %815 = arith.addf %814, %813 : vector<8x128xf32>
    %816 = arith.divf %814, %815 : vector<8x128xf32>
    %817 = vector.extract_strided_slice %816 {offsets = [0, 0], sizes = [8, 64], strides = [1, 1]} : vector<8x128xf32> to vector<8x64xf32>
    %818 = vector.extract_strided_slice %816 {offsets = [0, 64], sizes = [8, 64], strides = [1, 1]} : vector<8x128xf32> to vector<8x64xf32>
    %819 = vector.extract_strided_slice %808 {offsets = [0, 128], sizes = [8, 64], strides = [1, 1]} : vector<8x192xf32> to vector<8x64xf32>
    %820 = vector.extract_strided_slice %807 {offsets = [0, 128], sizes = [8, 64], strides = [1, 1]} : vector<8x192xf32> to vector<8x64xf32>
    %821 = arith.addf %820, %752 : vector<8x64xf32>
    %822 = arith.mulf %817, %821 : vector<8x64xf32>
    %823 = arith.addf %819, %822 : vector<8x64xf32>
    %824 = math.tanh %823 : vector<8x64xf32>
    %825 = arith.subf %801, %824 : vector<8x64xf32>
    %826 = arith.mulf %818, %825 : vector<8x64xf32>
    %827 = arith.addf %824, %826 : vector<8x64xf32>
    %828 = vector.extract_strided_slice %827 {offsets = [0, 0], sizes = [8, 32], strides = [1, 1]} : vector<8x64xf32> to vector<8x32xf32>
    %c16_321 = arith.constant 16 : index
    %c0_322 = arith.constant 0 : index
    %829 = vector.load %arg15[%c16_321, %c0_322] : memref<192x64xf32, #tpu.memory_space<vmem>>, vector<8x32xf32>
    tpu.vector_store %arg15[%c16_321, %c0_322], %828 {strides = array<i32>} : memref<192x64xf32, #tpu.memory_space<vmem>>, vector<8x32xf32>,
    %830 = vector.extract_strided_slice %827 {offsets = [0, 32], sizes = [8, 32], strides = [1, 1]} : vector<8x64xf32> to vector<8x32xf32>
    %c168_323 = arith.constant 168 : index
    %c32_324 = arith.constant 32 : index
    %831 = vector.load %arg15[%c168_323, %c32_324] : memref<192x64xf32, #tpu.memory_space<vmem>>, vector<8x32xf32>
    tpu.vector_store %arg15[%c168_323, %c32_324], %830 {strides = array<i32>} : memref<192x64xf32, #tpu.memory_space<vmem>>, vector<8x32xf32>,
    %832 = arith.truncf %827 : vector<8x64xf32> to vector<8x64xbf16>
    %cst_325 = arith.constant dense<0.000000e+00> : vector<8x192xf32>
    %833 = tpu.matmul %832, %749, %cst_325 {dimension_numbers = #tpu.dot_dimension_numbers<[1], [0], [0], [1], [0, 0, 1, 1], [], []>} : vector<8x64xbf16>, vector<64x192xbf16>, vector<8x192xf32> -> vector<8x192xf32>
    %c24_326 = arith.constant 24 : index
    %c0_327 = arith.constant 0 : index
    %834 = vector.load %arg17[%c24_326, %c0_327] : memref<192x192xf32, #tpu.memory_space<vmem>>, vector<8x192xf32>
    %835 = vector.extract_strided_slice %834 {offsets = [0, 0], sizes = [8, 128], strides = [1, 1]} : vector<8x192xf32> to vector<8x128xf32>
    %836 = vector.extract_strided_slice %833 {offsets = [0, 0], sizes = [8, 128], strides = [1, 1]} : vector<8x192xf32> to vector<8x128xf32>
    %837 = arith.addf %835, %836 : vector<8x128xf32>
    %838 = arith.negf %837 : vector<8x128xf32>
    %839 = math.exp %838 : vector<8x128xf32>
    %cst_328 = arith.constant 1.000000e+00 : f32
    %840 = vector.broadcast %cst_328 : f32 to vector<8x128xf32>
    %841 = arith.addf %840, %839 : vector<8x128xf32>
    %842 = arith.divf %840, %841 : vector<8x128xf32>
    %843 = vector.extract_strided_slice %842 {offsets = [0, 0], sizes = [8, 64], strides = [1, 1]} : vector<8x128xf32> to vector<8x64xf32>
    %844 = vector.extract_strided_slice %842 {offsets = [0, 64], sizes = [8, 64], strides = [1, 1]} : vector<8x128xf32> to vector<8x64xf32>
    %845 = vector.extract_strided_slice %834 {offsets = [0, 128], sizes = [8, 64], strides = [1, 1]} : vector<8x192xf32> to vector<8x64xf32>
    %846 = vector.extract_strided_slice %833 {offsets = [0, 128], sizes = [8, 64], strides = [1, 1]} : vector<8x192xf32> to vector<8x64xf32>
    %847 = arith.addf %846, %752 : vector<8x64xf32>
    %848 = arith.mulf %843, %847 : vector<8x64xf32>
    %849 = arith.addf %845, %848 : vector<8x64xf32>
    %850 = math.tanh %849 : vector<8x64xf32>
    %851 = arith.subf %827, %850 : vector<8x64xf32>
    %852 = arith.mulf %844, %851 : vector<8x64xf32>
    %853 = arith.addf %850, %852 : vector<8x64xf32>
    %854 = vector.extract_strided_slice %853 {offsets = [0, 0], sizes = [8, 32], strides = [1, 1]} : vector<8x64xf32> to vector<8x32xf32>
    %c24_329 = arith.constant 24 : index
    %c0_330 = arith.constant 0 : index
    %855 = vector.load %arg15[%c24_329, %c0_330] : memref<192x64xf32, #tpu.memory_space<vmem>>, vector<8x32xf32>
    tpu.vector_store %arg15[%c24_329, %c0_330], %854 {strides = array<i32>} : memref<192x64xf32, #tpu.memory_space<vmem>>, vector<8x32xf32>,
    %856 = vector.extract_strided_slice %853 {offsets = [0, 32], sizes = [8, 32], strides = [1, 1]} : vector<8x64xf32> to vector<8x32xf32>
    %c160_331 = arith.constant 160 : index
    %c32_332 = arith.constant 32 : index
    %857 = vector.load %arg15[%c160_331, %c32_332] : memref<192x64xf32, #tpu.memory_space<vmem>>, vector<8x32xf32>
    tpu.vector_store %arg15[%c160_331, %c32_332], %856 {strides = array<i32>} : memref<192x64xf32, #tpu.memory_space<vmem>>, vector<8x32xf32>,
    %858 = arith.truncf %853 : vector<8x64xf32> to vector<8x64xbf16>
    %cst_333 = arith.constant dense<0.000000e+00> : vector<8x192xf32>
    %859 = tpu.matmul %858, %749, %cst_333 {dimension_numbers = #tpu.dot_dimension_numbers<[1], [0], [0], [1], [0, 0, 1, 1], [], []>} : vector<8x64xbf16>, vector<64x192xbf16>, vector<8x192xf32> -> vector<8x192xf32>
    %c32_334 = arith.constant 32 : index
    %c0_335 = arith.constant 0 : index
    %860 = vector.load %arg17[%c32_334, %c0_335] : memref<192x192xf32, #tpu.memory_space<vmem>>, vector<8x192xf32>
    %861 = vector.extract_strided_slice %860 {offsets = [0, 0], sizes = [8, 128], strides = [1, 1]} : vector<8x192xf32> to vector<8x128xf32>
    %862 = vector.extract_strided_slice %859 {offsets = [0, 0], sizes = [8, 128], strides = [1, 1]} : vector<8x192xf32> to vector<8x128xf32>
    %863 = arith.addf %861, %862 : vector<8x128xf32>
    %864 = arith.negf %863 : vector<8x128xf32>
    %865 = math.exp %864 : vector<8x128xf32>
    %cst_336 = arith.constant 1.000000e+00 : f32
    %866 = vector.broadcast %cst_336 : f32 to vector<8x128xf32>
    %867 = arith.addf %866, %865 : vector<8x128xf32>
    %868 = arith.divf %866, %867 : vector<8x128xf32>
    %869 = vector.extract_strided_slice %868 {offsets = [0, 0], sizes = [8, 64], strides = [1, 1]} : vector<8x128xf32> to vector<8x64xf32>
    %870 = vector.extract_strided_slice %868 {offsets = [0, 64], sizes = [8, 64], strides = [1, 1]} : vector<8x128xf32> to vector<8x64xf32>
    %871 = vector.extract_strided_slice %860 {offsets = [0, 128], sizes = [8, 64], strides = [1, 1]} : vector<8x192xf32> to vector<8x64xf32>
    %872 = vector.extract_strided_slice %859 {offsets = [0, 128], sizes = [8, 64], strides = [1, 1]} : vector<8x192xf32> to vector<8x64xf32>
    %873 = arith.addf %872, %752 : vector<8x64xf32>
    %874 = arith.mulf %869, %873 : vector<8x64xf32>
    %875 = arith.addf %871, %874 : vector<8x64xf32>
    %876 = math.tanh %875 : vector<8x64xf32>
    %877 = arith.subf %853, %876 : vector<8x64xf32>
    %878 = arith.mulf %870, %877 : vector<8x64xf32>
    %879 = arith.addf %876, %878 : vector<8x64xf32>
    %880 = vector.extract_strided_slice %879 {offsets = [0, 0], sizes = [8, 32], strides = [1, 1]} : vector<8x64xf32> to vector<8x32xf32>
    %c32_337 = arith.constant 32 : index
    %c0_338 = arith.constant 0 : index
    %881 = vector.load %arg15[%c32_337, %c0_338] : memref<192x64xf32, #tpu.memory_space<vmem>>, vector<8x32xf32>
    tpu.vector_store %arg15[%c32_337, %c0_338], %880 {strides = array<i32>} : memref<192x64xf32, #tpu.memory_space<vmem>>, vector<8x32xf32>,
    %882 = vector.extract_strided_slice %879 {offsets = [0, 32], sizes = [8, 32], strides = [1, 1]} : vector<8x64xf32> to vector<8x32xf32>
    %c152_339 = arith.constant 152 : index
    %c32_340 = arith.constant 32 : index
    %883 = vector.load %arg15[%c152_339, %c32_340] : memref<192x64xf32, #tpu.memory_space<vmem>>, vector<8x32xf32>
    tpu.vector_store %arg15[%c152_339, %c32_340], %882 {strides = array<i32>} : memref<192x64xf32, #tpu.memory_space<vmem>>, vector<8x32xf32>,
    %884 = arith.truncf %879 : vector<8x64xf32> to vector<8x64xbf16>
    %cst_341 = arith.constant dense<0.000000e+00> : vector<8x192xf32>
    %885 = tpu.matmul %884, %749, %cst_341 {dimension_numbers = #tpu.dot_dimension_numbers<[1], [0], [0], [1], [0, 0, 1, 1], [], []>} : vector<8x64xbf16>, vector<64x192xbf16>, vector<8x192xf32> -> vector<8x192xf32>
    %c40_342 = arith.constant 40 : index
    %c0_343 = arith.constant 0 : index
    %886 = vector.load %arg17[%c40_342, %c0_343] : memref<192x192xf32, #tpu.memory_space<vmem>>, vector<8x192xf32>
    %887 = vector.extract_strided_slice %886 {offsets = [0, 0], sizes = [8, 128], strides = [1, 1]} : vector<8x192xf32> to vector<8x128xf32>
    %888 = vector.extract_strided_slice %885 {offsets = [0, 0], sizes = [8, 128], strides = [1, 1]} : vector<8x192xf32> to vector<8x128xf32>
    %889 = arith.addf %887, %888 : vector<8x128xf32>
    %890 = arith.negf %889 : vector<8x128xf32>
    %891 = math.exp %890 : vector<8x128xf32>
    %cst_344 = arith.constant 1.000000e+00 : f32
    %892 = vector.broadcast %cst_344 : f32 to vector<8x128xf32>
    %893 = arith.addf %892, %891 : vector<8x128xf32>
    %894 = arith.divf %892, %893 : vector<8x128xf32>
    %895 = vector.extract_strided_slice %894 {offsets = [0, 0], sizes = [8, 64], strides = [1, 1]} : vector<8x128xf32> to vector<8x64xf32>
    %896 = vector.extract_strided_slice %894 {offsets = [0, 64], sizes = [8, 64], strides = [1, 1]} : vector<8x128xf32> to vector<8x64xf32>
    %897 = vector.extract_strided_slice %886 {offsets = [0, 128], sizes = [8, 64], strides = [1, 1]} : vector<8x192xf32> to vector<8x64xf32>
    %898 = vector.extract_strided_slice %885 {offsets = [0, 128], sizes = [8, 64], strides = [1, 1]} : vector<8x192xf32> to vector<8x64xf32>
    %899 = arith.addf %898, %752 : vector<8x64xf32>
    %900 = arith.mulf %895, %899 : vector<8x64xf32>
    %901 = arith.addf %897, %900 : vector<8x64xf32>
    %902 = math.tanh %901 : vector<8x64xf32>
    %903 = arith.subf %879, %902 : vector<8x64xf32>
    %904 = arith.mulf %896, %903 : vector<8x64xf32>
    %905 = arith.addf %902, %904 : vector<8x64xf32>
    %906 = vector.extract_strided_slice %905 {offsets = [0, 0], sizes = [8, 32], strides = [1, 1]} : vector<8x64xf32> to vector<8x32xf32>
    %c40_345 = arith.constant 40 : index
    %c0_346 = arith.constant 0 : index
    %907 = vector.load %arg15[%c40_345, %c0_346] : memref<192x64xf32, #tpu.memory_space<vmem>>, vector<8x32xf32>
    tpu.vector_store %arg15[%c40_345, %c0_346], %906 {strides = array<i32>} : memref<192x64xf32, #tpu.memory_space<vmem>>, vector<8x32xf32>,
    %908 = vector.extract_strided_slice %905 {offsets = [0, 32], sizes = [8, 32], strides = [1, 1]} : vector<8x64xf32> to vector<8x32xf32>
    %c144_347 = arith.constant 144 : index
    %c32_348 = arith.constant 32 : index
    %909 = vector.load %arg15[%c144_347, %c32_348] : memref<192x64xf32, #tpu.memory_space<vmem>>, vector<8x32xf32>
    tpu.vector_store %arg15[%c144_347, %c32_348], %908 {strides = array<i32>} : memref<192x64xf32, #tpu.memory_space<vmem>>, vector<8x32xf32>,
    %910 = arith.truncf %905 : vector<8x64xf32> to vector<8x64xbf16>
    %cst_349 = arith.constant dense<0.000000e+00> : vector<8x192xf32>
    %911 = tpu.matmul %910, %749, %cst_349 {dimension_numbers = #tpu.dot_dimension_numbers<[1], [0], [0], [1], [0, 0, 1, 1], [], []>} : vector<8x64xbf16>, vector<64x192xbf16>, vector<8x192xf32> -> vector<8x192xf32>
    %c48_350 = arith.constant 48 : index
    %c0_351 = arith.constant 0 : index
    %912 = vector.load %arg17[%c48_350, %c0_351] : memref<192x192xf32, #tpu.memory_space<vmem>>, vector<8x192xf32>
    %913 = vector.extract_strided_slice %912 {offsets = [0, 0], sizes = [8, 128], strides = [1, 1]} : vector<8x192xf32> to vector<8x128xf32>
    %914 = vector.extract_strided_slice %911 {offsets = [0, 0], sizes = [8, 128], strides = [1, 1]} : vector<8x192xf32> to vector<8x128xf32>
    %915 = arith.addf %913, %914 : vector<8x128xf32>
    %916 = arith.negf %915 : vector<8x128xf32>
    %917 = math.exp %916 : vector<8x128xf32>
    %cst_352 = arith.constant 1.000000e+00 : f32
    %918 = vector.broadcast %cst_352 : f32 to vector<8x128xf32>
    %919 = arith.addf %918, %917 : vector<8x128xf32>
    %920 = arith.divf %918, %919 : vector<8x128xf32>
    %921 = vector.extract_strided_slice %920 {offsets = [0, 0], sizes = [8, 64], strides = [1, 1]} : vector<8x128xf32> to vector<8x64xf32>
    %922 = vector.extract_strided_slice %920 {offsets = [0, 64], sizes = [8, 64], strides = [1, 1]} : vector<8x128xf32> to vector<8x64xf32>
    %923 = vector.extract_strided_slice %912 {offsets = [0, 128], sizes = [8, 64], strides = [1, 1]} : vector<8x192xf32> to vector<8x64xf32>
    %924 = vector.extract_strided_slice %911 {offsets = [0, 128], sizes = [8, 64], strides = [1, 1]} : vector<8x192xf32> to vector<8x64xf32>
    %925 = arith.addf %924, %752 : vector<8x64xf32>
    %926 = arith.mulf %921, %925 : vector<8x64xf32>
    %927 = arith.addf %923, %926 : vector<8x64xf32>
    %928 = math.tanh %927 : vector<8x64xf32>
    %929 = arith.subf %905, %928 : vector<8x64xf32>
    %930 = arith.mulf %922, %929 : vector<8x64xf32>
    %931 = arith.addf %928, %930 : vector<8x64xf32>
    %932 = vector.extract_strided_slice %931 {offsets = [0, 0], sizes = [8, 32], strides = [1, 1]} : vector<8x64xf32> to vector<8x32xf32>
    %c48_353 = arith.constant 48 : index
    %c0_354 = arith.constant 0 : index
    %933 = vector.load %arg15[%c48_353, %c0_354] : memref<192x64xf32, #tpu.memory_space<vmem>>, vector<8x32xf32>
    tpu.vector_store %arg15[%c48_353, %c0_354], %932 {strides = array<i32>} : memref<192x64xf32, #tpu.memory_space<vmem>>, vector<8x32xf32>,
    %934 = vector.extract_strided_slice %931 {offsets = [0, 32], sizes = [8, 32], strides = [1, 1]} : vector<8x64xf32> to vector<8x32xf32>
    %c136_355 = arith.constant 136 : index
    %c32_356 = arith.constant 32 : index
    %935 = vector.load %arg15[%c136_355, %c32_356] : memref<192x64xf32, #tpu.memory_space<vmem>>, vector<8x32xf32>
    tpu.vector_store %arg15[%c136_355, %c32_356], %934 {strides = array<i32>} : memref<192x64xf32, #tpu.memory_space<vmem>>, vector<8x32xf32>,
    %936 = arith.truncf %931 : vector<8x64xf32> to vector<8x64xbf16>
    %cst_357 = arith.constant dense<0.000000e+00> : vector<8x192xf32>
    %937 = tpu.matmul %936, %749, %cst_357 {dimension_numbers = #tpu.dot_dimension_numbers<[1], [0], [0], [1], [0, 0, 1, 1], [], []>} : vector<8x64xbf16>, vector<64x192xbf16>, vector<8x192xf32> -> vector<8x192xf32>
    %c56_358 = arith.constant 56 : index
    %c0_359 = arith.constant 0 : index
    %938 = vector.load %arg17[%c56_358, %c0_359] : memref<192x192xf32, #tpu.memory_space<vmem>>, vector<8x192xf32>
    %939 = vector.extract_strided_slice %938 {offsets = [0, 0], sizes = [8, 128], strides = [1, 1]} : vector<8x192xf32> to vector<8x128xf32>
    %940 = vector.extract_strided_slice %937 {offsets = [0, 0], sizes = [8, 128], strides = [1, 1]} : vector<8x192xf32> to vector<8x128xf32>
    %941 = arith.addf %939, %940 : vector<8x128xf32>
    %942 = arith.negf %941 : vector<8x128xf32>
    %943 = math.exp %942 : vector<8x128xf32>
    %cst_360 = arith.constant 1.000000e+00 : f32
    %944 = vector.broadcast %cst_360 : f32 to vector<8x128xf32>
    %945 = arith.addf %944, %943 : vector<8x128xf32>
    %946 = arith.divf %944, %945 : vector<8x128xf32>
    %947 = vector.extract_strided_slice %946 {offsets = [0, 0], sizes = [8, 64], strides = [1, 1]} : vector<8x128xf32> to vector<8x64xf32>
    %948 = vector.extract_strided_slice %946 {offsets = [0, 64], sizes = [8, 64], strides = [1, 1]} : vector<8x128xf32> to vector<8x64xf32>
    %949 = vector.extract_strided_slice %938 {offsets = [0, 128], sizes = [8, 64], strides = [1, 1]} : vector<8x192xf32> to vector<8x64xf32>
    %950 = vector.extract_strided_slice %937 {offsets = [0, 128], sizes = [8, 64], strides = [1, 1]} : vector<8x192xf32> to vector<8x64xf32>
    %951 = arith.addf %950, %752 : vector<8x64xf32>
    %952 = arith.mulf %947, %951 : vector<8x64xf32>
    %953 = arith.addf %949, %952 : vector<8x64xf32>
    %954 = math.tanh %953 : vector<8x64xf32>
    %955 = arith.subf %931, %954 : vector<8x64xf32>
    %956 = arith.mulf %948, %955 : vector<8x64xf32>
    %957 = arith.addf %954, %956 : vector<8x64xf32>
    %958 = vector.extract_strided_slice %957 {offsets = [0, 0], sizes = [8, 32], strides = [1, 1]} : vector<8x64xf32> to vector<8x32xf32>
    %c56_361 = arith.constant 56 : index
    %c0_362 = arith.constant 0 : index
    %959 = vector.load %arg15[%c56_361, %c0_362] : memref<192x64xf32, #tpu.memory_space<vmem>>, vector<8x32xf32>
    tpu.vector_store %arg15[%c56_361, %c0_362], %958 {strides = array<i32>} : memref<192x64xf32, #tpu.memory_space<vmem>>, vector<8x32xf32>,
    %960 = vector.extract_strided_slice %957 {offsets = [0, 32], sizes = [8, 32], strides = [1, 1]} : vector<8x64xf32> to vector<8x32xf32>
    %c128_363 = arith.constant 128 : index
    %c32_364 = arith.constant 32 : index
    %961 = vector.load %arg15[%c128_363, %c32_364] : memref<192x64xf32, #tpu.memory_space<vmem>>, vector<8x32xf32>
    tpu.vector_store %arg15[%c128_363, %c32_364], %960 {strides = array<i32>} : memref<192x64xf32, #tpu.memory_space<vmem>>, vector<8x32xf32>,
    %962 = arith.truncf %957 : vector<8x64xf32> to vector<8x64xbf16>
    %cst_365 = arith.constant dense<0.000000e+00> : vector<8x192xf32>
    %963 = tpu.matmul %962, %749, %cst_365 {dimension_numbers = #tpu.dot_dimension_numbers<[1], [0], [0], [1], [0, 0, 1, 1], [], []>} : vector<8x64xbf16>, vector<64x192xbf16>, vector<8x192xf32> -> vector<8x192xf32>
    %c64_366 = arith.constant 64 : index
    %c0_367 = arith.constant 0 : index
    %964 = vector.load %arg17[%c64_366, %c0_367] : memref<192x192xf32, #tpu.memory_space<vmem>>, vector<8x192xf32>
    %965 = vector.extract_strided_slice %964 {offsets = [0, 0], sizes = [8, 128], strides = [1, 1]} : vector<8x192xf32> to vector<8x128xf32>
    %966 = vector.extract_strided_slice %963 {offsets = [0, 0], sizes = [8, 128], strides = [1, 1]} : vector<8x192xf32> to vector<8x128xf32>
    %967 = arith.addf %965, %966 : vector<8x128xf32>
    %968 = arith.negf %967 : vector<8x128xf32>
    %969 = math.exp %968 : vector<8x128xf32>
    %cst_368 = arith.constant 1.000000e+00 : f32
    %970 = vector.broadcast %cst_368 : f32 to vector<8x128xf32>
    %971 = arith.addf %970, %969 : vector<8x128xf32>
    %972 = arith.divf %970, %971 : vector<8x128xf32>
    %973 = vector.extract_strided_slice %972 {offsets = [0, 0], sizes = [8, 64], strides = [1, 1]} : vector<8x128xf32> to vector<8x64xf32>
    %974 = vector.extract_strided_slice %972 {offsets = [0, 64], sizes = [8, 64], strides = [1, 1]} : vector<8x128xf32> to vector<8x64xf32>
    %975 = vector.extract_strided_slice %964 {offsets = [0, 128], sizes = [8, 64], strides = [1, 1]} : vector<8x192xf32> to vector<8x64xf32>
    %976 = vector.extract_strided_slice %963 {offsets = [0, 128], sizes = [8, 64], strides = [1, 1]} : vector<8x192xf32> to vector<8x64xf32>
    %977 = arith.addf %976, %752 : vector<8x64xf32>
    %978 = arith.mulf %973, %977 : vector<8x64xf32>
    %979 = arith.addf %975, %978 : vector<8x64xf32>
    %980 = math.tanh %979 : vector<8x64xf32>
    %981 = arith.subf %957, %980 : vector<8x64xf32>
    %982 = arith.mulf %974, %981 : vector<8x64xf32>
    %983 = arith.addf %980, %982 : vector<8x64xf32>
    %984 = vector.extract_strided_slice %983 {offsets = [0, 0], sizes = [8, 32], strides = [1, 1]} : vector<8x64xf32> to vector<8x32xf32>
    %c64_369 = arith.constant 64 : index
    %c0_370 = arith.constant 0 : index
    %985 = vector.load %arg15[%c64_369, %c0_370] : memref<192x64xf32, #tpu.memory_space<vmem>>, vector<8x32xf32>
    tpu.vector_store %arg15[%c64_369, %c0_370], %984 {strides = array<i32>} : memref<192x64xf32, #tpu.memory_space<vmem>>, vector<8x32xf32>,
    %986 = vector.extract_strided_slice %983 {offsets = [0, 32], sizes = [8, 32], strides = [1, 1]} : vector<8x64xf32> to vector<8x32xf32>
    %c120_371 = arith.constant 120 : index
    %c32_372 = arith.constant 32 : index
    %987 = vector.load %arg15[%c120_371, %c32_372] : memref<192x64xf32, #tpu.memory_space<vmem>>, vector<8x32xf32>
    tpu.vector_store %arg15[%c120_371, %c32_372], %986 {strides = array<i32>} : memref<192x64xf32, #tpu.memory_space<vmem>>, vector<8x32xf32>,
    %988 = arith.truncf %983 : vector<8x64xf32> to vector<8x64xbf16>
    %cst_373 = arith.constant dense<0.000000e+00> : vector<8x192xf32>
    %989 = tpu.matmul %988, %749, %cst_373 {dimension_numbers = #tpu.dot_dimension_numbers<[1], [0], [0], [1], [0, 0, 1, 1], [], []>} : vector<8x64xbf16>, vector<64x192xbf16>, vector<8x192xf32> -> vector<8x192xf32>
    %c72_374 = arith.constant 72 : index
    %c0_375 = arith.constant 0 : index
    %990 = vector.load %arg17[%c72_374, %c0_375] : memref<192x192xf32, #tpu.memory_space<vmem>>, vector<8x192xf32>
    %991 = vector.extract_strided_slice %990 {offsets = [0, 0], sizes = [8, 128], strides = [1, 1]} : vector<8x192xf32> to vector<8x128xf32>
    %992 = vector.extract_strided_slice %989 {offsets = [0, 0], sizes = [8, 128], strides = [1, 1]} : vector<8x192xf32> to vector<8x128xf32>
    %993 = arith.addf %991, %992 : vector<8x128xf32>
    %994 = arith.negf %993 : vector<8x128xf32>
    %995 = math.exp %994 : vector<8x128xf32>
    %cst_376 = arith.constant 1.000000e+00 : f32
    %996 = vector.broadcast %cst_376 : f32 to vector<8x128xf32>
    %997 = arith.addf %996, %995 : vector<8x128xf32>
    %998 = arith.divf %996, %997 : vector<8x128xf32>
    %999 = vector.extract_strided_slice %998 {offsets = [0, 0], sizes = [8, 64], strides = [1, 1]} : vector<8x128xf32> to vector<8x64xf32>
    %1000 = vector.extract_strided_slice %998 {offsets = [0, 64], sizes = [8, 64], strides = [1, 1]} : vector<8x128xf32> to vector<8x64xf32>
    %1001 = vector.extract_strided_slice %990 {offsets = [0, 128], sizes = [8, 64], strides = [1, 1]} : vector<8x192xf32> to vector<8x64xf32>
    %1002 = vector.extract_strided_slice %989 {offsets = [0, 128], sizes = [8, 64], strides = [1, 1]} : vector<8x192xf32> to vector<8x64xf32>
    %1003 = arith.addf %1002, %752 : vector<8x64xf32>
    %1004 = arith.mulf %999, %1003 : vector<8x64xf32>
    %1005 = arith.addf %1001, %1004 : vector<8x64xf32>
    %1006 = math.tanh %1005 : vector<8x64xf32>
    %1007 = arith.subf %983, %1006 : vector<8x64xf32>
    %1008 = arith.mulf %1000, %1007 : vector<8x64xf32>
    %1009 = arith.addf %1006, %1008 : vector<8x64xf32>
    %1010 = vector.extract_strided_slice %1009 {offsets = [0, 0], sizes = [8, 32], strides = [1, 1]} : vector<8x64xf32> to vector<8x32xf32>
    %c72_377 = arith.constant 72 : index
    %c0_378 = arith.constant 0 : index
    %1011 = vector.load %arg15[%c72_377, %c0_378] : memref<192x64xf32, #tpu.memory_space<vmem>>, vector<8x32xf32>
    tpu.vector_store %arg15[%c72_377, %c0_378], %1010 {strides = array<i32>} : memref<192x64xf32, #tpu.memory_space<vmem>>, vector<8x32xf32>,
    %1012 = vector.extract_strided_slice %1009 {offsets = [0, 32], sizes = [8, 32], strides = [1, 1]} : vector<8x64xf32> to vector<8x32xf32>
    %c112_379 = arith.constant 112 : index
    %c32_380 = arith.constant 32 : index
    %1013 = vector.load %arg15[%c112_379, %c32_380] : memref<192x64xf32, #tpu.memory_space<vmem>>, vector<8x32xf32>
    tpu.vector_store %arg15[%c112_379, %c32_380], %1012 {strides = array<i32>} : memref<192x64xf32, #tpu.memory_space<vmem>>, vector<8x32xf32>,
    %1014 = arith.truncf %1009 : vector<8x64xf32> to vector<8x64xbf16>
    %cst_381 = arith.constant dense<0.000000e+00> : vector<8x192xf32>
    %1015 = tpu.matmul %1014, %749, %cst_381 {dimension_numbers = #tpu.dot_dimension_numbers<[1], [0], [0], [1], [0, 0, 1, 1], [], []>} : vector<8x64xbf16>, vector<64x192xbf16>, vector<8x192xf32> -> vector<8x192xf32>
    %c80_382 = arith.constant 80 : index
    %c0_383 = arith.constant 0 : index
    %1016 = vector.load %arg17[%c80_382, %c0_383] : memref<192x192xf32, #tpu.memory_space<vmem>>, vector<8x192xf32>
    %1017 = vector.extract_strided_slice %1016 {offsets = [0, 0], sizes = [8, 128], strides = [1, 1]} : vector<8x192xf32> to vector<8x128xf32>
    %1018 = vector.extract_strided_slice %1015 {offsets = [0, 0], sizes = [8, 128], strides = [1, 1]} : vector<8x192xf32> to vector<8x128xf32>
    %1019 = arith.addf %1017, %1018 : vector<8x128xf32>
    %1020 = arith.negf %1019 : vector<8x128xf32>
    %1021 = math.exp %1020 : vector<8x128xf32>
    %cst_384 = arith.constant 1.000000e+00 : f32
    %1022 = vector.broadcast %cst_384 : f32 to vector<8x128xf32>
    %1023 = arith.addf %1022, %1021 : vector<8x128xf32>
    %1024 = arith.divf %1022, %1023 : vector<8x128xf32>
    %1025 = vector.extract_strided_slice %1024 {offsets = [0, 0], sizes = [8, 64], strides = [1, 1]} : vector<8x128xf32> to vector<8x64xf32>
    %1026 = vector.extract_strided_slice %1024 {offsets = [0, 64], sizes = [8, 64], strides = [1, 1]} : vector<8x128xf32> to vector<8x64xf32>
    %1027 = vector.extract_strided_slice %1016 {offsets = [0, 128], sizes = [8, 64], strides = [1, 1]} : vector<8x192xf32> to vector<8x64xf32>
    %1028 = vector.extract_strided_slice %1015 {offsets = [0, 128], sizes = [8, 64], strides = [1, 1]} : vector<8x192xf32> to vector<8x64xf32>
    %1029 = arith.addf %1028, %752 : vector<8x64xf32>
    %1030 = arith.mulf %1025, %1029 : vector<8x64xf32>
    %1031 = arith.addf %1027, %1030 : vector<8x64xf32>
    %1032 = math.tanh %1031 : vector<8x64xf32>
    %1033 = arith.subf %1009, %1032 : vector<8x64xf32>
    %1034 = arith.mulf %1026, %1033 : vector<8x64xf32>
    %1035 = arith.addf %1032, %1034 : vector<8x64xf32>
    %1036 = vector.extract_strided_slice %1035 {offsets = [0, 0], sizes = [8, 32], strides = [1, 1]} : vector<8x64xf32> to vector<8x32xf32>
    %c80_385 = arith.constant 80 : index
    %c0_386 = arith.constant 0 : index
    %1037 = vector.load %arg15[%c80_385, %c0_386] : memref<192x64xf32, #tpu.memory_space<vmem>>, vector<8x32xf32>
    tpu.vector_store %arg15[%c80_385, %c0_386], %1036 {strides = array<i32>} : memref<192x64xf32, #tpu.memory_space<vmem>>, vector<8x32xf32>,
    %1038 = vector.extract_strided_slice %1035 {offsets = [0, 32], sizes = [8, 32], strides = [1, 1]} : vector<8x64xf32> to vector<8x32xf32>
    %c104_387 = arith.constant 104 : index
    %c32_388 = arith.constant 32 : index
    %1039 = vector.load %arg15[%c104_387, %c32_388] : memref<192x64xf32, #tpu.memory_space<vmem>>, vector<8x32xf32>
    tpu.vector_store %arg15[%c104_387, %c32_388], %1038 {strides = array<i32>} : memref<192x64xf32, #tpu.memory_space<vmem>>, vector<8x32xf32>,
    %1040 = arith.truncf %1035 : vector<8x64xf32> to vector<8x64xbf16>
    %cst_389 = arith.constant dense<0.000000e+00> : vector<8x192xf32>
    %1041 = tpu.matmul %1040, %749, %cst_389 {dimension_numbers = #tpu.dot_dimension_numbers<[1], [0], [0], [1], [0, 0, 1, 1], [], []>} : vector<8x64xbf16>, vector<64x192xbf16>, vector<8x192xf32> -> vector<8x192xf32>
    %c88_390 = arith.constant 88 : index
    %c0_391 = arith.constant 0 : index
    %1042 = vector.load %arg17[%c88_390, %c0_391] : memref<192x192xf32, #tpu.memory_space<vmem>>, vector<8x192xf32>
    %1043 = vector.extract_strided_slice %1042 {offsets = [0, 0], sizes = [8, 128], strides = [1, 1]} : vector<8x192xf32> to vector<8x128xf32>
    %1044 = vector.extract_strided_slice %1041 {offsets = [0, 0], sizes = [8, 128], strides = [1, 1]} : vector<8x192xf32> to vector<8x128xf32>
    %1045 = arith.addf %1043, %1044 : vector<8x128xf32>
    %1046 = arith.negf %1045 : vector<8x128xf32>
    %1047 = math.exp %1046 : vector<8x128xf32>
    %cst_392 = arith.constant 1.000000e+00 : f32
    %1048 = vector.broadcast %cst_392 : f32 to vector<8x128xf32>
    %1049 = arith.addf %1048, %1047 : vector<8x128xf32>
    %1050 = arith.divf %1048, %1049 : vector<8x128xf32>
    %1051 = vector.extract_strided_slice %1050 {offsets = [0, 0], sizes = [8, 64], strides = [1, 1]} : vector<8x128xf32> to vector<8x64xf32>
    %1052 = vector.extract_strided_slice %1050 {offsets = [0, 64], sizes = [8, 64], strides = [1, 1]} : vector<8x128xf32> to vector<8x64xf32>
    %1053 = vector.extract_strided_slice %1042 {offsets = [0, 128], sizes = [8, 64], strides = [1, 1]} : vector<8x192xf32> to vector<8x64xf32>
    %1054 = vector.extract_strided_slice %1041 {offsets = [0, 128], sizes = [8, 64], strides = [1, 1]} : vector<8x192xf32> to vector<8x64xf32>
    %1055 = arith.addf %1054, %752 : vector<8x64xf32>
    %1056 = arith.mulf %1051, %1055 : vector<8x64xf32>
    %1057 = arith.addf %1053, %1056 : vector<8x64xf32>
    %1058 = math.tanh %1057 : vector<8x64xf32>
    %1059 = arith.subf %1035, %1058 : vector<8x64xf32>
    %1060 = arith.mulf %1052, %1059 : vector<8x64xf32>
    %1061 = arith.addf %1058, %1060 : vector<8x64xf32>
    %1062 = vector.extract_strided_slice %1061 {offsets = [0, 0], sizes = [8, 32], strides = [1, 1]} : vector<8x64xf32> to vector<8x32xf32>
    %c88_393 = arith.constant 88 : index
    %c0_394 = arith.constant 0 : index
    %1063 = vector.load %arg15[%c88_393, %c0_394] : memref<192x64xf32, #tpu.memory_space<vmem>>, vector<8x32xf32>
    tpu.vector_store %arg15[%c88_393, %c0_394], %1062 {strides = array<i32>} : memref<192x64xf32, #tpu.memory_space<vmem>>, vector<8x32xf32>,
    %1064 = vector.extract_strided_slice %1061 {offsets = [0, 32], sizes = [8, 32], strides = [1, 1]} : vector<8x64xf32> to vector<8x32xf32>
    %c96_395 = arith.constant 96 : index
    %c32_396 = arith.constant 32 : index
    %1065 = vector.load %arg15[%c96_395, %c32_396] : memref<192x64xf32, #tpu.memory_space<vmem>>, vector<8x32xf32>
    tpu.vector_store %arg15[%c96_395, %c32_396], %1064 {strides = array<i32>} : memref<192x64xf32, #tpu.memory_space<vmem>>, vector<8x32xf32>,
    %1066 = arith.truncf %1061 : vector<8x64xf32> to vector<8x64xbf16>
    %cst_397 = arith.constant dense<0.000000e+00> : vector<8x192xf32>
    %1067 = tpu.matmul %1066, %749, %cst_397 {dimension_numbers = #tpu.dot_dimension_numbers<[1], [0], [0], [1], [0, 0, 1, 1], [], []>} : vector<8x64xbf16>, vector<64x192xbf16>, vector<8x192xf32> -> vector<8x192xf32>
    %c96_398 = arith.constant 96 : index
    %c0_399 = arith.constant 0 : index
    %1068 = vector.load %arg17[%c96_398, %c0_399] : memref<192x192xf32, #tpu.memory_space<vmem>>, vector<8x192xf32>
    %1069 = vector.extract_strided_slice %1068 {offsets = [0, 0], sizes = [8, 128], strides = [1, 1]} : vector<8x192xf32> to vector<8x128xf32>
    %1070 = vector.extract_strided_slice %1067 {offsets = [0, 0], sizes = [8, 128], strides = [1, 1]} : vector<8x192xf32> to vector<8x128xf32>
    %1071 = arith.addf %1069, %1070 : vector<8x128xf32>
    %1072 = arith.negf %1071 : vector<8x128xf32>
    %1073 = math.exp %1072 : vector<8x128xf32>
    %cst_400 = arith.constant 1.000000e+00 : f32
    %1074 = vector.broadcast %cst_400 : f32 to vector<8x128xf32>
    %1075 = arith.addf %1074, %1073 : vector<8x128xf32>
    %1076 = arith.divf %1074, %1075 : vector<8x128xf32>
    %1077 = vector.extract_strided_slice %1076 {offsets = [0, 0], sizes = [8, 64], strides = [1, 1]} : vector<8x128xf32> to vector<8x64xf32>
    %1078 = vector.extract_strided_slice %1076 {offsets = [0, 64], sizes = [8, 64], strides = [1, 1]} : vector<8x128xf32> to vector<8x64xf32>
    %1079 = vector.extract_strided_slice %1068 {offsets = [0, 128], sizes = [8, 64], strides = [1, 1]} : vector<8x192xf32> to vector<8x64xf32>
    %1080 = vector.extract_strided_slice %1067 {offsets = [0, 128], sizes = [8, 64], strides = [1, 1]} : vector<8x192xf32> to vector<8x64xf32>
    %1081 = arith.addf %1080, %752 : vector<8x64xf32>
    %1082 = arith.mulf %1077, %1081 : vector<8x64xf32>
    %1083 = arith.addf %1079, %1082 : vector<8x64xf32>
    %1084 = math.tanh %1083 : vector<8x64xf32>
    %1085 = arith.subf %1061, %1084 : vector<8x64xf32>
    %1086 = arith.mulf %1078, %1085 : vector<8x64xf32>
    %1087 = arith.addf %1084, %1086 : vector<8x64xf32>
    %1088 = vector.extract_strided_slice %1087 {offsets = [0, 0], sizes = [8, 32], strides = [1, 1]} : vector<8x64xf32> to vector<8x32xf32>
    %c96_401 = arith.constant 96 : index
    %c0_402 = arith.constant 0 : index
    %1089 = vector.load %arg15[%c96_401, %c0_402] : memref<192x64xf32, #tpu.memory_space<vmem>>, vector<8x32xf32>
    tpu.vector_store %arg15[%c96_401, %c0_402], %1088 {strides = array<i32>} : memref<192x64xf32, #tpu.memory_space<vmem>>, vector<8x32xf32>,
    %1090 = vector.extract_strided_slice %1087 {offsets = [0, 32], sizes = [8, 32], strides = [1, 1]} : vector<8x64xf32> to vector<8x32xf32>
    %c88_403 = arith.constant 88 : index
    %c32_404 = arith.constant 32 : index
    %1091 = vector.load %arg15[%c88_403, %c32_404] : memref<192x64xf32, #tpu.memory_space<vmem>>, vector<8x32xf32>
    tpu.vector_store %arg15[%c88_403, %c32_404], %1090 {strides = array<i32>} : memref<192x64xf32, #tpu.memory_space<vmem>>, vector<8x32xf32>,
    %1092 = arith.truncf %1087 : vector<8x64xf32> to vector<8x64xbf16>
    %cst_405 = arith.constant dense<0.000000e+00> : vector<8x192xf32>
    %1093 = tpu.matmul %1092, %749, %cst_405 {dimension_numbers = #tpu.dot_dimension_numbers<[1], [0], [0], [1], [0, 0, 1, 1], [], []>} : vector<8x64xbf16>, vector<64x192xbf16>, vector<8x192xf32> -> vector<8x192xf32>
    %c104_406 = arith.constant 104 : index
    %c0_407 = arith.constant 0 : index
    %1094 = vector.load %arg17[%c104_406, %c0_407] : memref<192x192xf32, #tpu.memory_space<vmem>>, vector<8x192xf32>
    %1095 = vector.extract_strided_slice %1094 {offsets = [0, 0], sizes = [8, 128], strides = [1, 1]} : vector<8x192xf32> to vector<8x128xf32>
    %1096 = vector.extract_strided_slice %1093 {offsets = [0, 0], sizes = [8, 128], strides = [1, 1]} : vector<8x192xf32> to vector<8x128xf32>
    %1097 = arith.addf %1095, %1096 : vector<8x128xf32>
    %1098 = arith.negf %1097 : vector<8x128xf32>
    %1099 = math.exp %1098 : vector<8x128xf32>
    %cst_408 = arith.constant 1.000000e+00 : f32
    %1100 = vector.broadcast %cst_408 : f32 to vector<8x128xf32>
    %1101 = arith.addf %1100, %1099 : vector<8x128xf32>
    %1102 = arith.divf %1100, %1101 : vector<8x128xf32>
    %1103 = vector.extract_strided_slice %1102 {offsets = [0, 0], sizes = [8, 64], strides = [1, 1]} : vector<8x128xf32> to vector<8x64xf32>
    %1104 = vector.extract_strided_slice %1102 {offsets = [0, 64], sizes = [8, 64], strides = [1, 1]} : vector<8x128xf32> to vector<8x64xf32>
    %1105 = vector.extract_strided_slice %1094 {offsets = [0, 128], sizes = [8, 64], strides = [1, 1]} : vector<8x192xf32> to vector<8x64xf32>
    %1106 = vector.extract_strided_slice %1093 {offsets = [0, 128], sizes = [8, 64], strides = [1, 1]} : vector<8x192xf32> to vector<8x64xf32>
    %1107 = arith.addf %1106, %752 : vector<8x64xf32>
    %1108 = arith.mulf %1103, %1107 : vector<8x64xf32>
    %1109 = arith.addf %1105, %1108 : vector<8x64xf32>
    %1110 = math.tanh %1109 : vector<8x64xf32>
    %1111 = arith.subf %1087, %1110 : vector<8x64xf32>
    %1112 = arith.mulf %1104, %1111 : vector<8x64xf32>
    %1113 = arith.addf %1110, %1112 : vector<8x64xf32>
    %1114 = vector.extract_strided_slice %1113 {offsets = [0, 0], sizes = [8, 32], strides = [1, 1]} : vector<8x64xf32> to vector<8x32xf32>
    %c104_409 = arith.constant 104 : index
    %c0_410 = arith.constant 0 : index
    %1115 = vector.load %arg15[%c104_409, %c0_410] : memref<192x64xf32, #tpu.memory_space<vmem>>, vector<8x32xf32>
    tpu.vector_store %arg15[%c104_409, %c0_410], %1114 {strides = array<i32>} : memref<192x64xf32, #tpu.memory_space<vmem>>, vector<8x32xf32>,
    %1116 = vector.extract_strided_slice %1113 {offsets = [0, 32], sizes = [8, 32], strides = [1, 1]} : vector<8x64xf32> to vector<8x32xf32>
    %c80_411 = arith.constant 80 : index
    %c32_412 = arith.constant 32 : index
    %1117 = vector.load %arg15[%c80_411, %c32_412] : memref<192x64xf32, #tpu.memory_space<vmem>>, vector<8x32xf32>
    tpu.vector_store %arg15[%c80_411, %c32_412], %1116 {strides = array<i32>} : memref<192x64xf32, #tpu.memory_space<vmem>>, vector<8x32xf32>,
    %1118 = arith.truncf %1113 : vector<8x64xf32> to vector<8x64xbf16>
    %cst_413 = arith.constant dense<0.000000e+00> : vector<8x192xf32>
    %1119 = tpu.matmul %1118, %749, %cst_413 {dimension_numbers = #tpu.dot_dimension_numbers<[1], [0], [0], [1], [0, 0, 1, 1], [], []>} : vector<8x64xbf16>, vector<64x192xbf16>, vector<8x192xf32> -> vector<8x192xf32>
    %c112_414 = arith.constant 112 : index
    %c0_415 = arith.constant 0 : index
    %1120 = vector.load %arg17[%c112_414, %c0_415] : memref<192x192xf32, #tpu.memory_space<vmem>>, vector<8x192xf32>
    %1121 = vector.extract_strided_slice %1120 {offsets = [0, 0], sizes = [8, 128], strides = [1, 1]} : vector<8x192xf32> to vector<8x128xf32>
    %1122 = vector.extract_strided_slice %1119 {offsets = [0, 0], sizes = [8, 128], strides = [1, 1]} : vector<8x192xf32> to vector<8x128xf32>
    %1123 = arith.addf %1121, %1122 : vector<8x128xf32>
    %1124 = arith.negf %1123 : vector<8x128xf32>
    %1125 = math.exp %1124 : vector<8x128xf32>
    %cst_416 = arith.constant 1.000000e+00 : f32
    %1126 = vector.broadcast %cst_416 : f32 to vector<8x128xf32>
    %1127 = arith.addf %1126, %1125 : vector<8x128xf32>
    %1128 = arith.divf %1126, %1127 : vector<8x128xf32>
    %1129 = vector.extract_strided_slice %1128 {offsets = [0, 0], sizes = [8, 64], strides = [1, 1]} : vector<8x128xf32> to vector<8x64xf32>
    %1130 = vector.extract_strided_slice %1128 {offsets = [0, 64], sizes = [8, 64], strides = [1, 1]} : vector<8x128xf32> to vector<8x64xf32>
    %1131 = vector.extract_strided_slice %1120 {offsets = [0, 128], sizes = [8, 64], strides = [1, 1]} : vector<8x192xf32> to vector<8x64xf32>
    %1132 = vector.extract_strided_slice %1119 {offsets = [0, 128], sizes = [8, 64], strides = [1, 1]} : vector<8x192xf32> to vector<8x64xf32>
    %1133 = arith.addf %1132, %752 : vector<8x64xf32>
    %1134 = arith.mulf %1129, %1133 : vector<8x64xf32>
    %1135 = arith.addf %1131, %1134 : vector<8x64xf32>
    %1136 = math.tanh %1135 : vector<8x64xf32>
    %1137 = arith.subf %1113, %1136 : vector<8x64xf32>
    %1138 = arith.mulf %1130, %1137 : vector<8x64xf32>
    %1139 = arith.addf %1136, %1138 : vector<8x64xf32>
    %1140 = vector.extract_strided_slice %1139 {offsets = [0, 0], sizes = [8, 32], strides = [1, 1]} : vector<8x64xf32> to vector<8x32xf32>
    %c112_417 = arith.constant 112 : index
    %c0_418 = arith.constant 0 : index
    %1141 = vector.load %arg15[%c112_417, %c0_418] : memref<192x64xf32, #tpu.memory_space<vmem>>, vector<8x32xf32>
    tpu.vector_store %arg15[%c112_417, %c0_418], %1140 {strides = array<i32>} : memref<192x64xf32, #tpu.memory_space<vmem>>, vector<8x32xf32>,
    %1142 = vector.extract_strided_slice %1139 {offsets = [0, 32], sizes = [8, 32], strides = [1, 1]} : vector<8x64xf32> to vector<8x32xf32>
    %c72_419 = arith.constant 72 : index
    %c32_420 = arith.constant 32 : index
    %1143 = vector.load %arg15[%c72_419, %c32_420] : memref<192x64xf32, #tpu.memory_space<vmem>>, vector<8x32xf32>
    tpu.vector_store %arg15[%c72_419, %c32_420], %1142 {strides = array<i32>} : memref<192x64xf32, #tpu.memory_space<vmem>>, vector<8x32xf32>,
    %1144 = arith.truncf %1139 : vector<8x64xf32> to vector<8x64xbf16>
    %cst_421 = arith.constant dense<0.000000e+00> : vector<8x192xf32>
    %1145 = tpu.matmul %1144, %749, %cst_421 {dimension_numbers = #tpu.dot_dimension_numbers<[1], [0], [0], [1], [0, 0, 1, 1], [], []>} : vector<8x64xbf16>, vector<64x192xbf16>, vector<8x192xf32> -> vector<8x192xf32>
    %c120_422 = arith.constant 120 : index
    %c0_423 = arith.constant 0 : index
    %1146 = vector.load %arg17[%c120_422, %c0_423] : memref<192x192xf32, #tpu.memory_space<vmem>>, vector<8x192xf32>
    %1147 = vector.extract_strided_slice %1146 {offsets = [0, 0], sizes = [8, 128], strides = [1, 1]} : vector<8x192xf32> to vector<8x128xf32>
    %1148 = vector.extract_strided_slice %1145 {offsets = [0, 0], sizes = [8, 128], strides = [1, 1]} : vector<8x192xf32> to vector<8x128xf32>
    %1149 = arith.addf %1147, %1148 : vector<8x128xf32>
    %1150 = arith.negf %1149 : vector<8x128xf32>
    %1151 = math.exp %1150 : vector<8x128xf32>
    %cst_424 = arith.constant 1.000000e+00 : f32
    %1152 = vector.broadcast %cst_424 : f32 to vector<8x128xf32>
    %1153 = arith.addf %1152, %1151 : vector<8x128xf32>
    %1154 = arith.divf %1152, %1153 : vector<8x128xf32>
    %1155 = vector.extract_strided_slice %1154 {offsets = [0, 0], sizes = [8, 64], strides = [1, 1]} : vector<8x128xf32> to vector<8x64xf32>
    %1156 = vector.extract_strided_slice %1154 {offsets = [0, 64], sizes = [8, 64], strides = [1, 1]} : vector<8x128xf32> to vector<8x64xf32>
    %1157 = vector.extract_strided_slice %1146 {offsets = [0, 128], sizes = [8, 64], strides = [1, 1]} : vector<8x192xf32> to vector<8x64xf32>
    %1158 = vector.extract_strided_slice %1145 {offsets = [0, 128], sizes = [8, 64], strides = [1, 1]} : vector<8x192xf32> to vector<8x64xf32>
    %1159 = arith.addf %1158, %752 : vector<8x64xf32>
    %1160 = arith.mulf %1155, %1159 : vector<8x64xf32>
    %1161 = arith.addf %1157, %1160 : vector<8x64xf32>
    %1162 = math.tanh %1161 : vector<8x64xf32>
    %1163 = arith.subf %1139, %1162 : vector<8x64xf32>
    %1164 = arith.mulf %1156, %1163 : vector<8x64xf32>
    %1165 = arith.addf %1162, %1164 : vector<8x64xf32>
    %1166 = vector.extract_strided_slice %1165 {offsets = [0, 0], sizes = [8, 32], strides = [1, 1]} : vector<8x64xf32> to vector<8x32xf32>
    %c120_425 = arith.constant 120 : index
    %c0_426 = arith.constant 0 : index
    %1167 = vector.load %arg15[%c120_425, %c0_426] : memref<192x64xf32, #tpu.memory_space<vmem>>, vector<8x32xf32>
    tpu.vector_store %arg15[%c120_425, %c0_426], %1166 {strides = array<i32>} : memref<192x64xf32, #tpu.memory_space<vmem>>, vector<8x32xf32>,
    %1168 = vector.extract_strided_slice %1165 {offsets = [0, 32], sizes = [8, 32], strides = [1, 1]} : vector<8x64xf32> to vector<8x32xf32>
    %c64_427 = arith.constant 64 : index
    %c32_428 = arith.constant 32 : index
    %1169 = vector.load %arg15[%c64_427, %c32_428] : memref<192x64xf32, #tpu.memory_space<vmem>>, vector<8x32xf32>
    tpu.vector_store %arg15[%c64_427, %c32_428], %1168 {strides = array<i32>} : memref<192x64xf32, #tpu.memory_space<vmem>>, vector<8x32xf32>,
    %1170 = arith.truncf %1165 : vector<8x64xf32> to vector<8x64xbf16>
    %cst_429 = arith.constant dense<0.000000e+00> : vector<8x192xf32>
    %1171 = tpu.matmul %1170, %749, %cst_429 {dimension_numbers = #tpu.dot_dimension_numbers<[1], [0], [0], [1], [0, 0, 1, 1], [], []>} : vector<8x64xbf16>, vector<64x192xbf16>, vector<8x192xf32> -> vector<8x192xf32>
    %c128_430 = arith.constant 128 : index
    %c0_431 = arith.constant 0 : index
    %1172 = vector.load %arg17[%c128_430, %c0_431] : memref<192x192xf32, #tpu.memory_space<vmem>>, vector<8x192xf32>
    %1173 = vector.extract_strided_slice %1172 {offsets = [0, 0], sizes = [8, 128], strides = [1, 1]} : vector<8x192xf32> to vector<8x128xf32>
    %1174 = vector.extract_strided_slice %1171 {offsets = [0, 0], sizes = [8, 128], strides = [1, 1]} : vector<8x192xf32> to vector<8x128xf32>
    %1175 = arith.addf %1173, %1174 : vector<8x128xf32>
    %1176 = arith.negf %1175 : vector<8x128xf32>
    %1177 = math.exp %1176 : vector<8x128xf32>
    %cst_432 = arith.constant 1.000000e+00 : f32
    %1178 = vector.broadcast %cst_432 : f32 to vector<8x128xf32>
    %1179 = arith.addf %1178, %1177 : vector<8x128xf32>
    %1180 = arith.divf %1178, %1179 : vector<8x128xf32>
    %1181 = vector.extract_strided_slice %1180 {offsets = [0, 0], sizes = [8, 64], strides = [1, 1]} : vector<8x128xf32> to vector<8x64xf32>
    %1182 = vector.extract_strided_slice %1180 {offsets = [0, 64], sizes = [8, 64], strides = [1, 1]} : vector<8x128xf32> to vector<8x64xf32>
    %1183 = vector.extract_strided_slice %1172 {offsets = [0, 128], sizes = [8, 64], strides = [1, 1]} : vector<8x192xf32> to vector<8x64xf32>
    %1184 = vector.extract_strided_slice %1171 {offsets = [0, 128], sizes = [8, 64], strides = [1, 1]} : vector<8x192xf32> to vector<8x64xf32>
    %1185 = arith.addf %1184, %752 : vector<8x64xf32>
    %1186 = arith.mulf %1181, %1185 : vector<8x64xf32>
    %1187 = arith.addf %1183, %1186 : vector<8x64xf32>
    %1188 = math.tanh %1187 : vector<8x64xf32>
    %1189 = arith.subf %1165, %1188 : vector<8x64xf32>
    %1190 = arith.mulf %1182, %1189 : vector<8x64xf32>
    %1191 = arith.addf %1188, %1190 : vector<8x64xf32>
    %1192 = vector.extract_strided_slice %1191 {offsets = [0, 0], sizes = [8, 32], strides = [1, 1]} : vector<8x64xf32> to vector<8x32xf32>
    %c128_433 = arith.constant 128 : index
    %c0_434 = arith.constant 0 : index
    %1193 = vector.load %arg15[%c128_433, %c0_434] : memref<192x64xf32, #tpu.memory_space<vmem>>, vector<8x32xf32>
    tpu.vector_store %arg15[%c128_433, %c0_434], %1192 {strides = array<i32>} : memref<192x64xf32, #tpu.memory_space<vmem>>, vector<8x32xf32>,
    %1194 = vector.extract_strided_slice %1191 {offsets = [0, 32], sizes = [8, 32], strides = [1, 1]} : vector<8x64xf32> to vector<8x32xf32>
    %c56_435 = arith.constant 56 : index
    %c32_436 = arith.constant 32 : index
    %1195 = vector.load %arg15[%c56_435, %c32_436] : memref<192x64xf32, #tpu.memory_space<vmem>>, vector<8x32xf32>
    tpu.vector_store %arg15[%c56_435, %c32_436], %1194 {strides = array<i32>} : memref<192x64xf32, #tpu.memory_space<vmem>>, vector<8x32xf32>,
    %1196 = arith.truncf %1191 : vector<8x64xf32> to vector<8x64xbf16>
    %cst_437 = arith.constant dense<0.000000e+00> : vector<8x192xf32>
    %1197 = tpu.matmul %1196, %749, %cst_437 {dimension_numbers = #tpu.dot_dimension_numbers<[1], [0], [0], [1], [0, 0, 1, 1], [], []>} : vector<8x64xbf16>, vector<64x192xbf16>, vector<8x192xf32> -> vector<8x192xf32>
    %c136_438 = arith.constant 136 : index
    %c0_439 = arith.constant 0 : index
    %1198 = vector.load %arg17[%c136_438, %c0_439] : memref<192x192xf32, #tpu.memory_space<vmem>>, vector<8x192xf32>
    %1199 = vector.extract_strided_slice %1198 {offsets = [0, 0], sizes = [8, 128], strides = [1, 1]} : vector<8x192xf32> to vector<8x128xf32>
    %1200 = vector.extract_strided_slice %1197 {offsets = [0, 0], sizes = [8, 128], strides = [1, 1]} : vector<8x192xf32> to vector<8x128xf32>
    %1201 = arith.addf %1199, %1200 : vector<8x128xf32>
    %1202 = arith.negf %1201 : vector<8x128xf32>
    %1203 = math.exp %1202 : vector<8x128xf32>
    %cst_440 = arith.constant 1.000000e+00 : f32
    %1204 = vector.broadcast %cst_440 : f32 to vector<8x128xf32>
    %1205 = arith.addf %1204, %1203 : vector<8x128xf32>
    %1206 = arith.divf %1204, %1205 : vector<8x128xf32>
    %1207 = vector.extract_strided_slice %1206 {offsets = [0, 0], sizes = [8, 64], strides = [1, 1]} : vector<8x128xf32> to vector<8x64xf32>
    %1208 = vector.extract_strided_slice %1206 {offsets = [0, 64], sizes = [8, 64], strides = [1, 1]} : vector<8x128xf32> to vector<8x64xf32>
    %1209 = vector.extract_strided_slice %1198 {offsets = [0, 128], sizes = [8, 64], strides = [1, 1]} : vector<8x192xf32> to vector<8x64xf32>
    %1210 = vector.extract_strided_slice %1197 {offsets = [0, 128], sizes = [8, 64], strides = [1, 1]} : vector<8x192xf32> to vector<8x64xf32>
    %1211 = arith.addf %1210, %752 : vector<8x64xf32>
    %1212 = arith.mulf %1207, %1211 : vector<8x64xf32>
    %1213 = arith.addf %1209, %1212 : vector<8x64xf32>
    %1214 = math.tanh %1213 : vector<8x64xf32>
    %1215 = arith.subf %1191, %1214 : vector<8x64xf32>
    %1216 = arith.mulf %1208, %1215 : vector<8x64xf32>
    %1217 = arith.addf %1214, %1216 : vector<8x64xf32>
    %1218 = vector.extract_strided_slice %1217 {offsets = [0, 0], sizes = [8, 32], strides = [1, 1]} : vector<8x64xf32> to vector<8x32xf32>
    %c136_441 = arith.constant 136 : index
    %c0_442 = arith.constant 0 : index
    %1219 = vector.load %arg15[%c136_441, %c0_442] : memref<192x64xf32, #tpu.memory_space<vmem>>, vector<8x32xf32>
    tpu.vector_store %arg15[%c136_441, %c0_442], %1218 {strides = array<i32>} : memref<192x64xf32, #tpu.memory_space<vmem>>, vector<8x32xf32>,
    %1220 = vector.extract_strided_slice %1217 {offsets = [0, 32], sizes = [8, 32], strides = [1, 1]} : vector<8x64xf32> to vector<8x32xf32>
    %c48_443 = arith.constant 48 : index
    %c32_444 = arith.constant 32 : index
    %1221 = vector.load %arg15[%c48_443, %c32_444] : memref<192x64xf32, #tpu.memory_space<vmem>>, vector<8x32xf32>
    tpu.vector_store %arg15[%c48_443, %c32_444], %1220 {strides = array<i32>} : memref<192x64xf32, #tpu.memory_space<vmem>>, vector<8x32xf32>,
    %1222 = arith.truncf %1217 : vector<8x64xf32> to vector<8x64xbf16>
    %cst_445 = arith.constant dense<0.000000e+00> : vector<8x192xf32>
    %1223 = tpu.matmul %1222, %749, %cst_445 {dimension_numbers = #tpu.dot_dimension_numbers<[1], [0], [0], [1], [0, 0, 1, 1], [], []>} : vector<8x64xbf16>, vector<64x192xbf16>, vector<8x192xf32> -> vector<8x192xf32>
    %c144_446 = arith.constant 144 : index
    %c0_447 = arith.constant 0 : index
    %1224 = vector.load %arg17[%c144_446, %c0_447] : memref<192x192xf32, #tpu.memory_space<vmem>>, vector<8x192xf32>
    %1225 = vector.extract_strided_slice %1224 {offsets = [0, 0], sizes = [8, 128], strides = [1, 1]} : vector<8x192xf32> to vector<8x128xf32>
    %1226 = vector.extract_strided_slice %1223 {offsets = [0, 0], sizes = [8, 128], strides = [1, 1]} : vector<8x192xf32> to vector<8x128xf32>
    %1227 = arith.addf %1225, %1226 : vector<8x128xf32>
    %1228 = arith.negf %1227 : vector<8x128xf32>
    %1229 = math.exp %1228 : vector<8x128xf32>
    %cst_448 = arith.constant 1.000000e+00 : f32
    %1230 = vector.broadcast %cst_448 : f32 to vector<8x128xf32>
    %1231 = arith.addf %1230, %1229 : vector<8x128xf32>
    %1232 = arith.divf %1230, %1231 : vector<8x128xf32>
    %1233 = vector.extract_strided_slice %1232 {offsets = [0, 0], sizes = [8, 64], strides = [1, 1]} : vector<8x128xf32> to vector<8x64xf32>
    %1234 = vector.extract_strided_slice %1232 {offsets = [0, 64], sizes = [8, 64], strides = [1, 1]} : vector<8x128xf32> to vector<8x64xf32>
    %1235 = vector.extract_strided_slice %1224 {offsets = [0, 128], sizes = [8, 64], strides = [1, 1]} : vector<8x192xf32> to vector<8x64xf32>
    %1236 = vector.extract_strided_slice %1223 {offsets = [0, 128], sizes = [8, 64], strides = [1, 1]} : vector<8x192xf32> to vector<8x64xf32>
    %1237 = arith.addf %1236, %752 : vector<8x64xf32>
    %1238 = arith.mulf %1233, %1237 : vector<8x64xf32>
    %1239 = arith.addf %1235, %1238 : vector<8x64xf32>
    %1240 = math.tanh %1239 : vector<8x64xf32>
    %1241 = arith.subf %1217, %1240 : vector<8x64xf32>
    %1242 = arith.mulf %1234, %1241 : vector<8x64xf32>
    %1243 = arith.addf %1240, %1242 : vector<8x64xf32>
    %1244 = vector.extract_strided_slice %1243 {offsets = [0, 0], sizes = [8, 32], strides = [1, 1]} : vector<8x64xf32> to vector<8x32xf32>
    %c144_449 = arith.constant 144 : index
    %c0_450 = arith.constant 0 : index
    %1245 = vector.load %arg15[%c144_449, %c0_450] : memref<192x64xf32, #tpu.memory_space<vmem>>, vector<8x32xf32>
    tpu.vector_store %arg15[%c144_449, %c0_450], %1244 {strides = array<i32>} : memref<192x64xf32, #tpu.memory_space<vmem>>, vector<8x32xf32>,
    %1246 = vector.extract_strided_slice %1243 {offsets = [0, 32], sizes = [8, 32], strides = [1, 1]} : vector<8x64xf32> to vector<8x32xf32>
    %c40_451 = arith.constant 40 : index
    %c32_452 = arith.constant 32 : index
    %1247 = vector.load %arg15[%c40_451, %c32_452] : memref<192x64xf32, #tpu.memory_space<vmem>>, vector<8x32xf32>
    tpu.vector_store %arg15[%c40_451, %c32_452], %1246 {strides = array<i32>} : memref<192x64xf32, #tpu.memory_space<vmem>>, vector<8x32xf32>,
    %1248 = arith.truncf %1243 : vector<8x64xf32> to vector<8x64xbf16>
    %cst_453 = arith.constant dense<0.000000e+00> : vector<8x192xf32>
    %1249 = tpu.matmul %1248, %749, %cst_453 {dimension_numbers = #tpu.dot_dimension_numbers<[1], [0], [0], [1], [0, 0, 1, 1], [], []>} : vector<8x64xbf16>, vector<64x192xbf16>, vector<8x192xf32> -> vector<8x192xf32>
    %c152_454 = arith.constant 152 : index
    %c0_455 = arith.constant 0 : index
    %1250 = vector.load %arg17[%c152_454, %c0_455] : memref<192x192xf32, #tpu.memory_space<vmem>>, vector<8x192xf32>
    %1251 = vector.extract_strided_slice %1250 {offsets = [0, 0], sizes = [8, 128], strides = [1, 1]} : vector<8x192xf32> to vector<8x128xf32>
    %1252 = vector.extract_strided_slice %1249 {offsets = [0, 0], sizes = [8, 128], strides = [1, 1]} : vector<8x192xf32> to vector<8x128xf32>
    %1253 = arith.addf %1251, %1252 : vector<8x128xf32>
    %1254 = arith.negf %1253 : vector<8x128xf32>
    %1255 = math.exp %1254 : vector<8x128xf32>
    %cst_456 = arith.constant 1.000000e+00 : f32
    %1256 = vector.broadcast %cst_456 : f32 to vector<8x128xf32>
    %1257 = arith.addf %1256, %1255 : vector<8x128xf32>
    %1258 = arith.divf %1256, %1257 : vector<8x128xf32>
    %1259 = vector.extract_strided_slice %1258 {offsets = [0, 0], sizes = [8, 64], strides = [1, 1]} : vector<8x128xf32> to vector<8x64xf32>
    %1260 = vector.extract_strided_slice %1258 {offsets = [0, 64], sizes = [8, 64], strides = [1, 1]} : vector<8x128xf32> to vector<8x64xf32>
    %1261 = vector.extract_strided_slice %1250 {offsets = [0, 128], sizes = [8, 64], strides = [1, 1]} : vector<8x192xf32> to vector<8x64xf32>
    %1262 = vector.extract_strided_slice %1249 {offsets = [0, 128], sizes = [8, 64], strides = [1, 1]} : vector<8x192xf32> to vector<8x64xf32>
    %1263 = arith.addf %1262, %752 : vector<8x64xf32>
    %1264 = arith.mulf %1259, %1263 : vector<8x64xf32>
    %1265 = arith.addf %1261, %1264 : vector<8x64xf32>
    %1266 = math.tanh %1265 : vector<8x64xf32>
    %1267 = arith.subf %1243, %1266 : vector<8x64xf32>
    %1268 = arith.mulf %1260, %1267 : vector<8x64xf32>
    %1269 = arith.addf %1266, %1268 : vector<8x64xf32>
    %1270 = vector.extract_strided_slice %1269 {offsets = [0, 0], sizes = [8, 32], strides = [1, 1]} : vector<8x64xf32> to vector<8x32xf32>
    %c152_457 = arith.constant 152 : index
    %c0_458 = arith.constant 0 : index
    %1271 = vector.load %arg15[%c152_457, %c0_458] : memref<192x64xf32, #tpu.memory_space<vmem>>, vector<8x32xf32>
    tpu.vector_store %arg15[%c152_457, %c0_458], %1270 {strides = array<i32>} : memref<192x64xf32, #tpu.memory_space<vmem>>, vector<8x32xf32>,
    %1272 = vector.extract_strided_slice %1269 {offsets = [0, 32], sizes = [8, 32], strides = [1, 1]} : vector<8x64xf32> to vector<8x32xf32>
    %c32_459 = arith.constant 32 : index
    %c32_460 = arith.constant 32 : index
    %1273 = vector.load %arg15[%c32_459, %c32_460] : memref<192x64xf32, #tpu.memory_space<vmem>>, vector<8x32xf32>
    tpu.vector_store %arg15[%c32_459, %c32_460], %1272 {strides = array<i32>} : memref<192x64xf32, #tpu.memory_space<vmem>>, vector<8x32xf32>,
    %1274 = arith.truncf %1269 : vector<8x64xf32> to vector<8x64xbf16>
    %cst_461 = arith.constant dense<0.000000e+00> : vector<8x192xf32>
    %1275 = tpu.matmul %1274, %749, %cst_461 {dimension_numbers = #tpu.dot_dimension_numbers<[1], [0], [0], [1], [0, 0, 1, 1], [], []>} : vector<8x64xbf16>, vector<64x192xbf16>, vector<8x192xf32> -> vector<8x192xf32>
    %c160_462 = arith.constant 160 : index
    %c0_463 = arith.constant 0 : index
    %1276 = vector.load %arg17[%c160_462, %c0_463] : memref<192x192xf32, #tpu.memory_space<vmem>>, vector<8x192xf32>
    %1277 = vector.extract_strided_slice %1276 {offsets = [0, 0], sizes = [8, 128], strides = [1, 1]} : vector<8x192xf32> to vector<8x128xf32>
    %1278 = vector.extract_strided_slice %1275 {offsets = [0, 0], sizes = [8, 128], strides = [1, 1]} : vector<8x192xf32> to vector<8x128xf32>
    %1279 = arith.addf %1277, %1278 : vector<8x128xf32>
    %1280 = arith.negf %1279 : vector<8x128xf32>
    %1281 = math.exp %1280 : vector<8x128xf32>
    %cst_464 = arith.constant 1.000000e+00 : f32
    %1282 = vector.broadcast %cst_464 : f32 to vector<8x128xf32>
    %1283 = arith.addf %1282, %1281 : vector<8x128xf32>
    %1284 = arith.divf %1282, %1283 : vector<8x128xf32>
    %1285 = vector.extract_strided_slice %1284 {offsets = [0, 0], sizes = [8, 64], strides = [1, 1]} : vector<8x128xf32> to vector<8x64xf32>
    %1286 = vector.extract_strided_slice %1284 {offsets = [0, 64], sizes = [8, 64], strides = [1, 1]} : vector<8x128xf32> to vector<8x64xf32>
    %1287 = vector.extract_strided_slice %1276 {offsets = [0, 128], sizes = [8, 64], strides = [1, 1]} : vector<8x192xf32> to vector<8x64xf32>
    %1288 = vector.extract_strided_slice %1275 {offsets = [0, 128], sizes = [8, 64], strides = [1, 1]} : vector<8x192xf32> to vector<8x64xf32>
    %1289 = arith.addf %1288, %752 : vector<8x64xf32>
    %1290 = arith.mulf %1285, %1289 : vector<8x64xf32>
    %1291 = arith.addf %1287, %1290 : vector<8x64xf32>
    %1292 = math.tanh %1291 : vector<8x64xf32>
    %1293 = arith.subf %1269, %1292 : vector<8x64xf32>
    %1294 = arith.mulf %1286, %1293 : vector<8x64xf32>
    %1295 = arith.addf %1292, %1294 : vector<8x64xf32>
    %1296 = vector.extract_strided_slice %1295 {offsets = [0, 0], sizes = [8, 32], strides = [1, 1]} : vector<8x64xf32> to vector<8x32xf32>
    %c160_465 = arith.constant 160 : index
    %c0_466 = arith.constant 0 : index
    %1297 = vector.load %arg15[%c160_465, %c0_466] : memref<192x64xf32, #tpu.memory_space<vmem>>, vector<8x32xf32>
    tpu.vector_store %arg15[%c160_465, %c0_466], %1296 {strides = array<i32>} : memref<192x64xf32, #tpu.memory_space<vmem>>, vector<8x32xf32>,
    %1298 = vector.extract_strided_slice %1295 {offsets = [0, 32], sizes = [8, 32], strides = [1, 1]} : vector<8x64xf32> to vector<8x32xf32>
    %c24_467 = arith.constant 24 : index
    %c32_468 = arith.constant 32 : index
    %1299 = vector.load %arg15[%c24_467, %c32_468] : memref<192x64xf32, #tpu.memory_space<vmem>>, vector<8x32xf32>
    tpu.vector_store %arg15[%c24_467, %c32_468], %1298 {strides = array<i32>} : memref<192x64xf32, #tpu.memory_space<vmem>>, vector<8x32xf32>,
    %1300 = arith.truncf %1295 : vector<8x64xf32> to vector<8x64xbf16>
    %cst_469 = arith.constant dense<0.000000e+00> : vector<8x192xf32>
    %1301 = tpu.matmul %1300, %749, %cst_469 {dimension_numbers = #tpu.dot_dimension_numbers<[1], [0], [0], [1], [0, 0, 1, 1], [], []>} : vector<8x64xbf16>, vector<64x192xbf16>, vector<8x192xf32> -> vector<8x192xf32>
    %c168_470 = arith.constant 168 : index
    %c0_471 = arith.constant 0 : index
    %1302 = vector.load %arg17[%c168_470, %c0_471] : memref<192x192xf32, #tpu.memory_space<vmem>>, vector<8x192xf32>
    %1303 = vector.extract_strided_slice %1302 {offsets = [0, 0], sizes = [8, 128], strides = [1, 1]} : vector<8x192xf32> to vector<8x128xf32>
    %1304 = vector.extract_strided_slice %1301 {offsets = [0, 0], sizes = [8, 128], strides = [1, 1]} : vector<8x192xf32> to vector<8x128xf32>
    %1305 = arith.addf %1303, %1304 : vector<8x128xf32>
    %1306 = arith.negf %1305 : vector<8x128xf32>
    %1307 = math.exp %1306 : vector<8x128xf32>
    %cst_472 = arith.constant 1.000000e+00 : f32
    %1308 = vector.broadcast %cst_472 : f32 to vector<8x128xf32>
    %1309 = arith.addf %1308, %1307 : vector<8x128xf32>
    %1310 = arith.divf %1308, %1309 : vector<8x128xf32>
    %1311 = vector.extract_strided_slice %1310 {offsets = [0, 0], sizes = [8, 64], strides = [1, 1]} : vector<8x128xf32> to vector<8x64xf32>
    %1312 = vector.extract_strided_slice %1310 {offsets = [0, 64], sizes = [8, 64], strides = [1, 1]} : vector<8x128xf32> to vector<8x64xf32>
    %1313 = vector.extract_strided_slice %1302 {offsets = [0, 128], sizes = [8, 64], strides = [1, 1]} : vector<8x192xf32> to vector<8x64xf32>
    %1314 = vector.extract_strided_slice %1301 {offsets = [0, 128], sizes = [8, 64], strides = [1, 1]} : vector<8x192xf32> to vector<8x64xf32>
    %1315 = arith.addf %1314, %752 : vector<8x64xf32>
    %1316 = arith.mulf %1311, %1315 : vector<8x64xf32>
    %1317 = arith.addf %1313, %1316 : vector<8x64xf32>
    %1318 = math.tanh %1317 : vector<8x64xf32>
    %1319 = arith.subf %1295, %1318 : vector<8x64xf32>
    %1320 = arith.mulf %1312, %1319 : vector<8x64xf32>
    %1321 = arith.addf %1318, %1320 : vector<8x64xf32>
    %1322 = vector.extract_strided_slice %1321 {offsets = [0, 0], sizes = [8, 32], strides = [1, 1]} : vector<8x64xf32> to vector<8x32xf32>
    %c168_473 = arith.constant 168 : index
    %c0_474 = arith.constant 0 : index
    %1323 = vector.load %arg15[%c168_473, %c0_474] : memref<192x64xf32, #tpu.memory_space<vmem>>, vector<8x32xf32>
    tpu.vector_store %arg15[%c168_473, %c0_474], %1322 {strides = array<i32>} : memref<192x64xf32, #tpu.memory_space<vmem>>, vector<8x32xf32>,
    %1324 = vector.extract_strided_slice %1321 {offsets = [0, 32], sizes = [8, 32], strides = [1, 1]} : vector<8x64xf32> to vector<8x32xf32>
    %c16_475 = arith.constant 16 : index
    %c32_476 = arith.constant 32 : index
    %1325 = vector.load %arg15[%c16_475, %c32_476] : memref<192x64xf32, #tpu.memory_space<vmem>>, vector<8x32xf32>
    tpu.vector_store %arg15[%c16_475, %c32_476], %1324 {strides = array<i32>} : memref<192x64xf32, #tpu.memory_space<vmem>>, vector<8x32xf32>,
    %1326 = arith.truncf %1321 : vector<8x64xf32> to vector<8x64xbf16>
    %cst_477 = arith.constant dense<0.000000e+00> : vector<8x192xf32>
    %1327 = tpu.matmul %1326, %749, %cst_477 {dimension_numbers = #tpu.dot_dimension_numbers<[1], [0], [0], [1], [0, 0, 1, 1], [], []>} : vector<8x64xbf16>, vector<64x192xbf16>, vector<8x192xf32> -> vector<8x192xf32>
    %c176_478 = arith.constant 176 : index
    %c0_479 = arith.constant 0 : index
    %1328 = vector.load %arg17[%c176_478, %c0_479] : memref<192x192xf32, #tpu.memory_space<vmem>>, vector<8x192xf32>
    %1329 = vector.extract_strided_slice %1328 {offsets = [0, 0], sizes = [8, 128], strides = [1, 1]} : vector<8x192xf32> to vector<8x128xf32>
    %1330 = vector.extract_strided_slice %1327 {offsets = [0, 0], sizes = [8, 128], strides = [1, 1]} : vector<8x192xf32> to vector<8x128xf32>
    %1331 = arith.addf %1329, %1330 : vector<8x128xf32>
    %1332 = arith.negf %1331 : vector<8x128xf32>
    %1333 = math.exp %1332 : vector<8x128xf32>
    %cst_480 = arith.constant 1.000000e+00 : f32
    %1334 = vector.broadcast %cst_480 : f32 to vector<8x128xf32>
    %1335 = arith.addf %1334, %1333 : vector<8x128xf32>
    %1336 = arith.divf %1334, %1335 : vector<8x128xf32>
    %1337 = vector.extract_strided_slice %1336 {offsets = [0, 0], sizes = [8, 64], strides = [1, 1]} : vector<8x128xf32> to vector<8x64xf32>
    %1338 = vector.extract_strided_slice %1336 {offsets = [0, 64], sizes = [8, 64], strides = [1, 1]} : vector<8x128xf32> to vector<8x64xf32>
    %1339 = vector.extract_strided_slice %1328 {offsets = [0, 128], sizes = [8, 64], strides = [1, 1]} : vector<8x192xf32> to vector<8x64xf32>
    %1340 = vector.extract_strided_slice %1327 {offsets = [0, 128], sizes = [8, 64], strides = [1, 1]} : vector<8x192xf32> to vector<8x64xf32>
    %1341 = arith.addf %1340, %752 : vector<8x64xf32>
    %1342 = arith.mulf %1337, %1341 : vector<8x64xf32>
    %1343 = arith.addf %1339, %1342 : vector<8x64xf32>
    %1344 = math.tanh %1343 : vector<8x64xf32>
    %1345 = arith.subf %1321, %1344 : vector<8x64xf32>
    %1346 = arith.mulf %1338, %1345 : vector<8x64xf32>
    %1347 = arith.addf %1344, %1346 : vector<8x64xf32>
    %1348 = vector.extract_strided_slice %1347 {offsets = [0, 0], sizes = [8, 32], strides = [1, 1]} : vector<8x64xf32> to vector<8x32xf32>
    %c176_481 = arith.constant 176 : index
    %c0_482 = arith.constant 0 : index
    %1349 = vector.load %arg15[%c176_481, %c0_482] : memref<192x64xf32, #tpu.memory_space<vmem>>, vector<8x32xf32>
    tpu.vector_store %arg15[%c176_481, %c0_482], %1348 {strides = array<i32>} : memref<192x64xf32, #tpu.memory_space<vmem>>, vector<8x32xf32>,
    %1350 = vector.extract_strided_slice %1347 {offsets = [0, 32], sizes = [8, 32], strides = [1, 1]} : vector<8x64xf32> to vector<8x32xf32>
    %c8_483 = arith.constant 8 : index
    %c32_484 = arith.constant 32 : index
    %1351 = vector.load %arg15[%c8_483, %c32_484] : memref<192x64xf32, #tpu.memory_space<vmem>>, vector<8x32xf32>
    tpu.vector_store %arg15[%c8_483, %c32_484], %1350 {strides = array<i32>} : memref<192x64xf32, #tpu.memory_space<vmem>>, vector<8x32xf32>,
    %1352 = arith.truncf %1347 : vector<8x64xf32> to vector<8x64xbf16>
    %cst_485 = arith.constant dense<0.000000e+00> : vector<8x192xf32>
    %1353 = tpu.matmul %1352, %749, %cst_485 {dimension_numbers = #tpu.dot_dimension_numbers<[1], [0], [0], [1], [0, 0, 1, 1], [], []>} : vector<8x64xbf16>, vector<64x192xbf16>, vector<8x192xf32> -> vector<8x192xf32>
    %c184_486 = arith.constant 184 : index
    %c0_487 = arith.constant 0 : index
    %1354 = vector.load %arg17[%c184_486, %c0_487] : memref<192x192xf32, #tpu.memory_space<vmem>>, vector<8x192xf32>
    %1355 = vector.extract_strided_slice %1354 {offsets = [0, 0], sizes = [8, 128], strides = [1, 1]} : vector<8x192xf32> to vector<8x128xf32>
    %1356 = vector.extract_strided_slice %1353 {offsets = [0, 0], sizes = [8, 128], strides = [1, 1]} : vector<8x192xf32> to vector<8x128xf32>
    %1357 = arith.addf %1355, %1356 : vector<8x128xf32>
    %1358 = arith.negf %1357 : vector<8x128xf32>
    %1359 = math.exp %1358 : vector<8x128xf32>
    %cst_488 = arith.constant 1.000000e+00 : f32
    %1360 = vector.broadcast %cst_488 : f32 to vector<8x128xf32>
    %1361 = arith.addf %1360, %1359 : vector<8x128xf32>
    %1362 = arith.divf %1360, %1361 : vector<8x128xf32>
    %1363 = vector.extract_strided_slice %1362 {offsets = [0, 0], sizes = [8, 64], strides = [1, 1]} : vector<8x128xf32> to vector<8x64xf32>
    %1364 = vector.extract_strided_slice %1362 {offsets = [0, 64], sizes = [8, 64], strides = [1, 1]} : vector<8x128xf32> to vector<8x64xf32>
    %1365 = vector.extract_strided_slice %1354 {offsets = [0, 128], sizes = [8, 64], strides = [1, 1]} : vector<8x192xf32> to vector<8x64xf32>
    %1366 = vector.extract_strided_slice %1353 {offsets = [0, 128], sizes = [8, 64], strides = [1, 1]} : vector<8x192xf32> to vector<8x64xf32>
    %1367 = arith.addf %1366, %752 : vector<8x64xf32>
    %1368 = arith.mulf %1363, %1367 : vector<8x64xf32>
    %1369 = arith.addf %1365, %1368 : vector<8x64xf32>
    %1370 = math.tanh %1369 : vector<8x64xf32>
    %1371 = arith.subf %1347, %1370 : vector<8x64xf32>
    %1372 = arith.mulf %1364, %1371 : vector<8x64xf32>
    %1373 = arith.addf %1370, %1372 : vector<8x64xf32>
    %1374 = vector.extract_strided_slice %1373 {offsets = [0, 0], sizes = [8, 32], strides = [1, 1]} : vector<8x64xf32> to vector<8x32xf32>
    %c184_489 = arith.constant 184 : index
    %c0_490 = arith.constant 0 : index
    %1375 = vector.load %arg15[%c184_489, %c0_490] : memref<192x64xf32, #tpu.memory_space<vmem>>, vector<8x32xf32>
    tpu.vector_store %arg15[%c184_489, %c0_490], %1374 {strides = array<i32>} : memref<192x64xf32, #tpu.memory_space<vmem>>, vector<8x32xf32>,
    %1376 = vector.extract_strided_slice %1373 {offsets = [0, 32], sizes = [8, 32], strides = [1, 1]} : vector<8x64xf32> to vector<8x32xf32>
    %c0_491 = arith.constant 0 : index
    %c32_492 = arith.constant 32 : index
    %1377 = vector.load %arg15[%c0_491, %c32_492] : memref<192x64xf32, #tpu.memory_space<vmem>>, vector<8x32xf32>
    tpu.vector_store %arg15[%c0_491, %c32_492], %1376 {strides = array<i32>} : memref<192x64xf32, #tpu.memory_space<vmem>>, vector<8x32xf32>,
    %c32_493 = arith.constant 32 : index
    %c0_494 = arith.constant 0 : index
    %1378 = vector.load %arg15[%c32_493, %c0_494] : memref<192x64xf32, #tpu.memory_space<vmem>>, vector<160x64xf32>
    %1379 = arith.truncf %1378 : vector<160x64xf32> to vector<160x64xbf16>
    %c0_495 = arith.constant 0 : index
    %c0_496 = arith.constant 0 : index
    %1380 = vector.load %arg12[%c0_495, %c0_496] : memref<64x128xbf16, #tpu.memory_space<vmem>>, vector<64x128xbf16>
    %cst_497 = arith.constant dense<0.000000e+00> : vector<160x128xf32>
    %1381 = tpu.matmul %1379, %1380, %cst_497 {dimension_numbers = #tpu.dot_dimension_numbers<[1], [0], [0], [1], [0, 0, 1, 1], [], []>} : vector<160x64xbf16>, vector<64x128xbf16>, vector<160x128xf32> -> vector<160x128xf32>
    %c0_498 = arith.constant 0 : index
    %c0_499 = arith.constant 0 : index
    %1382 = vector.load %arg13[%c0_498, %c0_499] : memref<1x128xf32, #tpu.memory_space<vmem>>, vector<1x128xf32>
    %1383 = vector.broadcast %1382 : vector<1x128xf32> to vector<160x128xf32>
    %1384 = arith.addf %1381, %1383 : vector<160x128xf32>
    %c0_500 = arith.constant 0 : index
    %c0_501 = arith.constant 0 : index
    %1385 = vector.load %arg14[%c0_500, %c0_501] : memref<160x128xf32, #tpu.memory_space<vmem>>, vector<160x128xf32>
    tpu.vector_store %arg14[%c0_500, %c0_501], %1384 {strides = array<i32>} : memref<160x128xf32, #tpu.memory_space<vmem>>, vector<160x128xf32>,
    return
  }
}

</mosaic_0001>

<bundles_post_ra>
// kernel: bigru_forward.1
= control target key start
LH: loop header
LB: loop body
LE: loop exit
PB: predicated region body
PF: predicated region fallthrough
CT: control target
= control target key end

     0   :  { %vm200_vm0 = vcmask 1043456   ;;  %v5851_v1 = vmov 0   ;;  %vm163_vm1 = vcmask 64512   ;;  %v622_v57 = vlaneseq  ;;  %s5852_s27 = smov 64   ;;  %s7603_s3 = inlined_call_operand.vmem [shape: bf16[8,192], index: 3, kind: input, shape index: {}]   ;;  %s7604_s1 = inlined_call_operand.vmem [shape: bf16[192,8], index: 1, kind: input, shape index: {}]   ;;  %s7605_s5 = inlined_call_operand.vmem [shape: bf16[64,192], index: 5, kind: input, shape index: {}]   ;;  %s7606_s2 = inlined_call_operand.vmem [shape: bf16[8,192], index: 2, kind: input, shape index: {}]   ;;  %s7607_s0 = inlined_call_operand.vmem [shape: bf16[192,8], index: 0, kind: input, shape index: {}]   ;;  %s7608_s4 = inlined_call_operand.vmem [shape: f32[1,192], index: 4, kind: input, shape index: {}]   ;;  %s7609_s6 = inlined_call_operand.vmem [shape: f32[1,64], index: 6, kind: input, shape index: {}]   ;;  %s7610_s8 = inlined_call_operand.vmem [shape: bf16[64,192], index: 8, kind: input, shape index: {}]   ;;  %s7611_s7 = inlined_call_operand.vmem [shape: bf16[64,192], index: 7, kind: input, shape index: {}]   ;;  %s7612_s10 = inlined_call_operand.vmem [shape: bf16[64,192], index: 10, kind: input, shape index: {}]   ;;  %s7613_s9 = inlined_call_operand.vmem [shape: f32[1,192], index: 9, kind: input, shape index: {}]   ;;  %s7614_s11 = inlined_call_operand.vmem [shape: f32[1,64], index: 11, kind: input, shape index: {}]   ;;  %s7615_s12 = inlined_call_operand.vmem [shape: bf16[64,128], index: 12, kind: input, shape index: {}]   ;;  %s7616_s13 = inlined_call_operand.vmem [shape: f32[1,128], index: 13, kind: input, shape index: {}]   ;;  %s7617_s14 = inlined_call_operand.vmem [shape: f32[160,128], index: 14, kind: output, shape index: {}]  }
   0x1   :  { %v97_v0 = vld [vmem:[%s7603_s3] sm:$0xff]  ;;  %239 = vmatprep.mubr.bf16.mxu0 %v5851_v1  ;;  %329 = vmatprep.mubr.bf16.mxu1 %v5851_v1  ;;  %v5452_v6 = vld [vmem:[%s7604_s1 + $0x48] sm:$0xff]   ;;  %v5945_v7 = vld [vmem:[%s7605_s5 + $0x34] ss:$8 sps:$4 sm:$0xff]   ;;  %vm681_vm2 = vcmask 523264   ;;  %vm852_vm3 = vcmask 261120  }
   0x2   :  { %v5195_v2 = vcombine.high %v97_v0, %v97_v0  ;;  %v5194_v3 = vcombine.low %v97_v0, %v97_v0  ;;  %v5451_v4 = vld [vmem:[%s7604_s1] sm:$0xff]   ;;  %v5950_v8 = vld [vmem:[%s7605_s5 + $0x30] ss:$8 sps:$4 sm:$0xff]   ;;  %v5456_v12 = vld [vmem:[%s7604_s1 + $0x8] sm:$0xff]   ;;  %v6151_v62 = vshrl.u32 %v622_v57, 7  ;;  %vm854_vm4 = vcmask 523520  }
   0x3   :  { %v5960_v9 = vld [vmem:[%s7605_s5 + $0x24] ss:$8 sps:$4 sm:$0xff]   ;;  %v5965_v10 = vld [vmem:[%s7605_s5 + $0x20] ss:$8 sps:$4 sm:$0xff]   ;;  %v5457_v15 = vld [vmem:[%s7604_s1 + $0x50] sm:$0xff]  }
   0x4   :  { %5196 = vmatprep.subr.msk.bf16.mxu0 %vm200_vm0, %v5195_v2  ;;  %5445 = vmatprep.subr.msk.bf16.mxu1 %vm200_vm0, %v5195_v2  ;;  %v202_v5 = vsel %vm200_vm0, %v5194_v3, 0  ;;  %v96_v11 = vld [vmem:[%s7606_s2] sm:$0xff]  ;;  %v5984_v17 = vld [vmem:[%s7605_s5 + $0x14] ss:$8 sps:$4 sm:$0xff]   ;;  %v5989_v18 = vld [vmem:[%s7605_s5 + $0x10] ss:$8 sps:$4 sm:$0xff]  }
   0x5   :  { %222 = vmatpush1.bf16.msra.mxu0 %v202_v5  ;;  %5446 = vmatpush1.bf16.msra.mxu1 %v202_v5  ;;  %v5222_v13 = vcombine.high %v96_v11, %v96_v11  ;;  %v5221_v14 = vcombine.low %v96_v11, %v96_v11  ;;  %v5458_v19 = vld [vmem:[%s7604_s1 + $0x10] sm:$0xff]   ;;  %v5459_v20 = vld [vmem:[%s7604_s1 + $0x58] sm:$0xff]   ;;  %v6007_v21 = vld [vmem:[%s7605_s5 + $0x4] ss:$8 sps:$4 sm:$0xff]   ;;  %v7618_v2 = vsub.s32 1, %v6151_v62 }
   0x6   :  { %795 = vmatprep.subr.bf16.mxu0 %v5945_v7  ;;  %v6012_v22 = vld [vmem:[%s7605_s5] ss:$8 sps:$4 sm:$0xff]   ;;  %v5465_v23 = vld [vmem:[%s7604_s1 + $0x18] sm:$0xff]   ;;  %v5473_v28 = vld [vmem:[%s7607_s0 + $0x10] sm:$0xff]  }
   0x7   :  { %5223 = vmatprep.subr.msk.bf16.mxu1 %vm200_vm0, %v5222_v13  ;;  %v462_v16 = vsel %vm200_vm0, %v5221_v14, 0  ;;  %v5466_v24 = vld [vmem:[%s7607_s0] sm:$0xff]   ;;  %v5468_v26 = vld [vmem:[%s7607_s0 + $0x8] sm:$0xff]   ;;  %v5474_v29 = vld [vmem:[%s7604_s1 + $0x30] sm:$0xff]  }
   0x8   :  { %5197 = vmatmul.mubr.msk.bf16.vlgmr.msra.gmra.mxu0 %vm163_vm1, %v5451_v4  ;;  %5206 = vmatmul.mubr.msk.bf16.vlgmr.msra.gmra.mxu1 %vm163_vm1, %v5452_v6  ;;  %v5467_v25 = vld [vmem:[%s7604_s1 + $0x20] sm:$0xff]   ;;  %v5472_v27 = vld [vmem:[%s7604_s1 + $0x28] sm:$0xff]   ;;  %v5475_v30 = vld [vmem:[%s7607_s0 + $0x18] sm:$0xff]  }
   0x9   :  { %796 = vmatpush1.bf16.msra.mxu0 %v5950_v8  ;;  %249 = vmatprep.mubr.bf16.mxu0 %v5851_v1  ;;  %v5479_v31 = vld [vmem:[%s7604_s1 + $0x38] sm:$0xff]   ;;  %v5480_v32 = vld [vmem:[%s7607_s0 + $0x20] sm:$0xff]   ;;  %v5482_v34 = vld [vmem:[%s7607_s0 + $0x28] sm:$0xff]  }
   0xa   :  { %339 = vmatprep.mubr.bf16.mxu1 %v5851_v1  ;;  %797 = vmatprep.subr.bf16.mxu0 %v5960_v9  ;;  %v5481_v33 = vld [vmem:[%s7604_s1 + $0x40] sm:$0xff]   ;;  %v5483_v35 = vld [vmem:[%s7607_s0 + $0x30] sm:$0xff]   ;;  %v5484_v36 = vld [vmem:[%s7607_s0 + $0x38] sm:$0xff]  }
   0xb   :  { %482 = vmatpush1.bf16.msra.mxu1 %v462_v16  ;;  %v5485_v37 = vld [vmem:[%s7607_s0 + $0x40] sm:$0xff]   ;;  %v5486_v38 = vld [vmem:[%s7607_s0 + $0x48] sm:$0xff]   ;;  %v5487_v39 = vld [vmem:[%s7607_s0 + $0x50] sm:$0xff]  }
   0xc   :  { %870 = vmatprep.subr.bf16.mxu1 %v5945_v7  ;;  %v5488_v40 = vld [vmem:[%s7607_s0 + $0x58] sm:$0xff]   ;;  %v6163_v11 = vld [vmem:[%s7608_s4] sm:$0x3] }
   0xd   :  { %798 = vmatpush1.bf16.msra.mxu0 %v5965_v10 }
   0xe   :  { %799 = vmatprep.subr.bf16.mxu0 %v5984_v17 }
  0x10   :  { %5198 = vmatmul.mubr.msk.bf16.gmra.mxu0 %vm163_vm1, %v5456_v12  ;;  %5207 = vmatmul.mubr.msk.bf16.gmra.mxu1 %vm163_vm1, %v5457_v15  ;;  %v6168_v12 = vrot.slane %v6163_v11, %v7618_v2 }
  0x11   :  { %259 = vmatprep.mubr.bf16.mxu0 %v5851_v1  ;;  %349 = vmatprep.mubr.bf16.mxu1 %v5851_v1 }
  0x12   :  { %800 = vmatpush1.bf16.msra.mxu0 %v5989_v18 }
  0x13   :  { %801 = vmatprep.subr.bf16.mxu0 %v6007_v21 }
  0x16   :  { %802 = vmatpush1.bf16.msra.mxu0 %v6012_v22 }
  0x17   :  { %943 = vmatprep.subr.bf16.mxu0 %v5945_v7 }
  0x18   :  { %5199 = vmatmul.mubr.msk.bf16.gmra.mxu0 %vm163_vm1, %v5458_v19  ;;  %5208 = vmatmul.mubr.msk.bf16.gmra.mxu1 %vm163_vm1, %v5459_v20 }
  0x19   :  { %269 = vmatprep.mubr.bf16.mxu0 %v5851_v1  ;;  %499 = vmatprep.mubr.bf16.mxu1 %v5851_v1 }
  0x20   :  { %5200 = vmatmul.mubr.msk.bf16.gmra.mxu0 %vm163_vm1, %v5465_v23  ;;  %5224 = vmatmul.mubr.msk.bf16.vlgmr.msra.gmra.mxu1 %vm163_vm1, %v5466_v24 }
  0x21   :  { %279 = vmatprep.mubr.bf16.mxu0 %v5851_v1  ;;  %509 = vmatprep.mubr.bf16.mxu1 %v5851_v1 }
  0x22   :  { %871 = vmatpush1.bf16.msra.mxu1 %v5950_v8 }
  0x23   :  { %872 = vmatprep.subr.bf16.mxu1 %v5960_v9 }
  0x26   :  { %873 = vmatpush1.bf16.msra.mxu1 %v5965_v10 }
  0x27   :  { %874 = vmatprep.subr.bf16.mxu1 %v5984_v17 }
  0x28   :  { %5201 = vmatmul.mubr.msk.bf16.gmra.mxu0 %vm163_vm1, %v5467_v25  ;;  %5225 = vmatmul.mubr.msk.bf16.gmra.mxu1 %vm163_vm1, %v5468_v26 }
  0x29   :  { %289 = vmatprep.mubr.bf16.mxu0 %v5851_v1  ;;  %519 = vmatprep.mubr.bf16.mxu1 %v5851_v1 }
  0x2a   :  { %875 = vmatpush1.bf16.msra.mxu1 %v5989_v18 }
  0x2b   :  { %876 = vmatprep.subr.bf16.mxu1 %v6007_v21 }
  0x2e   :  { %877 = vmatpush1.bf16.msra.mxu1 %v6012_v22 }
  0x2f   :  { %1016 = vmatprep.subr.bf16.mxu1 %v5945_v7 }
  0x30   :  { %5202 = vmatmul.mubr.msk.bf16.gmra.mxu0 %vm163_vm1, %v5472_v27  ;;  %5226 = vmatmul.mubr.msk.bf16.gmra.mxu1 %vm163_vm1, %v5473_v28 }
  0x31   :  { %299 = vmatprep.mubr.bf16.mxu0 %v5851_v1  ;;  %529 = vmatprep.mubr.bf16.mxu1 %v5851_v1 }
  0x38   :  { %5203 = vmatmul.mubr.msk.bf16.gmra.mxu0 %vm163_vm1, %v5474_v29  ;;  %5227 = vmatmul.mubr.msk.bf16.gmra.mxu1 %vm163_vm1, %v5475_v30 }
  0x39   :  { %309 = vmatprep.mubr.bf16.mxu0 %v5851_v1  ;;  %539 = vmatprep.mubr.bf16.mxu1 %v5851_v1 }
  0x40   :  { %5204 = vmatmul.mubr.msk.bf16.gmra.mxu0 %vm163_vm1, %v5479_v31  ;;  %5228 = vmatmul.mubr.msk.bf16.gmra.mxu1 %vm163_vm1, %v5480_v32 }
  0x41   :  { %319 = vmatprep.mubr.bf16.mxu0 %v5851_v1  ;;  %549 = vmatprep.mubr.bf16.mxu1 %v5851_v1 }
  0x48   :  { %5205 = vmatmul.mubr.msk.bf16.gmra.mxu0 %vm163_vm1, %v5481_v33  ;;  %5229 = vmatmul.mubr.msk.bf16.gmra.mxu1 %vm163_vm1, %v5482_v34 }
  0x49   :  { %559 = vmatprep.mubr.bf16.mxu1 %v5851_v1  ;;  %819 = vmatprep.mubr.bf16.mxu0 %v5851_v1 }
  0x50   :  { %5230 = vmatmul.mubr.msk.bf16.gmra.mxu1 %vm163_vm1, %v5483_v35  ;;  %820 = vmatmul.mubr.bf16.vlgmr.msra.gmra.mxu0 %v5851_v1 }
  0x51   :  { %569 = vmatprep.mubr.bf16.mxu1 %v5851_v1  ;;  %944 = vmatpush1.bf16.msra.mxu0 %v5950_v8 }
  0x52   :  { %945 = vmatprep.subr.bf16.mxu0 %v5960_v9  ;;  %967 = vmatprep.mubr.bf16.mxu0 %v5851_v1 }
  0x55   :  { %946 = vmatpush1.bf16.msra.mxu0 %v5965_v10 }
  0x56   :  { %947 = vmatprep.subr.bf16.mxu0 %v5984_v17 }
  0x58   :  { %5231 = vmatmul.mubr.msk.bf16.gmra.mxu1 %vm163_vm1, %v5484_v36 }
  0x59   :  { %579 = vmatprep.mubr.bf16.mxu1 %v5851_v1  ;;  %948 = vmatpush1.bf16.msra.mxu0 %v5989_v18 }
  0x5a   :  { %949 = vmatprep.subr.bf16.mxu0 %v6007_v21 }
  0x5d   :  { %950 = vmatpush1.bf16.msra.mxu0 %v6012_v22 }
  0x5e   :  { %1089 = vmatprep.subr.bf16.mxu0 %v5945_v7 }
  0x60   :  { %5232 = vmatmul.mubr.msk.bf16.gmra.mxu1 %vm163_vm1, %v5485_v37 }
  0x61   :  { %589 = vmatprep.mubr.bf16.mxu1 %v5851_v1 }
  0x68   :  { %5233 = vmatmul.mubr.msk.bf16.gmra.mxu1 %vm163_vm1, %v5486_v38 }
  0x69   :  { %599 = vmatprep.mubr.bf16.mxu1 %v5851_v1 }
  0x70   :  { %5234 = vmatmul.mubr.msk.bf16.gmra.mxu1 %vm163_vm1, %v5487_v39 }
  0x71   :  { %609 = vmatprep.mubr.bf16.mxu1 %v5851_v1 }
  0x78   :  { %5235 = vmatmul.mubr.msk.bf16.gmra.mxu1 %vm163_vm1, %v5488_v40 }
  0x79   :  { %894 = vmatprep.mubr.bf16.mxu1 %v5851_v1 }
  0xc8   :  { %v6129_v41 = vpop.f32.mrf.mxu0  ;;  %v6131_v42 = vpop.f32.mrf.mxu1 }
  0xca   :  { %v243_v43 = vpop.f32.mrf.mxu0  ;;  %v6133_v44 = vpop.f32.mrf.mxu1 }
  0xcc   :  { %v245_v45 = vpop.f32.mrf.mxu0  ;;  %v6135_v46 = vpop.f32.mrf.mxu1 }
  0xce   :  { %v247_v47 = vpop.f32.mrf.mxu0  ;;  %v6137_v48 = vpop.f32.mrf.mxu1 }
  0xd0   :  { %v251_v49 = vpop.f32.mrf.mxu0  ;;  %v6139_v50 = vpop.f32.mrf.mxu1 }
  0xd2   :  { %v253_v51 = vpop.f32.mrf.mxu0  ;;  %v6141_v52 = vpop.f32.mrf.mxu1 }
  0xd4   :  { %v255_v53 = vpop.f32.mrf.mxu0  ;;  %v6143_v54 = vpop.f32.mrf.mxu1 }
  0xd6   :  { %v257_v55 = vpop.f32.mrf.mxu0  ;;  %v6145_v56 = vpop.f32.mrf.mxu1 }
  0xd8   :  { %v261_v58 = vpop.f32.mrf.mxu0  ;;  %v6147_v59 = vpop.f32.mrf.mxu1 }
  0xda   :  { %v263_v60 = vpop.f32.mrf.mxu0  ;;  %v6149_v61 = vpop.f32.mrf.mxu1 }
  0xdc   :  { %v265_v63 = vpop.f32.mrf.mxu0  ;;  %v6153_v0 = vpop.f32.mrf.mxu1 }
  0xde   :  { %v267_v3 = vpop.f32.mrf.mxu0  ;;  %v6156_v4 = vpop.f32.mrf.mxu1 }
  0xe0   :  { %v271_v5 = vpop.f32.mrf.mxu0  ;;  %v6158_v6 = vpop.f32.mrf.mxu1 }
  0xe2   :  { %v273_v13 = vpop.f32.mrf.mxu0  ;;  %v503_v14 = vpop.f32.mrf.mxu1 }
  0xe3   :  { %v504_v15 = vadd.f32 %v503_v14, %v243_v43 }
  0xe4   :  { %v275_v16 = vpop.f32.mrf.mxu0  ;;  %v505_v19 = vpop.f32.mrf.mxu1 }
  0xe5   :  { %v633_v20 = vadd.f32 %v6168_v12, %v504_v15  ;;  %v6171_v23 = vadd.f32 %v505_v19, %v245_v45 }
  0xe6   :  { %v277_v24 = vpop.f32.mrf.mxu0  ;;  %v507_v25 = vpop.f32.mrf.mxu1 }
  0xe7   :  { %682 = vst.msk [vmem:[#allocation4 + $0x8] sm:$0xff] %vm681_vm2, %v633_v20  ;;  %v508_v26 = vadd.f32 %v507_v25, %v247_v47 }
  0xe8   :  { %v281_v27 = vpop.f32.mrf.mxu0  ;;  %v511_v28 = vpop.f32.mrf.mxu1 }
  0xe9   :  { %v635_v29 = vadd.f32 %v6168_v12, %v508_v26  ;;  %v6175_v30 = vadd.f32 %v511_v28, %v251_v49 }
  0xea   :  { %v283_v31 = vpop.f32.mrf.mxu0  ;;  %v513_v32 = vpop.f32.mrf.mxu1 }
  0xeb   :  { %684 = vst.msk [vmem:[#allocation4 + $0x18] sm:$0xff] %vm681_vm2, %v635_v29  ;;  %v514_v33 = vadd.f32 %v513_v32, %v253_v51 }
  0xec   :  { %v285_v34 = vpop.f32.mrf.mxu0  ;;  %v515_v35 = vpop.f32.mrf.mxu1 }
  0xed   :  { %v637_v36 = vadd.f32 %v6168_v12, %v514_v33  ;;  %v6179_v37 = vadd.f32 %v515_v35, %v255_v53 }
  0xee   :  { %v287_v38 = vpop.f32.mrf.mxu0  ;;  %v517_v39 = vpop.f32.mrf.mxu1 }
  0xef   :  { %686 = vst.msk [vmem:[#allocation4 + $0x28] sm:$0xff] %vm681_vm2, %v637_v36  ;;  %v518_v40 = vadd.f32 %v517_v39, %v257_v55 }
  0xf0   :  { %v291_v43 = vpop.f32.mrf.mxu0  ;;  %v521_v45 = vpop.f32.mrf.mxu1 }
  0xf1   :  { %v639_v47 = vadd.f32 %v6168_v12, %v518_v40  ;;  %v6183_v49 = vadd.f32 %v521_v45, %v261_v58 }
  0xf2   :  { %v293_v57 = vpop.f32.mrf.mxu0  ;;  %v523_v14 = vpop.f32.mrf.mxu1 }
  0xf3   :  { %688 = vst.msk [vmem:[#allocation4 + $0x38] sm:$0xff] %vm681_vm2, %v639_v47  ;;  %v524_v51 = vadd.f32 %v523_v14, %v263_v60 }
  0xf4   :  { %v295_v15 = vpop.f32.mrf.mxu0  ;;  %v525_v19 = vpop.f32.mrf.mxu1 }
  0xf5   :  { %v641_v53 = vadd.f32 %v6168_v12, %v524_v51  ;;  %v6187_v20 = vadd.f32 %v525_v19, %v265_v63 }
  0xf6   :  { %v297_v25 = vpop.f32.mrf.mxu0  ;;  %v527_v26 = vpop.f32.mrf.mxu1 }
  0xf7   :  { %690 = vst.msk [vmem:[#allocation4 + $0x48] sm:$0xff] %vm681_vm2, %v641_v53  ;;  %v528_v55 = vadd.f32 %v527_v26, %v267_v3 }
  0xf8   :  { %v301_v28 = vpop.f32.mrf.mxu0  ;;  %v531_v29 = vpop.f32.mrf.mxu1 }
  0xf9   :  { %v643_v58 = vadd.f32 %v6168_v12, %v528_v55  ;;  %v6191_v32 = vadd.f32 %v531_v29, %v271_v5 }
  0xfa   :  { %v303_v33 = vpop.f32.mrf.mxu0  ;;  %v533_v35 = vpop.f32.mrf.mxu1 }
  0xfb   :  { %692 = vst.msk [vmem:[#allocation4 + $0x58] sm:$0xff] %vm681_vm2, %v643_v58  ;;  %v534_v60 = vadd.f32 %v533_v35, %v273_v13 }
  0xfc   :  { %v305_v36 = vpop.f32.mrf.mxu0  ;;  %v535_v39 = vpop.f32.mrf.mxu1 }
  0xfd   :  { %v645_v63 = vadd.f32 %v6168_v12, %v534_v60  ;;  %v6195_v40 = vadd.f32 %v535_v39, %v275_v16  ;;  %v7619_v60 = vsub.s32 0, %v6151_v62 }
  0xfe   :  { %v6197_v45 = vpop.f32.mrf.mxu0  ;;  %v537_v3 = vpop.f32.mrf.mxu1 }
  0xff   :  { %694 = vst.msk [vmem:[#allocation4 + $0x68] sm:$0xff] %vm681_vm2, %v645_v63  ;;  %v538_v47 = vadd.f32 %v537_v3, %v277_v24 }
 0x100   :  { %v6200_v14 = vpop.f32.mrf.mxu0  ;;  %v541_v5 = vpop.f32.mrf.mxu1 }
 0x101   :  { %v647_v51 = vadd.f32 %v6168_v12, %v538_v47  ;;  %v6203_v19 = vadd.f32 %v541_v5, %v281_v27 }
 0x102   :  { %v6205_v13 = vpop.f32.mrf.mxu0  ;;  %v543_v53 = vpop.f32.mrf.mxu1 }
 0x103   :  { %696 = vst.msk [vmem:[#allocation4 + $0x78] sm:$0xff] %vm681_vm2, %v647_v51  ;;  %v544_v16 = vadd.f32 %v543_v53, %v283_v31  ;;  %v6227_v51 = vrot.slane %v6163_v11, %v7619_v60 }
 0x104   :  { %v6208_v26 = vpop.f32.mrf.mxu0  ;;  %v545_v55 = vpop.f32.mrf.mxu1 }
 0x105   :  { %v649_v29 = vadd.f32 %v6168_v12, %v544_v16  ;;  %v6211_v58 = vadd.f32 %v545_v55, %v285_v34  ;;  %v502_v34 = vadd.f32 %v6158_v6, %v6129_v41 }
 0x106   :  { %v6213_v24 = vpop.f32.mrf.mxu0  ;;  %v547_v35 = vpop.f32.mrf.mxu1 }
 0x107   :  { %698 = vst.msk [vmem:[#allocation4 + $0x88] sm:$0xff] %vm681_vm2, %v649_v29  ;;  %v548_v27 = vadd.f32 %v547_v35, %v287_v38 }
 0x108   :  { %v321_v39 = vpop.f32.mrf.mxu0  ;;  %v551_v63 = vpop.f32.mrf.mxu1 }
 0x109   :  { %v651_v3 = vadd.f32 %v6168_v12, %v548_v27  ;;  %v6218_v31 = vadd.f32 %v551_v63, %v291_v43  ;;  %v632_v27 = vadd.f32 %v6227_v51, %v502_v34 }
 0x10a   :  { %v6220_v47 = vpop.f32.mrf.mxu0  ;;  %v553_v5 = vpop.f32.mrf.mxu1 }
 0x10b   :  { %700 = vst.msk [vmem:[#allocation4 + $0x98] sm:$0xff] %vm681_vm2, %v651_v3  ;;  %v554_v38 = vadd.f32 %v553_v5, %v293_v57 }
 0x10c   :  { %v6230_v53 = vpop.f32.mrf.mxu0  ;;  %v555_v16 = vpop.f32.mrf.mxu1 }
 0x10d   :  { %v653_v43 = vadd.f32 %v6168_v12, %v554_v38  ;;  %v556_v55 = vadd.f32 %v555_v16, %v295_v15 }
 0x10e   :  { %v6233_v29 = vpop.f32.mrf.mxu0  ;;  %v557_v35 = vpop.f32.mrf.mxu1 }
 0x10f   :  { %702 = vst.msk [vmem:[#allocation4 + $0xa8] sm:$0xff] %vm681_vm2, %v653_v43  ;;  %v654_v41 = vadd.f32 %v6227_v51, %v556_v55  ;;  %v558_v6 = vadd.f32 %v557_v35, %v297_v25 }
 0x110   :  { %v561_v11 = vpop.f32.mrf.mxu1  ;;  %v821_v63 = vpop.f32.mrf.mxu0 }
 0x111   :  { %703 = vst [vmem:[#allocation4 + $0xb0] sm:$0xff] %v654_v41  ;;  %v655_v57 = vadd.f32 %v6168_v12, %v558_v6  ;;  %v562_v3 = vadd.f32 %v561_v11, %v301_v28  ;;  %v830_v5 = vadd.f32 %v821_v63, %v632_v27 }
 0x112   :  { %v563_v2 = vpop.f32.mrf.mxu1  ;;  %v6239_v38 = vpop.f32.mrf.mxu0 }
 0x113   :  { %704 = vst.msk [vmem:[#allocation4 + $0xb8] sm:$0xff] %vm681_vm2, %v655_v57  ;;  %v656_v15 = vadd.f32 %v6227_v51, %v562_v3  ;;  %v5245_v34 = vmul.f32 -1.442695, %v830_v5  ;;  %v564_v16 = vadd.f32 %v563_v2, %v303_v33 }
 0x114   :  { %v565_v43 = vpop.f32.mrf.mxu1  ;;  %v825_v60 = vpop.f32.mrf.mxu0 }
 0x115   :  { %705 = vst [vmem:[#allocation4 + $0xc0] sm:$0xff] %v656_v15  ;;  %5529 = vpow2.f32 %v5245_v34  ;;  %v657_v25 = vadd.f32 %v6168_v12, %v564_v16  ;;  %v566_v55 = vadd.f32 %v565_v43, %v305_v36 }
 0x116   :  { %v567_v35 = vpop.f32.mrf.mxu1  ;;  %v826_v41 = vpop.f32.mrf.mxu0 }
 0x117   :  { %706 = vst.msk [vmem:[#allocation4 + $0xc8] sm:$0xff] %vm681_vm2, %v657_v25  ;;  %v658_v28 = vadd.f32 %v6227_v51, %v566_v55  ;;  %v568_v27 = vadd.f32 %v567_v35, %v6197_v45 }
 0x118   :  { %v571_v6 = vpop.f32.mrf.mxu1 }
 0x119   :  { %707 = vst [vmem:[#allocation4 + $0xd0] sm:$0xff] %v658_v28  ;;  %v659_v11 = vadd.f32 %v6168_v12, %v568_v27  ;;  %v572_v2 = vadd.f32 %v571_v6, %v6200_v14 }
 0x11a   :  { %v573_v33 = vpop.f32.mrf.mxu1 }
 0x11b   :  { %708 = vst.msk [vmem:[#allocation4 + $0xd8] sm:$0xff] %vm681_vm2, %v659_v11  ;;  %v660_v60 = vadd.f32 %v6227_v51, %v572_v2  ;;  %v574_v36 = vadd.f32 %v573_v33, %v6205_v13 }
 0x11c   :  { %v575_v63 = vpop.f32.mrf.mxu1 }
 0x11d   :  { %709 = vst [vmem:[#allocation4 + $0xe0] sm:$0xff] %v660_v60  ;;  %v661_v57 = vadd.f32 %v6168_v12, %v574_v36  ;;  %v576_v3 = vadd.f32 %v575_v63, %v6208_v26 }
 0x11e   :  { %v577_v45 = vpop.f32.mrf.mxu1 }
 0x11f   :  { %710 = vst.msk [vmem:[#allocation4 + $0xe8] sm:$0xff] %vm681_vm2, %v661_v57  ;;  %v662_v5 = vadd.f32 %v6227_v51, %v576_v3  ;;  %v578_v14 = vadd.f32 %v577_v45, %v6213_v24 }
 0x120   :  { %v581_v15 = vpop.f32.mrf.mxu1 }
 0x121   :  { %711 = vst [vmem:[#allocation4 + $0xf0] sm:$0xff] %v662_v5  ;;  %v663_v34 = vadd.f32 %v6168_v12, %v578_v14  ;;  %v582_v16 = vadd.f32 %v581_v15, %v321_v39 }
 0x122   :  { %v5530_v43 = vpop.eup %5529  ;;  %v583_v13 = vpop.f32.mrf.mxu1 }
 0x123   :  { %v834_v25 = vadd.f32 1.0, %v5530_v43  ;;  %712 = vst.msk [vmem:[#allocation4 + $0xf8] sm:$0xff] %vm681_vm2, %v663_v34  ;;  %v664_v55 = vadd.f32 %v6227_v51, %v582_v16  ;;  %v584_v26 = vadd.f32 %v583_v13, %v6220_v47  ;;  %v829_v13 = vld [vmem:[#allocation4 + $0x8] sm:$0xff] }
 0x124   :  { %v585_v35 = vpop.f32.mrf.mxu1 }
 0x125   :  { %5531 = vrcp.f32 %v834_v25  ;;  %713 = vst [vmem:[#allocation4 + $0x100] sm:$0xff] %v664_v55  ;;  %v665_v41 = vadd.f32 %v6168_v12, %v584_v26  ;;  %v586_v24 = vadd.f32 %v585_v35, %v6230_v53 }
 0x126   :  { %v587_v28 = vpop.f32.mrf.mxu1 }
 0x127   :  { %714 = vst.msk [vmem:[#allocation4 + $0x108] sm:$0xff] %vm681_vm2, %v665_v41  ;;  %v666_v39 = vadd.f32 %v6227_v51, %v586_v24  ;;  %v588_v27 = vadd.f32 %v587_v28, %v6233_v29  ;;  %v6276_v29 = vld [vmem:[%s7609_s6] ss:$0 sm:$0xff] }
 0x128   :  { %v591_v6 = vpop.f32.mrf.mxu1 }
 0x129   :  { %715 = vst [vmem:[#allocation4 + $0x110] sm:$0xff] %v666_v39  ;;  %v667_v11 = vadd.f32 %v6168_v12, %v588_v27  ;;  %v592_v47 = vadd.f32 %v591_v6, %v6131_v42 }
 0x12a   :  { %v593_v2 = vpop.f32.mrf.mxu1 }
 0x12b   :  { %716 = vst.msk [vmem:[#allocation4 + $0x118] sm:$0xff] %vm681_vm2, %v667_v11  ;;  %v668_v33 = vadd.f32 %v6227_v51, %v592_v47  ;;  %v594_v53 = vadd.f32 %v593_v2, %v6133_v44  ;;  %v837_v44 = vadd.f32 %v6276_v29, %v6239_v38 }
 0x12c   :  { %v595_v60 = vpop.f32.mrf.mxu1 }
 0x12d   :  { %717 = vst [vmem:[#allocation4 + $0x120] sm:$0xff] %v668_v33  ;;  %v669_v36 = vadd.f32 %v6168_v12, %v594_v53  ;;  %v596_v63 = vadd.f32 %v595_v60, %v6135_v46 }
 0x12e   :  { %v597_v57 = vpop.f32.mrf.mxu1 }
 0x12f   :  { %718 = vst.msk [vmem:[#allocation4 + $0x128] sm:$0xff] %vm681_vm2, %v669_v36  ;;  %v670_v42 = vadd.f32 %v6227_v51, %v596_v63  ;;  %v598_v3 = vadd.f32 %v597_v57, %v6137_v48 }
 0x130   :  { %v601_v45 = vpop.f32.mrf.mxu1 }
 0x131   :  { %719 = vst [vmem:[#allocation4 + $0x130] sm:$0xff] %v670_v42  ;;  %v671_v5 = vadd.f32 %v6168_v12, %v598_v3  ;;  %v602_v46 = vadd.f32 %v601_v45, %v6139_v50 }
 0x132   :  { %v5532_v14 = vpop.eup %5531  ;;  %v603_v15 = vpop.f32.mrf.mxu1 }
 0x133   :  { %v838_v34 = vmul.f32 %v5532_v14, %v837_v44  ;;  %720 = vst.msk [vmem:[#allocation4 + $0x138] sm:$0xff] %vm681_vm2, %v671_v5  ;;  %v672_v16 = vadd.f32 %v6227_v51, %v602_v46  ;;  %v604_v43 = vadd.f32 %v603_v15, %v6141_v52 }
 0x134   :  { %v605_v48 = vpop.f32.mrf.mxu1 }
 0x135   :  { %v839_v25 = vadd.f32 %v838_v34, %v829_v13  ;;  %721 = vst [vmem:[#allocation4 + $0x140] sm:$0xff] %v672_v16  ;;  %v673_v38 = vadd.f32 %v6168_v12, %v604_v43  ;;  %v606_v55 = vadd.f32 %v605_v48, %v6143_v54  ;;  %v904_v16 = vld [vmem:[#allocation4 + $0x18] sm:$0xff] }
 0x136   :  { %v607_v26 = vpop.f32.mrf.mxu1 }
 0x137   :  { %5533 = vtanh.f32 %v839_v25  ;;  %722 = vst.msk [vmem:[#allocation4 + $0x148] sm:$0xff] %vm681_vm2, %v673_v38  ;;  %v674_v50 = vadd.f32 %v6227_v51, %v606_v55  ;;  %v608_v35 = vadd.f32 %v607_v26, %v6145_v56 }
 0x138   :  { %v611_v41 = vpop.f32.mrf.mxu1 }
 0x139   :  { %723 = vst [vmem:[#allocation4 + $0x150] sm:$0xff] %v674_v50  ;;  %v675_v52 = vadd.f32 %v6168_v12, %v608_v35  ;;  %v612_v24 = vadd.f32 %v611_v41, %v6147_v59  ;;  %v636_v50 = vadd.f32 %v6227_v51, %v6175_v30 }
 0x13a   :  { %v613_v28 = vpop.f32.mrf.mxu1 }
 0x13b   :  { %724 = vst.msk [vmem:[#allocation4 + $0x158] sm:$0xff] %vm681_vm2, %v675_v52  ;;  %v676_v39 = vadd.f32 %v6227_v51, %v612_v24  ;;  %v614_v54 = vadd.f32 %v613_v28, %v6149_v61 }
 0x13c   :  { %v615_v27 = vpop.f32.mrf.mxu1 }
 0x13d   :  { %725 = vst [vmem:[#allocation4 + $0x160] sm:$0xff] %v676_v39  ;;  %v677_v6 = vadd.f32 %v6168_v12, %v614_v54  ;;  %v616_v11 = vadd.f32 %v615_v27, %v6153_v0 }
 0x13e   :  { %v617_v56 = vpop.f32.mrf.mxu1 }
 0x13f   :  { %726 = vst.msk [vmem:[#allocation4 + $0x168] sm:$0xff] %vm681_vm2, %v677_v6  ;;  %v678_v47 = vadd.f32 %v6227_v51, %v616_v11  ;;  %v618_v59 = vadd.f32 %v617_v56, %v6156_v4  ;;  %v634_v4 = vadd.f32 %v6227_v51, %v6171_v23 }
 0x141   :  { %727 = vst [vmem:[#allocation4 + $0x170] sm:$0xff] %v678_v47  ;;  %v679_v2 = vadd.f32 %v6168_v12, %v618_v59  ;;  %v977_v47 = vld [vmem:[#allocation4 + $0x28] sm:$0xff] }
 0x143   :  { %728 = vst.msk [vmem:[#allocation4 + $0x178] sm:$0xff] %vm681_vm2, %v679_v2 }
 0x144   :  { %v5534_v33 = vpop.eup %5533 }
 0x145   :  { %v841_v61 = vsub.f32 0.0, %v5534_v33 }
 0x147   :  { %843 = vrot.lane.b32.xlu0 %v841_v61, %s5852_s27 }
 0x1b9   :  { %v844_v53 = vpop.permute.xlu0 %843 }
 0x1ba   :  { %v846_v60 = vmul.f32 %v5532_v14, %v844_v53 }
 0x1bc   :  { %848 = vrot.lane.b32.xlu0 %v846_v60, %s5852_s27 }
 0x22e   :  { %v849_v0 = vpop.permute.xlu0 %848 }
 0x22f   :  { %v851_v36 = vadd.f32 %v5534_v33, %v849_v0  ;;  %v6361_v0 = vld [vmem:[%s7605_s5 + $0x34] ss:$8 sps:$4 sm:$0xff]  }
 0x231   :  { %v858_v63 = vpack.c.bf16 %v851_v36, %v851_v36  ;;  %853 = vst.msk [vmem:[#allocation2] sm:$0xff] %vm852_vm3, %v851_v36  ;;  %856 = vst.msk [vmem:[#allocation3 + $0xb8] sm:$0xff] %vm852_vm3, %v851_v36 }
 0x232   :  { %855 = vst.msk [vmem:[#allocation2 + $0xb8] sm:$0xff] %vm854_vm4, %v851_v36  ;;  %857 = vst.msk [vmem:[#allocation3] sm:$0xff] %vm854_vm4, %v851_v36 }
 0x233   :  { %5246 = vmatmul.mubr.msk.bf16.vlgmr.msra.gmra.mxu1 %vm681_vm2, %v858_v63 }
 0x234   :  { %1017 = vmatpush1.bf16.msra.mxu1 %v5950_v8  ;;  %1040 = vmatprep.mubr.bf16.mxu1 %v5851_v1 }
 0x235   :  { %1018 = vmatprep.subr.bf16.mxu1 %v5960_v9 }
 0x238   :  { %1019 = vmatpush1.bf16.msra.mxu1 %v5965_v10 }
 0x239   :  { %1020 = vmatprep.subr.bf16.mxu1 %v5984_v17 }
 0x23c   :  { %1021 = vmatpush1.bf16.msra.mxu1 %v5989_v18 }
 0x23d   :  { %1022 = vmatprep.subr.bf16.mxu1 %v6007_v21 }
 0x240   :  { %1023 = vmatpush1.bf16.msra.mxu1 %v6012_v22 }
 0x241   :  { %1162 = vmatprep.subr.bf16.mxu1 %v5945_v7 }
 0x2f3   :  { %v896_v12 = vpop.f32.mrf.mxu1 }
 0x2f4   :  { %v905_v57 = vadd.f32 %v896_v12, %v634_v4 }
 0x2f5   :  { %v898_v42 = vpop.f32.mrf.mxu1 }
 0x2f6   :  { %v5247_v3 = vmul.f32 -1.442695, %v905_v57  ;;  %v912_v14 = vadd.f32 %v6276_v29, %v898_v42 }
 0x2f7   :  { %v900_v45 = vpop.f32.mrf.mxu1 }
 0x2f8   :  { %5535 = vpow2.f32 %v5247_v3 }
 0x2f9   :  { %v901_v44 = vpop.f32.mrf.mxu1 }
 0x305   :  { %v5536_v5 = vpop.eup %5535 }
 0x306   :  { %v909_v46 = vadd.f32 1.0, %v5536_v5  ;;  %v1050_v5 = vld [vmem:[#allocation4 + $0x38] sm:$0xff] }
 0x308   :  { %5537 = vrcp.f32 %v909_v46 }
 0x315   :  { %v5538_v15 = vpop.eup %5537 }
 0x316   :  { %v913_v34 = vmul.f32 %v5538_v15, %v912_v14 }
 0x318   :  { %v914_v43 = vadd.f32 %v913_v34, %v904_v16 }
 0x31a   :  { %5539 = vtanh.f32 %v914_v43 }
 0x327   :  { %v5540_v13 = vpop.eup %5539 }
 0x328   :  { %v916_v48 = vsub.f32 %v851_v36, %v5540_v13 }
 0x32a   :  { %918 = vrot.lane.b32.xlu1 %v916_v48, %s5852_s27  ;;  %v6377_v48 = vld [vmem:[%s7605_s5 + $0x30] ss:$8 sps:$4 sm:$0xff]  }
 0x39c   :  { %v919_v23 = vpop.permute.xlu1 %918 }
 0x39d   :  { %v921_v25 = vmul.f32 %v5538_v15, %v919_v23  ;;  %v6384_v23 = vld [vmem:[%s7605_s5 + $0x24] ss:$8 sps:$4 sm:$0xff]  }
 0x39f   :  { %923 = vrot.lane.b32.xlu1 %v921_v25, %s5852_s27  ;;  %v6390_v25 = vld [vmem:[%s7605_s5 + $0x20] ss:$8 sps:$4 sm:$0xff]  }
 0x411   :  { %v924_v38 = vpop.permute.xlu1 %923 }
 0x412   :  { %v926_v55 = vadd.f32 %v5540_v13, %v924_v38  ;;  %v640_v38 = vadd.f32 %v6227_v51, %v6183_v49 }
 0x414   :  { %927 = vst.msk [vmem:[#allocation2 + $0x8] sm:$0xff] %vm852_vm3, %v926_v55  ;;  %929 = vst.msk [vmem:[#allocation3 + $0xb0] sm:$0xff] %vm852_vm3, %v926_v55  ;;  %v931_v26 = vpack.c.bf16 %v926_v55, %v926_v55 }
 0x415   :  { %928 = vst.msk [vmem:[#allocation2 + $0xb0] sm:$0xff] %vm854_vm4, %v926_v55  ;;  %930 = vst.msk [vmem:[#allocation3 + $0x8] sm:$0xff] %vm854_vm4, %v926_v55 }
 0x416   :  { %5248 = vmatmul.mubr.msk.bf16.vlgmr.msra.gmra.mxu0 %vm681_vm2, %v931_v26 }
 0x417   :  { %1090 = vmatpush1.bf16.msra.mxu0 %v5950_v8  ;;  %1113 = vmatprep.mubr.bf16.mxu0 %v5851_v1 }
 0x418   :  { %1091 = vmatprep.subr.bf16.mxu0 %v5960_v9 }
 0x41b   :  { %1092 = vmatpush1.bf16.msra.mxu0 %v5965_v10 }
 0x41c   :  { %1093 = vmatprep.subr.bf16.mxu0 %v5984_v17 }
 0x41f   :  { %1094 = vmatpush1.bf16.msra.mxu0 %v5989_v18 }
 0x420   :  { %1095 = vmatprep.subr.bf16.mxu0 %v6007_v21 }
 0x423   :  { %1096 = vmatpush1.bf16.msra.mxu0 %v6012_v22 }
 0x424   :  { %1235 = vmatprep.subr.bf16.mxu0 %v5945_v7 }
 0x4d6   :  { %v969_v35 = vpop.f32.mrf.mxu0 }
 0x4d7   :  { %v978_v41 = vadd.f32 %v969_v35, %v636_v50 }
 0x4d8   :  { %v971_v52 = vpop.f32.mrf.mxu0 }
 0x4d9   :  { %v5249_v24 = vmul.f32 -1.442695, %v978_v41  ;;  %v985_v6 = vadd.f32 %v6276_v29, %v971_v52 }
 0x4da   :  { %v973_v28 = vpop.f32.mrf.mxu0 }
 0x4db   :  { %5541 = vpow2.f32 %v5249_v24 }
 0x4dc   :  { %v974_v39 = vpop.f32.mrf.mxu0 }
 0x4e8   :  { %v5542_v54 = vpop.eup %5541 }
 0x4e9   :  { %v982_v27 = vadd.f32 1.0, %v5542_v54 }
 0x4eb   :  { %5543 = vrcp.f32 %v982_v27 }
 0x4f8   :  { %v5544_v11 = vpop.eup %5543 }
 0x4f9   :  { %v986_v56 = vmul.f32 %v5544_v11, %v985_v6 }
 0x4fb   :  { %v987_v59 = vadd.f32 %v986_v56, %v977_v47 }
 0x4fd   :  { %5545 = vtanh.f32 %v987_v59  ;;  %v6415_v59 = vld [vmem:[%s7605_s5 + $0x14] ss:$8 sps:$4 sm:$0xff]  }
 0x50a   :  { %v5546_v7 = vpop.eup %5545 }
 0x50b   :  { %v989_v2 = vsub.f32 %v926_v55, %v5546_v7 }
 0x50d   :  { %991 = vrot.lane.b32.xlu0 %v989_v2, %s5852_s27  ;;  %v6427_v2 = vld [vmem:[%s7605_s5 + $0x4] ss:$8 sps:$4 sm:$0xff]  }
 0x57f   :  { %v992_v30 = vpop.permute.xlu0 %991 }
 0x580   :  { %v994_v33 = vmul.f32 %v5544_v11, %v992_v30  ;;  %v6433_v30 = vld [vmem:[%s7605_s5] ss:$8 sps:$4 sm:$0xff]  }
 0x582   :  { %996 = vrot.lane.b32.xlu1 %v994_v33, %s5852_s27  ;;  %v642_v33 = vadd.f32 %v6227_v51, %v6187_v20 }
 0x5f4   :  { %v997_v61 = vpop.permute.xlu1 %996 }
 0x5f5   :  { %v999_v53 = vadd.f32 %v5546_v7, %v997_v61  ;;  %v6421_v7 = vld [vmem:[%s7605_s5 + $0x10] ss:$8 sps:$4 sm:$0xff]  }
 0x5f7   :  { %1000 = vst.msk [vmem:[#allocation2 + $0x10] sm:$0xff] %vm852_vm3, %v999_v53  ;;  %1002 = vst.msk [vmem:[#allocation3 + $0xa8] sm:$0xff] %vm852_vm3, %v999_v53  ;;  %v1004_v60 = vpack.c.bf16 %v999_v53, %v999_v53 }
 0x5f8   :  { %1001 = vst.msk [vmem:[#allocation2 + $0xa8] sm:$0xff] %vm854_vm4, %v999_v53  ;;  %1003 = vst.msk [vmem:[#allocation3 + $0x10] sm:$0xff] %vm854_vm4, %v999_v53 }
 0x5f9   :  { %5250 = vmatmul.mubr.msk.bf16.vlgmr.msra.gmra.mxu1 %vm681_vm2, %v1004_v60 }
 0x5fa   :  { %1163 = vmatpush1.bf16.msra.mxu1 %v5950_v8  ;;  %1186 = vmatprep.mubr.bf16.mxu1 %v5851_v1  ;;  %v638_v8 = vadd.f32 %v6227_v51, %v6179_v37 }
 0x5fb   :  { %1164 = vmatprep.subr.bf16.mxu1 %v5960_v9 }
 0x5fe   :  { %1165 = vmatpush1.bf16.msra.mxu1 %v5965_v10 }
 0x5ff   :  { %1166 = vmatprep.subr.bf16.mxu1 %v5984_v17 }
 0x602   :  { %1167 = vmatpush1.bf16.msra.mxu1 %v5989_v18 }
 0x603   :  { %1168 = vmatprep.subr.bf16.mxu1 %v6007_v21 }
 0x606   :  { %1169 = vmatpush1.bf16.msra.mxu1 %v6012_v22 }
 0x607   :  { %1308 = vmatprep.subr.bf16.mxu1 %v6361_v0 }
 0x6b9   :  { %v1042_v9 = vpop.f32.mrf.mxu1 }
 0x6ba   :  { %v1051_v10 = vadd.f32 %v1042_v9, %v638_v8 }
 0x6bb   :  { %v1044_v36 = vpop.f32.mrf.mxu1 }
 0x6bc   :  { %v5251_v63 = vmul.f32 -1.442695, %v1051_v10  ;;  %v1058_v3 = vadd.f32 %v6276_v29, %v1044_v36 }
 0x6bd   :  { %v1046_v4 = vpop.f32.mrf.mxu1 }
 0x6be   :  { %5547 = vpow2.f32 %v5251_v63 }
 0x6bf   :  { %v1047_v12 = vpop.f32.mrf.mxu1 }
 0x6cb   :  { %v5548_v57 = vpop.eup %5547 }
 0x6cc   :  { %v1055_v42 = vadd.f32 1.0, %v5548_v57 }
 0x6ce   :  { %5549 = vrcp.f32 %v1055_v42  ;;  %v1196_v42 = vld [vmem:[#allocation4 + $0x58] sm:$0xff] }
 0x6db   :  { %v5550_v45 = vpop.eup %5549 }
 0x6dc   :  { %v1059_v44 = vmul.f32 %v5550_v45, %v1058_v3 }
 0x6de   :  { %v1060_v46 = vadd.f32 %v1059_v44, %v1050_v5 }
 0x6e0   :  { %5551 = vtanh.f32 %v1060_v46 }
 0x6ed   :  { %v5552_v14 = vpop.eup %5551 }
 0x6ee   :  { %v1062_v15 = vsub.f32 %v999_v53, %v5552_v14 }
 0x6f0   :  { %1064 = vrot.lane.b32.xlu0 %v1062_v15, %s5852_s27 }
 0x762   :  { %v1065_v37 = vpop.permute.xlu0 %1064 }
 0x763   :  { %v1067_v34 = vmul.f32 %v5550_v45, %v1065_v37  ;;  %v644_v37 = vadd.f32 %v6227_v51, %v6191_v32 }
 0x765   :  { %1069 = vrot.lane.b32.xlu1 %v1067_v34, %s5852_s27 }
 0x7d7   :  { %v1070_v16 = vpop.permute.xlu1 %1069 }
 0x7d8   :  { %v1072_v43 = vadd.f32 %v5552_v14, %v1070_v16 }
 0x7da   :  { %1073 = vst.msk [vmem:[#allocation2 + $0x18] sm:$0xff] %vm852_vm3, %v1072_v43  ;;  %1075 = vst.msk [vmem:[#allocation3 + $0xa0] sm:$0xff] %vm852_vm3, %v1072_v43  ;;  %v1077_v13 = vpack.c.bf16 %v1072_v43, %v1072_v43 }
 0x7db   :  { %1074 = vst.msk [vmem:[#allocation2 + $0xa0] sm:$0xff] %vm854_vm4, %v1072_v43  ;;  %1076 = vst.msk [vmem:[#allocation3 + $0x18] sm:$0xff] %vm854_vm4, %v1072_v43 }
 0x7dc   :  { %5252 = vmatmul.mubr.msk.bf16.vlgmr.msra.gmra.mxu0 %vm681_vm2, %v1077_v13 }
 0x7dd   :  { %1236 = vmatpush1.bf16.msra.mxu0 %v6377_v48  ;;  %1259 = vmatprep.mubr.bf16.mxu0 %v5851_v1 }
 0x7de   :  { %1237 = vmatprep.subr.bf16.mxu0 %v6384_v23 }
 0x7e1   :  { %1238 = vmatpush1.bf16.msra.mxu0 %v6390_v25 }
 0x7e2   :  { %1239 = vmatprep.subr.bf16.mxu0 %v5984_v17 }
 0x7e5   :  { %1240 = vmatpush1.bf16.msra.mxu0 %v5989_v18 }
 0x7e6   :  { %1241 = vmatprep.subr.bf16.mxu0 %v6007_v21 }
 0x7e9   :  { %1242 = vmatpush1.bf16.msra.mxu0 %v6012_v22  ;;  %v1123_v22 = vld [vmem:[#allocation4 + $0x48] sm:$0xff] }
 0x7ea   :  { %1381 = vmatprep.subr.bf16.mxu0 %v6361_v0 }
 0x89c   :  { %v1115_v55 = vpop.f32.mrf.mxu0 }
 0x89d   :  { %v1124_v26 = vadd.f32 %v1115_v55, %v640_v38 }
 0x89e   :  { %v1117_v50 = vpop.f32.mrf.mxu0 }
 0x89f   :  { %v5253_v35 = vmul.f32 -1.442695, %v1124_v26  ;;  %v1131_v18 = vadd.f32 %v6276_v29, %v1117_v50 }
 0x8a0   :  { %v1119_v41 = vpop.f32.mrf.mxu0 }
 0x8a1   :  { %5553 = vpow2.f32 %v5253_v35 }
 0x8a2   :  { %v1120_v52 = vpop.f32.mrf.mxu0 }
 0x8ae   :  { %v5554_v24 = vpop.eup %5553 }
 0x8af   :  { %v1128_v17 = vadd.f32 1.0, %v5554_v24  ;;  %v1269_v24 = vld [vmem:[#allocation4 + $0x68] sm:$0xff] }
 0x8b1   :  { %5555 = vrcp.f32 %v1128_v17 }
 0x8be   :  { %v5556_v21 = vpop.eup %5555 }
 0x8bf   :  { %v1132_v28 = vmul.f32 %v5556_v21, %v1131_v18 }
 0x8c1   :  { %v1133_v39 = vadd.f32 %v1132_v28, %v1123_v22 }
 0x8c3   :  { %5557 = vtanh.f32 %v1133_v39 }
 0x8d0   :  { %v5558_v54 = vpop.eup %5557 }
 0x8d1   :  { %v1135_v27 = vsub.f32 %v1072_v43, %v5558_v54 }
 0x8d3   :  { %1137 = vrot.lane.b32.xlu0 %v1135_v27, %s5852_s27  ;;  %v646_v27 = vadd.f32 %v6227_v51, %v6195_v40 }
 0x945   :  { %v1138_v49 = vpop.permute.xlu0 %1137 }
 0x946   :  { %v1140_v6 = vmul.f32 %v5556_v21, %v1138_v49 }
 0x948   :  { %1142 = vrot.lane.b32.xlu1 %v1140_v6, %s5852_s27 }
 0x9ba   :  { %v1143_v11 = vpop.permute.xlu1 %1142 }
 0x9bb   :  { %v1145_v56 = vadd.f32 %v5558_v54, %v1143_v11 }
 0x9bd   :  { %1146 = vst.msk [vmem:[#allocation2 + $0x20] sm:$0xff] %vm852_vm3, %v1145_v56  ;;  %1148 = vst.msk [vmem:[#allocation3 + $0x98] sm:$0xff] %vm852_vm3, %v1145_v56  ;;  %v1150_v47 = vpack.c.bf16 %v1145_v56, %v1145_v56 }
 0x9be   :  { %1147 = vst.msk [vmem:[#allocation2 + $0x98] sm:$0xff] %vm854_vm4, %v1145_v56  ;;  %1149 = vst.msk [vmem:[#allocation3 + $0x20] sm:$0xff] %vm854_vm4, %v1145_v56 }
 0x9bf   :  { %5254 = vmatmul.mubr.msk.bf16.vlgmr.msra.gmra.mxu1 %vm681_vm2, %v1150_v47 }
 0x9c0   :  { %1309 = vmatpush1.bf16.msra.mxu1 %v6377_v48  ;;  %1332 = vmatprep.mubr.bf16.mxu1 %v5851_v1 }
 0x9c1   :  { %1310 = vmatprep.subr.bf16.mxu1 %v6384_v23 }
 0x9c4   :  { %1311 = vmatpush1.bf16.msra.mxu1 %v6390_v25 }
 0x9c5   :  { %1312 = vmatprep.subr.bf16.mxu1 %v6415_v59 }
 0x9c8   :  { %1313 = vmatpush1.bf16.msra.mxu1 %v6421_v7 }
 0x9c9   :  { %1314 = vmatprep.subr.bf16.mxu1 %v6427_v2 }
 0x9cc   :  { %1315 = vmatpush1.bf16.msra.mxu1 %v6433_v30 }
 0x9cd   :  { %1454 = vmatprep.subr.bf16.mxu1 %v6361_v0 }
 0xa7f   :  { %v1188_v61 = vpop.f32.mrf.mxu1 }
 0xa80   :  { %v1197_v53 = vadd.f32 %v1188_v61, %v642_v33 }
 0xa81   :  { %v1190_v60 = vpop.f32.mrf.mxu1 }
 0xa82   :  { %v5255_v8 = vmul.f32 -1.442695, %v1197_v53  ;;  %v1204_v4 = vadd.f32 %v6276_v29, %v1190_v60 }
 0xa83   :  { %v1192_v9 = vpop.f32.mrf.mxu1 }
 0xa84   :  { %5559 = vpow2.f32 %v5255_v8 }
 0xa85   :  { %v1193_v10 = vpop.f32.mrf.mxu1 }
 0xa86   :  { %v1342_v10 = vld [vmem:[#allocation4 + $0x78] sm:$0xff] }
 0xa91   :  { %v5560_v36 = vpop.eup %5559 }
 0xa92   :  { %v1201_v63 = vadd.f32 1.0, %v5560_v36 }
 0xa94   :  { %5561 = vrcp.f32 %v1201_v63 }
 0xaa1   :  { %v5562_v12 = vpop.eup %5561 }
 0xaa2   :  { %v1205_v57 = vmul.f32 %v5562_v12, %v1204_v4 }
 0xaa4   :  { %v1206_v3 = vadd.f32 %v1205_v57, %v1196_v42 }
 0xaa6   :  { %5563 = vtanh.f32 %v1206_v3 }
 0xab3   :  { %v5564_v45 = vpop.eup %5563 }
 0xab4   :  { %v1208_v44 = vsub.f32 %v1145_v56, %v5564_v45 }
 0xab6   :  { %1210 = vrot.lane.b32.xlu0 %v1208_v44, %s5852_s27 }
 0xb28   :  { %v1211_v20 = vpop.permute.xlu0 %1210 }
 0xb29   :  { %v1213_v5 = vmul.f32 %v5562_v12, %v1211_v20 }
 0xb2b   :  { %1215 = vrot.lane.b32.xlu1 %v1213_v5, %s5852_s27 }
 0xb9d   :  { %v1216_v46 = vpop.permute.xlu1 %1215 }
 0xb9e   :  { %v1218_v14 = vadd.f32 %v5564_v45, %v1216_v46  ;;  %v648_v45 = vadd.f32 %v6227_v51, %v6203_v19 }
 0xba0   :  { %1219 = vst.msk [vmem:[#allocation2 + $0x28] sm:$0xff] %vm852_vm3, %v1218_v14  ;;  %1221 = vst.msk [vmem:[#allocation3 + $0x90] sm:$0xff] %vm852_vm3, %v1218_v14  ;;  %v1223_v15 = vpack.c.bf16 %v1218_v14, %v1218_v14 }
 0xba1   :  { %1220 = vst.msk [vmem:[#allocation2 + $0x90] sm:$0xff] %vm854_vm4, %v1218_v14  ;;  %1222 = vst.msk [vmem:[#allocation3 + $0x28] sm:$0xff] %vm854_vm4, %v1218_v14 }
 0xba2   :  { %5256 = vmatmul.mubr.msk.bf16.vlgmr.msra.gmra.mxu0 %vm681_vm2, %v1223_v15 }
 0xba3   :  { %1382 = vmatpush1.bf16.msra.mxu0 %v6377_v48  ;;  %1405 = vmatprep.mubr.bf16.mxu0 %v5851_v1 }
 0xba4   :  { %1383 = vmatprep.subr.bf16.mxu0 %v6384_v23 }
 0xba7   :  { %1384 = vmatpush1.bf16.msra.mxu0 %v6390_v25 }
 0xba8   :  { %1385 = vmatprep.subr.bf16.mxu0 %v6415_v59 }
 0xbab   :  { %1386 = vmatpush1.bf16.msra.mxu0 %v6421_v7 }
 0xbac   :  { %1387 = vmatprep.subr.bf16.mxu0 %v6427_v2 }
 0xbaf   :  { %1388 = vmatpush1.bf16.msra.mxu0 %v6433_v30 }
 0xbb0   :  { %1527 = vmatprep.subr.bf16.mxu0 %v6361_v0 }
 0xc62   :  { %v1261_v34 = vpop.f32.mrf.mxu0 }
 0xc63   :  { %v1270_v16 = vadd.f32 %v1261_v34, %v644_v37 }
 0xc64   :  { %v1263_v43 = vpop.f32.mrf.mxu0 }
 0xc65   :  { %v5257_v13 = vmul.f32 -1.442695, %v1270_v16  ;;  %v1277_v35 = vadd.f32 %v6276_v29, %v1263_v43 }
 0xc66   :  { %v1265_v38 = vpop.f32.mrf.mxu0 }
 0xc67   :  { %5565 = vpow2.f32 %v5257_v13  ;;  %v1415_v38 = vld [vmem:[#allocation4 + $0x88] sm:$0xff] }
 0xc68   :  { %v1266_v55 = vpop.f32.mrf.mxu0 }
 0xc74   :  { %v5566_v26 = vpop.eup %5565 }
 0xc75   :  { %v1274_v50 = vadd.f32 1.0, %v5566_v26 }
 0xc77   :  { %5567 = vrcp.f32 %v1274_v50 }
 0xc84   :  { %v5568_v41 = vpop.eup %5567 }
 0xc85   :  { %v1278_v52 = vmul.f32 %v5568_v41, %v1277_v35 }
 0xc87   :  { %v1279_v17 = vadd.f32 %v1278_v52, %v1269_v24 }
 0xc89   :  { %5569 = vtanh.f32 %v1279_v17  ;;  %v650_v17 = vadd.f32 %v6227_v51, %v6211_v58 }
 0xc96   :  { %v5570_v18 = vpop.eup %5569 }
 0xc97   :  { %v1281_v21 = vsub.f32 %v1218_v14, %v5570_v18 }
 0xc99   :  { %1283 = vrot.lane.b32.xlu0 %v1281_v21, %s5852_s27 }
 0xd0b   :  { %v1284_v32 = vpop.permute.xlu0 %1283 }
 0xd0c   :  { %v1286_v28 = vmul.f32 %v5568_v41, %v1284_v32 }
 0xd0e   :  { %1288 = vrot.lane.b32.xlu1 %v1286_v28, %s5852_s27 }
 0xd80   :  { %v1289_v22 = vpop.permute.xlu1 %1288 }
 0xd81   :  { %v1291_v39 = vadd.f32 %v5570_v18, %v1289_v22 }
 0xd83   :  { %1292 = vst.msk [vmem:[#allocation2 + $0x30] sm:$0xff] %vm852_vm3, %v1291_v39  ;;  %1294 = vst.msk [vmem:[#allocation3 + $0x88] sm:$0xff] %vm852_vm3, %v1291_v39  ;;  %v1296_v54 = vpack.c.bf16 %v1291_v39, %v1291_v39 }
 0xd84   :  { %1293 = vst.msk [vmem:[#allocation2 + $0x88] sm:$0xff] %vm854_vm4, %v1291_v39  ;;  %1295 = vst.msk [vmem:[#allocation3 + $0x30] sm:$0xff] %vm854_vm4, %v1291_v39 }
 0xd85   :  { %5258 = vmatmul.mubr.msk.bf16.vlgmr.msra.gmra.mxu1 %vm681_vm2, %v1296_v54 }
 0xd86   :  { %1455 = vmatpush1.bf16.msra.mxu1 %v6377_v48  ;;  %1478 = vmatprep.mubr.bf16.mxu1 %v5851_v1 }
 0xd87   :  { %1456 = vmatprep.subr.bf16.mxu1 %v6384_v23 }
 0xd8a   :  { %1457 = vmatpush1.bf16.msra.mxu1 %v6390_v25 }
 0xd8b   :  { %1458 = vmatprep.subr.bf16.mxu1 %v6415_v59 }
 0xd8e   :  { %1459 = vmatpush1.bf16.msra.mxu1 %v6421_v7 }
 0xd8f   :  { %1460 = vmatprep.subr.bf16.mxu1 %v6427_v2 }
 0xd92   :  { %1461 = vmatpush1.bf16.msra.mxu1 %v6433_v30 }
 0xd93   :  { %1600 = vmatprep.subr.bf16.mxu1 %v6361_v0 }
 0xe45   :  { %v1334_v49 = vpop.f32.mrf.mxu1 }
 0xe46   :  { %v1343_v6 = vadd.f32 %v1334_v49, %v646_v27 }
 0xe47   :  { %v1336_v11 = vpop.f32.mrf.mxu1 }
 0xe48   :  { %v5259_v56 = vmul.f32 -1.442695, %v1343_v6  ;;  %v1350_v60 = vadd.f32 %v6276_v29, %v1336_v11 }
 0xe49   :  { %v1338_v47 = vpop.f32.mrf.mxu1 }
 0xe4a   :  { %5571 = vpow2.f32 %v5259_v56  ;;  %v1488_v56 = vld [vmem:[#allocation4 + $0x98] sm:$0xff] }
 0xe4b   :  { %v1339_v33 = vpop.f32.mrf.mxu1 }
 0xe57   :  { %v5572_v61 = vpop.eup %5571 }
 0xe58   :  { %v1347_v53 = vadd.f32 1.0, %v5572_v61 }
 0xe5a   :  { %5573 = vrcp.f32 %v1347_v53 }
 0xe67   :  { %v5574_v8 = vpop.eup %5573 }
 0xe68   :  { %v1351_v9 = vmul.f32 %v5574_v8, %v1350_v60 }
 0xe6a   :  { %v1352_v36 = vadd.f32 %v1351_v9, %v1342_v10  ;;  %v652_v10 = vadd.f32 %v6227_v51, %v6218_v31 }
 0xe6c   :  { %5575 = vtanh.f32 %v1352_v36 }
 0xe79   :  { %v5576_v63 = vpop.eup %5575 }
 0xe7a   :  { %v1354_v4 = vsub.f32 %v1291_v39, %v5576_v63 }
 0xe7c   :  { %1356 = vrot.lane.b32.xlu0 %v1354_v4, %s5852_s27 }
 0xeee   :  { %v1357_v40 = vpop.permute.xlu0 %1356 }
 0xeef   :  { %v1359_v12 = vmul.f32 %v5574_v8, %v1357_v40 }
 0xef1   :  { %1361 = vrot.lane.b32.xlu1 %v1359_v12, %s5852_s27 }
 0xf63   :  { %v1362_v57 = vpop.permute.xlu1 %1361 }
 0xf64   :  { %v1364_v42 = vadd.f32 %v5576_v63, %v1362_v57 }
 0xf66   :  { %1365 = vst.msk [vmem:[#allocation2 + $0x38] sm:$0xff] %vm852_vm3, %v1364_v42  ;;  %1367 = vst.msk [vmem:[#allocation3 + $0x80] sm:$0xff] %vm852_vm3, %v1364_v42  ;;  %v1369_v3 = vpack.c.bf16 %v1364_v42, %v1364_v42 }
 0xf67   :  { %1366 = vst.msk [vmem:[#allocation2 + $0x80] sm:$0xff] %vm854_vm4, %v1364_v42  ;;  %1368 = vst.msk [vmem:[#allocation3 + $0x38] sm:$0xff] %vm854_vm4, %v1364_v42 }
 0xf68   :  { %5260 = vmatmul.mubr.msk.bf16.vlgmr.msra.gmra.mxu0 %vm681_vm2, %v1369_v3 }
 0xf69   :  { %1528 = vmatpush1.bf16.msra.mxu0 %v6377_v48  ;;  %1551 = vmatprep.mubr.bf16.mxu0 %v5851_v1 }
 0xf6a   :  { %1529 = vmatprep.subr.bf16.mxu0 %v6384_v23 }
 0xf6d   :  { %1530 = vmatpush1.bf16.msra.mxu0 %v6390_v25 }
 0xf6e   :  { %1531 = vmatprep.subr.bf16.mxu0 %v6415_v59 }
 0xf71   :  { %1532 = vmatpush1.bf16.msra.mxu0 %v6421_v7 }
 0xf72   :  { %1533 = vmatprep.subr.bf16.mxu0 %v6427_v2 }
 0xf75   :  { %1534 = vmatpush1.bf16.msra.mxu0 %v6433_v30 }
 0xf76   :  { %1673 = vmatprep.subr.bf16.mxu0 %v6361_v0 }
0x1028   :  { %v1407_v44 = vpop.f32.mrf.mxu0 }
0x1029   :  { %v1416_v20 = vadd.f32 %v1407_v44, %v648_v45 }
0x102a   :  { %v1409_v5 = vpop.f32.mrf.mxu0 }
0x102b   :  { %v5261_v46 = vmul.f32 -1.442695, %v1416_v20  ;;  %v1423_v16 = vadd.f32 %v6276_v29, %v1409_v5  ;;  %v1561_v5 = vld [vmem:[#allocation4 + $0xa8] sm:$0xff] }
0x102c   :  { %v1411_v14 = vpop.f32.mrf.mxu0 }
0x102d   :  { %5577 = vpow2.f32 %v5261_v46 }
0x102e   :  { %v1412_v15 = vpop.f32.mrf.mxu0 }
0x103a   :  { %v5578_v37 = vpop.eup %5577 }
0x103b   :  { %v1420_v34 = vadd.f32 1.0, %v5578_v37 }
0x103d   :  { %5579 = vrcp.f32 %v1420_v34 }
0x104a   :  { %v5580_v43 = vpop.eup %5579 }
0x104b   :  { %v1424_v13 = vmul.f32 %v5580_v43, %v1423_v16 }
0x104d   :  { %v1425_v55 = vadd.f32 %v1424_v13, %v1415_v38  ;;  %v1633_v13 = vld [vmem:[#allocation4 + $0xb0] sm:$0xff] }
0x104f   :  { %5581 = vtanh.f32 %v1425_v55 }
0x105c   :  { %v5582_v26 = vpop.eup %5581 }
0x105d   :  { %v1427_v50 = vsub.f32 %v1364_v42, %v5582_v26 }
0x105f   :  { %1429 = vrot.lane.b32.xlu0 %v1427_v50, %s5852_s27 }
0x10d1   :  { %v1430_v19 = vpop.permute.xlu0 %1429 }
0x10d2   :  { %v1432_v35 = vmul.f32 %v5580_v43, %v1430_v19 }
0x10d4   :  { %1434 = vrot.lane.b32.xlu1 %v1432_v35, %s5852_s27 }
0x1146   :  { %v1435_v41 = vpop.permute.xlu1 %1434 }
0x1147   :  { %v1437_v52 = vadd.f32 %v5582_v26, %v1435_v41 }
0x1149   :  { %1438 = vst.msk [vmem:[#allocation2 + $0x40] sm:$0xff] %vm852_vm3, %v1437_v52  ;;  %1440 = vst.msk [vmem:[#allocation3 + $0x78] sm:$0xff] %vm852_vm3, %v1437_v52  ;;  %v1442_v24 = vpack.c.bf16 %v1437_v52, %v1437_v52 }
0x114a   :  { %1439 = vst.msk [vmem:[#allocation2 + $0x78] sm:$0xff] %vm854_vm4, %v1437_v52  ;;  %1441 = vst.msk [vmem:[#allocation3 + $0x40] sm:$0xff] %vm854_vm4, %v1437_v52 }
0x114b   :  { %5262 = vmatmul.mubr.msk.bf16.vlgmr.msra.gmra.mxu1 %vm681_vm2, %v1442_v24 }
0x114c   :  { %1601 = vmatpush1.bf16.msra.mxu1 %v6377_v48  ;;  %1624 = vmatprep.mubr.bf16.mxu1 %v5851_v1 }
0x114d   :  { %1602 = vmatprep.subr.bf16.mxu1 %v6384_v23 }
0x1150   :  { %1603 = vmatpush1.bf16.msra.mxu1 %v6390_v25 }
0x1151   :  { %1604 = vmatprep.subr.bf16.mxu1 %v6415_v59 }
0x1154   :  { %1605 = vmatpush1.bf16.msra.mxu1 %v6421_v7 }
0x1155   :  { %1606 = vmatprep.subr.bf16.mxu1 %v6427_v2 }
0x1158   :  { %1607 = vmatpush1.bf16.msra.mxu1 %v6433_v30 }
0x1159   :  { %1746 = vmatprep.subr.bf16.mxu1 %v6361_v0 }
0x120b   :  { %v1480_v18 = vpop.f32.mrf.mxu1 }
0x120c   :  { %v1489_v21 = vadd.f32 %v1480_v18, %v650_v17  ;;  %v1634_v18 = vld [vmem:[#allocation4 + $0xb8] sm:$0xff] }
0x120d   :  { %v1482_v32 = vpop.f32.mrf.mxu1 }
0x120e   :  { %v5263_v28 = vmul.f32 -1.442695, %v1489_v21  ;;  %v1496_v49 = vadd.f32 %v6276_v29, %v1482_v32 }
0x120f   :  { %v1484_v22 = vpop.f32.mrf.mxu1 }
0x1210   :  { %5583 = vpow2.f32 %v5263_v28 }
0x1211   :  { %v1485_v39 = vpop.f32.mrf.mxu1 }
0x121d   :  { %v5584_v54 = vpop.eup %5583 }
0x121e   :  { %v1493_v27 = vadd.f32 1.0, %v5584_v54 }
0x1220   :  { %5585 = vrcp.f32 %v1493_v27 }
0x122d   :  { %v5586_v6 = vpop.eup %5585 }
0x122e   :  { %v1497_v11 = vmul.f32 %v5586_v6, %v1496_v49 }
0x1230   :  { %v1498_v47 = vadd.f32 %v1497_v11, %v1488_v56 }
0x1232   :  { %5587 = vtanh.f32 %v1498_v47 }
0x123f   :  { %v5588_v33 = vpop.eup %5587 }
0x1240   :  { %v1500_v61 = vsub.f32 %v1437_v52, %v5588_v33 }
0x1242   :  { %1502 = vrot.lane.b32.xlu0 %v1500_v61, %s5852_s27 }
0x12b4   :  { %v1503_v58 = vpop.permute.xlu0 %1502 }
0x12b5   :  { %v1505_v53 = vmul.f32 %v5586_v6, %v1503_v58  ;;  %v1706_v6 = vld [vmem:[#allocation4 + $0xc0] sm:$0xff] }
0x12b7   :  { %1507 = vrot.lane.b32.xlu1 %v1505_v53, %s5852_s27 }
0x1329   :  { %v1508_v60 = vpop.permute.xlu1 %1507 }
0x132a   :  { %v1510_v8 = vadd.f32 %v5588_v33, %v1508_v60  ;;  %v6571_v60 = vld [vmem:[%s7609_s6] ss:$0 sm:$0xff] }
0x132c   :  { %1511 = vst.msk [vmem:[#allocation2 + $0x48] sm:$0xff] %vm852_vm3, %v1510_v8  ;;  %1513 = vst.msk [vmem:[#allocation3 + $0x70] sm:$0xff] %vm852_vm3, %v1510_v8  ;;  %v1515_v9 = vpack.c.bf16 %v1510_v8, %v1510_v8 }
0x132d   :  { %1512 = vst.msk [vmem:[#allocation2 + $0x70] sm:$0xff] %vm854_vm4, %v1510_v8  ;;  %1514 = vst.msk [vmem:[#allocation3 + $0x48] sm:$0xff] %vm854_vm4, %v1510_v8 }
0x132e   :  { %5264 = vmatmul.mubr.msk.bf16.vlgmr.msra.gmra.mxu0 %vm681_vm2, %v1515_v9 }
0x132f   :  { %1674 = vmatpush1.bf16.msra.mxu0 %v6377_v48  ;;  %1697 = vmatprep.mubr.bf16.mxu0 %v5851_v1 }
0x1330   :  { %1675 = vmatprep.subr.bf16.mxu0 %v6384_v23 }
0x1333   :  { %1676 = vmatpush1.bf16.msra.mxu0 %v6390_v25 }
0x1334   :  { %1677 = vmatprep.subr.bf16.mxu0 %v6415_v59 }
0x1337   :  { %1678 = vmatpush1.bf16.msra.mxu0 %v6421_v7 }
0x1338   :  { %1679 = vmatprep.subr.bf16.mxu0 %v6427_v2 }
0x133b   :  { %1680 = vmatpush1.bf16.msra.mxu0 %v6433_v30 }
0x133c   :  { %1819 = vmatprep.subr.bf16.mxu0 %v6361_v0 }
0x13ee   :  { %v1553_v36 = vpop.f32.mrf.mxu0 }
0x13ef   :  { %v1562_v63 = vadd.f32 %v1553_v36, %v652_v10  ;;  %v1707_v36 = vld [vmem:[#allocation4 + $0xc8] sm:$0xff] }
0x13f0   :  { %v1555_v4 = vpop.f32.mrf.mxu0 }
0x13f1   :  { %v5265_v40 = vmul.f32 -1.442695, %v1562_v63  ;;  %v1569_v45 = vadd.f32 %v6276_v29, %v1555_v4 }
0x13f2   :  { %v1557_v12 = vpop.f32.mrf.mxu0 }
0x13f3   :  { %5589 = vpow2.f32 %v5265_v40 }
0x13f4   :  { %v1558_v57 = vpop.f32.mrf.mxu0 }
0x1400   :  { %v5590_v42 = vpop.eup %5589 }
0x1401   :  { %v1566_v3 = vadd.f32 1.0, %v5590_v42 }
0x1403   :  { %5591 = vrcp.f32 %v1566_v3 }
0x1410   :  { %v5592_v44 = vpop.eup %5591 }
0x1411   :  { %v1570_v20 = vmul.f32 %v5592_v44, %v1569_v45 }
0x1413   :  { %v1571_v46 = vadd.f32 %v1570_v20, %v1561_v5  ;;  %v1779_v20 = vld [vmem:[#allocation4 + $0xd0] sm:$0xff] }
0x1415   :  { %5593 = vtanh.f32 %v1571_v46 }
0x1422   :  { %v5594_v14 = vpop.eup %5593 }
0x1423   :  { %v1573_v15 = vsub.f32 %v1510_v8, %v5594_v14 }
0x1425   :  { %1575 = vrot.lane.b32.xlu0 %v1573_v15, %s5852_s27 }
0x1497   :  { %v1576_v31 = vpop.permute.xlu0 %1575 }
0x1498   :  { %v1578_v51 = vmul.f32 %v5592_v44, %v1576_v31 }
0x149a   :  { %1580 = vrot.lane.b32.xlu1 %v1578_v51, %s5852_s27 }
0x150c   :  { %v1581_v37 = vpop.permute.xlu1 %1580 }
0x150d   :  { %v1583_v34 = vadd.f32 %v5594_v14, %v1581_v37 }
0x150f   :  { %1584 = vst.msk [vmem:[#allocation2 + $0x50] sm:$0xff] %vm852_vm3, %v1583_v34  ;;  %1586 = vst.msk [vmem:[#allocation3 + $0x68] sm:$0xff] %vm852_vm3, %v1583_v34  ;;  %v1588_v16 = vpack.c.bf16 %v1583_v34, %v1583_v34 }
0x1510   :  { %1585 = vst.msk [vmem:[#allocation2 + $0x68] sm:$0xff] %vm854_vm4, %v1583_v34  ;;  %1587 = vst.msk [vmem:[#allocation3 + $0x50] sm:$0xff] %vm854_vm4, %v1583_v34 }
0x1511   :  { %5266 = vmatmul.mubr.msk.bf16.vlgmr.msra.gmra.mxu1 %vm681_vm2, %v1588_v16 }
0x1512   :  { %1747 = vmatpush1.bf16.msra.mxu1 %v6377_v48  ;;  %1770 = vmatprep.mubr.bf16.mxu1 %v5851_v1 }
0x1513   :  { %1748 = vmatprep.subr.bf16.mxu1 %v6384_v23 }
0x1516   :  { %1749 = vmatpush1.bf16.msra.mxu1 %v6390_v25 }
0x1517   :  { %1750 = vmatprep.subr.bf16.mxu1 %v6415_v59 }
0x151a   :  { %1751 = vmatpush1.bf16.msra.mxu1 %v6421_v7 }
0x151b   :  { %1752 = vmatprep.subr.bf16.mxu1 %v6427_v2 }
0x151e   :  { %1753 = vmatpush1.bf16.msra.mxu1 %v6433_v30 }
0x151f   :  { %1892 = vmatprep.subr.bf16.mxu1 %v6361_v0 }
0x15d1   :  { %v1626_v43 = vpop.f32.mrf.mxu1 }
0x15d2   :  { %v1635_v38 = vadd.f32 %v1633_v13, %v1626_v43  ;;  %v1780_v13 = vld [vmem:[#allocation4 + $0xd8] sm:$0xff] }
0x15d3   :  { %v1628_v55 = vpop.f32.mrf.mxu1 }
0x15d4   :  { %v5267_v26 = vmul.f32 -1.442695, %v1635_v38  ;;  %v1642_v52 = vadd.f32 %v6276_v29, %v1628_v55 }
0x15d5   :  { %v1630_v50 = vpop.f32.mrf.mxu1 }
0x15d6   :  { %5595 = vpow2.f32 %v5267_v26 }
0x15d7   :  { %v1631_v19 = vpop.f32.mrf.mxu1 }
0x15e3   :  { %v5596_v35 = vpop.eup %5595 }
0x15e4   :  { %v1639_v41 = vadd.f32 1.0, %v5596_v35 }
0x15e6   :  { %5597 = vrcp.f32 %v1639_v41 }
0x15f3   :  { %v5598_v24 = vpop.eup %5597 }
0x15f4   :  { %v1643_v17 = vmul.f32 %v5598_v24, %v1642_v52 }
0x15f6   :  { %v1644_v21 = vadd.f32 %v1643_v17, %v1634_v18  ;;  %v1852_v17 = vld [vmem:[#allocation4 + $0xe0] sm:$0xff] }
0x15f8   :  { %5599 = vtanh.f32 %v1644_v21 }
0x1605   :  { %v5600_v32 = vpop.eup %5599 }
0x1606   :  { %v1646_v28 = vsub.f32 %v1583_v34, %v5600_v32 }
0x1608   :  { %1648 = vrot.lane.b32.xlu0 %v1646_v28, %s5852_s27 }
0x167a   :  { %v1649_v22 = vpop.permute.xlu0 %1648 }
0x167b   :  { %v1651_v39 = vmul.f32 %v5598_v24, %v1649_v22 }
0x167d   :  { %1653 = vrot.lane.b32.xlu1 %v1651_v39, %s5852_s27 }
0x16ef   :  { %v1654_v54 = vpop.permute.xlu1 %1653 }
0x16f0   :  { %v1656_v27 = vadd.f32 %v5600_v32, %v1654_v54 }
0x16f2   :  { %1657 = vst.msk [vmem:[#allocation2 + $0x58] sm:$0xff] %vm852_vm3, %v1656_v27  ;;  %1659 = vst.msk [vmem:[#allocation3 + $0x60] sm:$0xff] %vm852_vm3, %v1656_v27  ;;  %v1661_v29 = vpack.c.bf16 %v1656_v27, %v1656_v27 }
0x16f3   :  { %1658 = vst.msk [vmem:[#allocation2 + $0x60] sm:$0xff] %vm854_vm4, %v1656_v27  ;;  %1660 = vst.msk [vmem:[#allocation3 + $0x58] sm:$0xff] %vm854_vm4, %v1656_v27 }
0x16f4   :  { %5268 = vmatmul.mubr.msk.bf16.vlgmr.msra.gmra.mxu0 %vm681_vm2, %v1661_v29 }
0x16f5   :  { %1820 = vmatpush1.bf16.msra.mxu0 %v6377_v48  ;;  %1843 = vmatprep.mubr.bf16.mxu0 %v5851_v1 }
0x16f6   :  { %1821 = vmatprep.subr.bf16.mxu0 %v6384_v23 }
0x16f9   :  { %1822 = vmatpush1.bf16.msra.mxu0 %v6390_v25 }
0x16fa   :  { %1823 = vmatprep.subr.bf16.mxu0 %v6415_v59 }
0x16fd   :  { %1824 = vmatpush1.bf16.msra.mxu0 %v6421_v7 }
0x16fe   :  { %1825 = vmatprep.subr.bf16.mxu0 %v6427_v2 }
0x1701   :  { %1826 = vmatpush1.bf16.msra.mxu0 %v6433_v30 }
0x1702   :  { %1965 = vmatprep.subr.bf16.mxu0 %v6361_v0 }
0x17b4   :  { %v1699_v49 = vpop.f32.mrf.mxu0 }
0x17b5   :  { %v1708_v11 = vadd.f32 %v1706_v6, %v1699_v49  ;;  %v1853_v6 = vld [vmem:[#allocation4 + $0xe8] sm:$0xff] }
0x17b6   :  { %v1701_v56 = vpop.f32.mrf.mxu0 }
0x17b7   :  { %v5269_v47 = vmul.f32 -1.442695, %v1708_v11  ;;  %v1715_v8 = vadd.f32 %v6571_v60, %v1701_v56 }
0x17b8   :  { %v1703_v33 = vpop.f32.mrf.mxu0 }
0x17b9   :  { %5601 = vpow2.f32 %v5269_v47 }
0x17ba   :  { %v1704_v61 = vpop.f32.mrf.mxu0 }
0x17c6   :  { %v5602_v58 = vpop.eup %5601 }
0x17c7   :  { %v1712_v53 = vadd.f32 1.0, %v5602_v58 }
0x17c9   :  { %5603 = vrcp.f32 %v1712_v53 }
0x17d6   :  { %v5604_v9 = vpop.eup %5603 }
0x17d7   :  { %v1716_v10 = vmul.f32 %v5604_v9, %v1715_v8 }
0x17d9   :  { %v1717_v63 = vadd.f32 %v1716_v10, %v1707_v36  ;;  %v1925_v10 = vld [vmem:[#allocation4 + $0xf0] sm:$0xff] }
0x17db   :  { %5605 = vtanh.f32 %v1717_v63 }
0x17e8   :  { %v5606_v4 = vpop.eup %5605 }
0x17e9   :  { %v1719_v40 = vsub.f32 %v1656_v27, %v5606_v4 }
0x17eb   :  { %1721 = vrot.lane.b32.xlu0 %v1719_v40, %s5852_s27 }
0x185d   :  { %v1722_v12 = vpop.permute.xlu0 %1721 }
0x185e   :  { %v1724_v57 = vmul.f32 %v5604_v9, %v1722_v12 }
0x1860   :  { %1726 = vrot.lane.b32.xlu1 %v1724_v57, %s5852_s27 }
0x18d2   :  { %v1727_v42 = vpop.permute.xlu1 %1726 }
0x18d3   :  { %v1729_v3 = vadd.f32 %v5606_v4, %v1727_v42 }
0x18d5   :  { %1730 = vst.msk [vmem:[#allocation2 + $0x60] sm:$0xff] %vm852_vm3, %v1729_v3  ;;  %1732 = vst.msk [vmem:[#allocation3 + $0x58] sm:$0xff] %vm852_vm3, %v1729_v3  ;;  %v1734_v45 = vpack.c.bf16 %v1729_v3, %v1729_v3 }
0x18d6   :  { %1731 = vst.msk [vmem:[#allocation2 + $0x58] sm:$0xff] %vm854_vm4, %v1729_v3  ;;  %1733 = vst.msk [vmem:[#allocation3 + $0x60] sm:$0xff] %vm854_vm4, %v1729_v3 }
0x18d7   :  { %5270 = vmatmul.mubr.msk.bf16.vlgmr.msra.gmra.mxu1 %vm681_vm2, %v1734_v45 }
0x18d8   :  { %1893 = vmatpush1.bf16.msra.mxu1 %v6377_v48  ;;  %1916 = vmatprep.mubr.bf16.mxu1 %v5851_v1 }
0x18d9   :  { %1894 = vmatprep.subr.bf16.mxu1 %v6384_v23 }
0x18dc   :  { %1895 = vmatpush1.bf16.msra.mxu1 %v6390_v25 }
0x18dd   :  { %1896 = vmatprep.subr.bf16.mxu1 %v6415_v59 }
0x18e0   :  { %1897 = vmatpush1.bf16.msra.mxu1 %v6421_v7 }
0x18e1   :  { %1898 = vmatprep.subr.bf16.mxu1 %v6427_v2 }
0x18e4   :  { %1899 = vmatpush1.bf16.msra.mxu1 %v6433_v30 }
0x18e5   :  { %2038 = vmatprep.subr.bf16.mxu1 %v6361_v0 }
0x1997   :  { %v1772_v44 = vpop.f32.mrf.mxu1 }
0x1998   :  { %v1781_v5 = vadd.f32 %v1779_v20, %v1772_v44  ;;  %v1926_v20 = vld [vmem:[#allocation4 + $0xf8] sm:$0xff] }
0x1999   :  { %v1774_v46 = vpop.f32.mrf.mxu1 }
0x199a   :  { %v5271_v14 = vmul.f32 -1.442695, %v1781_v5  ;;  %v1788_v34 = vadd.f32 %v6571_v60, %v1774_v46 }
0x199b   :  { %v1776_v15 = vpop.f32.mrf.mxu1 }
0x199c   :  { %5607 = vpow2.f32 %v5271_v14 }
0x199d   :  { %v1777_v31 = vpop.f32.mrf.mxu1 }
0x19a9   :  { %v5608_v51 = vpop.eup %5607 }
0x19aa   :  { %v1785_v37 = vadd.f32 1.0, %v5608_v51 }
0x19ac   :  { %5609 = vrcp.f32 %v1785_v37 }
0x19b9   :  { %v5610_v16 = vpop.eup %5609 }
0x19ba   :  { %v1789_v43 = vmul.f32 %v5610_v16, %v1788_v34  ;;  %v6643_v34 = vld [vmem:[%s7605_s5 + $0x34] ss:$8 sps:$4 sm:$0xff]  }
0x19bc   :  { %v1790_v38 = vadd.f32 %v1789_v43, %v1780_v13 }
0x19be   :  { %5611 = vtanh.f32 %v1790_v38 }
0x19cb   :  { %v5612_v55 = vpop.eup %5611 }
0x19cc   :  { %v1792_v26 = vsub.f32 %v1729_v3, %v5612_v55 }
0x19ce   :  { %1794 = vrot.lane.b32.xlu0 %v1792_v26, %s5852_s27 }
0x1a40   :  { %v1795_v50 = vpop.permute.xlu0 %1794 }
0x1a41   :  { %v1797_v19 = vmul.f32 %v5610_v16, %v1795_v50  ;;  %v1998_v16 = vld [vmem:[#allocation4 + $0x100] sm:$0xff] }
0x1a43   :  { %1799 = vrot.lane.b32.xlu1 %v1797_v19, %s5852_s27 }
0x1ab5   :  { %v1800_v35 = vpop.permute.xlu1 %1799 }
0x1ab6   :  { %v1802_v41 = vadd.f32 %v5612_v55, %v1800_v35 }
0x1ab8   :  { %1803 = vst.msk [vmem:[#allocation2 + $0x68] sm:$0xff] %vm852_vm3, %v1802_v41  ;;  %1805 = vst.msk [vmem:[#allocation3 + $0x50] sm:$0xff] %vm852_vm3, %v1802_v41  ;;  %v1807_v52 = vpack.c.bf16 %v1802_v41, %v1802_v41 }
0x1ab9   :  { %1804 = vst.msk [vmem:[#allocation2 + $0x50] sm:$0xff] %vm854_vm4, %v1802_v41  ;;  %1806 = vst.msk [vmem:[#allocation3 + $0x68] sm:$0xff] %vm854_vm4, %v1802_v41 }
0x1aba   :  { %5272 = vmatmul.mubr.msk.bf16.vlgmr.msra.gmra.mxu0 %vm681_vm2, %v1807_v52 }
0x1abb   :  { %1966 = vmatpush1.bf16.msra.mxu0 %v6377_v48  ;;  %1989 = vmatprep.mubr.bf16.mxu0 %v5851_v1 }
0x1abc   :  { %1967 = vmatprep.subr.bf16.mxu0 %v6384_v23 }
0x1abf   :  { %1968 = vmatpush1.bf16.msra.mxu0 %v6390_v25 }
0x1ac0   :  { %1969 = vmatprep.subr.bf16.mxu0 %v6415_v59 }
0x1ac3   :  { %1970 = vmatpush1.bf16.msra.mxu0 %v6421_v7 }
0x1ac4   :  { %1971 = vmatprep.subr.bf16.mxu0 %v6427_v2 }
0x1ac7   :  { %1972 = vmatpush1.bf16.msra.mxu0 %v6433_v30 }
0x1ac8   :  { %2111 = vmatprep.subr.bf16.mxu0 %v6361_v0 }
0x1b7a   :  { %v1845_v24 = vpop.f32.mrf.mxu0 }
0x1b7b   :  { %v1854_v18 = vadd.f32 %v1852_v17, %v1845_v24 }
0x1b7c   :  { %v1847_v21 = vpop.f32.mrf.mxu0 }
0x1b7d   :  { %v5273_v32 = vmul.f32 -1.442695, %v1854_v18  ;;  %v1861_v27 = vadd.f32 %v6571_v60, %v1847_v21 }
0x1b7e   :  { %v1849_v28 = vpop.f32.mrf.mxu0 }
0x1b7f   :  { %5613 = vpow2.f32 %v5273_v32 }
0x1b80   :  { %v1850_v22 = vpop.f32.mrf.mxu0 }
0x1b8c   :  { %v5614_v39 = vpop.eup %5613 }
0x1b8d   :  { %v1858_v54 = vadd.f32 1.0, %v5614_v39  ;;  %v6657_v39 = vld [vmem:[%s7605_s5 + $0x30] ss:$8 sps:$4 sm:$0xff]  }
0x1b8f   :  { %5615 = vrcp.f32 %v1858_v54  ;;  %v6664_v54 = vld [vmem:[%s7605_s5 + $0x24] ss:$8 sps:$4 sm:$0xff]  }
0x1b9c   :  { %v5616_v29 = vpop.eup %5615 }
0x1b9d   :  { %v1862_v49 = vmul.f32 %v5616_v29, %v1861_v27  ;;  %v6670_v27 = vld [vmem:[%s7605_s5 + $0x20] ss:$8 sps:$4 sm:$0xff]  }
0x1b9f   :  { %v1863_v11 = vadd.f32 %v1862_v49, %v1853_v6  ;;  %v2071_v49 = vld [vmem:[#allocation4 + $0x110] sm:$0xff] }
0x1ba1   :  { %5617 = vtanh.f32 %v1863_v11 }
0x1bae   :  { %v5618_v56 = vpop.eup %5617 }
0x1baf   :  { %v1865_v47 = vsub.f32 %v1802_v41, %v5618_v56  ;;  %v1999_v41 = vld [vmem:[#allocation4 + $0x108] sm:$0xff] }
0x1bb1   :  { %1867 = vrot.lane.b32.xlu0 %v1865_v47, %s5852_s27 }
0x1c23   :  { %v1868_v33 = vpop.permute.xlu0 %1867 }
0x1c24   :  { %v1870_v61 = vmul.f32 %v5616_v29, %v1868_v33 }
0x1c26   :  { %1872 = vrot.lane.b32.xlu1 %v1870_v61, %s5852_s27 }
0x1c98   :  { %v1873_v58 = vpop.permute.xlu1 %1872 }
0x1c99   :  { %v1875_v53 = vadd.f32 %v5618_v56, %v1873_v58 }
0x1c9b   :  { %1876 = vst.msk [vmem:[#allocation2 + $0x70] sm:$0xff] %vm852_vm3, %v1875_v53  ;;  %1878 = vst.msk [vmem:[#allocation3 + $0x48] sm:$0xff] %vm852_vm3, %v1875_v53  ;;  %v1880_v8 = vpack.c.bf16 %v1875_v53, %v1875_v53 }
0x1c9c   :  { %1877 = vst.msk [vmem:[#allocation2 + $0x48] sm:$0xff] %vm854_vm4, %v1875_v53  ;;  %1879 = vst.msk [vmem:[#allocation3 + $0x70] sm:$0xff] %vm854_vm4, %v1875_v53 }
0x1c9d   :  { %5274 = vmatmul.mubr.msk.bf16.vlgmr.msra.gmra.mxu1 %vm681_vm2, %v1880_v8 }
0x1c9e   :  { %2039 = vmatpush1.bf16.msra.mxu1 %v6377_v48  ;;  %2062 = vmatprep.mubr.bf16.mxu1 %v5851_v1 }
0x1c9f   :  { %2040 = vmatprep.subr.bf16.mxu1 %v6384_v23 }
0x1ca2   :  { %2041 = vmatpush1.bf16.msra.mxu1 %v6390_v25 }
0x1ca3   :  { %2042 = vmatprep.subr.bf16.mxu1 %v6415_v59 }
0x1ca6   :  { %2043 = vmatpush1.bf16.msra.mxu1 %v6421_v7 }
0x1ca7   :  { %2044 = vmatprep.subr.bf16.mxu1 %v6427_v2 }
0x1caa   :  { %2045 = vmatpush1.bf16.msra.mxu1 %v6433_v30 }
0x1cab   :  { %2184 = vmatprep.subr.bf16.mxu1 %v6361_v0 }
0x1d5d   :  { %v1918_v9 = vpop.f32.mrf.mxu1 }
0x1d5e   :  { %v1927_v36 = vadd.f32 %v1925_v10, %v1918_v9 }
0x1d5f   :  { %v1920_v63 = vpop.f32.mrf.mxu1 }
0x1d60   :  { %v5275_v4 = vmul.f32 -1.442695, %v1927_v36  ;;  %v1934_v3 = vadd.f32 %v6571_v60, %v1920_v63 }
0x1d61   :  { %v1922_v40 = vpop.f32.mrf.mxu1 }
0x1d62   :  { %5619 = vpow2.f32 %v5275_v4 }
0x1d63   :  { %v1923_v12 = vpop.f32.mrf.mxu1 }
0x1d64   :  { %v6693_v12 = vld [vmem:[%s7605_s5 + $0x14] ss:$8 sps:$4 sm:$0xff]  }
0x1d6f   :  { %v5620_v57 = vpop.eup %5619 }
0x1d70   :  { %v1931_v42 = vadd.f32 1.0, %v5620_v57  ;;  %v6699_v57 = vld [vmem:[%s7605_s5 + $0x10] ss:$8 sps:$4 sm:$0xff]  }
0x1d72   :  { %5621 = vrcp.f32 %v1931_v42  ;;  %v6705_v42 = vld [vmem:[%s7605_s5 + $0x4] ss:$8 sps:$4 sm:$0xff]  }
0x1d7f   :  { %v5622_v45 = vpop.eup %5621 }
0x1d80   :  { %v1935_v44 = vmul.f32 %v5622_v45, %v1934_v3  ;;  %v6711_v3 = vld [vmem:[%s7605_s5] ss:$8 sps:$4 sm:$0xff]  }
0x1d82   :  { %v1936_v5 = vadd.f32 %v1935_v44, %v1926_v20  ;;  %v2144_v44 = vld [vmem:[#allocation4 + $0x120] sm:$0xff] }
0x1d84   :  { %5623 = vtanh.f32 %v1936_v5 }
0x1d91   :  { %v5624_v46 = vpop.eup %5623 }
0x1d92   :  { %v1938_v0 = vsub.f32 %v1875_v53, %v5624_v46 }
0x1d94   :  { %1940 = vrot.lane.b32.xlu0 %v1938_v0, %s5852_s27 }
0x1e06   :  { %v1941_v14 = vpop.permute.xlu0 %1940 }
0x1e07   :  { %v1943_v15 = vmul.f32 %v5622_v45, %v1941_v14 }
0x1e09   :  { %1945 = vrot.lane.b32.xlu1 %v1943_v15, %s5852_s27 }
0x1e7b   :  { %v1946_v31 = vpop.permute.xlu1 %1945 }
0x1e7c   :  { %v1948_v51 = vadd.f32 %v5624_v46, %v1946_v31 }
0x1e7e   :  { %1949 = vst.msk [vmem:[#allocation2 + $0x78] sm:$0xff] %vm852_vm3, %v1948_v51  ;;  %1951 = vst.msk [vmem:[#allocation3 + $0x40] sm:$0xff] %vm852_vm3, %v1948_v51  ;;  %v1953_v37 = vpack.c.bf16 %v1948_v51, %v1948_v51 }
0x1e7f   :  { %1950 = vst.msk [vmem:[#allocation2 + $0x40] sm:$0xff] %vm854_vm4, %v1948_v51  ;;  %1952 = vst.msk [vmem:[#allocation3 + $0x78] sm:$0xff] %vm854_vm4, %v1948_v51 }
0x1e80   :  { %5276 = vmatmul.mubr.msk.bf16.vlgmr.msra.gmra.mxu0 %vm681_vm2, %v1953_v37 }
0x1e81   :  { %2112 = vmatpush1.bf16.msra.mxu0 %v6377_v48  ;;  %2135 = vmatprep.mubr.bf16.mxu0 %v5851_v1 }
0x1e82   :  { %2113 = vmatprep.subr.bf16.mxu0 %v6384_v23 }
0x1e85   :  { %2114 = vmatpush1.bf16.msra.mxu0 %v6390_v25 }
0x1e86   :  { %2115 = vmatprep.subr.bf16.mxu0 %v6415_v59 }
0x1e89   :  { %2116 = vmatpush1.bf16.msra.mxu0 %v6421_v7 }
0x1e8a   :  { %2117 = vmatprep.subr.bf16.mxu0 %v6427_v2 }
0x1e8d   :  { %2118 = vmatpush1.bf16.msra.mxu0 %v6433_v30 }
0x1e8e   :  { %2257 = vmatprep.subr.bf16.mxu0 %v6643_v34 }
0x1f40   :  { %v1991_v48 = vpop.f32.mrf.mxu0 }
0x1f41   :  { %v2000_v23 = vadd.f32 %v1998_v16, %v1991_v48  ;;  %v2145_v16 = vld [vmem:[#allocation4 + $0x128] sm:$0xff] }
0x1f42   :  { %v1993_v43 = vpop.f32.mrf.mxu0 }
0x1f43   :  { %v5277_v25 = vmul.f32 -1.442695, %v2000_v23  ;;  %v2007_v50 = vadd.f32 %v6571_v60, %v1993_v43 }
0x1f44   :  { %v1995_v13 = vpop.f32.mrf.mxu0 }
0x1f45   :  { %5625 = vpow2.f32 %v5277_v25 }
0x1f46   :  { %v1996_v38 = vpop.f32.mrf.mxu0 }
0x1f52   :  { %v5626_v55 = vpop.eup %5625 }
0x1f53   :  { %v2004_v26 = vadd.f32 1.0, %v5626_v55 }
0x1f55   :  { %5627 = vrcp.f32 %v2004_v26 }
0x1f62   :  { %v5628_v19 = vpop.eup %5627 }
0x1f63   :  { %v2008_v35 = vmul.f32 %v5628_v19, %v2007_v50 }
0x1f65   :  { %v2009_v52 = vadd.f32 %v2008_v35, %v1999_v41  ;;  %v2217_v35 = vld [vmem:[#allocation4 + $0x130] sm:$0xff] }
0x1f67   :  { %5629 = vtanh.f32 %v2009_v52 }
0x1f74   :  { %v5630_v24 = vpop.eup %5629 }
0x1f75   :  { %v2011_v17 = vsub.f32 %v1948_v51, %v5630_v24 }
0x1f77   :  { %2013 = vrot.lane.b32.xlu0 %v2011_v17, %s5852_s27 }
0x1fe9   :  { %v2014_v18 = vpop.permute.xlu0 %2013 }
0x1fea   :  { %v2016_v21 = vmul.f32 %v5628_v19, %v2014_v18 }
0x1fec   :  { %2018 = vrot.lane.b32.xlu1 %v2016_v21, %s5852_s27 }
0x205e   :  { %v2019_v32 = vpop.permute.xlu1 %2018 }
0x205f   :  { %v2021_v28 = vadd.f32 %v5630_v24, %v2019_v32 }
0x2061   :  { %2022 = vst.msk [vmem:[#allocation2 + $0x80] sm:$0xff] %vm852_vm3, %v2021_v28  ;;  %2024 = vst.msk [vmem:[#allocation3 + $0x38] sm:$0xff] %vm852_vm3, %v2021_v28  ;;  %v2026_v22 = vpack.c.bf16 %v2021_v28, %v2021_v28 }
0x2062   :  { %2023 = vst.msk [vmem:[#allocation2 + $0x38] sm:$0xff] %vm854_vm4, %v2021_v28  ;;  %2025 = vst.msk [vmem:[#allocation3 + $0x80] sm:$0xff] %vm854_vm4, %v2021_v28 }
0x2063   :  { %5278 = vmatmul.mubr.msk.bf16.vlgmr.msra.gmra.mxu1 %vm681_vm2, %v2026_v22 }
0x2064   :  { %2185 = vmatpush1.bf16.msra.mxu1 %v6657_v39  ;;  %2208 = vmatprep.mubr.bf16.mxu1 %v5851_v1 }
0x2065   :  { %2186 = vmatprep.subr.bf16.mxu1 %v6664_v54 }
0x2068   :  { %2187 = vmatpush1.bf16.msra.mxu1 %v6670_v27 }
0x2069   :  { %2188 = vmatprep.subr.bf16.mxu1 %v6415_v59 }
0x206c   :  { %2189 = vmatpush1.bf16.msra.mxu1 %v6421_v7 }
0x206d   :  { %2190 = vmatprep.subr.bf16.mxu1 %v6427_v2  ;;  %v2072_v2 = vld [vmem:[#allocation4 + $0x118] sm:$0xff] }
0x2070   :  { %2191 = vmatpush1.bf16.msra.mxu1 %v6433_v30 }
0x2071   :  { %2330 = vmatprep.subr.bf16.mxu1 %v6643_v34 }
0x2123   :  { %v2064_v29 = vpop.f32.mrf.mxu1 }
0x2124   :  { %v2073_v6 = vadd.f32 %v2071_v49, %v2064_v29  ;;  %v2218_v49 = vld [vmem:[#allocation4 + $0x138] sm:$0xff] }
0x2125   :  { %v2066_v11 = vpop.f32.mrf.mxu1 }
0x2126   :  { %v5279_v56 = vmul.f32 -1.442695, %v2073_v6  ;;  %v2080_v59 = vadd.f32 %v6571_v60, %v2066_v11 }
0x2127   :  { %v2068_v47 = vpop.f32.mrf.mxu1 }
0x2128   :  { %5631 = vpow2.f32 %v5279_v56 }
0x2129   :  { %v2069_v33 = vpop.f32.mrf.mxu1 }
0x2135   :  { %v5632_v61 = vpop.eup %5631 }
0x2136   :  { %v2077_v58 = vadd.f32 1.0, %v5632_v61 }
0x2138   :  { %5633 = vrcp.f32 %v2077_v58 }
0x2145   :  { %v5634_v7 = vpop.eup %5633 }
0x2146   :  { %v2081_v53 = vmul.f32 %v5634_v7, %v2080_v59 }
0x2148   :  { %v2082_v8 = vadd.f32 %v2081_v53, %v2072_v2 }
0x214a   :  { %5635 = vtanh.f32 %v2082_v8 }
0x2157   :  { %v5636_v30 = vpop.eup %5635 }
0x2158   :  { %v2084_v9 = vsub.f32 %v2021_v28, %v5636_v30 }
0x215a   :  { %2086 = vrot.lane.b32.xlu0 %v2084_v9, %s5852_s27 }
0x21cc   :  { %v2087_v10 = vpop.permute.xlu0 %2086 }
0x21cd   :  { %v2089_v36 = vmul.f32 %v5634_v7, %v2087_v10  ;;  %v2290_v7 = vld [vmem:[#allocation4 + $0x140] sm:$0xff] }
0x21cf   :  { %2091 = vrot.lane.b32.xlu1 %v2089_v36, %s5852_s27 }
0x2241   :  { %v2092_v63 = vpop.permute.xlu1 %2091 }
0x2242   :  { %v2094_v4 = vadd.f32 %v5636_v30, %v2092_v63 }
0x2244   :  { %2095 = vst.msk [vmem:[#allocation2 + $0x88] sm:$0xff] %vm852_vm3, %v2094_v4  ;;  %2097 = vst.msk [vmem:[#allocation3 + $0x30] sm:$0xff] %vm852_vm3, %v2094_v4  ;;  %v2099_v40 = vpack.c.bf16 %v2094_v4, %v2094_v4 }
0x2245   :  { %2096 = vst.msk [vmem:[#allocation2 + $0x30] sm:$0xff] %vm854_vm4, %v2094_v4  ;;  %2098 = vst.msk [vmem:[#allocation3 + $0x88] sm:$0xff] %vm854_vm4, %v2094_v4 }
0x2246   :  { %5280 = vmatmul.mubr.msk.bf16.vlgmr.msra.gmra.mxu0 %vm681_vm2, %v2099_v40 }
0x2247   :  { %2258 = vmatpush1.bf16.msra.mxu0 %v6657_v39  ;;  %2281 = vmatprep.mubr.bf16.mxu0 %v5851_v1 }
0x2248   :  { %2259 = vmatprep.subr.bf16.mxu0 %v6664_v54 }
0x224b   :  { %2260 = vmatpush1.bf16.msra.mxu0 %v6670_v27 }
0x224c   :  { %2261 = vmatprep.subr.bf16.mxu0 %v6693_v12 }
0x224f   :  { %2262 = vmatpush1.bf16.msra.mxu0 %v6699_v57 }
0x2250   :  { %2263 = vmatprep.subr.bf16.mxu0 %v6705_v42 }
0x2253   :  { %2264 = vmatpush1.bf16.msra.mxu0 %v6711_v3 }
0x2254   :  { %2403 = vmatprep.subr.bf16.mxu0 %v6643_v34 }
0x2306   :  { %v2137_v45 = vpop.f32.mrf.mxu0 }
0x2307   :  { %v2146_v20 = vadd.f32 %v2144_v44, %v2137_v45  ;;  %v2291_v45 = vld [vmem:[#allocation4 + $0x148] sm:$0xff] }
0x2308   :  { %v2139_v5 = vpop.f32.mrf.mxu0 }
0x2309   :  { %v5281_v46 = vmul.f32 -1.442695, %v2146_v20  ;;  %v2153_v51 = vadd.f32 %v6571_v60, %v2139_v5 }
0x230a   :  { %v2141_v0 = vpop.f32.mrf.mxu0 }
0x230b   :  { %5637 = vpow2.f32 %v5281_v46 }
0x230c   :  { %v2142_v14 = vpop.f32.mrf.mxu0 }
0x2318   :  { %v5638_v15 = vpop.eup %5637 }
0x2319   :  { %v2150_v31 = vadd.f32 1.0, %v5638_v15 }
0x231b   :  { %5639 = vrcp.f32 %v2150_v31 }
0x2328   :  { %v5640_v37 = vpop.eup %5639 }
0x2329   :  { %v2154_v48 = vmul.f32 %v5640_v37, %v2153_v51 }
0x232b   :  { %v2155_v23 = vadd.f32 %v2154_v48, %v2145_v16 }
0x232d   :  { %5641 = vtanh.f32 %v2155_v23 }
0x233a   :  { %v5642_v43 = vpop.eup %5641 }
0x233b   :  { %v2157_v25 = vsub.f32 %v2094_v4, %v5642_v43 }
0x233d   :  { %2159 = vrot.lane.b32.xlu0 %v2157_v25, %s5852_s27 }
0x23af   :  { %v2160_v13 = vpop.permute.xlu0 %2159 }
0x23b0   :  { %v2162_v38 = vmul.f32 %v5640_v37, %v2160_v13  ;;  %v2363_v37 = vld [vmem:[#allocation4 + $0x150] sm:$0xff] }
0x23b2   :  { %2164 = vrot.lane.b32.xlu1 %v2162_v38, %s5852_s27 }
0x2424   :  { %v2165_v55 = vpop.permute.xlu1 %2164 }
0x2425   :  { %v2167_v26 = vadd.f32 %v5642_v43, %v2165_v55 }
0x2427   :  { %2168 = vst.msk [vmem:[#allocation2 + $0x90] sm:$0xff] %vm852_vm3, %v2167_v26  ;;  %2170 = vst.msk [vmem:[#allocation3 + $0x28] sm:$0xff] %vm852_vm3, %v2167_v26  ;;  %v2172_v50 = vpack.c.bf16 %v2167_v26, %v2167_v26 }
0x2428   :  { %2169 = vst.msk [vmem:[#allocation2 + $0x28] sm:$0xff] %vm854_vm4, %v2167_v26  ;;  %2171 = vst.msk [vmem:[#allocation3 + $0x90] sm:$0xff] %vm854_vm4, %v2167_v26 }
0x2429   :  { %5282 = vmatmul.mubr.msk.bf16.vlgmr.msra.gmra.mxu1 %vm681_vm2, %v2172_v50 }
0x242a   :  { %2331 = vmatpush1.bf16.msra.mxu1 %v6657_v39  ;;  %2354 = vmatprep.mubr.bf16.mxu1 %v5851_v1 }
0x242b   :  { %2332 = vmatprep.subr.bf16.mxu1 %v6664_v54 }
0x242e   :  { %2333 = vmatpush1.bf16.msra.mxu1 %v6670_v27 }
0x242f   :  { %2334 = vmatprep.subr.bf16.mxu1 %v6693_v12 }
0x2432   :  { %2335 = vmatpush1.bf16.msra.mxu1 %v6699_v57 }
0x2433   :  { %2336 = vmatprep.subr.bf16.mxu1 %v6705_v42 }
0x2436   :  { %2337 = vmatpush1.bf16.msra.mxu1 %v6711_v3 }
0x2437   :  { %2476 = vmatprep.subr.bf16.mxu1 %v6643_v34 }
0x24e9   :  { %v2210_v19 = vpop.f32.mrf.mxu1 }
0x24ea   :  { %v2219_v41 = vadd.f32 %v2217_v35, %v2210_v19 }
0x24eb   :  { %v2212_v52 = vpop.f32.mrf.mxu1 }
0x24ec   :  { %v5283_v24 = vmul.f32 -1.442695, %v2219_v41  ;;  %v2226_v28 = vadd.f32 %v6571_v60, %v2212_v52  ;;  %v2436_v52 = vld [vmem:[#allocation4 + $0x160] sm:$0xff] }
0x24ed   :  { %v2214_v17 = vpop.f32.mrf.mxu1 }
0x24ee   :  { %5643 = vpow2.f32 %v5283_v24 }
0x24ef   :  { %v2215_v18 = vpop.f32.mrf.mxu1 }
0x24fb   :  { %v5644_v21 = vpop.eup %5643 }
0x24fc   :  { %v2223_v32 = vadd.f32 1.0, %v5644_v21 }
0x24fe   :  { %5645 = vrcp.f32 %v2223_v32 }
0x250b   :  { %v5646_v22 = vpop.eup %5645 }
0x250c   :  { %v2227_v29 = vmul.f32 %v5646_v22, %v2226_v28 }
0x250e   :  { %v2228_v6 = vadd.f32 %v2227_v29, %v2218_v49 }
0x2510   :  { %5647 = vtanh.f32 %v2228_v6 }
0x251d   :  { %v5648_v11 = vpop.eup %5647 }
0x251e   :  { %v2230_v34 = vsub.f32 %v2167_v26, %v5648_v11 }
0x2520   :  { %2232 = vrot.lane.b32.xlu0 %v2230_v34, %s5852_s27 }
0x2592   :  { %v2233_v56 = vpop.permute.xlu0 %2232 }
0x2593   :  { %v2235_v47 = vmul.f32 %v5646_v22, %v2233_v56 }
0x2595   :  { %2237 = vrot.lane.b32.xlu1 %v2235_v47, %s5852_s27 }
0x2607   :  { %v2238_v33 = vpop.permute.xlu1 %2237 }
0x2608   :  { %v2240_v61 = vadd.f32 %v5648_v11, %v2238_v33  ;;  %v2437_v11 = vld [vmem:[#allocation4 + $0x168] sm:$0xff] }
0x260a   :  { %2241 = vst.msk [vmem:[#allocation2 + $0x98] sm:$0xff] %vm852_vm3, %v2240_v61  ;;  %2243 = vst.msk [vmem:[#allocation3 + $0x20] sm:$0xff] %vm852_vm3, %v2240_v61  ;;  %v2245_v58 = vpack.c.bf16 %v2240_v61, %v2240_v61 }
0x260b   :  { %2242 = vst.msk [vmem:[#allocation2 + $0x20] sm:$0xff] %vm854_vm4, %v2240_v61  ;;  %2244 = vst.msk [vmem:[#allocation3 + $0x98] sm:$0xff] %vm854_vm4, %v2240_v61 }
0x260c   :  { %5284 = vmatmul.mubr.msk.bf16.vlgmr.msra.gmra.mxu0 %vm681_vm2, %v2245_v58 }
0x260d   :  { %2404 = vmatpush1.bf16.msra.mxu0 %v6657_v39  ;;  %2427 = vmatprep.mubr.bf16.mxu0 %v5851_v1 }
0x260e   :  { %2405 = vmatprep.subr.bf16.mxu0 %v6664_v54 }
0x2611   :  { %2406 = vmatpush1.bf16.msra.mxu0 %v6670_v27 }
0x2612   :  { %2407 = vmatprep.subr.bf16.mxu0 %v6693_v12 }
0x2615   :  { %2408 = vmatpush1.bf16.msra.mxu0 %v6699_v57 }
0x2616   :  { %2409 = vmatprep.subr.bf16.mxu0 %v6705_v42 }
0x2619   :  { %2410 = vmatpush1.bf16.msra.mxu0 %v6711_v3 }
0x26cc   :  { %v2283_v59 = vpop.f32.mrf.mxu0 }
0x26cd   :  { %v2292_v53 = vadd.f32 %v2290_v7, %v2283_v59 }
0x26ce   :  { %v2285_v2 = vpop.f32.mrf.mxu0 }
0x26cf   :  { %v5285_v8 = vmul.f32 -1.442695, %v2292_v53  ;;  %v2299_v63 = vadd.f32 %v6571_v60, %v2285_v2  ;;  %v2509_v2 = vld [vmem:[#allocation4 + $0x170] sm:$0xff] }
0x26d0   :  { %v2287_v30 = vpop.f32.mrf.mxu0 }
0x26d1   :  { %5649 = vpow2.f32 %v5285_v8 }
0x26d2   :  { %v2288_v9 = vpop.f32.mrf.mxu0 }
0x26de   :  { %v5650_v10 = vpop.eup %5649 }
0x26df   :  { %v2296_v36 = vadd.f32 1.0, %v5650_v10 }
0x26e1   :  { %5651 = vrcp.f32 %v2296_v36 }
0x26ee   :  { %v5652_v4 = vpop.eup %5651 }
0x26ef   :  { %v2300_v40 = vmul.f32 %v5652_v4, %v2299_v63 }
0x26f1   :  { %v2301_v44 = vadd.f32 %v2300_v40, %v2291_v45 }
0x26f3   :  { %5653 = vtanh.f32 %v2301_v44 }
0x2700   :  { %v5654_v20 = vpop.eup %5653 }
0x2701   :  { %v2303_v5 = vsub.f32 %v2240_v61, %v5654_v20 }
0x2703   :  { %2305 = vrot.lane.b32.xlu0 %v2303_v5, %s5852_s27 }
0x2775   :  { %v2306_v46 = vpop.permute.xlu0 %2305 }
0x2776   :  { %v2308_v0 = vmul.f32 %v5652_v4, %v2306_v46  ;;  %v5489_v46 = vld [vmem:[%s7610_s8 + $0x30] ss:$8 sps:$4 sm:$0xff]  }
0x2778   :  { %2310 = vrot.lane.b32.xlu1 %v2308_v0, %s5852_s27  ;;  %v5491_v0 = vld [vmem:[%s7610_s8 + $0x34] ss:$8 sps:$4 sm:$0xff]  }
0x2779   :  { %2709 = vmatprep.subr.bf16.mxu0 %v5491_v0  ;;  %v2548_v0 = vld [vmem:[#allocation2 + $0x58] sm:$0xff] }
0x27ea   :  { %v2311_v14 = vpop.permute.xlu1 %2310 }
0x27eb   :  { %v2313_v15 = vadd.f32 %v5654_v20, %v2311_v14  ;;  %v2510_v20 = vld [vmem:[#allocation4 + $0x178] sm:$0xff] }
0x27ec   :  { %v5492_v14 = vld [vmem:[%s7611_s7 + $0x30] ss:$8 sps:$4 sm:$0xff]  }
0x27ed   :  { %2314 = vst.msk [vmem:[#allocation2 + $0xa0] sm:$0xff] %vm852_vm3, %v2313_v15  ;;  %2316 = vst.msk [vmem:[#allocation3 + $0x18] sm:$0xff] %vm852_vm3, %v2313_v15  ;;  %v2318_v31 = vpack.c.bf16 %v2313_v15, %v2313_v15 }
0x27ee   :  { %2315 = vst.msk [vmem:[#allocation2 + $0x18] sm:$0xff] %vm854_vm4, %v2313_v15  ;;  %2317 = vst.msk [vmem:[#allocation3 + $0xa0] sm:$0xff] %vm854_vm4, %v2313_v15 }
0x27ef   :  { %5286 = vmatmul.mubr.msk.bf16.vlgmr.msra.gmra.mxu1 %vm681_vm2, %v2318_v31 }
0x27f0   :  { %2477 = vmatpush1.bf16.msra.mxu1 %v6657_v39  ;;  %2500 = vmatprep.mubr.bf16.mxu1 %v5851_v1 }
0x27f1   :  { %2478 = vmatprep.subr.bf16.mxu1 %v6664_v54 }
0x27f4   :  { %2479 = vmatpush1.bf16.msra.mxu1 %v6670_v27 }
0x27f5   :  { %2480 = vmatprep.subr.bf16.mxu1 %v6693_v12 }
0x27f8   :  { %2481 = vmatpush1.bf16.msra.mxu1 %v6699_v57  ;;  %v2364_v57 = vld [vmem:[#allocation4 + $0x158] sm:$0xff] }
0x27f9   :  { %2482 = vmatprep.subr.bf16.mxu1 %v6705_v42 }
0x27fc   :  { %2483 = vmatpush1.bf16.msra.mxu1 %v6711_v3 }
0x28af   :  { %v2356_v51 = vpop.f32.mrf.mxu1 }
0x28b0   :  { %v2365_v48 = vadd.f32 %v2363_v37, %v2356_v51  ;;  %v5497_v51 = vld [vmem:[%s7610_s8 + $0x24] ss:$8 sps:$4 sm:$0xff]  }
0x28b1   :  { %v2358_v16 = vpop.f32.mrf.mxu1  ;;  %v5500_v37 = vld [vmem:[%s7611_s7 + $0x24] ss:$8 sps:$4 sm:$0xff]  }
0x28b2   :  { %v5287_v23 = vmul.f32 -1.442695, %v2365_v48  ;;  %v2372_v27 = vadd.f32 %v6571_v60, %v2358_v16  ;;  %v5495_v48 = vld [vmem:[%s7610_s8 + $0x20] ss:$8 sps:$4 sm:$0xff]  }
0x28b3   :  { %v2360_v39 = vpop.f32.mrf.mxu1  ;;  %v5498_v16 = vld [vmem:[%s7611_s7 + $0x20] ss:$8 sps:$4 sm:$0xff]  }
0x28b4   :  { %5655 = vpow2.f32 %v5287_v23  ;;  %v5501_v23 = vld [vmem:[%s7610_s8 + $0x10] ss:$8 sps:$4 sm:$0xff]   ;;  %v5503_v39 = vld [vmem:[%s7610_s8 + $0x14] ss:$8 sps:$4 sm:$0xff]  }
0x28b5   :  { %v2361_v43 = vpop.f32.mrf.mxu1 }
0x28b6   :  { %v5504_v43 = vld [vmem:[%s7611_s7 + $0x10] ss:$8 sps:$4 sm:$0xff]  }
0x28c1   :  { %v5656_v25 = vpop.eup %5655 }
0x28c2   :  { %v2369_v54 = vadd.f32 1.0, %v5656_v25  ;;  %v5506_v25 = vld [vmem:[%s7611_s7 + $0x14] ss:$8 sps:$4 sm:$0xff]  }
0x28c4   :  { %5657 = vrcp.f32 %v2369_v54  ;;  %v5509_v54 = vld [vmem:[%s7610_s8 + $0x4] ss:$8 sps:$4 sm:$0xff]  }
0x28d1   :  { %v5658_v12 = vpop.eup %5657 }
0x28d2   :  { %v2373_v13 = vmul.f32 %v5658_v12, %v2372_v27  ;;  %v5512_v27 = vld [vmem:[%s7611_s7 + $0x4] ss:$8 sps:$4 sm:$0xff]  }
0x28d4   :  { %v2374_v38 = vadd.f32 %v2373_v13, %v2364_v57  ;;  %v5510_v13 = vld [vmem:[%s7611_s7] ss:$8 sps:$4 sm:$0xff]  }
0x28d6   :  { %5659 = vtanh.f32 %v2374_v38 }
0x28e3   :  { %v5660_v42 = vpop.eup %5659 }
0x28e4   :  { %v2376_v3 = vsub.f32 %v2313_v15, %v5660_v42 }
0x28e6   :  { %2378 = vrot.lane.b32.xlu0 %v2376_v3, %s5852_s27 }
0x2958   :  { %v2379_v55 = vpop.permute.xlu0 %2378 }
0x2959   :  { %v2381_v26 = vmul.f32 %v5658_v12, %v2379_v55  ;;  %v5507_v12 = vld [vmem:[%s7610_s8] ss:$8 sps:$4 sm:$0xff]  }
0x295b   :  { %2383 = vrot.lane.b32.xlu1 %v2381_v26, %s5852_s27 }
0x29cd   :  { %v2384_v50 = vpop.permute.xlu1 %2383 }
0x29ce   :  { %v2386_v19 = vadd.f32 %v5660_v42, %v2384_v50  ;;  %v6836_v42 = vld [vmem:[%s7612_s10 + $0x34] ss:$8 sps:$4 sm:$0xff]  }
0x29d0   :  { %2387 = vst.msk [vmem:[#allocation2 + $0xa8] sm:$0xff] %vm852_vm3, %v2386_v19  ;;  %2389 = vst.msk [vmem:[#allocation3 + $0x10] sm:$0xff] %vm852_vm3, %v2386_v19  ;;  %v2391_v35 = vpack.c.bf16 %v2386_v19, %v2386_v19 }
0x29d1   :  { %2388 = vst.msk [vmem:[#allocation2 + $0x10] sm:$0xff] %vm854_vm4, %v2386_v19  ;;  %2390 = vst.msk [vmem:[#allocation3 + $0xa8] sm:$0xff] %vm854_vm4, %v2386_v19 }
0x29d2   :  { %5288 = vmatmul.mubr.msk.bf16.vlgmr.msra.gmra.mxu0 %vm681_vm2, %v2391_v35 }
0x29d3   :  { %2733 = vmatprep.mubr.bf16.mxu0 %v5851_v1  ;;  %2710 = vmatpush1.bf16.msra.mxu0 %v5489_v46  ;;  %v2584_v46 = vld [vmem:[#allocation3 + $0x58] sm:$0xff] }
0x29d4   :  { %2711 = vmatprep.subr.bf16.mxu0 %v5497_v51  ;;  %v2585_v51 = vld [vmem:[#allocation3 + $0x60] sm:$0xff] }
0x29d7   :  { %2712 = vmatpush1.bf16.msra.mxu0 %v5495_v48 }
0x29d8   :  { %2713 = vmatprep.subr.bf16.mxu0 %v5503_v39  ;;  %v2552_v39 = vld [vmem:[#allocation2 + $0x78] sm:$0xff] }
0x29db   :  { %2714 = vmatpush1.bf16.msra.mxu0 %v5501_v23  ;;  %v2588_v23 = vld [vmem:[#allocation3 + $0x78] sm:$0xff] }
0x29dc   :  { %2715 = vmatprep.subr.bf16.mxu0 %v5509_v54 }
0x29df   :  { %2716 = vmatpush1.bf16.msra.mxu0 %v5507_v12  ;;  %v2590_v12 = vld [vmem:[#allocation3 + $0x88] sm:$0xff] }
0x29e0   :  { %3254 = vmatprep.subr.bf16.mxu0 %v6836_v42 }
0x2a92   :  { %v2429_v41 = vpop.f32.mrf.mxu0 }
0x2a93   :  { %v2438_v24 = vadd.f32 %v2436_v52, %v2429_v41  ;;  %v6847_v41 = vld [vmem:[%s7612_s10 + $0x30] ss:$8 sps:$4 sm:$0xff]  }
0x2a94   :  { %v2431_v17 = vpop.f32.mrf.mxu0 }
0x2a95   :  { %v5289_v18 = vmul.f32 -1.442695, %v2438_v24  ;;  %v2445_v29 = vadd.f32 %v6571_v60, %v2431_v17  ;;  %v6852_v17 = vld [vmem:[%s7612_s10 + $0x24] ss:$8 sps:$4 sm:$0xff]  }
0x2a96   :  { %v2433_v21 = vpop.f32.mrf.mxu0 }
0x2a97   :  { %5661 = vpow2.f32 %v5289_v18  ;;  %v6861_v18 = vld [vmem:[%s7612_s10 + $0x20] ss:$8 sps:$4 sm:$0xff]   ;;  %v6868_v21 = vld [vmem:[%s7612_s10 + $0x14] ss:$8 sps:$4 sm:$0xff]  }
0x2a98   :  { %v2434_v32 = vpop.f32.mrf.mxu0 }
0x2a99   :  { %v2575_v32 = vld [vmem:[#allocation3 + $0x10] sm:$0xff] }
0x2aa4   :  { %v5662_v28 = vpop.eup %5661 }
0x2aa5   :  { %v2442_v22 = vadd.f32 1.0, %v5662_v28  ;;  %v2539_v28 = vld [vmem:[#allocation2 + $0x10] sm:$0xff] }
0x2aa7   :  { %5663 = vrcp.f32 %v2442_v22  ;;  %v2576_v22 = vld [vmem:[#allocation3 + $0x18] sm:$0xff] }
0x2ab4   :  { %v5664_v49 = vpop.eup %5663 }
0x2ab5   :  { %v2446_v6 = vmul.f32 %v5664_v49, %v2445_v29  ;;  %v2540_v29 = vld [vmem:[#allocation2 + $0x18] sm:$0xff] }
0x2ab7   :  { %v2447_v34 = vadd.f32 %v2446_v6, %v2437_v11  ;;  %v2562_v6 = vpack.c.bf16 %v2540_v29, %v2539_v28  ;;  %v6877_v11 = vld [vmem:[%s7612_s10 + $0x10] ss:$8 sps:$4 sm:$0xff]   ;;  %v2558_v28 = vld [vmem:[#allocation2 + $0xa8] sm:$0xff]  ;;  %v2557_v29 = vld [vmem:[#allocation2 + $0xa0] sm:$0xff] }
0x2ab9   :  { %5665 = vtanh.f32 %v2447_v34  ;;  %v6882_v34 = vld [vmem:[%s7612_s10 + $0x4] ss:$8 sps:$4 sm:$0xff]  }
0x2ac6   :  { %v5666_v56 = vpop.eup %5665 }
0x2ac7   :  { %v2449_v47 = vsub.f32 %v2386_v19, %v5666_v56 }
0x2ac9   :  { %2451 = vrot.lane.b32.xlu0 %v2449_v47, %s5852_s27  ;;  %v2577_v47 = vld [vmem:[#allocation3 + $0x20] sm:$0xff] }
0x2b3b   :  { %v2452_v33 = vpop.permute.xlu0 %2451 }
0x2b3c   :  { %v2454_v61 = vmul.f32 %v5664_v49, %v2452_v33  ;;  %v2598_v49 = vpack.c.bf16 %v2576_v22, %v2575_v32  ;;  %v2541_v33 = vld [vmem:[#allocation2 + $0x20] sm:$0xff]  ;;  %v2594_v32 = vld [vmem:[#allocation3 + $0xa8] sm:$0xff] }
0x2b3d   :  { %v2593_v22 = vld [vmem:[#allocation3 + $0xa0] sm:$0xff] }
0x2b3e   :  { %2456 = vrot.lane.b32.xlu1 %v2454_v61, %s5852_s27  ;;  %v2578_v61 = vld [vmem:[#allocation3 + $0x28] sm:$0xff] }
0x2bb0   :  { %v2457_v58 = vpop.permute.xlu1 %2456 }
0x2bb1   :  { %v2459_v59 = vadd.f32 %v5666_v56, %v2457_v58  ;;  %v6893_v56 = vld [vmem:[%s7612_s10] ss:$8 sps:$4 sm:$0xff]  }
0x2bb2   :  { %v2542_v58 = vld [vmem:[#allocation2 + $0x28] sm:$0xff] }
0x2bb3   :  { %2460 = vst.msk [vmem:[#allocation2 + $0xb0] sm:$0xff] %vm852_vm3, %v2459_v59  ;;  %2462 = vst.msk [vmem:[#allocation3 + $0x8] sm:$0xff] %vm852_vm3, %v2459_v59  ;;  %v2464_v7 = vpack.c.bf16 %v2459_v59, %v2459_v59 }
0x2bb4   :  { %2461 = vst.msk [vmem:[#allocation2 + $0x8] sm:$0xff] %vm854_vm4, %v2459_v59  ;;  %2463 = vst.msk [vmem:[#allocation3 + $0xb0] sm:$0xff] %vm854_vm4, %v2459_v59 }
0x2bb5   :  { %5290 = vmatmul.mubr.msk.bf16.vlgmr.msra.gmra.mxu1 %vm681_vm2, %v2464_v7  ;;  %v2563_v7 = vpack.c.bf16 %v2542_v58, %v2541_v33 }
0x2bb6   :  { %2962 = vmatprep.mubr.bf16.mxu1 %v5851_v1 }
0x2bba   :  { %v2574_v26 = vld [vmem:[#allocation3 + $0x8] sm:$0xff]  ;;  %v2559_v58 = vld [vmem:[#allocation2 + $0xb0] sm:$0xff] }
0x2bbb   :  { %v2538_v50 = vld [vmem:[#allocation2 + $0x8] sm:$0xff] }
0x2c75   :  { %v2502_v53 = vpop.f32.mrf.mxu1 }
0x2c76   :  { %v2511_v8 = vadd.f32 %v2509_v2, %v2502_v53  ;;  %v2579_v53 = vld [vmem:[#allocation3 + $0x30] sm:$0xff] }
0x2c77   :  { %v2504_v30 = vpop.f32.mrf.mxu1  ;;  %v2543_v2 = vld [vmem:[#allocation2 + $0x30] sm:$0xff] }
0x2c78   :  { %v5291_v9 = vmul.f32 -1.442695, %v2511_v8  ;;  %v2518_v40 = vadd.f32 %v6571_v60, %v2504_v30  ;;  %v5494_v60 = vld [vmem:[%s7611_s7 + $0x34] ss:$8 sps:$4 sm:$0xff]  }
0x2c79   :  { %v2506_v10 = vpop.f32.mrf.mxu1  ;;  %2938 = vmatprep.subr.bf16.mxu1 %v5494_v60  ;;  %v2580_v8 = vld [vmem:[#allocation3 + $0x38] sm:$0xff] }
0x2c7a   :  { %5667 = vpow2.f32 %v5291_v9  ;;  %2939 = vmatpush1.bf16.msra.mxu1 %v5492_v14  ;;  %v2544_v30 = vld [vmem:[#allocation2 + $0x38] sm:$0xff]  ;;  %v2600_v9 = vpack.c.bf16 %v2580_v8, %v2579_v53  ;;  %v3083_v53 = vld [vmem:[%s7613_s9] sm:$0x3] }
0x2c7b   :  { %v2507_v36 = vpop.f32.mrf.mxu1  ;;  %2940 = vmatprep.subr.bf16.mxu1 %v5500_v37  ;;  %v2564_v10 = vpack.c.bf16 %v2544_v30, %v2543_v2  ;;  %v2549_v37 = vld [vmem:[#allocation2 + $0x60] sm:$0xff]  ;;  %v7620_v2 = vsub.s32 0, %v6151_v62 }
0x2c7c   :  { %v2581_v36 = vld [vmem:[#allocation3 + $0x40] sm:$0xff] }
0x2c7d   :  { %v6958_v8 = vrot.slane %v3083_v53, %v7620_v2 }
0x2c7e   :  { %2941 = vmatpush1.bf16.msra.mxu1 %v5498_v16 }
0x2c7f   :  { %2942 = vmatprep.subr.bf16.mxu1 %v5506_v25  ;;  %v2551_v25 = vld [vmem:[#allocation2 + $0x70] sm:$0xff] }
0x2c82   :  { %2943 = vmatpush1.bf16.msra.mxu1 %v5504_v43  ;;  %v2587_v43 = vld [vmem:[#allocation3 + $0x70] sm:$0xff] }
0x2c83   :  { %2944 = vmatprep.subr.bf16.mxu1 %v5512_v27  ;;  %v2604_v54 = vpack.c.bf16 %v2588_v23, %v2587_v43  ;;  %v2568_v27 = vpack.c.bf16 %v2552_v39, %v2551_v25 }
0x2c86   :  { %2945 = vmatpush1.bf16.msra.mxu1 %v5510_v13  ;;  %v2554_v13 = vld [vmem:[#allocation2 + $0x88] sm:$0xff] }
0x2c87   :  { %v5668_v63 = vpop.eup %5667  ;;  %3325 = vmatprep.subr.bf16.mxu1 %v6836_v42 }
0x2c88   :  { %v2515_v4 = vadd.f32 1.0, %v5668_v63  ;;  %v2545_v63 = vld [vmem:[#allocation2 + $0x40] sm:$0xff] }
0x2c8a   :  { %5669 = vrcp.f32 %v2515_v4  ;;  %v2582_v4 = vld [vmem:[#allocation3 + $0x48] sm:$0xff] }
0x2c97   :  { %v5670_v45 = vpop.eup %5669 }
0x2c98   :  { %v2519_v44 = vmul.f32 %v5670_v45, %v2518_v40  ;;  %v2546_v40 = vld [vmem:[#allocation2 + $0x48] sm:$0xff] }
0x2c9a   :  { %v2520_v5 = vadd.f32 %v2519_v44, %v2510_v20  ;;  %v2565_v44 = vpack.c.bf16 %v2546_v40, %v2545_v63  ;;  %v2583_v20 = vld [vmem:[#allocation3 + $0x50] sm:$0xff] }
0x2c9b   :  { %v2602_v14 = vpack.c.bf16 %v2584_v46, %v2583_v20 }
0x2c9c   :  { %5671 = vtanh.f32 %v2520_v5  ;;  %v2547_v5 = vld [vmem:[#allocation2 + $0x50] sm:$0xff] }
0x2c9d   :  { %v2566_v60 = vpack.c.bf16 %v2548_v0, %v2547_v5 }
0x2ca9   :  { %v5672_v15 = vpop.eup %5671 }
0x2caa   :  { %v2522_v31 = vsub.f32 %v2459_v59, %v5672_v15  ;;  %v2599_v59 = vpack.c.bf16 %v2578_v61, %v2577_v47  ;;  %v2595_v61 = vld [vmem:[#allocation3 + $0xb0] sm:$0xff] }
0x2cac   :  { %2524 = vrot.lane.b32.xlu0 %v2522_v31, %s5852_s27  ;;  %v2550_v31 = vld [vmem:[#allocation2 + $0x68] sm:$0xff] }
0x2cad   :  { %v2567_v16 = vpack.c.bf16 %v2550_v31, %v2549_v37 }
0x2d1e   :  { %v2525_v57 = vpop.permute.xlu0 %2524 }
0x2d1f   :  { %v2527_v38 = vmul.f32 %v5670_v45, %v2525_v57  ;;  %v2601_v45 = vpack.c.bf16 %v2582_v4, %v2581_v36  ;;  %v2589_v57 = vld [vmem:[#allocation3 + $0x80] sm:$0xff]  ;;  %v7621_v36 = vsub.s32 1, %v6151_v62 }
0x2d21   :  { %2529 = vrot.lane.b32.xlu1 %v2527_v38, %s5852_s27  ;;  %v2553_v38 = vld [vmem:[#allocation2 + $0x80] sm:$0xff]  ;;  %v6962_v63 = vrot.slane %v3083_v53, %v7621_v36 }
0x2d93   :  { %v2530_v3 = vpop.permute.xlu1 %2529 }
0x2d94   :  { %v2532_v55 = vadd.f32 %v5672_v15, %v2530_v3  ;;  %v2586_v15 = vld [vmem:[#allocation3 + $0x68] sm:$0xff]  ;;  %v2605_v3 = vpack.c.bf16 %v2590_v12, %v2589_v57 }
0x2d95   :  { %v2603_v48 = vpack.c.bf16 %v2586_v15, %v2585_v51 }
0x2d96   :  { %2533 = vst.msk [vmem:[#allocation2 + $0xb8] sm:$0xff] %vm852_vm3, %v2532_v55  ;;  %2535 = vst.msk [vmem:[#allocation3] sm:$0xff] %vm852_vm3, %v2532_v55 }
0x2d97   :  { %2534 = vst.msk [vmem:[#allocation2] sm:$0xff] %vm854_vm4, %v2532_v55  ;;  %2536 = vst.msk [vmem:[#allocation3 + $0xb8] sm:$0xff] %vm854_vm4, %v2532_v55  ;;  %v2569_v55 = vpack.c.bf16 %v2554_v13, %v2553_v38 }
0x2d9d   :  { %v2573_v19 = vld [vmem:[#allocation3] sm:$0xff]  ;;  %v2560_v33 = vld [vmem:[#allocation2 + $0xb8] sm:$0xff] }
0x2d9e   :  { %v2537_v35 = vld [vmem:[#allocation2] sm:$0xff]  ;;  %v2597_v52 = vpack.c.bf16 %v2574_v26, %v2573_v19  ;;  %v2592_v26 = vld [vmem:[#allocation3 + $0x98] sm:$0xff]  ;;  %v2591_v19 = vld [vmem:[#allocation3 + $0x90] sm:$0xff] }
0x2d9f   :  { %v2561_v24 = vpack.c.bf16 %v2538_v50, %v2537_v35  ;;  %v2556_v50 = vld [vmem:[#allocation2 + $0x98] sm:$0xff]  ;;  %v2555_v35 = vld [vmem:[#allocation2 + $0x90] sm:$0xff] }
0x2da0   :  { %5300 = vmatmul.mubr.msk.bf16.vlgmr.msra.gmra.mxu0 %vm681_vm2, %v2597_v52  ;;  %v2606_v52 = vpack.c.bf16 %v2592_v26, %v2591_v19  ;;  %v2596_v47 = vld [vmem:[#allocation3 + $0xb8] sm:$0xff] }
0x2da1   :  { %5320 = vmatmul.mubr.msk.bf16.vlgmr.msra.gmra.mxu1 %vm681_vm2, %v2561_v24  ;;  %3255 = vmatpush1.bf16.msra.mxu0 %v6847_v41  ;;  %v2570_v24 = vpack.c.bf16 %v2556_v50, %v2555_v35 }
0x2da2   :  { %2743 = vmatprep.mubr.bf16.mxu0 %v5851_v1  ;;  %2972 = vmatprep.mubr.bf16.mxu1 %v5851_v1 }
0x2da3   :  { %3256 = vmatprep.subr.bf16.mxu0 %v6852_v17  ;;  %3326 = vmatpush1.bf16.msra.mxu1 %v6847_v41 }
0x2da4   :  { %3327 = vmatprep.subr.bf16.mxu1 %v6852_v17 }
0x2da5   :  { %3257 = vmatpush1.bf16.msra.mxu0 %v6861_v18 }
0x2da6   :  { %3258 = vmatprep.subr.bf16.mxu0 %v6868_v21 }
0x2da7   :  { %3328 = vmatpush1.bf16.msra.mxu1 %v6861_v18 }
0x2da8   :  { %5301 = vmatmul.mubr.msk.bf16.gmra.mxu0 %vm681_vm2, %v2598_v49  ;;  %3329 = vmatprep.subr.bf16.mxu1 %v6868_v21  ;;  %v2607_v49 = vpack.c.bf16 %v2594_v32, %v2593_v22 }
0x2da9   :  { %5321 = vmatmul.mubr.msk.bf16.gmra.mxu1 %vm681_vm2, %v2562_v6  ;;  %2753 = vmatprep.mubr.bf16.mxu0 %v5851_v1  ;;  %v2571_v6 = vpack.c.bf16 %v2558_v28, %v2557_v29 }
0x2daa   :  { %2982 = vmatprep.mubr.bf16.mxu1 %v5851_v1  ;;  %3259 = vmatpush1.bf16.msra.mxu0 %v6877_v11 }
0x2dab   :  { %3260 = vmatprep.subr.bf16.mxu0 %v6882_v34  ;;  %3330 = vmatpush1.bf16.msra.mxu1 %v6877_v11 }
0x2dac   :  { %3331 = vmatprep.subr.bf16.mxu1 %v6882_v34 }
0x2dae   :  { %3261 = vmatpush1.bf16.msra.mxu0 %v6893_v56 }
0x2daf   :  { %3332 = vmatpush1.bf16.msra.mxu1 %v6893_v56  ;;  %3396 = vmatprep.subr.bf16.mxu0 %v6836_v42 }
0x2db0   :  { %5302 = vmatmul.mubr.msk.bf16.gmra.mxu0 %vm681_vm2, %v2599_v59  ;;  %3467 = vmatprep.subr.bf16.mxu1 %v6836_v42  ;;  %v2608_v59 = vpack.c.bf16 %v2596_v47, %v2595_v61 }
0x2db1   :  { %5322 = vmatmul.mubr.msk.bf16.gmra.mxu1 %vm681_vm2, %v2563_v7  ;;  %2763 = vmatprep.mubr.bf16.mxu0 %v5851_v1  ;;  %v2572_v7 = vpack.c.bf16 %v2560_v33, %v2559_v58 }
0x2db2   :  { %2992 = vmatprep.mubr.bf16.mxu1 %v5851_v1 }
0x2db8   :  { %5303 = vmatmul.mubr.msk.bf16.gmra.mxu0 %vm681_vm2, %v2600_v9 }
0x2db9   :  { %5323 = vmatmul.mubr.msk.bf16.gmra.mxu1 %vm681_vm2, %v2564_v10  ;;  %2773 = vmatprep.mubr.bf16.mxu0 %v5851_v1 }
0x2dba   :  { %3002 = vmatprep.mubr.bf16.mxu1 %v5851_v1 }
0x2dc0   :  { %5304 = vmatmul.mubr.msk.bf16.gmra.mxu0 %vm681_vm2, %v2601_v45 }
0x2dc1   :  { %5324 = vmatmul.mubr.msk.bf16.gmra.mxu1 %vm681_vm2, %v2565_v44  ;;  %2783 = vmatprep.mubr.bf16.mxu0 %v5851_v1 }
0x2dc2   :  { %3012 = vmatprep.mubr.bf16.mxu1 %v5851_v1 }
0x2dc8   :  { %5305 = vmatmul.mubr.msk.bf16.gmra.mxu0 %vm681_vm2, %v2602_v14 }
0x2dc9   :  { %5325 = vmatmul.mubr.msk.bf16.gmra.mxu1 %vm681_vm2, %v2566_v60  ;;  %2793 = vmatprep.mubr.bf16.mxu0 %v5851_v1 }
0x2dca   :  { %3022 = vmatprep.mubr.bf16.mxu1 %v5851_v1 }
0x2dd0   :  { %5306 = vmatmul.mubr.msk.bf16.gmra.mxu0 %vm681_vm2, %v2603_v48 }
0x2dd1   :  { %5326 = vmatmul.mubr.msk.bf16.gmra.mxu1 %vm681_vm2, %v2567_v16  ;;  %2803 = vmatprep.mubr.bf16.mxu0 %v5851_v1 }
0x2dd2   :  { %3032 = vmatprep.mubr.bf16.mxu1 %v5851_v1 }
0x2dd8   :  { %5307 = vmatmul.mubr.msk.bf16.gmra.mxu0 %vm681_vm2, %v2604_v54 }
0x2dd9   :  { %5327 = vmatmul.mubr.msk.bf16.gmra.mxu1 %vm681_vm2, %v2568_v27  ;;  %2813 = vmatprep.mubr.bf16.mxu0 %v5851_v1 }
0x2dda   :  { %3042 = vmatprep.mubr.bf16.mxu1 %v5851_v1 }
0x2de0   :  { %5308 = vmatmul.mubr.msk.bf16.gmra.mxu0 %vm681_vm2, %v2605_v3 }
0x2de1   :  { %5328 = vmatmul.mubr.msk.bf16.gmra.mxu1 %vm681_vm2, %v2569_v55  ;;  %2823 = vmatprep.mubr.bf16.mxu0 %v5851_v1 }
0x2de2   :  { %3052 = vmatprep.mubr.bf16.mxu1 %v5851_v1 }
0x2de8   :  { %5309 = vmatmul.mubr.msk.bf16.gmra.mxu0 %vm681_vm2, %v2606_v52 }
0x2de9   :  { %5329 = vmatmul.mubr.msk.bf16.gmra.mxu1 %vm681_vm2, %v2570_v24  ;;  %2833 = vmatprep.mubr.bf16.mxu0 %v5851_v1 }
0x2dea   :  { %3062 = vmatprep.mubr.bf16.mxu1 %v5851_v1 }
0x2df0   :  { %5310 = vmatmul.mubr.msk.bf16.gmra.mxu0 %vm681_vm2, %v2607_v49 }
0x2df1   :  { %5330 = vmatmul.mubr.msk.bf16.gmra.mxu1 %vm681_vm2, %v2571_v6  ;;  %2843 = vmatprep.mubr.bf16.mxu0 %v5851_v1 }
0x2df2   :  { %3072 = vmatprep.mubr.bf16.mxu1 %v5851_v1 }
0x2df8   :  { %5311 = vmatmul.mubr.msk.bf16.gmra.mxu0 %vm681_vm2, %v2608_v59 }
0x2df9   :  { %5331 = vmatmul.mubr.msk.bf16.gmra.mxu1 %vm681_vm2, %v2572_v7  ;;  %3278 = vmatprep.mubr.bf16.mxu0 %v5851_v1 }
0x2dfa   :  { %3349 = vmatprep.mubr.bf16.mxu1 %v5851_v1 }
0x2e00   :  { %3279 = vmatmul.mubr.bf16.vlgmr.msra.gmra.mxu0 %v5851_v1 }
0x2e01   :  { %3397 = vmatpush1.bf16.msra.mxu0 %v6847_v41  ;;  %3420 = vmatprep.mubr.bf16.mxu0 %v5851_v1 }
0x2e02   :  { %3398 = vmatprep.subr.bf16.mxu0 %v6852_v17 }
0x2e05   :  { %3399 = vmatpush1.bf16.msra.mxu0 %v6861_v18 }
0x2e06   :  { %3400 = vmatprep.subr.bf16.mxu0 %v6868_v21 }
0x2e09   :  { %3401 = vmatpush1.bf16.msra.mxu0 %v6877_v11 }
0x2e0a   :  { %3402 = vmatprep.subr.bf16.mxu0 %v6882_v34 }
0x2e0d   :  { %3403 = vmatpush1.bf16.msra.mxu0 %v6893_v56 }
0x2e0e   :  { %3538 = vmatprep.subr.bf16.mxu0 %v6836_v42 }
0x2e60   :  { %v2735_v30 = vpop.f32.mrf.mxu0 }
0x2e61   :  { %v2964_v9 = vpop.f32.mrf.mxu1 }
0x2e62   :  { %v2965_v10 = vadd.f32 %v2964_v9, %v2735_v30  ;;  %v2737_v4 = vpop.f32.mrf.mxu0 }
0x2e63   :  { %v2966_v40 = vpop.f32.mrf.mxu1 }
0x2e64   :  { %v6965_v45 = vadd.f32 %v6958_v8, %v2965_v10  ;;  %v2967_v44 = vadd.f32 %v2966_v40, %v2737_v4  ;;  %v2739_v20 = vpop.f32.mrf.mxu0 }
0x2e65   :  { %v2968_v5 = vpop.f32.mrf.mxu1 }
0x2e66   :  { %v3096_v46 = vadd.f32 %v6962_v63, %v2967_v44  ;;  %v2969_v0 = vadd.f32 %v2968_v5, %v2739_v20  ;;  %v2741_v14 = vpop.f32.mrf.mxu0 }
0x2e67   :  { %v2970_v60 = vpop.f32.mrf.mxu1 }
0x2e68   :  { %3144 = vst.msk [vmem:[#allocation4 + $0x8] sm:$0xff] %vm681_vm2, %v3096_v46  ;;  %v6970_v15 = vadd.f32 %v6958_v8, %v2969_v0  ;;  %v2971_v62 = vadd.f32 %v2970_v60, %v2741_v14  ;;  %v2745_v31 = vpop.f32.mrf.mxu0 }
0x2e69   :  { %v2974_v51 = vpop.f32.mrf.mxu1 }
0x2e6a   :  { %v3098_v37 = vadd.f32 %v6962_v63, %v2971_v62  ;;  %v2975_v48 = vadd.f32 %v2974_v51, %v2745_v31  ;;  %v2747_v16 = vpop.f32.mrf.mxu0 }
0x2e6b   :  { %v2976_v23 = vpop.f32.mrf.mxu1 }
0x2e6c   :  { %3146 = vst.msk [vmem:[#allocation4 + $0x18] sm:$0xff] %vm681_vm2, %v3098_v37  ;;  %v6975_v39 = vadd.f32 %v6958_v8, %v2975_v48  ;;  %v2977_v43 = vadd.f32 %v2976_v23, %v2747_v16  ;;  %v2749_v25 = vpop.f32.mrf.mxu0 }
0x2e6d   :  { %v2978_v54 = vpop.f32.mrf.mxu1 }
0x2e6e   :  { %v3100_v27 = vadd.f32 %v6962_v63, %v2977_v43  ;;  %v2979_v12 = vadd.f32 %v2978_v54, %v2749_v25  ;;  %v2751_v13 = vpop.f32.mrf.mxu0 }
0x2e6f   :  { %v2980_v57 = vpop.f32.mrf.mxu1 }
0x2e70   :  { %3148 = vst.msk [vmem:[#allocation4 + $0x28] sm:$0xff] %vm681_vm2, %v3100_v27  ;;  %v6980_v38 = vadd.f32 %v6958_v8, %v2979_v12  ;;  %v2981_v3 = vadd.f32 %v2980_v57, %v2751_v13  ;;  %v2755_v55 = vpop.f32.mrf.mxu0 }
0x2e71   :  { %v2984_v26 = vpop.f32.mrf.mxu1 }
0x2e72   :  { %v3102_v50 = vadd.f32 %v6962_v63, %v2981_v3  ;;  %v2985_v19 = vadd.f32 %v2984_v26, %v2755_v55  ;;  %v2757_v35 = vpop.f32.mrf.mxu0 }
0x2e73   :  { %v2986_v52 = vpop.f32.mrf.mxu1 }
0x2e74   :  { %3150 = vst.msk [vmem:[#allocation4 + $0x38] sm:$0xff] %vm681_vm2, %v3102_v50  ;;  %v6985_v24 = vadd.f32 %v6958_v8, %v2985_v19  ;;  %v2987_v32 = vadd.f32 %v2986_v52, %v2757_v35  ;;  %v2759_v28 = vpop.f32.mrf.mxu0 }
0x2e75   :  { %v2988_v22 = vpop.f32.mrf.mxu1 }
0x2e76   :  { %v3104_v29 = vadd.f32 %v6962_v63, %v2987_v32  ;;  %v2989_v49 = vadd.f32 %v2988_v22, %v2759_v28  ;;  %v2761_v6 = vpop.f32.mrf.mxu0 }
0x2e77   :  { %v2990_v47 = vpop.f32.mrf.mxu1 }
0x2e78   :  { %3152 = vst.msk [vmem:[#allocation4 + $0x48] sm:$0xff] %vm681_vm2, %v3104_v29  ;;  %v6990_v33 = vadd.f32 %v6958_v8, %v2989_v49  ;;  %v2991_v61 = vadd.f32 %v2990_v47, %v2761_v6  ;;  %v2765_v58 = vpop.f32.mrf.mxu0 }
0x2e79   :  { %v2994_v59 = vpop.f32.mrf.mxu1 }
0x2e7a   :  { %v3106_v7 = vadd.f32 %v6962_v63, %v2991_v61  ;;  %v2995_v53 = vadd.f32 %v2994_v59, %v2765_v58  ;;  %v2767_v2 = vpop.f32.mrf.mxu0 }
0x2e7b   :  { %v2996_v30 = vpop.f32.mrf.mxu1 }
0x2e7c   :  { %3154 = vst.msk [vmem:[#allocation4 + $0x58] sm:$0xff] %vm681_vm2, %v3106_v7  ;;  %v6995_v9 = vadd.f32 %v6958_v8, %v2995_v53  ;;  %v2997_v10 = vadd.f32 %v2996_v30, %v2767_v2  ;;  %v2769_v36 = vpop.f32.mrf.mxu0 }
0x2e7d   :  { %v2998_v4 = vpop.f32.mrf.mxu1 }
0x2e7e   :  { %v3108_v40 = vadd.f32 %v6962_v63, %v2997_v10  ;;  %v2999_v44 = vadd.f32 %v2998_v4, %v2769_v36  ;;  %v2771_v20 = vpop.f32.mrf.mxu0 }
0x2e7f   :  { %v3000_v5 = vpop.f32.mrf.mxu1 }
0x2e80   :  { %3156 = vst.msk [vmem:[#allocation4 + $0x68] sm:$0xff] %vm681_vm2, %v3108_v40  ;;  %v7000_v46 = vadd.f32 %v6958_v8, %v2999_v44  ;;  %v3001_v0 = vadd.f32 %v3000_v5, %v2771_v20  ;;  %v2775_v14 = vpop.f32.mrf.mxu0 }
0x2e81   :  { %v3004_v60 = vpop.f32.mrf.mxu1 }
0x2e82   :  { %v3110_v62 = vadd.f32 %v6962_v63, %v3001_v0  ;;  %v3005_v31 = vadd.f32 %v3004_v60, %v2775_v14  ;;  %v2777_v51 = vpop.f32.mrf.mxu0 }
0x2e83   :  { %v3006_v37 = vpop.f32.mrf.mxu1 }
0x2e84   :  { %3158 = vst.msk [vmem:[#allocation4 + $0x78] sm:$0xff] %vm681_vm2, %v3110_v62  ;;  %v7005_v48 = vadd.f32 %v6958_v8, %v3005_v31  ;;  %v3007_v16 = vadd.f32 %v3006_v37, %v2777_v51  ;;  %v2779_v23 = vpop.f32.mrf.mxu0 }
0x2e85   :  { %v3008_v43 = vpop.f32.mrf.mxu1 }
0x2e86   :  { %v3112_v25 = vadd.f32 %v6962_v63, %v3007_v16  ;;  %v3009_v54 = vadd.f32 %v3008_v43, %v2779_v23  ;;  %v2781_v27 = vpop.f32.mrf.mxu0 }
0x2e87   :  { %v3010_v12 = vpop.f32.mrf.mxu1 }
0x2e88   :  { %3160 = vst.msk [vmem:[#allocation4 + $0x88] sm:$0xff] %vm681_vm2, %v3112_v25  ;;  %v7010_v13 = vadd.f32 %v6958_v8, %v3009_v54  ;;  %v3011_v57 = vadd.f32 %v3010_v12, %v2781_v27  ;;  %v2785_v3 = vpop.f32.mrf.mxu0 }
0x2e89   :  { %v3014_v55 = vpop.f32.mrf.mxu1 }
0x2e8a   :  { %v3114_v26 = vadd.f32 %v6962_v63, %v3011_v57  ;;  %v3015_v50 = vadd.f32 %v3014_v55, %v2785_v3  ;;  %v2787_v19 = vpop.f32.mrf.mxu0 }
0x2e8b   :  { %v3016_v35 = vpop.f32.mrf.mxu1 }
0x2e8c   :  { %3162 = vst.msk [vmem:[#allocation4 + $0x98] sm:$0xff] %vm681_vm2, %v3114_v26  ;;  %v7015_v52 = vadd.f32 %v6958_v8, %v3015_v50  ;;  %v3017_v32 = vadd.f32 %v3016_v35, %v2787_v19  ;;  %v2789_v28 = vpop.f32.mrf.mxu0 }
0x2e8d   :  { %v3018_v22 = vpop.f32.mrf.mxu1 }
0x2e8e   :  { %v3116_v29 = vadd.f32 %v6962_v63, %v3017_v32  ;;  %v3019_v49 = vadd.f32 %v3018_v22, %v2789_v28  ;;  %v2791_v6 = vpop.f32.mrf.mxu0 }
0x2e8f   :  { %v3020_v47 = vpop.f32.mrf.mxu1 }
0x2e90   :  { %3164 = vst.msk [vmem:[#allocation4 + $0xa8] sm:$0xff] %vm681_vm2, %v3116_v29  ;;  %v3117_v61 = vadd.f32 %v6958_v8, %v3019_v49  ;;  %v3021_v58 = vadd.f32 %v3020_v47, %v2791_v6  ;;  %v2795_v59 = vpop.f32.mrf.mxu0 }
0x2e91   :  { %v3024_v7 = vpop.f32.mrf.mxu1 }
0x2e92   :  { %3165 = vst [vmem:[#allocation4 + $0xb0] sm:$0xff] %v3117_v61  ;;  %v3118_v53 = vadd.f32 %v6962_v63, %v3021_v58  ;;  %v3025_v2 = vadd.f32 %v3024_v7, %v2795_v59  ;;  %v2797_v30 = vpop.f32.mrf.mxu0 }
0x2e93   :  { %v3026_v10 = vpop.f32.mrf.mxu1 }
0x2e94   :  { %3166 = vst.msk [vmem:[#allocation4 + $0xb8] sm:$0xff] %vm681_vm2, %v3118_v53  ;;  %v3119_v36 = vadd.f32 %v6958_v8, %v3025_v2  ;;  %v3027_v4 = vadd.f32 %v3026_v10, %v2797_v30  ;;  %v2799_v40 = vpop.f32.mrf.mxu0 }
0x2e95   :  { %v3028_v44 = vpop.f32.mrf.mxu1 }
0x2e96   :  { %3167 = vst [vmem:[#allocation4 + $0xc0] sm:$0xff] %v3119_v36  ;;  %v3120_v20 = vadd.f32 %v6962_v63, %v3027_v4  ;;  %v3029_v5 = vadd.f32 %v3028_v44, %v2799_v40  ;;  %v2801_v0 = vpop.f32.mrf.mxu0 }
0x2e97   :  { %v3030_v14 = vpop.f32.mrf.mxu1 }
0x2e98   :  { %3168 = vst.msk [vmem:[#allocation4 + $0xc8] sm:$0xff] %vm681_vm2, %v3120_v20  ;;  %v3121_v60 = vadd.f32 %v6958_v8, %v3029_v5  ;;  %v3031_v62 = vadd.f32 %v3030_v14, %v2801_v0  ;;  %v2805_v31 = vpop.f32.mrf.mxu0 }
0x2e99   :  { %v3034_v51 = vpop.f32.mrf.mxu1 }
0x2e9a   :  { %3169 = vst [vmem:[#allocation4 + $0xd0] sm:$0xff] %v3121_v60  ;;  %v3122_v37 = vadd.f32 %v6962_v63, %v3031_v62  ;;  %v3035_v16 = vadd.f32 %v3034_v51, %v2805_v31  ;;  %v2807_v23 = vpop.f32.mrf.mxu0 }
0x2e9b   :  { %v3036_v43 = vpop.f32.mrf.mxu1 }
0x2e9c   :  { %3170 = vst.msk [vmem:[#allocation4 + $0xd8] sm:$0xff] %vm681_vm2, %v3122_v37  ;;  %v3123_v25 = vadd.f32 %v6958_v8, %v3035_v16  ;;  %v3037_v54 = vadd.f32 %v3036_v43, %v2807_v23  ;;  %v2809_v27 = vpop.f32.mrf.mxu0 }
0x2e9d   :  { %v3038_v12 = vpop.f32.mrf.mxu1 }
0x2e9e   :  { %3171 = vst [vmem:[#allocation4 + $0xe0] sm:$0xff] %v3123_v25  ;;  %v3124_v57 = vadd.f32 %v6962_v63, %v3037_v54  ;;  %v3039_v3 = vadd.f32 %v3038_v12, %v2809_v27  ;;  %v2811_v55 = vpop.f32.mrf.mxu0 }
0x2e9f   :  { %v3040_v26 = vpop.f32.mrf.mxu1 }
0x2ea0   :  { %3172 = vst.msk [vmem:[#allocation4 + $0xe8] sm:$0xff] %vm681_vm2, %v3124_v57  ;;  %v3125_v50 = vadd.f32 %v6958_v8, %v3039_v3  ;;  %v3041_v19 = vadd.f32 %v3040_v26, %v2811_v55  ;;  %v2815_v35 = vpop.f32.mrf.mxu0 }
0x2ea1   :  { %v3044_v32 = vpop.f32.mrf.mxu1 }
0x2ea2   :  { %3173 = vst [vmem:[#allocation4 + $0xf0] sm:$0xff] %v3125_v50  ;;  %v3126_v28 = vadd.f32 %v6962_v63, %v3041_v19  ;;  %v3045_v22 = vadd.f32 %v3044_v32, %v2815_v35  ;;  %v2817_v29 = vpop.f32.mrf.mxu0 }
0x2ea3   :  { %v3046_v49 = vpop.f32.mrf.mxu1 }
0x2ea4   :  { %3174 = vst.msk [vmem:[#allocation4 + $0xf8] sm:$0xff] %vm681_vm2, %v3126_v28  ;;  %v3127_v6 = vadd.f32 %v6958_v8, %v3045_v22  ;;  %v3047_v47 = vadd.f32 %v3046_v49, %v2817_v29  ;;  %v2819_v61 = vpop.f32.mrf.mxu0 }
0x2ea5   :  { %v3048_v58 = vpop.f32.mrf.mxu1 }
0x2ea6   :  { %3175 = vst [vmem:[#allocation4 + $0x100] sm:$0xff] %v3127_v6  ;;  %v3128_v59 = vadd.f32 %v6962_v63, %v3047_v47  ;;  %v3049_v7 = vadd.f32 %v3048_v58, %v2819_v61  ;;  %v2821_v53 = vpop.f32.mrf.mxu0 }
0x2ea7   :  { %v3050_v2 = vpop.f32.mrf.mxu1 }
0x2ea8   :  { %3176 = vst.msk [vmem:[#allocation4 + $0x108] sm:$0xff] %vm681_vm2, %v3128_v59  ;;  %v3129_v30 = vadd.f32 %v6958_v8, %v3049_v7  ;;  %v3051_v10 = vadd.f32 %v3050_v2, %v2821_v53  ;;  %v2825_v36 = vpop.f32.mrf.mxu0 }
0x2ea9   :  { %v3054_v4 = vpop.f32.mrf.mxu1 }
0x2eaa   :  { %3177 = vst [vmem:[#allocation4 + $0x110] sm:$0xff] %v3129_v30  ;;  %v3130_v40 = vadd.f32 %v6962_v63, %v3051_v10  ;;  %v3055_v44 = vadd.f32 %v3054_v4, %v2825_v36  ;;  %v2827_v20 = vpop.f32.mrf.mxu0 }
0x2eab   :  { %v3056_v5 = vpop.f32.mrf.mxu1 }
0x2eac   :  { %3178 = vst.msk [vmem:[#allocation4 + $0x118] sm:$0xff] %vm681_vm2, %v3130_v40  ;;  %v3131_v0 = vadd.f32 %v6958_v8, %v3055_v44  ;;  %v3057_v14 = vadd.f32 %v3056_v5, %v2827_v20  ;;  %v2829_v60 = vpop.f32.mrf.mxu0 }
0x2ead   :  { %v3058_v62 = vpop.f32.mrf.mxu1 }
0x2eae   :  { %3179 = vst [vmem:[#allocation4 + $0x120] sm:$0xff] %v3131_v0  ;;  %v3132_v31 = vadd.f32 %v6962_v63, %v3057_v14  ;;  %v3059_v51 = vadd.f32 %v3058_v62, %v2829_v60  ;;  %v2831_v37 = vpop.f32.mrf.mxu0 }
0x2eaf   :  { %v3060_v16 = vpop.f32.mrf.mxu1 }
0x2eb0   :  { %3180 = vst.msk [vmem:[#allocation4 + $0x128] sm:$0xff] %vm681_vm2, %v3132_v31  ;;  %v3133_v23 = vadd.f32 %v6958_v8, %v3059_v51  ;;  %v3061_v43 = vadd.f32 %v3060_v16, %v2831_v37  ;;  %v2835_v25 = vpop.f32.mrf.mxu0 }
0x2eb1   :  { %v3064_v54 = vpop.f32.mrf.mxu1 }
0x2eb2   :  { %3181 = vst [vmem:[#allocation4 + $0x130] sm:$0xff] %v3133_v23  ;;  %v3134_v27 = vadd.f32 %v6962_v63, %v3061_v43  ;;  %v3065_v12 = vadd.f32 %v3064_v54, %v2835_v25  ;;  %v2837_v57 = vpop.f32.mrf.mxu0 }
0x2eb3   :  { %v3066_v3 = vpop.f32.mrf.mxu1 }
0x2eb4   :  { %3182 = vst.msk [vmem:[#allocation4 + $0x138] sm:$0xff] %vm681_vm2, %v3134_v27  ;;  %v3135_v55 = vadd.f32 %v6958_v8, %v3065_v12  ;;  %v3067_v26 = vadd.f32 %v3066_v3, %v2837_v57  ;;  %v2839_v50 = vpop.f32.mrf.mxu0 }
0x2eb5   :  { %v3068_v19 = vpop.f32.mrf.mxu1 }
0x2eb6   :  { %3183 = vst [vmem:[#allocation4 + $0x140] sm:$0xff] %v3135_v55  ;;  %v3136_v35 = vadd.f32 %v6962_v63, %v3067_v26  ;;  %v3069_v32 = vadd.f32 %v3068_v19, %v2839_v50  ;;  %v2841_v28 = vpop.f32.mrf.mxu0 }
0x2eb7   :  { %v3070_v22 = vpop.f32.mrf.mxu1 }
0x2eb8   :  { %3184 = vst.msk [vmem:[#allocation4 + $0x148] sm:$0xff] %vm681_vm2, %v3136_v35  ;;  %v3137_v29 = vadd.f32 %v6958_v8, %v3069_v32  ;;  %v3071_v49 = vadd.f32 %v3070_v22, %v2841_v28  ;;  %v2845_v6 = vpop.f32.mrf.mxu0 }
0x2eb9   :  { %v3074_v47 = vpop.f32.mrf.mxu1 }
0x2eba   :  { %3185 = vst [vmem:[#allocation4 + $0x150] sm:$0xff] %v3137_v29  ;;  %v3138_v61 = vadd.f32 %v6962_v63, %v3071_v49  ;;  %v3075_v58 = vadd.f32 %v3074_v47, %v2845_v6  ;;  %v2847_v59 = vpop.f32.mrf.mxu0 }
0x2ebb   :  { %v3076_v7 = vpop.f32.mrf.mxu1 }
0x2ebc   :  { %3186 = vst.msk [vmem:[#allocation4 + $0x158] sm:$0xff] %vm681_vm2, %v3138_v61  ;;  %v3139_v53 = vadd.f32 %v6958_v8, %v3075_v58  ;;  %v3077_v2 = vadd.f32 %v3076_v7, %v2847_v59  ;;  %v2849_v30 = vpop.f32.mrf.mxu0  ;;  %v3359_v59 = vld [vmem:[#allocation4 + $0x18] sm:$0xff] }
0x2ebd   :  { %v3078_v10 = vpop.f32.mrf.mxu1 }
0x2ebe   :  { %3187 = vst [vmem:[#allocation4 + $0x160] sm:$0xff] %v3139_v53  ;;  %v3140_v36 = vadd.f32 %v6962_v63, %v3077_v2  ;;  %v3079_v4 = vadd.f32 %v3078_v10, %v2849_v30  ;;  %v2851_v40 = vpop.f32.mrf.mxu0 }
0x2ebf   :  { %v3080_v44 = vpop.f32.mrf.mxu1 }
0x2ec0   :  { %3188 = vst.msk [vmem:[#allocation4 + $0x168] sm:$0xff] %vm681_vm2, %v3140_v36  ;;  %v3141_v20 = vadd.f32 %v6958_v8, %v3079_v4  ;;  %v3081_v5 = vadd.f32 %v3080_v44, %v2851_v40  ;;  %v3280_v0 = vpop.f32.mrf.mxu0  ;;  %v7062_v8 = vld [vmem:[%s7614_s11] ss:$0 sm:$0xff] }
0x2ec1   :  { %v3289_v60 = vadd.f32 %v3280_v0, %v6965_v45  ;;  %v3288_v45 = vld [vmem:[#allocation4 + $0x8] sm:$0xff] }
0x2ec2   :  { %3189 = vst [vmem:[#allocation4 + $0x170] sm:$0xff] %v3141_v20  ;;  %v3142_v14 = vadd.f32 %v6962_v63, %v3081_v5  ;;  %v3282_v62 = vpop.f32.mrf.mxu0 }
0x2ec3   :  { %v5341_v31 = vmul.f32 -1.442695, %v3289_v60  ;;  %v3296_v43 = vadd.f32 %v7062_v8, %v3282_v62 }
0x2ec4   :  { %3190 = vst.msk [vmem:[#allocation4 + $0x178] sm:$0xff] %vm681_vm2, %v3142_v14  ;;  %v3284_v51 = vpop.f32.mrf.mxu0 }
0x2ec5   :  { %5673 = vpow2.f32 %v5341_v31 }
0x2ec6   :  { %v3285_v37 = vpop.f32.mrf.mxu0 }
0x2ed2   :  { %v5674_v16 = vpop.eup %5673 }
0x2ed3   :  { %v3293_v23 = vadd.f32 1.0, %v5674_v16  ;;  %v3430_v16 = vld [vmem:[#allocation4 + $0x28] sm:$0xff] }
0x2ed5   :  { %5675 = vrcp.f32 %v3293_v23 }
0x2ee2   :  { %v5676_v63 = vpop.eup %5675 }
0x2ee3   :  { %v3297_v25 = vmul.f32 %v5676_v63, %v3296_v43 }
0x2ee5   :  { %v3298_v54 = vadd.f32 %v3297_v25, %v3288_v45 }
0x2ee7   :  { %5677 = vtanh.f32 %v3298_v54 }
0x2ef4   :  { %v5678_v27 = vpop.eup %5677 }
0x2ef5   :  { %v3300_v12 = vsub.f32 0.0, %v5678_v27 }
0x2ef7   :  { %3302 = vrot.lane.b32.xlu0 %v3300_v12, %s5852_s27 }
0x2f69   :  { %v3303_v57 = vpop.permute.xlu0 %3302 }
0x2f6a   :  { %v3305_v3 = vmul.f32 %v5676_v63, %v3303_v57 }
0x2f6c   :  { %3307 = vrot.lane.b32.xlu1 %v3305_v3, %s5852_s27 }
0x2fde   :  { %v3308_v55 = vpop.permute.xlu1 %3307 }
0x2fdf   :  { %v3310_v26 = vadd.f32 %v5678_v27, %v3308_v55  ;;  %v7113_v27 = vld [vmem:[%s7612_s10 + $0x34] ss:$8 sps:$4 sm:$0xff]  }
0x2fe1   :  { %v3313_v50 = vpack.c.bf16 %v3310_v26, %v3310_v26  ;;  %3311 = vst.msk [vmem:[#allocation2] sm:$0xff] %vm852_vm3, %v3310_v26 }
0x2fe2   :  { %3312 = vst.msk [vmem:[#allocation2 + $0xb8] sm:$0xff] %vm854_vm4, %v3310_v26 }
0x2fe3   :  { %5342 = vmatmul.mubr.msk.bf16.vlgmr.msra.gmra.mxu1 %vm681_vm2, %v3313_v50  ;;  %v3501_v50 = vld [vmem:[#allocation4 + $0x38] sm:$0xff] }
0x2fe4   :  { %3468 = vmatpush1.bf16.msra.mxu1 %v6847_v41  ;;  %3491 = vmatprep.mubr.bf16.mxu1 %v5851_v1 }
0x2fe5   :  { %3469 = vmatprep.subr.bf16.mxu1 %v6852_v17 }
0x2fe8   :  { %3470 = vmatpush1.bf16.msra.mxu1 %v6861_v18 }
0x2fe9   :  { %3471 = vmatprep.subr.bf16.mxu1 %v6868_v21 }
0x2fec   :  { %3472 = vmatpush1.bf16.msra.mxu1 %v6877_v11 }
0x2fed   :  { %3473 = vmatprep.subr.bf16.mxu1 %v6882_v34 }
0x2ff0   :  { %3474 = vmatpush1.bf16.msra.mxu1 %v6893_v56 }
0x2ff1   :  { %3609 = vmatprep.subr.bf16.mxu1 %v6836_v42 }
0x30a3   :  { %v3351_v19 = vpop.f32.mrf.mxu1 }
0x30a4   :  { %v3360_v35 = vadd.f32 %v3351_v19, %v6970_v15 }
0x30a5   :  { %v3353_v32 = vpop.f32.mrf.mxu1 }
0x30a6   :  { %v5343_v28 = vmul.f32 -1.442695, %v3360_v35  ;;  %v3367_v47 = vadd.f32 %v7062_v8, %v3353_v32 }
0x30a7   :  { %v3355_v22 = vpop.f32.mrf.mxu1 }
0x30a8   :  { %5679 = vpow2.f32 %v5343_v28 }
0x30a9   :  { %v3356_v29 = vpop.f32.mrf.mxu1 }
0x30b5   :  { %v5680_v49 = vpop.eup %5679 }
0x30b6   :  { %v3364_v6 = vadd.f32 1.0, %v5680_v49 }
0x30b8   :  { %5681 = vrcp.f32 %v3364_v6  ;;  %v7126_v6 = vld [vmem:[%s7612_s10 + $0x30] ss:$8 sps:$4 sm:$0xff]  }
0x30c5   :  { %v5682_v61 = vpop.eup %5681 }
0x30c6   :  { %v3368_v58 = vmul.f32 %v5682_v61, %v3367_v47  ;;  %v7133_v47 = vld [vmem:[%s7612_s10 + $0x24] ss:$8 sps:$4 sm:$0xff]  }
0x30c8   :  { %v3369_v7 = vadd.f32 %v3368_v58, %v3359_v59  ;;  %v7145_v58 = vld [vmem:[%s7612_s10 + $0x14] ss:$8 sps:$4 sm:$0xff]   ;;  %v7151_v59 = vld [vmem:[%s7612_s10 + $0x10] ss:$8 sps:$4 sm:$0xff]  }
0x30ca   :  { %5683 = vtanh.f32 %v3369_v7  ;;  %v7157_v7 = vld [vmem:[%s7612_s10 + $0x4] ss:$8 sps:$4 sm:$0xff]  }
0x30d7   :  { %v5684_v53 = vpop.eup %5683 }
0x30d8   :  { %v3371_v2 = vsub.f32 %v3310_v26, %v5684_v53 }
0x30da   :  { %3373 = vrot.lane.b32.xlu0 %v3371_v2, %s5852_s27 }
0x314c   :  { %v3374_v15 = vpop.permute.xlu0 %3373 }
0x314d   :  { %v3376_v30 = vmul.f32 %v5682_v61, %v3374_v15  ;;  %v7139_v61 = vld [vmem:[%s7612_s10 + $0x20] ss:$8 sps:$4 sm:$0xff]  }
0x314f   :  { %3378 = vrot.lane.b32.xlu1 %v3376_v30, %s5852_s27 }
0x31c1   :  { %v3379_v10 = vpop.permute.xlu1 %3378 }
0x31c2   :  { %v3381_v36 = vadd.f32 %v5684_v53, %v3379_v10 }
0x31c4   :  { %3382 = vst.msk [vmem:[#allocation2 + $0x8] sm:$0xff] %vm852_vm3, %v3381_v36  ;;  %v3384_v4 = vpack.c.bf16 %v3381_v36, %v3381_v36 }
0x31c5   :  { %3383 = vst.msk [vmem:[#allocation2 + $0xb0] sm:$0xff] %vm854_vm4, %v3381_v36 }
0x31c6   :  { %5344 = vmatmul.mubr.msk.bf16.vlgmr.msra.gmra.mxu0 %vm681_vm2, %v3384_v4 }
0x31c7   :  { %3539 = vmatpush1.bf16.msra.mxu0 %v6847_v41  ;;  %3562 = vmatprep.mubr.bf16.mxu0 %v5851_v1 }
0x31c8   :  { %3540 = vmatprep.subr.bf16.mxu0 %v6852_v17 }
0x31cb   :  { %3541 = vmatpush1.bf16.msra.mxu0 %v6861_v18 }
0x31cc   :  { %3542 = vmatprep.subr.bf16.mxu0 %v6868_v21 }
0x31cf   :  { %3543 = vmatpush1.bf16.msra.mxu0 %v6877_v11 }
0x31d0   :  { %3544 = vmatprep.subr.bf16.mxu0 %v6882_v34 }
0x31d3   :  { %3545 = vmatpush1.bf16.msra.mxu0 %v6893_v56 }
0x31d4   :  { %3680 = vmatprep.subr.bf16.mxu0 %v6836_v42 }
0x3286   :  { %v3422_v40 = vpop.f32.mrf.mxu0 }
0x3287   :  { %v3431_v44 = vadd.f32 %v3422_v40, %v6975_v39 }
0x3288   :  { %v3424_v20 = vpop.f32.mrf.mxu0 }
0x3289   :  { %v5345_v5 = vmul.f32 -1.442695, %v3431_v44  ;;  %v3438_v31 = vadd.f32 %v7062_v8, %v3424_v20 }
0x328a   :  { %v3426_v0 = vpop.f32.mrf.mxu0 }
0x328b   :  { %5685 = vpow2.f32 %v5345_v5  ;;  %v3572_v0 = vld [vmem:[#allocation4 + $0x48] sm:$0xff] }
0x328c   :  { %v3427_v14 = vpop.f32.mrf.mxu0 }
0x3298   :  { %v5686_v60 = vpop.eup %5685 }
0x3299   :  { %v3435_v62 = vadd.f32 1.0, %v5686_v60 }
0x329b   :  { %5687 = vrcp.f32 %v3435_v62 }
0x32a8   :  { %v5688_v51 = vpop.eup %5687 }
0x32a9   :  { %v3439_v37 = vmul.f32 %v5688_v51, %v3438_v31 }
0x32ab   :  { %v3440_v23 = vadd.f32 %v3439_v37, %v3430_v16  ;;  %v7179_v16 = vld [vmem:[%s7612_s10] ss:$8 sps:$4 sm:$0xff]  }
0x32ad   :  { %5689 = vtanh.f32 %v3440_v23 }
0x32ba   :  { %v5690_v43 = vpop.eup %5689 }
0x32bb   :  { %v3442_v42 = vsub.f32 %v3381_v36, %v5690_v43 }
0x32bd   :  { %3444 = vrot.lane.b32.xlu0 %v3442_v42, %s5852_s27 }
0x332f   :  { %v3445_v39 = vpop.permute.xlu0 %3444 }
0x3330   :  { %v3447_v63 = vmul.f32 %v5688_v51, %v3445_v39 }
0x3332   :  { %3449 = vrot.lane.b32.xlu1 %v3447_v63, %s5852_s27 }
0x33a4   :  { %v3450_v25 = vpop.permute.xlu1 %3449 }
0x33a5   :  { %v3452_v45 = vadd.f32 %v5690_v43, %v3450_v25 }
0x33a7   :  { %3453 = vst.msk [vmem:[#allocation2 + $0x10] sm:$0xff] %vm852_vm3, %v3452_v45  ;;  %v3455_v54 = vpack.c.bf16 %v3452_v45, %v3452_v45 }
0x33a8   :  { %3454 = vst.msk [vmem:[#allocation2 + $0xa8] sm:$0xff] %vm854_vm4, %v3452_v45 }
0x33a9   :  { %5346 = vmatmul.mubr.msk.bf16.vlgmr.msra.gmra.mxu1 %vm681_vm2, %v3455_v54 }
0x33aa   :  { %3610 = vmatpush1.bf16.msra.mxu1 %v6847_v41  ;;  %3633 = vmatprep.mubr.bf16.mxu1 %v5851_v1 }
0x33ab   :  { %3611 = vmatprep.subr.bf16.mxu1 %v6852_v17 }
0x33ae   :  { %3612 = vmatpush1.bf16.msra.mxu1 %v6861_v18 }
0x33af   :  { %3613 = vmatprep.subr.bf16.mxu1 %v6868_v21 }
0x33b2   :  { %3614 = vmatpush1.bf16.msra.mxu1 %v6877_v11 }
0x33b3   :  { %3615 = vmatprep.subr.bf16.mxu1 %v6882_v34 }
0x33b6   :  { %3616 = vmatpush1.bf16.msra.mxu1 %v6893_v56 }
0x33b7   :  { %3751 = vmatprep.subr.bf16.mxu1 %v7113_v27 }
0x3469   :  { %v3493_v41 = vpop.f32.mrf.mxu1 }
0x346a   :  { %v3502_v17 = vadd.f32 %v3493_v41, %v6980_v38 }
0x346b   :  { %v3495_v12 = vpop.f32.mrf.mxu1 }
0x346c   :  { %v5347_v18 = vmul.f32 -1.442695, %v3502_v17  ;;  %v3509_v34 = vadd.f32 %v7062_v8, %v3495_v12 }
0x346d   :  { %v3497_v57 = vpop.f32.mrf.mxu1 }
0x346e   :  { %5691 = vpow2.f32 %v5347_v18  ;;  %v3643_v18 = vld [vmem:[#allocation4 + $0x58] sm:$0xff] }
0x346f   :  { %v3498_v21 = vpop.f32.mrf.mxu1 }
0x347b   :  { %v5692_v11 = vpop.eup %5691 }
0x347c   :  { %v3506_v3 = vadd.f32 1.0, %v5692_v11 }
0x347e   :  { %5693 = vrcp.f32 %v3506_v3 }
0x348b   :  { %v5694_v55 = vpop.eup %5693 }
0x348c   :  { %v3510_v26 = vmul.f32 %v5694_v55, %v3509_v34 }
0x348e   :  { %v3511_v19 = vadd.f32 %v3510_v26, %v3501_v50 }
0x3490   :  { %5695 = vtanh.f32 %v3511_v19 }
0x349d   :  { %v5696_v35 = vpop.eup %5695 }
0x349e   :  { %v3513_v32 = vsub.f32 %v3452_v45, %v5696_v35 }
0x34a0   :  { %3515 = vrot.lane.b32.xlu0 %v3513_v32, %s5852_s27 }
0x3512   :  { %v3516_v38 = vpop.permute.xlu0 %3515 }
0x3513   :  { %v3518_v28 = vmul.f32 %v5694_v55, %v3516_v38 }
0x3515   :  { %3520 = vrot.lane.b32.xlu1 %v3518_v28, %s5852_s27 }
0x3587   :  { %v3521_v22 = vpop.permute.xlu1 %3520 }
0x3588   :  { %v3523_v29 = vadd.f32 %v5696_v35, %v3521_v22 }
0x358a   :  { %3524 = vst.msk [vmem:[#allocation2 + $0x18] sm:$0xff] %vm852_vm3, %v3523_v29  ;;  %v3526_v49 = vpack.c.bf16 %v3523_v29, %v3523_v29 }
0x358b   :  { %3525 = vst.msk [vmem:[#allocation2 + $0xa0] sm:$0xff] %vm854_vm4, %v3523_v29 }
0x358c   :  { %5348 = vmatmul.mubr.msk.bf16.vlgmr.msra.gmra.mxu0 %vm681_vm2, %v3526_v49 }
0x358d   :  { %3681 = vmatpush1.bf16.msra.mxu0 %v7126_v6  ;;  %3704 = vmatprep.mubr.bf16.mxu0 %v5851_v1 }
0x358e   :  { %3682 = vmatprep.subr.bf16.mxu0 %v7133_v47 }
0x3591   :  { %3683 = vmatpush1.bf16.msra.mxu0 %v7139_v61 }
0x3592   :  { %3684 = vmatprep.subr.bf16.mxu0 %v7145_v58 }
0x3595   :  { %3685 = vmatpush1.bf16.msra.mxu0 %v7151_v59 }
0x3596   :  { %3686 = vmatprep.subr.bf16.mxu0 %v7157_v7 }
0x3599   :  { %3687 = vmatpush1.bf16.msra.mxu0 %v6893_v56 }
0x359a   :  { %3822 = vmatprep.subr.bf16.mxu0 %v7113_v27 }
0x364c   :  { %v3564_v53 = vpop.f32.mrf.mxu0 }
0x364d   :  { %v3573_v2 = vadd.f32 %v3564_v53, %v6985_v24 }
0x364e   :  { %v3566_v15 = vpop.f32.mrf.mxu0 }
0x364f   :  { %v5349_v30 = vmul.f32 -1.442695, %v3573_v2  ;;  %v3580_v44 = vadd.f32 %v7062_v8, %v3566_v15  ;;  %v3714_v15 = vld [vmem:[#allocation4 + $0x68] sm:$0xff] }
0x3650   :  { %v3568_v10 = vpop.f32.mrf.mxu0 }
0x3651   :  { %5697 = vpow2.f32 %v5349_v30 }
0x3652   :  { %v3569_v36 = vpop.f32.mrf.mxu0 }
0x365e   :  { %v5698_v4 = vpop.eup %5697 }
0x365f   :  { %v3577_v40 = vadd.f32 1.0, %v5698_v4 }
0x3661   :  { %5699 = vrcp.f32 %v3577_v40 }
0x366e   :  { %v5700_v20 = vpop.eup %5699 }
0x366f   :  { %v3581_v5 = vmul.f32 %v5700_v20, %v3580_v44 }
0x3671   :  { %v3582_v14 = vadd.f32 %v3581_v5, %v3572_v0 }
0x3673   :  { %5701 = vtanh.f32 %v3582_v14 }
0x3680   :  { %v5702_v56 = vpop.eup %5701 }
0x3681   :  { %v3584_v60 = vsub.f32 %v3523_v29, %v5702_v56 }
0x3683   :  { %3586 = vrot.lane.b32.xlu0 %v3584_v60, %s5852_s27 }
0x36f5   :  { %v3587_v24 = vpop.permute.xlu0 %3586 }
0x36f6   :  { %v3589_v62 = vmul.f32 %v5700_v20, %v3587_v24 }
0x36f8   :  { %3591 = vrot.lane.b32.xlu1 %v3589_v62, %s5852_s27 }
0x376a   :  { %v3592_v31 = vpop.permute.xlu1 %3591 }
0x376b   :  { %v3594_v51 = vadd.f32 %v5702_v56, %v3592_v31 }
0x376d   :  { %3595 = vst.msk [vmem:[#allocation2 + $0x20] sm:$0xff] %vm852_vm3, %v3594_v51  ;;  %v3597_v37 = vpack.c.bf16 %v3594_v51, %v3594_v51 }
0x376e   :  { %3596 = vst.msk [vmem:[#allocation2 + $0x98] sm:$0xff] %vm854_vm4, %v3594_v51 }
0x376f   :  { %5350 = vmatmul.mubr.msk.bf16.vlgmr.msra.gmra.mxu1 %vm681_vm2, %v3597_v37 }
0x3770   :  { %3752 = vmatpush1.bf16.msra.mxu1 %v7126_v6  ;;  %3775 = vmatprep.mubr.bf16.mxu1 %v5851_v1 }
0x3771   :  { %3753 = vmatprep.subr.bf16.mxu1 %v7133_v47 }
0x3774   :  { %3754 = vmatpush1.bf16.msra.mxu1 %v7139_v61 }
0x3775   :  { %3755 = vmatprep.subr.bf16.mxu1 %v7145_v58 }
0x3778   :  { %3756 = vmatpush1.bf16.msra.mxu1 %v7151_v59 }
0x3779   :  { %3757 = vmatprep.subr.bf16.mxu1 %v7157_v7 }
0x377c   :  { %3758 = vmatpush1.bf16.msra.mxu1 %v7179_v16 }
0x377d   :  { %3893 = vmatprep.subr.bf16.mxu1 %v7113_v27 }
0x382f   :  { %v3635_v23 = vpop.f32.mrf.mxu1 }
0x3830   :  { %v3644_v43 = vadd.f32 %v3635_v23, %v6990_v33 }
0x3831   :  { %v3637_v42 = vpop.f32.mrf.mxu1 }
0x3832   :  { %v5351_v39 = vmul.f32 -1.442695, %v3644_v43  ;;  %v3651_v41 = vadd.f32 %v7062_v8, %v3637_v42  ;;  %v3785_v43 = vld [vmem:[#allocation4 + $0x78] sm:$0xff] }
0x3833   :  { %v3639_v63 = vpop.f32.mrf.mxu1 }
0x3834   :  { %5703 = vpow2.f32 %v5351_v39 }
0x3835   :  { %v3640_v25 = vpop.f32.mrf.mxu1 }
0x3841   :  { %v5704_v45 = vpop.eup %5703 }
0x3842   :  { %v3648_v54 = vadd.f32 1.0, %v5704_v45 }
0x3844   :  { %5705 = vrcp.f32 %v3648_v54 }
0x3851   :  { %v5706_v17 = vpop.eup %5705 }
0x3852   :  { %v3652_v12 = vmul.f32 %v5706_v17, %v3651_v41 }
0x3854   :  { %v3653_v57 = vadd.f32 %v3652_v12, %v3643_v18 }
0x3856   :  { %5707 = vtanh.f32 %v3653_v57 }
0x3863   :  { %v5708_v21 = vpop.eup %5707 }
0x3864   :  { %v3655_v11 = vsub.f32 %v3594_v51, %v5708_v21 }
0x3866   :  { %3657 = vrot.lane.b32.xlu0 %v3655_v11, %s5852_s27 }
0x38d8   :  { %v3658_v33 = vpop.permute.xlu0 %3657 }
0x38d9   :  { %v3660_v3 = vmul.f32 %v5706_v17, %v3658_v33 }
0x38db   :  { %3662 = vrot.lane.b32.xlu1 %v3660_v3, %s5852_s27 }
0x394d   :  { %v3663_v34 = vpop.permute.xlu1 %3662 }
0x394e   :  { %v3665_v55 = vadd.f32 %v5708_v21, %v3663_v34 }
0x3950   :  { %3666 = vst.msk [vmem:[#allocation2 + $0x28] sm:$0xff] %vm852_vm3, %v3665_v55  ;;  %v3668_v26 = vpack.c.bf16 %v3665_v55, %v3665_v55 }
0x3951   :  { %3667 = vst.msk [vmem:[#allocation2 + $0x90] sm:$0xff] %vm854_vm4, %v3665_v55 }
0x3952   :  { %5352 = vmatmul.mubr.msk.bf16.vlgmr.msra.gmra.mxu0 %vm681_vm2, %v3668_v26 }
0x3953   :  { %3823 = vmatpush1.bf16.msra.mxu0 %v7126_v6  ;;  %3846 = vmatprep.mubr.bf16.mxu0 %v5851_v1 }
0x3954   :  { %3824 = vmatprep.subr.bf16.mxu0 %v7133_v47 }
0x3957   :  { %3825 = vmatpush1.bf16.msra.mxu0 %v7139_v61 }
0x3958   :  { %3826 = vmatprep.subr.bf16.mxu0 %v7145_v58 }
0x395b   :  { %3827 = vmatpush1.bf16.msra.mxu0 %v7151_v59 }
0x395c   :  { %3828 = vmatprep.subr.bf16.mxu0 %v7157_v7 }
0x395f   :  { %3829 = vmatpush1.bf16.msra.mxu0 %v7179_v16 }
0x3960   :  { %3964 = vmatprep.subr.bf16.mxu0 %v7113_v27 }
0x3a12   :  { %v3706_v50 = vpop.f32.mrf.mxu0 }
0x3a13   :  { %v3715_v19 = vadd.f32 %v3706_v50, %v6995_v9  ;;  %v3856_v50 = vld [vmem:[#allocation4 + $0x88] sm:$0xff] }
0x3a14   :  { %v3708_v35 = vpop.f32.mrf.mxu0 }
0x3a15   :  { %v5353_v32 = vmul.f32 -1.442695, %v3715_v19  ;;  %v3722_v49 = vadd.f32 %v7062_v8, %v3708_v35 }
0x3a16   :  { %v3710_v38 = vpop.f32.mrf.mxu0 }
0x3a17   :  { %5709 = vpow2.f32 %v5353_v32 }
0x3a18   :  { %v3711_v28 = vpop.f32.mrf.mxu0 }
0x3a24   :  { %v5710_v22 = vpop.eup %5709 }
0x3a25   :  { %v3719_v29 = vadd.f32 1.0, %v5710_v22 }
0x3a27   :  { %5711 = vrcp.f32 %v3719_v29 }
0x3a34   :  { %v5712_v53 = vpop.eup %5711 }
0x3a35   :  { %v3723_v2 = vmul.f32 %v5712_v53, %v3722_v49 }
0x3a37   :  { %v3724_v30 = vadd.f32 %v3723_v2, %v3714_v15 }
0x3a39   :  { %5713 = vtanh.f32 %v3724_v30 }
0x3a46   :  { %v5714_v10 = vpop.eup %5713 }
0x3a47   :  { %v3726_v36 = vsub.f32 %v3665_v55, %v5714_v10 }
0x3a49   :  { %3728 = vrot.lane.b32.xlu0 %v3726_v36, %s5852_s27 }
0x3abb   :  { %v3729_v9 = vpop.permute.xlu0 %3728 }
0x3abc   :  { %v3731_v4 = vmul.f32 %v5712_v53, %v3729_v9 }
0x3abe   :  { %3733 = vrot.lane.b32.xlu1 %v3731_v4, %s5852_s27 }
0x3b30   :  { %v3734_v40 = vpop.permute.xlu1 %3733 }
0x3b31   :  { %v3736_v44 = vadd.f32 %v5714_v10, %v3734_v40 }
0x3b33   :  { %3737 = vst.msk [vmem:[#allocation2 + $0x30] sm:$0xff] %vm852_vm3, %v3736_v44  ;;  %v3739_v20 = vpack.c.bf16 %v3736_v44, %v3736_v44 }
0x3b34   :  { %3738 = vst.msk [vmem:[#allocation2 + $0x88] sm:$0xff] %vm854_vm4, %v3736_v44 }
0x3b35   :  { %5354 = vmatmul.mubr.msk.bf16.vlgmr.msra.gmra.mxu1 %vm681_vm2, %v3739_v20  ;;  %v3927_v20 = vld [vmem:[#allocation4 + $0x98] sm:$0xff] }
0x3b36   :  { %3894 = vmatpush1.bf16.msra.mxu1 %v7126_v6  ;;  %3917 = vmatprep.mubr.bf16.mxu1 %v5851_v1 }
0x3b37   :  { %3895 = vmatprep.subr.bf16.mxu1 %v7133_v47 }
0x3b3a   :  { %3896 = vmatpush1.bf16.msra.mxu1 %v7139_v61 }
0x3b3b   :  { %3897 = vmatprep.subr.bf16.mxu1 %v7145_v58 }
0x3b3e   :  { %3898 = vmatpush1.bf16.msra.mxu1 %v7151_v59 }
0x3b3f   :  { %3899 = vmatprep.subr.bf16.mxu1 %v7157_v7 }
0x3b42   :  { %3900 = vmatpush1.bf16.msra.mxu1 %v7179_v16 }
0x3b43   :  { %4035 = vmatprep.subr.bf16.mxu1 %v7113_v27 }
0x3bf5   :  { %v3777_v5 = vpop.f32.mrf.mxu1 }
0x3bf6   :  { %v3786_v0 = vadd.f32 %v3777_v5, %v7000_v46 }
0x3bf7   :  { %v3779_v14 = vpop.f32.mrf.mxu1 }
0x3bf8   :  { %v5355_v56 = vmul.f32 -1.442695, %v3786_v0  ;;  %v3793_v51 = vadd.f32 %v7062_v8, %v3779_v14 }
0x3bf9   :  { %v3781_v60 = vpop.f32.mrf.mxu1 }
0x3bfa   :  { %5715 = vpow2.f32 %v5355_v56 }
0x3bfb   :  { %v3782_v24 = vpop.f32.mrf.mxu1 }
0x3c07   :  { %v5716_v62 = vpop.eup %5715 }
0x3c08   :  { %v3790_v31 = vadd.f32 1.0, %v5716_v62 }
0x3c0a   :  { %5717 = vrcp.f32 %v3790_v31 }
0x3c17   :  { %v5718_v37 = vpop.eup %5717 }
0x3c18   :  { %v3794_v23 = vmul.f32 %v5718_v37, %v3793_v51 }
0x3c1a   :  { %v3795_v42 = vadd.f32 %v3794_v23, %v3785_v43 }
0x3c1c   :  { %5719 = vtanh.f32 %v3795_v42 }
0x3c29   :  { %v5720_v39 = vpop.eup %5719 }
0x3c2a   :  { %v3797_v63 = vsub.f32 %v3736_v44, %v5720_v39 }
0x3c2c   :  { %3799 = vrot.lane.b32.xlu0 %v3797_v63, %s5852_s27 }
0x3c9e   :  { %v3800_v46 = vpop.permute.xlu0 %3799 }
0x3c9f   :  { %v3802_v25 = vmul.f32 %v5718_v37, %v3800_v46 }
0x3ca1   :  { %3804 = vrot.lane.b32.xlu1 %v3802_v25, %s5852_s27 }
0x3d13   :  { %v3805_v45 = vpop.permute.xlu1 %3804 }
0x3d14   :  { %v3807_v54 = vadd.f32 %v5720_v39, %v3805_v45 }
0x3d16   :  { %3808 = vst.msk [vmem:[#allocation2 + $0x38] sm:$0xff] %vm852_vm3, %v3807_v54  ;;  %v3810_v41 = vpack.c.bf16 %v3807_v54, %v3807_v54 }
0x3d17   :  { %3809 = vst.msk [vmem:[#allocation2 + $0x80] sm:$0xff] %vm854_vm4, %v3807_v54 }
0x3d18   :  { %5356 = vmatmul.mubr.msk.bf16.vlgmr.msra.gmra.mxu0 %vm681_vm2, %v3810_v41 }
0x3d19   :  { %3965 = vmatpush1.bf16.msra.mxu0 %v7126_v6  ;;  %3988 = vmatprep.mubr.bf16.mxu0 %v5851_v1 }
0x3d1a   :  { %3966 = vmatprep.subr.bf16.mxu0 %v7133_v47 }
0x3d1d   :  { %3967 = vmatpush1.bf16.msra.mxu0 %v7139_v61 }
0x3d1e   :  { %3968 = vmatprep.subr.bf16.mxu0 %v7145_v58 }
0x3d21   :  { %3969 = vmatpush1.bf16.msra.mxu0 %v7151_v59 }
0x3d22   :  { %3970 = vmatprep.subr.bf16.mxu0 %v7157_v7 }
0x3d25   :  { %3971 = vmatpush1.bf16.msra.mxu0 %v7179_v16 }
0x3d26   :  { %4106 = vmatprep.subr.bf16.mxu0 %v7113_v27 }
0x3dd8   :  { %v3848_v17 = vpop.f32.mrf.mxu0 }
0x3dd9   :  { %v3857_v12 = vadd.f32 %v3848_v17, %v7005_v48 }
0x3dda   :  { %v3850_v18 = vpop.f32.mrf.mxu0 }
0x3ddb   :  { %v5357_v57 = vmul.f32 -1.442695, %v3857_v12  ;;  %v3864_v34 = vadd.f32 %v7062_v8, %v3850_v18 }
0x3ddc   :  { %v3852_v21 = vpop.f32.mrf.mxu0 }
0x3ddd   :  { %5721 = vpow2.f32 %v5357_v57 }
0x3dde   :  { %v3853_v11 = vpop.f32.mrf.mxu0 }
0x3dea   :  { %v5722_v33 = vpop.eup %5721 }
0x3deb   :  { %v3861_v3 = vadd.f32 1.0, %v5722_v33 }
0x3ded   :  { %5723 = vrcp.f32 %v3861_v3  ;;  %v4068_v3 = vld [vmem:[#allocation4 + $0xb0] sm:$0xff] }
0x3dfa   :  { %v5724_v55 = vpop.eup %5723 }
0x3dfb   :  { %v3865_v26 = vmul.f32 %v5724_v55, %v3864_v34 }
0x3dfd   :  { %v3866_v19 = vadd.f32 %v3865_v26, %v3856_v50 }
0x3dff   :  { %5725 = vtanh.f32 %v3866_v19 }
0x3e0c   :  { %v5726_v35 = vpop.eup %5725 }
0x3e0d   :  { %v3868_v32 = vsub.f32 %v3807_v54, %v5726_v35  ;;  %v3998_v54 = vld [vmem:[#allocation4 + $0xa8] sm:$0xff] }
0x3e0f   :  { %3870 = vrot.lane.b32.xlu0 %v3868_v32, %s5852_s27 }
0x3e81   :  { %v3871_v48 = vpop.permute.xlu0 %3870 }
0x3e82   :  { %v3873_v38 = vmul.f32 %v5724_v55, %v3871_v48 }
0x3e84   :  { %3875 = vrot.lane.b32.xlu1 %v3873_v38, %s5852_s27 }
0x3ef6   :  { %v3876_v28 = vpop.permute.xlu1 %3875 }
0x3ef7   :  { %v3878_v22 = vadd.f32 %v5726_v35, %v3876_v28 }
0x3ef9   :  { %3879 = vst.msk [vmem:[#allocation2 + $0x40] sm:$0xff] %vm852_vm3, %v3878_v22  ;;  %v3881_v29 = vpack.c.bf16 %v3878_v22, %v3878_v22 }
0x3efa   :  { %3880 = vst.msk [vmem:[#allocation2 + $0x78] sm:$0xff] %vm854_vm4, %v3878_v22 }
0x3efb   :  { %5358 = vmatmul.mubr.msk.bf16.vlgmr.msra.gmra.mxu1 %vm681_vm2, %v3881_v29 }
0x3efc   :  { %4036 = vmatpush1.bf16.msra.mxu1 %v7126_v6  ;;  %4059 = vmatprep.mubr.bf16.mxu1 %v5851_v1 }
0x3efd   :  { %4037 = vmatprep.subr.bf16.mxu1 %v7133_v47 }
0x3f00   :  { %4038 = vmatpush1.bf16.msra.mxu1 %v7139_v61 }
0x3f01   :  { %4039 = vmatprep.subr.bf16.mxu1 %v7145_v58 }
0x3f04   :  { %4040 = vmatpush1.bf16.msra.mxu1 %v7151_v59 }
0x3f05   :  { %4041 = vmatprep.subr.bf16.mxu1 %v7157_v7 }
0x3f08   :  { %4042 = vmatpush1.bf16.msra.mxu1 %v7179_v16 }
0x3f09   :  { %4177 = vmatprep.subr.bf16.mxu1 %v7113_v27 }
0x3fbb   :  { %v3919_v49 = vpop.f32.mrf.mxu1 }
0x3fbc   :  { %v3928_v53 = vadd.f32 %v3919_v49, %v7010_v13 }
0x3fbd   :  { %v3921_v2 = vpop.f32.mrf.mxu1 }
0x3fbe   :  { %v5359_v15 = vmul.f32 -1.442695, %v3928_v53  ;;  %v3935_v4 = vadd.f32 %v7062_v8, %v3921_v2 }
0x3fbf   :  { %v3923_v30 = vpop.f32.mrf.mxu1 }
0x3fc0   :  { %5727 = vpow2.f32 %v5359_v15 }
0x3fc1   :  { %v3924_v10 = vpop.f32.mrf.mxu1 }
0x3fcd   :  { %v5728_v36 = vpop.eup %5727 }
0x3fce   :  { %v3932_v9 = vadd.f32 1.0, %v5728_v36 }
0x3fd0   :  { %5729 = vrcp.f32 %v3932_v9 }
0x3fdd   :  { %v5730_v40 = vpop.eup %5729 }
0x3fde   :  { %v3936_v44 = vmul.f32 %v5730_v40, %v3935_v4  ;;  %v4139_v4 = vld [vmem:[#allocation4 + $0xc0] sm:$0xff] }
0x3fe0   :  { %v3937_v5 = vadd.f32 %v3936_v44, %v3927_v20 }
0x3fe2   :  { %5731 = vtanh.f32 %v3937_v5 }
0x3fef   :  { %v5732_v0 = vpop.eup %5731 }
0x3ff0   :  { %v3939_v14 = vsub.f32 %v3878_v22, %v5732_v0  ;;  %v4069_v22 = vld [vmem:[#allocation4 + $0xb8] sm:$0xff] }
0x3ff2   :  { %3941 = vrot.lane.b32.xlu0 %v3939_v14, %s5852_s27 }
0x4064   :  { %v3942_v13 = vpop.permute.xlu0 %3941 }
0x4065   :  { %v3944_v56 = vmul.f32 %v5730_v40, %v3942_v13 }
0x4067   :  { %3946 = vrot.lane.b32.xlu1 %v3944_v56, %s5852_s27 }
0x40d9   :  { %v3947_v60 = vpop.permute.xlu1 %3946 }
0x40da   :  { %v3949_v24 = vadd.f32 %v5732_v0, %v3947_v60 }
0x40dc   :  { %3950 = vst.msk [vmem:[#allocation2 + $0x48] sm:$0xff] %vm852_vm3, %v3949_v24  ;;  %v3952_v62 = vpack.c.bf16 %v3949_v24, %v3949_v24 }
0x40dd   :  { %3951 = vst.msk [vmem:[#allocation2 + $0x70] sm:$0xff] %vm854_vm4, %v3949_v24 }
0x40de   :  { %5360 = vmatmul.mubr.msk.bf16.vlgmr.msra.gmra.mxu0 %vm681_vm2, %v3952_v62  ;;  %v4140_v62 = vld [vmem:[#allocation4 + $0xc8] sm:$0xff] }
0x40df   :  { %4107 = vmatpush1.bf16.msra.mxu0 %v7126_v6  ;;  %4130 = vmatprep.mubr.bf16.mxu0 %v5851_v1 }
0x40e0   :  { %4108 = vmatprep.subr.bf16.mxu0 %v7133_v47 }
0x40e3   :  { %4109 = vmatpush1.bf16.msra.mxu0 %v7139_v61 }
0x40e4   :  { %4110 = vmatprep.subr.bf16.mxu0 %v7145_v58 }
0x40e7   :  { %4111 = vmatpush1.bf16.msra.mxu0 %v7151_v59 }
0x40e8   :  { %4112 = vmatprep.subr.bf16.mxu0 %v7157_v7 }
0x40eb   :  { %4113 = vmatpush1.bf16.msra.mxu0 %v7179_v16 }
0x40ec   :  { %4248 = vmatprep.subr.bf16.mxu0 %v7113_v27 }
0x419e   :  { %v3990_v31 = vpop.f32.mrf.mxu0 }
0x419f   :  { %v3999_v51 = vadd.f32 %v3990_v31, %v7015_v52 }
0x41a0   :  { %v3992_v37 = vpop.f32.mrf.mxu0 }
0x41a1   :  { %v5361_v23 = vmul.f32 -1.442695, %v3999_v51  ;;  %v4006_v46 = vadd.f32 %v7062_v8, %v3992_v37 }
0x41a2   :  { %v3994_v43 = vpop.f32.mrf.mxu0 }
0x41a3   :  { %5733 = vpow2.f32 %v5361_v23 }
0x41a4   :  { %v3995_v42 = vpop.f32.mrf.mxu0 }
0x41b0   :  { %v5734_v39 = vpop.eup %5733 }
0x41b1   :  { %v4003_v63 = vadd.f32 1.0, %v5734_v39 }
0x41b3   :  { %5735 = vrcp.f32 %v4003_v63 }
0x41c0   :  { %v5736_v25 = vpop.eup %5735 }
0x41c1   :  { %v4007_v45 = vmul.f32 %v5736_v25, %v4006_v46 }
0x41c3   :  { %v4008_v41 = vadd.f32 %v4007_v45, %v3998_v54 }
0x41c5   :  { %5737 = vtanh.f32 %v4008_v41 }
0x41d2   :  { %v5738_v17 = vpop.eup %5737 }
0x41d3   :  { %v4010_v12 = vsub.f32 %v3949_v24, %v5738_v17 }
0x41d5   :  { %4012 = vrot.lane.b32.xlu0 %v4010_v12, %s5852_s27 }
0x4247   :  { %v4013_v52 = vpop.permute.xlu0 %4012 }
0x4248   :  { %v4015_v18 = vmul.f32 %v5736_v25, %v4013_v52  ;;  %v4210_v25 = vld [vmem:[#allocation4 + $0xd0] sm:$0xff] }
0x424a   :  { %4017 = vrot.lane.b32.xlu1 %v4015_v18, %s5852_s27 }
0x42bc   :  { %v4018_v57 = vpop.permute.xlu1 %4017 }
0x42bd   :  { %v4020_v21 = vadd.f32 %v5738_v17, %v4018_v57 }
0x42bf   :  { %4021 = vst.msk [vmem:[#allocation2 + $0x50] sm:$0xff] %vm852_vm3, %v4020_v21  ;;  %v4023_v11 = vpack.c.bf16 %v4020_v21, %v4020_v21 }
0x42c0   :  { %4022 = vst.msk [vmem:[#allocation2 + $0x68] sm:$0xff] %vm854_vm4, %v4020_v21 }
0x42c1   :  { %5362 = vmatmul.mubr.msk.bf16.vlgmr.msra.gmra.mxu1 %vm681_vm2, %v4023_v11 }
0x42c2   :  { %4178 = vmatpush1.bf16.msra.mxu1 %v7126_v6  ;;  %4201 = vmatprep.mubr.bf16.mxu1 %v5851_v1 }
0x42c3   :  { %4179 = vmatprep.subr.bf16.mxu1 %v7133_v47 }
0x42c6   :  { %4180 = vmatpush1.bf16.msra.mxu1 %v7139_v61 }
0x42c7   :  { %4181 = vmatprep.subr.bf16.mxu1 %v7145_v58 }
0x42ca   :  { %4182 = vmatpush1.bf16.msra.mxu1 %v7151_v59 }
0x42cb   :  { %4183 = vmatprep.subr.bf16.mxu1 %v7157_v7 }
0x42ce   :  { %4184 = vmatpush1.bf16.msra.mxu1 %v7179_v16 }
0x42cf   :  { %4319 = vmatprep.subr.bf16.mxu1 %v7113_v27 }
0x4381   :  { %v4061_v33 = vpop.f32.mrf.mxu1 }
0x4382   :  { %v4070_v34 = vadd.f32 %v4068_v3, %v4061_v33  ;;  %v4211_v33 = vld [vmem:[#allocation4 + $0xd8] sm:$0xff] }
0x4383   :  { %v4063_v55 = vpop.f32.mrf.mxu1 }
0x4384   :  { %v5363_v26 = vmul.f32 -1.442695, %v4070_v34  ;;  %v4077_v48 = vadd.f32 %v7062_v8, %v4063_v55 }
0x4385   :  { %v4065_v50 = vpop.f32.mrf.mxu1 }
0x4386   :  { %5739 = vpow2.f32 %v5363_v26 }
0x4387   :  { %v4066_v19 = vpop.f32.mrf.mxu1 }
0x4393   :  { %v5740_v35 = vpop.eup %5739 }
0x4394   :  { %v4074_v32 = vadd.f32 1.0, %v5740_v35 }
0x4396   :  { %5741 = vrcp.f32 %v4074_v32 }
0x43a3   :  { %v5742_v38 = vpop.eup %5741 }
0x43a4   :  { %v4078_v28 = vmul.f32 %v5742_v38, %v4077_v48  ;;  %v4281_v48 = vld [vmem:[#allocation4 + $0xe0] sm:$0xff] }
0x43a6   :  { %v4079_v29 = vadd.f32 %v4078_v28, %v4069_v22 }
0x43a8   :  { %5743 = vtanh.f32 %v4079_v29 }
0x43b5   :  { %v5744_v49 = vpop.eup %5743 }
0x43b6   :  { %v4081_v53 = vsub.f32 %v4020_v21, %v5744_v49 }
0x43b8   :  { %4083 = vrot.lane.b32.xlu0 %v4081_v53, %s5852_s27 }
0x442a   :  { %v4084_v2 = vpop.permute.xlu0 %4083 }
0x442b   :  { %v4086_v15 = vmul.f32 %v5742_v38, %v4084_v2 }
0x442d   :  { %4088 = vrot.lane.b32.xlu1 %v4086_v15, %s5852_s27  ;;  %v7327_v15 = vld [vmem:[%s7614_s11] ss:$0 sm:$0xff] }
0x449f   :  { %v4089_v30 = vpop.permute.xlu1 %4088 }
0x44a0   :  { %v4091_v10 = vadd.f32 %v5744_v49, %v4089_v30 }
0x44a2   :  { %4092 = vst.msk [vmem:[#allocation2 + $0x58] sm:$0xff] %vm852_vm3, %v4091_v10  ;;  %v4094_v36 = vpack.c.bf16 %v4091_v10, %v4091_v10 }
0x44a3   :  { %4093 = vst.msk [vmem:[#allocation2 + $0x60] sm:$0xff] %vm854_vm4, %v4091_v10 }
0x44a4   :  { %5364 = vmatmul.mubr.msk.bf16.vlgmr.msra.gmra.mxu0 %vm681_vm2, %v4094_v36 }
0x44a5   :  { %4249 = vmatpush1.bf16.msra.mxu0 %v7126_v6  ;;  %4272 = vmatprep.mubr.bf16.mxu0 %v5851_v1 }
0x44a6   :  { %4250 = vmatprep.subr.bf16.mxu0 %v7133_v47 }
0x44a9   :  { %4251 = vmatpush1.bf16.msra.mxu0 %v7139_v61 }
0x44aa   :  { %4252 = vmatprep.subr.bf16.mxu0 %v7145_v58 }
0x44ad   :  { %4253 = vmatpush1.bf16.msra.mxu0 %v7151_v59 }
0x44ae   :  { %4254 = vmatprep.subr.bf16.mxu0 %v7157_v7 }
0x44b1   :  { %4255 = vmatpush1.bf16.msra.mxu0 %v7179_v16 }
0x44b2   :  { %4390 = vmatprep.subr.bf16.mxu0 %v7113_v27 }
0x4564   :  { %v4132_v9 = vpop.f32.mrf.mxu0 }
0x4565   :  { %v4141_v40 = vadd.f32 %v4139_v4, %v4132_v9  ;;  %v4282_v9 = vld [vmem:[#allocation4 + $0xe8] sm:$0xff] }
0x4566   :  { %v4134_v44 = vpop.f32.mrf.mxu0 }
0x4567   :  { %v5365_v20 = vmul.f32 -1.442695, %v4141_v40  ;;  %v4148_v56 = vadd.f32 %v7062_v8, %v4134_v44 }
0x4568   :  { %v4136_v5 = vpop.f32.mrf.mxu0 }
0x4569   :  { %5745 = vpow2.f32 %v5365_v20 }
0x456a   :  { %v4137_v0 = vpop.f32.mrf.mxu0 }
0x4576   :  { %v5746_v14 = vpop.eup %5745 }
0x4577   :  { %v4145_v13 = vadd.f32 1.0, %v5746_v14 }
0x4579   :  { %5747 = vrcp.f32 %v4145_v13 }
0x4586   :  { %v5748_v60 = vpop.eup %5747 }
0x4587   :  { %v4149_v24 = vmul.f32 %v5748_v60, %v4148_v56 }
0x4589   :  { %v4150_v31 = vadd.f32 %v4149_v24, %v4140_v62 }
0x458b   :  { %5749 = vtanh.f32 %v4150_v31 }
0x4598   :  { %v5750_v51 = vpop.eup %5749 }
0x4599   :  { %v4152_v37 = vsub.f32 %v4091_v10, %v5750_v51 }
0x459b   :  { %4154 = vrot.lane.b32.xlu0 %v4152_v37, %s5852_s27 }
0x460d   :  { %v4155_v23 = vpop.permute.xlu0 %4154 }
0x460e   :  { %v4157_v43 = vmul.f32 %v5748_v60, %v4155_v23  ;;  %v4352_v60 = vld [vmem:[#allocation4 + $0xf0] sm:$0xff] }
0x4610   :  { %4159 = vrot.lane.b32.xlu1 %v4157_v43, %s5852_s27 }
0x4682   :  { %v4160_v42 = vpop.permute.xlu1 %4159 }
0x4683   :  { %v4162_v39 = vadd.f32 %v5750_v51, %v4160_v42 }
0x4685   :  { %4163 = vst.msk [vmem:[#allocation2 + $0x60] sm:$0xff] %vm852_vm3, %v4162_v39  ;;  %v4165_v63 = vpack.c.bf16 %v4162_v39, %v4162_v39 }
0x4686   :  { %4164 = vst.msk [vmem:[#allocation2 + $0x58] sm:$0xff] %vm854_vm4, %v4162_v39 }
0x4687   :  { %5366 = vmatmul.mubr.msk.bf16.vlgmr.msra.gmra.mxu1 %vm681_vm2, %v4165_v63 }
0x4688   :  { %4320 = vmatpush1.bf16.msra.mxu1 %v7126_v6  ;;  %4343 = vmatprep.mubr.bf16.mxu1 %v5851_v1 }
0x4689   :  { %4321 = vmatprep.subr.bf16.mxu1 %v7133_v47 }
0x468c   :  { %4322 = vmatpush1.bf16.msra.mxu1 %v7139_v61 }
0x468d   :  { %4323 = vmatprep.subr.bf16.mxu1 %v7145_v58 }
0x4690   :  { %4324 = vmatpush1.bf16.msra.mxu1 %v7151_v59 }
0x4691   :  { %4325 = vmatprep.subr.bf16.mxu1 %v7157_v7 }
0x4694   :  { %4326 = vmatpush1.bf16.msra.mxu1 %v7179_v16 }
0x4695   :  { %4461 = vmatprep.subr.bf16.mxu1 %v7113_v27 }
0x4747   :  { %v4203_v46 = vpop.f32.mrf.mxu1 }
0x4748   :  { %v4212_v45 = vadd.f32 %v4210_v25, %v4203_v46  ;;  %v4353_v46 = vld [vmem:[#allocation4 + $0xf8] sm:$0xff] }
0x4749   :  { %v4205_v54 = vpop.f32.mrf.mxu1 }
0x474a   :  { %v5367_v41 = vmul.f32 -1.442695, %v4212_v45  ;;  %v4219_v57 = vadd.f32 %v7062_v8, %v4205_v54 }
0x474b   :  { %v4207_v17 = vpop.f32.mrf.mxu1 }
0x474c   :  { %5751 = vpow2.f32 %v5367_v41 }
0x474d   :  { %v4208_v12 = vpop.f32.mrf.mxu1 }
0x4759   :  { %v5752_v52 = vpop.eup %5751 }
0x475a   :  { %v4216_v18 = vadd.f32 1.0, %v5752_v52 }
0x475c   :  { %5753 = vrcp.f32 %v4216_v18 }
0x4769   :  { %v5754_v21 = vpop.eup %5753 }
0x476a   :  { %v4220_v11 = vmul.f32 %v5754_v21, %v4219_v57 }
0x476c   :  { %v4221_v3 = vadd.f32 %v4220_v11, %v4211_v33 }
0x476e   :  { %5755 = vtanh.f32 %v4221_v3 }
0x477b   :  { %v5756_v34 = vpop.eup %5755 }
0x477c   :  { %v4223_v55 = vsub.f32 %v4162_v39, %v5756_v34 }
0x477e   :  { %4225 = vrot.lane.b32.xlu0 %v4223_v55, %s5852_s27 }
0x47f0   :  { %v4226_v26 = vpop.permute.xlu0 %4225 }
0x47f1   :  { %v4228_v50 = vmul.f32 %v5754_v21, %v4226_v26  ;;  %v4423_v21 = vld [vmem:[#allocation4 + $0x100] sm:$0xff] }
0x47f3   :  { %4230 = vrot.lane.b32.xlu1 %v4228_v50, %s5852_s27 }
0x4865   :  { %v4231_v19 = vpop.permute.xlu1 %4230 }
0x4866   :  { %v4233_v35 = vadd.f32 %v5756_v34, %v4231_v19 }
0x4868   :  { %4234 = vst.msk [vmem:[#allocation2 + $0x68] sm:$0xff] %vm852_vm3, %v4233_v35  ;;  %v4236_v8 = vpack.c.bf16 %v4233_v35, %v4233_v35 }
0x4869   :  { %4235 = vst.msk [vmem:[#allocation2 + $0x50] sm:$0xff] %vm854_vm4, %v4233_v35 }
0x486a   :  { %5368 = vmatmul.mubr.msk.bf16.vlgmr.msra.gmra.mxu0 %vm681_vm2, %v4236_v8 }
0x486b   :  { %4391 = vmatpush1.bf16.msra.mxu0 %v7126_v6  ;;  %4414 = vmatprep.mubr.bf16.mxu0 %v5851_v1 }
0x486c   :  { %4392 = vmatprep.subr.bf16.mxu0 %v7133_v47 }
0x486f   :  { %4393 = vmatpush1.bf16.msra.mxu0 %v7139_v61 }
0x4870   :  { %4394 = vmatprep.subr.bf16.mxu0 %v7145_v58 }
0x4873   :  { %4395 = vmatpush1.bf16.msra.mxu0 %v7151_v59 }
0x4874   :  { %4396 = vmatprep.subr.bf16.mxu0 %v7157_v7 }
0x4877   :  { %4397 = vmatpush1.bf16.msra.mxu0 %v7179_v16 }
0x4878   :  { %4532 = vmatprep.subr.bf16.mxu0 %v7113_v27 }
0x492a   :  { %v4274_v32 = vpop.f32.mrf.mxu0 }
0x492b   :  { %v4283_v38 = vadd.f32 %v4281_v48, %v4274_v32  ;;  %v4424_v32 = vld [vmem:[#allocation4 + $0x108] sm:$0xff] }
0x492c   :  { %v4276_v28 = vpop.f32.mrf.mxu0 }
0x492d   :  { %v5369_v22 = vmul.f32 -1.442695, %v4283_v38  ;;  %v4290_v30 = vadd.f32 %v7327_v15, %v4276_v28 }
0x492e   :  { %v4278_v29 = vpop.f32.mrf.mxu0 }
0x492f   :  { %5757 = vpow2.f32 %v5369_v22 }
0x4930   :  { %v4279_v49 = vpop.f32.mrf.mxu0 }
0x493c   :  { %v5758_v53 = vpop.eup %5757 }
0x493d   :  { %v4287_v2 = vadd.f32 1.0, %v5758_v53 }
0x493f   :  { %5759 = vrcp.f32 %v4287_v2  ;;  %v7376_v2 = vld [vmem:[%s7612_s10 + $0x34] ss:$8 sps:$4 sm:$0xff]  }
0x494c   :  { %v5760_v10 = vpop.eup %5759 }
0x494d   :  { %v4291_v36 = vmul.f32 %v5760_v10, %v4290_v30  ;;  %v4494_v30 = vld [vmem:[#allocation4 + $0x110] sm:$0xff] }
0x494f   :  { %v4292_v4 = vadd.f32 %v4291_v36, %v4282_v9 }
0x4951   :  { %5761 = vtanh.f32 %v4292_v4 }
0x495e   :  { %v5762_v40 = vpop.eup %5761 }
0x495f   :  { %v4294_v44 = vsub.f32 %v4233_v35, %v5762_v40 }
0x4961   :  { %4296 = vrot.lane.b32.xlu0 %v4294_v44, %s5852_s27  ;;  %v4495_v44 = vld [vmem:[#allocation4 + $0x118] sm:$0xff] }
0x49d3   :  { %v4297_v20 = vpop.permute.xlu0 %4296 }
0x49d4   :  { %v4299_v5 = vmul.f32 %v5760_v10, %v4297_v20 }
0x49d6   :  { %4301 = vrot.lane.b32.xlu1 %v4299_v5, %s5852_s27 }
0x4a48   :  { %v4302_v0 = vpop.permute.xlu1 %4301 }
0x4a49   :  { %v4304_v14 = vadd.f32 %v5762_v40, %v4302_v0 }
0x4a4b   :  { %4305 = vst.msk [vmem:[#allocation2 + $0x70] sm:$0xff] %vm852_vm3, %v4304_v14  ;;  %v4307_v13 = vpack.c.bf16 %v4304_v14, %v4304_v14 }
0x4a4c   :  { %4306 = vst.msk [vmem:[#allocation2 + $0x48] sm:$0xff] %vm854_vm4, %v4304_v14 }
0x4a4d   :  { %5370 = vmatmul.mubr.msk.bf16.vlgmr.msra.gmra.mxu1 %vm681_vm2, %v4307_v13 }
0x4a4e   :  { %4462 = vmatpush1.bf16.msra.mxu1 %v7126_v6  ;;  %4485 = vmatprep.mubr.bf16.mxu1 %v5851_v1 }
0x4a4f   :  { %4463 = vmatprep.subr.bf16.mxu1 %v7133_v47 }
0x4a52   :  { %4464 = vmatpush1.bf16.msra.mxu1 %v7139_v61 }
0x4a53   :  { %4465 = vmatprep.subr.bf16.mxu1 %v7145_v58 }
0x4a56   :  { %4466 = vmatpush1.bf16.msra.mxu1 %v7151_v59 }
0x4a57   :  { %4467 = vmatprep.subr.bf16.mxu1 %v7157_v7 }
0x4a5a   :  { %4468 = vmatpush1.bf16.msra.mxu1 %v7179_v16 }
0x4a5b   :  { %4603 = vmatprep.subr.bf16.mxu1 %v7113_v27 }
0x4b0d   :  { %v4345_v56 = vpop.f32.mrf.mxu1 }
0x4b0e   :  { %v4354_v24 = vadd.f32 %v4352_v60, %v4345_v56 }
0x4b0f   :  { %v4347_v62 = vpop.f32.mrf.mxu1 }
0x4b10   :  { %v5371_v31 = vmul.f32 -1.442695, %v4354_v24  ;;  %v4361_v42 = vadd.f32 %v7327_v15, %v4347_v62  ;;  %v7388_v62 = vld [vmem:[%s7612_s10 + $0x30] ss:$8 sps:$4 sm:$0xff]  }
0x4b11   :  { %v4349_v51 = vpop.f32.mrf.mxu1 }
0x4b12   :  { %5763 = vpow2.f32 %v5371_v31  ;;  %v7395_v31 = vld [vmem:[%s7612_s10 + $0x24] ss:$8 sps:$4 sm:$0xff]   ;;  %v7401_v51 = vld [vmem:[%s7612_s10 + $0x20] ss:$8 sps:$4 sm:$0xff]  }
0x4b13   :  { %v4350_v37 = vpop.f32.mrf.mxu1 }
0x4b14   :  { %v7407_v37 = vld [vmem:[%s7612_s10 + $0x14] ss:$8 sps:$4 sm:$0xff]  }
0x4b1f   :  { %v5764_v23 = vpop.eup %5763 }
0x4b20   :  { %v4358_v43 = vadd.f32 1.0, %v5764_v23  ;;  %v7413_v23 = vld [vmem:[%s7612_s10 + $0x10] ss:$8 sps:$4 sm:$0xff]  }
0x4b22   :  { %5765 = vrcp.f32 %v4358_v43  ;;  %v7419_v43 = vld [vmem:[%s7612_s10 + $0x4] ss:$8 sps:$4 sm:$0xff]  }
0x4b2f   :  { %v5766_v39 = vpop.eup %5765 }
0x4b30   :  { %v4362_v63 = vmul.f32 %v5766_v39, %v4361_v42 }
0x4b32   :  { %v4363_v25 = vadd.f32 %v4362_v63, %v4353_v46 }
0x4b34   :  { %5767 = vtanh.f32 %v4363_v25 }
0x4b41   :  { %v5768_v45 = vpop.eup %5767 }
0x4b42   :  { %v4365_v54 = vsub.f32 %v4304_v14, %v5768_v45 }
0x4b44   :  { %4367 = vrot.lane.b32.xlu0 %v4365_v54, %s5852_s27 }
0x4bb6   :  { %v4368_v41 = vpop.permute.xlu0 %4367 }
0x4bb7   :  { %v4370_v17 = vmul.f32 %v5766_v39, %v4368_v41  ;;  %v4565_v39 = vld [vmem:[#allocation4 + $0x120] sm:$0xff] }
0x4bb9   :  { %4372 = vrot.lane.b32.xlu1 %v4370_v17, %s5852_s27 }
0x4c2b   :  { %v4373_v12 = vpop.permute.xlu1 %4372 }
0x4c2c   :  { %v4375_v52 = vadd.f32 %v5768_v45, %v4373_v12 }
0x4c2e   :  { %4376 = vst.msk [vmem:[#allocation2 + $0x78] sm:$0xff] %vm852_vm3, %v4375_v52  ;;  %v4378_v18 = vpack.c.bf16 %v4375_v52, %v4375_v52 }
0x4c2f   :  { %4377 = vst.msk [vmem:[#allocation2 + $0x40] sm:$0xff] %vm854_vm4, %v4375_v52 }
0x4c30   :  { %5372 = vmatmul.mubr.msk.bf16.vlgmr.msra.gmra.mxu0 %vm681_vm2, %v4378_v18 }
0x4c31   :  { %4533 = vmatpush1.bf16.msra.mxu0 %v7126_v6  ;;  %4556 = vmatprep.mubr.bf16.mxu0 %v5851_v1 }
0x4c32   :  { %4534 = vmatprep.subr.bf16.mxu0 %v7133_v47 }
0x4c35   :  { %4535 = vmatpush1.bf16.msra.mxu0 %v7139_v61 }
0x4c36   :  { %4536 = vmatprep.subr.bf16.mxu0 %v7145_v58 }
0x4c39   :  { %4537 = vmatpush1.bf16.msra.mxu0 %v7151_v59 }
0x4c3a   :  { %4538 = vmatprep.subr.bf16.mxu0 %v7157_v7 }
0x4c3d   :  { %4539 = vmatpush1.bf16.msra.mxu0 %v7179_v16 }
0x4c3e   :  { %4674 = vmatprep.subr.bf16.mxu0 %v7113_v27 }
0x4cf0   :  { %v4416_v57 = vpop.f32.mrf.mxu0 }
0x4cf1   :  { %v4425_v11 = vadd.f32 %v4423_v21, %v4416_v57  ;;  %v4566_v57 = vld [vmem:[#allocation4 + $0x128] sm:$0xff] }
0x4cf2   :  { %v4418_v33 = vpop.f32.mrf.mxu0 }
0x4cf3   :  { %v5373_v3 = vmul.f32 -1.442695, %v4425_v11  ;;  %v4432_v19 = vadd.f32 %v7327_v15, %v4418_v33 }
0x4cf4   :  { %v4420_v34 = vpop.f32.mrf.mxu0 }
0x4cf5   :  { %5769 = vpow2.f32 %v5373_v3 }
0x4cf6   :  { %v4421_v55 = vpop.f32.mrf.mxu0 }
0x4d02   :  { %v5770_v26 = vpop.eup %5769 }
0x4d03   :  { %v4429_v50 = vadd.f32 1.0, %v5770_v26 }
0x4d05   :  { %5771 = vrcp.f32 %v4429_v50  ;;  %v7440_v50 = vld [vmem:[%s7612_s10] ss:$8 sps:$4 sm:$0xff]  }
0x4d12   :  { %v5772_v35 = vpop.eup %5771 }
0x4d13   :  { %v4433_v8 = vmul.f32 %v5772_v35, %v4432_v19 }
0x4d15   :  { %v4434_v48 = vadd.f32 %v4433_v8, %v4424_v32 }
0x4d17   :  { %5773 = vtanh.f32 %v4434_v48 }
0x4d24   :  { %v5774_v38 = vpop.eup %5773 }
0x4d25   :  { %v4436_v27 = vsub.f32 %v4375_v52, %v5774_v38 }
0x4d27   :  { %4438 = vrot.lane.b32.xlu0 %v4436_v27, %s5852_s27 }
0x4d99   :  { %v4439_v28 = vpop.permute.xlu0 %4438 }
0x4d9a   :  { %v4441_v22 = vmul.f32 %v5772_v35, %v4439_v28  ;;  %v4636_v35 = vld [vmem:[#allocation4 + $0x130] sm:$0xff] }
0x4d9c   :  { %4443 = vrot.lane.b32.xlu1 %v4441_v22, %s5852_s27 }
0x4e0e   :  { %v4444_v29 = vpop.permute.xlu1 %4443 }
0x4e0f   :  { %v4446_v49 = vadd.f32 %v5774_v38, %v4444_v29 }
0x4e11   :  { %4447 = vst.msk [vmem:[#allocation2 + $0x80] sm:$0xff] %vm852_vm3, %v4446_v49  ;;  %v4449_v53 = vpack.c.bf16 %v4446_v49, %v4446_v49 }
0x4e12   :  { %4448 = vst.msk [vmem:[#allocation2 + $0x38] sm:$0xff] %vm854_vm4, %v4446_v49 }
0x4e13   :  { %5374 = vmatmul.mubr.msk.bf16.vlgmr.msra.gmra.mxu1 %vm681_vm2, %v4449_v53 }
0x4e14   :  { %4604 = vmatpush1.bf16.msra.mxu1 %v7126_v6  ;;  %4627 = vmatprep.mubr.bf16.mxu1 %v5851_v1 }
0x4e15   :  { %4605 = vmatprep.subr.bf16.mxu1 %v7133_v47 }
0x4e18   :  { %4606 = vmatpush1.bf16.msra.mxu1 %v7139_v61 }
0x4e19   :  { %4607 = vmatprep.subr.bf16.mxu1 %v7145_v58 }
0x4e1c   :  { %4608 = vmatpush1.bf16.msra.mxu1 %v7151_v59 }
0x4e1d   :  { %4609 = vmatprep.subr.bf16.mxu1 %v7157_v7 }
0x4e20   :  { %4610 = vmatpush1.bf16.msra.mxu1 %v7179_v16 }
0x4e21   :  { %4745 = vmatprep.subr.bf16.mxu1 %v7376_v2 }
0x4ed3   :  { %v4487_v6 = vpop.f32.mrf.mxu1 }
0x4ed4   :  { %v4496_v47 = vadd.f32 %v4494_v30, %v4487_v6  ;;  %v4637_v6 = vld [vmem:[#allocation4 + $0x138] sm:$0xff] }
0x4ed5   :  { %v4489_v10 = vpop.f32.mrf.mxu1 }
0x4ed6   :  { %v5375_v61 = vmul.f32 -1.442695, %v4496_v47  ;;  %v4503_v7 = vadd.f32 %v7327_v15, %v4489_v10 }
0x4ed7   :  { %v4491_v36 = vpop.f32.mrf.mxu1 }
0x4ed8   :  { %5775 = vpow2.f32 %v5375_v61 }
0x4ed9   :  { %v4492_v58 = vpop.f32.mrf.mxu1 }
0x4ee5   :  { %v5776_v59 = vpop.eup %5775 }
0x4ee6   :  { %v4500_v9 = vadd.f32 1.0, %v5776_v59 }
0x4ee8   :  { %5777 = vrcp.f32 %v4500_v9 }
0x4ef5   :  { %v5778_v4 = vpop.eup %5777 }
0x4ef6   :  { %v4504_v40 = vmul.f32 %v5778_v4, %v4503_v7  ;;  %v4707_v7 = vld [vmem:[#allocation4 + $0x140] sm:$0xff] }
0x4ef8   :  { %v4505_v20 = vadd.f32 %v4504_v40, %v4495_v44 }
0x4efa   :  { %5779 = vtanh.f32 %v4505_v20 }
0x4f07   :  { %v5780_v5 = vpop.eup %5779 }
0x4f08   :  { %v4507_v0 = vsub.f32 %v4446_v49, %v5780_v5 }
0x4f0a   :  { %4509 = vrot.lane.b32.xlu0 %v4507_v0, %s5852_s27 }
0x4f7c   :  { %v4510_v14 = vpop.permute.xlu0 %4509 }
0x4f7d   :  { %v4512_v13 = vmul.f32 %v5778_v4, %v4510_v14 }
0x4f7f   :  { %4514 = vrot.lane.b32.xlu1 %v4512_v13, %s5852_s27 }
0x4ff1   :  { %v4515_v56 = vpop.permute.xlu1 %4514 }
0x4ff2   :  { %v4517_v60 = vadd.f32 %v5780_v5, %v4515_v56 }
0x4ff4   :  { %4518 = vst.msk [vmem:[#allocation2 + $0x88] sm:$0xff] %vm852_vm3, %v4517_v60  ;;  %v4520_v24 = vpack.c.bf16 %v4517_v60, %v4517_v60 }
0x4ff5   :  { %4519 = vst.msk [vmem:[#allocation2 + $0x30] sm:$0xff] %vm854_vm4, %v4517_v60 }
0x4ff6   :  { %5376 = vmatmul.mubr.msk.bf16.vlgmr.msra.gmra.mxu0 %vm681_vm2, %v4520_v24  ;;  %v4708_v24 = vld [vmem:[#allocation4 + $0x148] sm:$0xff] }
0x4ff7   :  { %4675 = vmatpush1.bf16.msra.mxu0 %v7388_v62  ;;  %4698 = vmatprep.mubr.bf16.mxu0 %v5851_v1 }
0x4ff8   :  { %4676 = vmatprep.subr.bf16.mxu0 %v7395_v31 }
0x4ffb   :  { %4677 = vmatpush1.bf16.msra.mxu0 %v7401_v51 }
0x4ffc   :  { %4678 = vmatprep.subr.bf16.mxu0 %v7407_v37 }
0x4fff   :  { %4679 = vmatpush1.bf16.msra.mxu0 %v7413_v23 }
0x5000   :  { %4680 = vmatprep.subr.bf16.mxu0 %v7419_v43 }
0x5003   :  { %4681 = vmatpush1.bf16.msra.mxu0 %v7179_v16 }
0x5004   :  { %4816 = vmatprep.subr.bf16.mxu0 %v7376_v2 }
0x50b6   :  { %v4558_v42 = vpop.f32.mrf.mxu0 }
0x50b7   :  { %v4567_v63 = vadd.f32 %v4565_v39, %v4558_v42 }
0x50b8   :  { %v4560_v46 = vpop.f32.mrf.mxu0 }
0x50b9   :  { %v5377_v25 = vmul.f32 -1.442695, %v4567_v63  ;;  %v4574_v12 = vadd.f32 %v7327_v15, %v4560_v46 }
0x50ba   :  { %v4562_v45 = vpop.f32.mrf.mxu0 }
0x50bb   :  { %5781 = vpow2.f32 %v5377_v25 }
0x50bc   :  { %v4563_v54 = vpop.f32.mrf.mxu0 }
0x50c8   :  { %v5782_v41 = vpop.eup %5781 }
0x50c9   :  { %v4571_v17 = vadd.f32 1.0, %v5782_v41 }
0x50cb   :  { %5783 = vrcp.f32 %v4571_v17 }
0x50d8   :  { %v5784_v52 = vpop.eup %5783 }
0x50d9   :  { %v4575_v18 = vmul.f32 %v5784_v52, %v4574_v12  ;;  %v4778_v12 = vld [vmem:[#allocation4 + $0x150] sm:$0xff] }
0x50db   :  { %v4576_v21 = vadd.f32 %v4575_v18, %v4566_v57 }
0x50dd   :  { %5785 = vtanh.f32 %v4576_v21 }
0x50ea   :  { %v5786_v16 = vpop.eup %5785 }
0x50eb   :  { %v4578_v11 = vsub.f32 %v4517_v60, %v5786_v16 }
0x50ed   :  { %4580 = vrot.lane.b32.xlu0 %v4578_v11, %s5852_s27 }
0x515f   :  { %v4581_v33 = vpop.permute.xlu0 %4580 }
0x5160   :  { %v4583_v3 = vmul.f32 %v5784_v52, %v4581_v33 }
0x5162   :  { %4585 = vrot.lane.b32.xlu1 %v4583_v3, %s5852_s27  ;;  %v5525_v3 = vld [vmem:[%s7615_s12 + $0x18] sm:$0xff]  }
0x51d4   :  { %v4586_v34 = vpop.permute.xlu1 %4585 }
0x51d5   :  { %v4588_v55 = vadd.f32 %v5786_v16, %v4586_v34 }
0x51d7   :  { %4589 = vst.msk [vmem:[#allocation2 + $0x90] sm:$0xff] %vm852_vm3, %v4588_v55  ;;  %v4591_v26 = vpack.c.bf16 %v4588_v55, %v4588_v55 }
0x51d8   :  { %4590 = vst.msk [vmem:[#allocation2 + $0x28] sm:$0xff] %vm854_vm4, %v4588_v55 }
0x51d9   :  { %5378 = vmatmul.mubr.msk.bf16.vlgmr.msra.gmra.mxu1 %vm681_vm2, %v4591_v26 }
0x51da   :  { %4746 = vmatpush1.bf16.msra.mxu1 %v7388_v62  ;;  %4769 = vmatprep.mubr.bf16.mxu1 %v5851_v1 }
0x51db   :  { %4747 = vmatprep.subr.bf16.mxu1 %v7395_v31 }
0x51de   :  { %4748 = vmatpush1.bf16.msra.mxu1 %v7401_v51 }
0x51df   :  { %4749 = vmatprep.subr.bf16.mxu1 %v7407_v37 }
0x51e2   :  { %4750 = vmatpush1.bf16.msra.mxu1 %v7413_v23 }
0x51e3   :  { %4751 = vmatprep.subr.bf16.mxu1 %v7419_v43 }
0x51e6   :  { %4752 = vmatpush1.bf16.msra.mxu1 %v7440_v50 }
0x51e7   :  { %4887 = vmatprep.subr.bf16.mxu1 %v7376_v2 }
0x5299   :  { %v4629_v19 = vpop.f32.mrf.mxu1 }
0x529a   :  { %v4638_v8 = vadd.f32 %v4636_v35, %v4629_v19 }
0x529b   :  { %v4631_v32 = vpop.f32.mrf.mxu1 }
0x529c   :  { %v5379_v48 = vmul.f32 -1.442695, %v4638_v8  ;;  %v4645_v29 = vadd.f32 %v7327_v15, %v4631_v32  ;;  %v4947_v8 = vld [vmem:[#allocation2 + $0x28] sm:$0xff]  ;;  %v5526_v32 = vld [vmem:[%s7615_s12 + $0x10] sm:$0xff]  }
0x529d   :  { %v4633_v38 = vpop.f32.mrf.mxu1 }
0x529e   :  { %5787 = vpow2.f32 %v5379_v48  ;;  %v5527_v38 = vld [vmem:[%s7615_s12 + $0x8] sm:$0xff]  }
0x529f   :  { %v4634_v27 = vpop.f32.mrf.mxu1 }
0x52a0   :  { %v5528_v27 = vld [vmem:[%s7615_s12] sm:$0xff]  }
0x52ab   :  { %v5788_v28 = vpop.eup %5787 }
0x52ac   :  { %v4642_v22 = vadd.f32 1.0, %v5788_v28  ;;  %v4948_v28 = vld [vmem:[#allocation2 + $0x30] sm:$0xff] }
0x52ae   :  { %5789 = vrcp.f32 %v4642_v22  ;;  %v4950_v22 = vld [vmem:[#allocation2 + $0x40] sm:$0xff] }
0x52bb   :  { %v5790_v49 = vpop.eup %5789 }
0x52bc   :  { %v4646_v53 = vmul.f32 %v5790_v49, %v4645_v29  ;;  %v4949_v29 = vld [vmem:[#allocation2 + $0x38] sm:$0xff] }
0x52be   :  { %v4647_v30 = vadd.f32 %v4646_v53, %v4637_v6  ;;  %v4951_v53 = vld [vmem:[#allocation2 + $0x48] sm:$0xff] }
0x52bf   :  { %v4968_v6 = vpack.c.bf16 %v4951_v53, %v4950_v22 }
0x52c0   :  { %5791 = vtanh.f32 %v4647_v30  ;;  %v4952_v30 = vld [vmem:[#allocation2 + $0x50] sm:$0xff] }
0x52cd   :  { %v5792_v47 = vpop.eup %5791 }
0x52ce   :  { %v4649_v2 = vsub.f32 %v4588_v55, %v5792_v47 }
0x52d0   :  { %4651 = vrot.lane.b32.xlu0 %v4649_v2, %s5852_s27  ;;  %v4953_v2 = vld [vmem:[#allocation2 + $0x58] sm:$0xff] }
0x5342   :  { %v4652_v10 = vpop.permute.xlu0 %4651 }
0x5343   :  { %v4654_v61 = vmul.f32 %v5790_v49, %v4652_v10  ;;  %v4967_v49 = vpack.c.bf16 %v4949_v29, %v4948_v28  ;;  %v4969_v10 = vpack.c.bf16 %v4953_v2, %v4952_v30 }
0x5345   :  { %4656 = vrot.lane.b32.xlu1 %v4654_v61, %s5852_s27  ;;  %v4954_v61 = vld [vmem:[#allocation2 + $0x60] sm:$0xff] }
0x53b7   :  { %v4657_v36 = vpop.permute.xlu1 %4656 }
0x53b8   :  { %v4659_v58 = vadd.f32 %v5792_v47, %v4657_v36  ;;  %v4955_v47 = vld [vmem:[#allocation2 + $0x68] sm:$0xff] }
0x53b9   :  { %v4970_v36 = vpack.c.bf16 %v4955_v47, %v4954_v61 }
0x53ba   :  { %4660 = vst.msk [vmem:[#allocation2 + $0x98] sm:$0xff] %vm852_vm3, %v4659_v58  ;;  %v4662_v59 = vpack.c.bf16 %v4659_v58, %v4659_v58 }
0x53bb   :  { %4661 = vst.msk [vmem:[#allocation2 + $0x20] sm:$0xff] %vm854_vm4, %v4659_v58 }
0x53bc   :  { %5380 = vmatmul.mubr.msk.bf16.vlgmr.msra.gmra.mxu0 %vm681_vm2, %v4662_v59  ;;  %v4959_v59 = vld [vmem:[#allocation2 + $0x88] sm:$0xff] }
0x53bd   :  { %4817 = vmatpush1.bf16.msra.mxu0 %v7388_v62  ;;  %4840 = vmatprep.mubr.bf16.mxu0 %v5851_v1 }
0x53be   :  { %4818 = vmatprep.subr.bf16.mxu0 %v7395_v31 }
0x53c1   :  { %4819 = vmatpush1.bf16.msra.mxu0 %v7401_v51 }
0x53c2   :  { %4820 = vmatprep.subr.bf16.mxu0 %v7407_v37  ;;  %v4946_v19 = vld [vmem:[#allocation2 + $0x20] sm:$0xff] }
0x53c3   :  { %v4966_v48 = vpack.c.bf16 %v4947_v8, %v4946_v19  ;;  %v4850_v8 = vld [vmem:[#allocation4 + $0x168] sm:$0xff] }
0x53c5   :  { %4821 = vmatpush1.bf16.msra.mxu0 %v7413_v23 }
0x53c6   :  { %4822 = vmatprep.subr.bf16.mxu0 %v7419_v43 }
0x53c9   :  { %4823 = vmatpush1.bf16.msra.mxu0 %v7440_v50 }
0x53ca   :  { %5417 = vmatprep.subr.bf16.mxu0 %v5525_v3 }
0x547c   :  { %v4700_v9 = vpop.f32.mrf.mxu0 }
0x547d   :  { %v4709_v4 = vadd.f32 %v4707_v7, %v4700_v9  ;;  %v4956_v9 = vld [vmem:[#allocation2 + $0x70] sm:$0xff] }
0x547e   :  { %v4702_v40 = vpop.f32.mrf.mxu0 }
0x547f   :  { %v5381_v44 = vmul.f32 -1.442695, %v4709_v4  ;;  %v4716_v13 = vadd.f32 %v7327_v15, %v4702_v40  ;;  %v4958_v4 = vld [vmem:[#allocation2 + $0x80] sm:$0xff] }
0x5480   :  { %v4704_v20 = vpop.f32.mrf.mxu0  ;;  %v4972_v40 = vpack.c.bf16 %v4959_v59, %v4958_v4 }
0x5481   :  { %5793 = vpow2.f32 %v5381_v44  ;;  %v4961_v44 = vld [vmem:[#allocation2 + $0x98] sm:$0xff] }
0x5482   :  { %v4705_v5 = vpop.f32.mrf.mxu0 }
0x5483   :  { %v4960_v5 = vld [vmem:[#allocation2 + $0x90] sm:$0xff] }
0x548e   :  { %v5794_v0 = vpop.eup %5793 }
0x548f   :  { %v4713_v14 = vadd.f32 1.0, %v5794_v0  ;;  %v4973_v0 = vpack.c.bf16 %v4961_v44, %v4960_v5 }
0x5491   :  { %5795 = vrcp.f32 %v4713_v14 }
0x549e   :  { %v5796_v56 = vpop.eup %5795 }
0x549f   :  { %v4717_v60 = vmul.f32 %v5796_v56, %v4716_v13 }
0x54a1   :  { %v4718_v42 = vadd.f32 %v4717_v60, %v4708_v24  ;;  %v4849_v60 = vld [vmem:[#allocation4 + $0x160] sm:$0xff] }
0x54a3   :  { %5797 = vtanh.f32 %v4718_v42 }
0x54b0   :  { %v5798_v39 = vpop.eup %5797 }
0x54b1   :  { %v4720_v63 = vsub.f32 %v4659_v58, %v5798_v39  ;;  %v4957_v58 = vld [vmem:[#allocation2 + $0x78] sm:$0xff] }
0x54b2   :  { %v4971_v7 = vpack.c.bf16 %v4957_v58, %v4956_v9 }
0x54b3   :  { %4722 = vrot.lane.b32.xlu0 %v4720_v63, %s5852_s27 }
0x5525   :  { %v4723_v46 = vpop.permute.xlu0 %4722 }
0x5526   :  { %v4725_v25 = vmul.f32 %v5796_v56, %v4723_v46 }
0x5528   :  { %4727 = vrot.lane.b32.xlu1 %v4725_v25, %s5852_s27  ;;  %v7508_v25 = vld [vmem:[%s7616_s13] ss:$0 sm:$0xff] }
0x559a   :  { %v4728_v45 = vpop.permute.xlu1 %4727 }
0x559b   :  { %v4730_v54 = vadd.f32 %v5798_v39, %v4728_v45 }
0x559d   :  { %4731 = vst.msk [vmem:[#allocation2 + $0xa0] sm:$0xff] %vm852_vm3, %v4730_v54  ;;  %v4733_v41 = vpack.c.bf16 %v4730_v54, %v4730_v54 }
0x559e   :  { %4732 = vst.msk [vmem:[#allocation2 + $0x18] sm:$0xff] %vm854_vm4, %v4730_v54 }
0x559f   :  { %5382 = vmatmul.mubr.msk.bf16.vlgmr.msra.gmra.mxu1 %vm681_vm2, %v4733_v41 }
0x55a0   :  { %4888 = vmatpush1.bf16.msra.mxu1 %v7388_v62  ;;  %4911 = vmatprep.mubr.bf16.mxu1 %v5851_v1 }
0x55a1   :  { %4889 = vmatprep.subr.bf16.mxu1 %v7395_v31 }
0x55a4   :  { %4890 = vmatpush1.bf16.msra.mxu1 %v7401_v51  ;;  %v4962_v14 = vld [vmem:[#allocation2 + $0xa0] sm:$0xff] }
0x55a5   :  { %4891 = vmatprep.subr.bf16.mxu1 %v7407_v37 }
0x55a8   :  { %4892 = vmatpush1.bf16.msra.mxu1 %v7413_v23  ;;  %v4779_v23 = vld [vmem:[#allocation4 + $0x158] sm:$0xff] }
0x55a9   :  { %4893 = vmatprep.subr.bf16.mxu1 %v7419_v43 }
0x55ac   :  { %4894 = vmatpush1.bf16.msra.mxu1 %v7440_v50 }
0x565f   :  { %v4771_v17 = vpop.f32.mrf.mxu1 }
0x5660   :  { %v4780_v52 = vadd.f32 %v4778_v12, %v4771_v17 }
0x5661   :  { %v4773_v18 = vpop.f32.mrf.mxu1 }
0x5662   :  { %v5383_v57 = vmul.f32 -1.442695, %v4780_v52  ;;  %v4787_v51 = vadd.f32 %v7327_v15, %v4773_v18 }
0x5663   :  { %v4775_v62 = vpop.f32.mrf.mxu1 }
0x5664   :  { %5799 = vpow2.f32 %v5383_v57 }
0x5665   :  { %v4776_v1 = vpop.f32.mrf.mxu1 }
0x5671   :  { %v5800_v21 = vpop.eup %5799 }
0x5672   :  { %v4784_v31 = vadd.f32 1.0, %v5800_v21 }
0x5674   :  { %5801 = vrcp.f32 %v4784_v31 }
0x5681   :  { %v5802_v37 = vpop.eup %5801 }
0x5682   :  { %v4788_v16 = vmul.f32 %v5802_v37, %v4787_v51 }
0x5684   :  { %v4789_v11 = vadd.f32 %v4788_v16, %v4779_v23 }
0x5686   :  { %5803 = vtanh.f32 %v4789_v11 }
0x5693   :  { %v5804_v43 = vpop.eup %5803 }
0x5694   :  { %v4791_v33 = vsub.f32 %v4730_v54, %v5804_v43 }
0x5696   :  { %4793 = vrot.lane.b32.xlu0 %v4791_v33, %s5852_s27 }
0x5708   :  { %v4794_v34 = vpop.permute.xlu0 %4793 }
0x5709   :  { %v4796_v55 = vmul.f32 %v5802_v37, %v4794_v34 }
0x570b   :  { %4798 = vrot.lane.b32.xlu1 %v4796_v55, %s5852_s27 }
0x577d   :  { %v4799_v26 = vpop.permute.xlu1 %4798 }
0x577e   :  { %v7478_v50 = vadd.f32 %v5804_v43, %v4799_v26 }
0x5780   :  { %4802 = vst.msk [vmem:[#allocation2 + $0xa8] sm:$0xff] %vm852_vm3, %v7478_v50  ;;  %v4804_v35 = vpack.c.bf16 %v7478_v50, %v7478_v50 }
0x5781   :  { %4803 = vst.msk [vmem:[#allocation2 + $0x10] sm:$0xff] %vm854_vm4, %v7478_v50 }
0x5782   :  { %5384 = vmatmul.mubr.msk.bf16.vlgmr.msra.gmra.mxu0 %vm681_vm2, %v4804_v35 }
0x5783   :  { %5418 = vmatpush3.bf16.msra.mxu0 %v5525_v3  ;;  %5425 = vmatprep.mubr.msk.bf16.mxu0 %vm681_vm2, %v4966_v48 }
0x5784   :  { %5419 = vmatprep.subr.bf16.mxu0 %v5526_v32 }
0x5787   :  { %5420 = vmatpush3.bf16.msra.mxu0 %v5526_v32  ;;  %v4963_v20 = vld [vmem:[#allocation2 + $0xa8] sm:$0xff] }
0x5788   :  { %5421 = vmatprep.subr.bf16.mxu0 %v5527_v38  ;;  %v4974_v13 = vpack.c.bf16 %v4963_v20, %v4962_v14 }
0x578b   :  { %5422 = vmatpush3.bf16.msra.mxu0 %v5527_v38 }
0x578c   :  { %5423 = vmatprep.subr.bf16.mxu0 %v5528_v27 }
0x578f   :  { %5424 = vmatpush3.bf16.msra.mxu0 %v5528_v27 }
0x5792   :  { %5426 = vmatmul.mubr.msk.bf16.vlgmr.msra.gmra.mxu0 %vm681_vm2, %v4967_v49 }
0x5793   :  { %5429 = vmatprep.mubr.msk.bf16.mxu0 %vm681_vm2, %v4968_v6 }
0x579a   :  { %5430 = vmatmul.mubr.msk.bf16.gmra.mxu0 %vm681_vm2, %v4969_v10 }
0x579b   :  { %5433 = vmatprep.mubr.msk.bf16.mxu0 %vm681_vm2, %v4970_v36 }
0x57a2   :  { %5434 = vmatmul.mubr.msk.bf16.gmra.mxu0 %vm681_vm2, %v4971_v7 }
0x57a3   :  { %5437 = vmatprep.mubr.msk.bf16.mxu0 %vm681_vm2, %v4972_v40  ;;  %v4920_v40 = vld [vmem:[#allocation4 + $0x170] sm:$0xff] }
0x57aa   :  { %5438 = vmatmul.mubr.msk.bf16.gmra.mxu0 %vm681_vm2, %v4973_v0 }
0x57ab   :  { %5441 = vmatprep.mubr.msk.bf16.mxu0 %vm681_vm2, %v4974_v13 }
0x5842   :  { %v4842_v56 = vpop.f32.mrf.mxu0 }
0x5843   :  { %v4851_v24 = vadd.f32 %v4849_v60, %v4842_v56 }
0x5844   :  { %v4844_v42 = vpop.f32.mrf.mxu0 }
0x5845   :  { %v5385_v39 = vmul.f32 -1.442695, %v4851_v24  ;;  %v4858_v3 = vadd.f32 %v7327_v15, %v4844_v42  ;;  %v4921_v42 = vld [vmem:[#allocation4 + $0x178] sm:$0xff] }
0x5846   :  { %v4846_v63 = vpop.f32.mrf.mxu0 }
0x5847   :  { %5805 = vpow2.f32 %v5385_v39 }
0x5848   :  { %v4847_v46 = vpop.f32.mrf.mxu0 }
0x5852   :  { %v5427_v45 = vpop.f32.mrf.mxu0 }
0x5853   :  { %v5088_v54 = vadd.f32 %v5427_v45, %v7508_v25 }
0x5854   :  { %v5806_v41 = vpop.eup %5805  ;;  %v5079_v17 = vpop.f32.mrf.mxu0 }
0x5855   :  { %v4855_v12 = vadd.f32 1.0, %v5806_v41  ;;  %5160 = vst [vmem:[%s7617_s14 + $0x10] sm:$0xff] %v5088_v54  ;;  %v5080_v52 = vadd.f32 %v7508_v25, %v5079_v17 }
0x5856   :  { %v5428_v18 = vpop.f32.mrf.mxu0 }
0x5857   :  { %5807 = vrcp.f32 %v4855_v12  ;;  %5158 = vst [vmem:[%s7617_s14] sm:$0xff] %v5080_v52  ;;  %v5091_v57 = vadd.f32 %v5428_v18, %v7508_v25 }
0x5858   :  { %v5082_v62 = vpop.f32.mrf.mxu0 }
0x5859   :  { %5161 = vst [vmem:[%s7617_s14 + $0x18] sm:$0xff] %v5091_v57  ;;  %v5083_v1 = vadd.f32 %v7508_v25, %v5082_v62 }
0x585a   :  { %v5431_v21 = vpop.f32.mrf.mxu0 }
0x585b   :  { %5159 = vst [vmem:[%s7617_s14 + $0x8] sm:$0xff] %v5083_v1  ;;  %v5104_v31 = vadd.f32 %v5431_v21, %v7508_v25 }
0x585c   :  { %v5095_v51 = vpop.f32.mrf.mxu0 }
0x585d   :  { %5164 = vst [vmem:[%s7617_s14 + $0x30] sm:$0xff] %v5104_v31  ;;  %v5096_v37 = vadd.f32 %v7508_v25, %v5095_v51 }
0x585e   :  { %v5432_v16 = vpop.f32.mrf.mxu0 }
0x585f   :  { %5162 = vst [vmem:[%s7617_s14 + $0x20] sm:$0xff] %v5096_v37  ;;  %v5107_v23 = vadd.f32 %v5432_v16, %v7508_v25 }
0x5860   :  { %v5098_v11 = vpop.f32.mrf.mxu0 }
0x5861   :  { %5165 = vst [vmem:[%s7617_s14 + $0x38] sm:$0xff] %v5107_v23  ;;  %v5099_v43 = vadd.f32 %v7508_v25, %v5098_v11 }
0x5862   :  { %v5435_v33 = vpop.f32.mrf.mxu0 }
0x5863   :  { %5163 = vst [vmem:[%s7617_s14 + $0x28] sm:$0xff] %v5099_v43  ;;  %v5120_v34 = vadd.f32 %v5435_v33, %v7508_v25 }
0x5864   :  { %v5808_v55 = vpop.eup %5807  ;;  %v5111_v26 = vpop.f32.mrf.mxu0 }
0x5865   :  { %v4859_v19 = vmul.f32 %v5808_v55, %v4858_v3  ;;  %5168 = vst [vmem:[%s7617_s14 + $0x50] sm:$0xff] %v5120_v34  ;;  %v5112_v35 = vadd.f32 %v7508_v25, %v5111_v26 }
0x5866   :  { %v5436_v32 = vpop.f32.mrf.mxu0 }
0x5867   :  { %v4860_v48 = vadd.f32 %v4859_v19, %v4850_v8  ;;  %5166 = vst [vmem:[%s7617_s14 + $0x40] sm:$0xff] %v5112_v35  ;;  %v5123_v38 = vadd.f32 %v5436_v32, %v7508_v25 }
0x5868   :  { %v5114_v27 = vpop.f32.mrf.mxu0 }
0x5869   :  { %5809 = vtanh.f32 %v4860_v48  ;;  %5169 = vst [vmem:[%s7617_s14 + $0x58] sm:$0xff] %v5123_v38  ;;  %v5115_v28 = vadd.f32 %v7508_v25, %v5114_v27 }
0x586a   :  { %v5439_v22 = vpop.f32.mrf.mxu0 }
0x586b   :  { %5167 = vst [vmem:[%s7617_s14 + $0x48] sm:$0xff] %v5115_v28  ;;  %v5136_v29 = vadd.f32 %v5439_v22, %v7508_v25 }
0x586c   :  { %v5127_v49 = vpop.f32.mrf.mxu0 }
0x586d   :  { %5172 = vst [vmem:[%s7617_s14 + $0x70] sm:$0xff] %v5136_v29  ;;  %v5128_v53 = vadd.f32 %v7508_v25, %v5127_v49 }
0x586e   :  { %v5440_v6 = vpop.f32.mrf.mxu0 }
0x586f   :  { %5170 = vst [vmem:[%s7617_s14 + $0x60] sm:$0xff] %v5128_v53  ;;  %v5139_v30 = vadd.f32 %v5440_v6, %v7508_v25 }
0x5870   :  { %v5130_v47 = vpop.f32.mrf.mxu0 }
0x5871   :  { %5173 = vst [vmem:[%s7617_s14 + $0x78] sm:$0xff] %v5139_v30  ;;  %v5131_v2 = vadd.f32 %v7508_v25, %v5130_v47 }
0x5873   :  { %5171 = vst [vmem:[%s7617_s14 + $0x68] sm:$0xff] %v5131_v2 }
0x5876   :  { %v5810_v10 = vpop.eup %5809 }
0x5877   :  { %v4862_v61 = vsub.f32 %v7478_v50, %v5810_v10 }
0x5879   :  { %4864 = vrot.lane.b32.xlu0 %v4862_v61, %s5852_s27 }
0x58eb   :  { %v4865_v36 = vpop.permute.xlu0 %4864 }
0x58ec   :  { %v4867_v58 = vmul.f32 %v5808_v55, %v4865_v36 }
0x58ee   :  { %4869 = vrot.lane.b32.xlu1 %v4867_v58, %s5852_s27 }
0x5960   :  { %v4870_v59 = vpop.permute.xlu1 %4869 }
0x5961   :  { %v4872_v9 = vadd.f32 %v5810_v10, %v4870_v59 }
0x5963   :  { %4873 = vst.msk [vmem:[#allocation2 + $0xb0] sm:$0xff] %vm852_vm3, %v4872_v9  ;;  %v4875_v7 = vpack.c.bf16 %v4872_v9, %v4872_v9 }
0x5964   :  { %4874 = vst.msk [vmem:[#allocation2 + $0x8] sm:$0xff] %vm854_vm4, %v4872_v9 }
0x5965   :  { %5386 = vmatmul.mubr.msk.bf16.vlgmr.msra.gmra.mxu1 %vm681_vm2, %v4875_v7 }
0x5a25   :  { %v4913_v4 = vpop.f32.mrf.mxu1 }
0x5a26   :  { %v4922_v44 = vadd.f32 %v4920_v40, %v4913_v4 }
0x5a27   :  { %v4915_v20 = vpop.f32.mrf.mxu1 }
0x5a28   :  { %v5387_v50 = vmul.f32 -1.442695, %v4922_v44  ;;  %v4929_v56 = vadd.f32 %v7327_v15, %v4915_v20  ;;  %v4964_v15 = vld [vmem:[#allocation2 + $0xb0] sm:$0xff] }
0x5a29   :  { %v4917_v5 = vpop.f32.mrf.mxu1 }
0x5a2a   :  { %5811 = vpow2.f32 %v5387_v50 }
0x5a2b   :  { %v4918_v0 = vpop.f32.mrf.mxu1 }
0x5a37   :  { %v5812_v14 = vpop.eup %5811 }
0x5a38   :  { %v4926_v13 = vadd.f32 1.0, %v5812_v14 }
0x5a3a   :  { %5813 = vrcp.f32 %v4926_v13 }
0x5a47   :  { %v5814_v60 = vpop.eup %5813 }
0x5a48   :  { %v4930_v24 = vmul.f32 %v5814_v60, %v4929_v56 }
0x5a4a   :  { %v4931_v39 = vadd.f32 %v4930_v24, %v4921_v42 }
0x5a4c   :  { %5815 = vtanh.f32 %v4931_v39 }
0x5a59   :  { %v5816_v63 = vpop.eup %5815 }
0x5a5a   :  { %v4933_v46 = vsub.f32 %v4872_v9, %v5816_v63 }
0x5a5c   :  { %4935 = vrot.lane.b32.xlu0 %v4933_v46, %s5852_s27 }
0x5ace   :  { %v4936_v45 = vpop.permute.xlu0 %4935 }
0x5acf   :  { %v4938_v54 = vmul.f32 %v5814_v60, %v4936_v45 }
0x5ad1   :  { %4940 = vrot.lane.b32.xlu1 %v4938_v54, %s5852_s27 }
0x5b43   :  { %v4941_v41 = vpop.permute.xlu1 %4940 }
0x5b44   :  { %v4943_v17 = vadd.f32 %v5816_v63, %v4941_v41 }
0x5b46   :  { %4944 = vst.msk [vmem:[#allocation2 + $0xb8] sm:$0xff] %vm852_vm3, %v4943_v17 }
0x5b47   :  { %4945 = vst.msk [vmem:[#allocation2] sm:$0xff] %vm854_vm4, %v4943_v17 }
0x5b4d   :  { %v4965_v12 = vld [vmem:[#allocation2 + $0xb8] sm:$0xff] }
0x5b4e   :  { %v4975_v52 = vpack.c.bf16 %v4965_v12, %v4964_v15 }
0x5b50   :  { %5442 = vmatmul.mubr.msk.bf16.gmra.mxu0 %vm681_vm2, %v4975_v52 }
0x5c10   :  { %v5443_v18 = vpop.f32.mrf.mxu0 }
0x5c11   :  { %v5152_v57 = vadd.f32 %v5443_v18, %v7508_v25 }
0x5c12   :  { %v5143_v62 = vpop.f32.mrf.mxu0 }
0x5c13   :  { %5176 = vst [vmem:[%s7617_s14 + $0x90] sm:$0xff] %v5152_v57  ;;  %v5144_v1 = vadd.f32 %v7508_v25, %v5143_v62 }
0x5c14   :  { %v5444_v21 = vpop.f32.mrf.mxu0 }
0x5c15   :  { %5174 = vst [vmem:[%s7617_s14 + $0x80] sm:$0xff] %v5144_v1  ;;  %v5155_v31 = vadd.f32 %v5444_v21, %v7508_v25 }
0x5c16   :  { %v5146_v51 = vpop.f32.mrf.mxu0 }
0x5c17   :  { %5177 = vst [vmem:[%s7617_s14 + $0x98] sm:$0xff] %v5155_v31  ;;  %v5147_v37 = vadd.f32 %v7508_v25, %v5146_v51 }
0x5c19   :  { %5175 = vst [vmem:[%s7617_s14 + $0x88] sm:$0xff] %v5147_v37 }

</bundles_post_ra>
